<compile_context>
chip_gen: v6e
topology: v6e:2x2x1
jax: 0.10.0
libtpu: 0.0.40
codegen_flags: <defaults>
</compile_context>

<pallas_src>
import functools

import jax
import jax.numpy as jnp
from jax.experimental import pallas as pl
from jax.experimental.pallas import tpu as pltpu


# ----------------------------------------------------------------------------
# Helpers
# ----------------------------------------------------------------------------
def _round_up(x, m):
    return (x + m - 1) // m * m


def _fold_bn(gamma, beta, mean, var, eps=1e-5):
    scale = gamma / jnp.sqrt(var + eps)
    bias = beta - mean * scale
    return scale.astype(jnp.float32), bias.astype(jnp.float32)


# ----------------------------------------------------------------------------
# Pallas kernels
# ----------------------------------------------------------------------------
def _matmul_bn_act_kernel(p_ref, w_ref, scale_ref, bias_ref, o_ref, acc_ref, *,
                          relu):
    """out = act((patches @ w) * scale + bias); K accumulated over grid axis 2."""
    k = pl.program_id(2)

    @pl.when(k == 0)
    def _():
        acc_ref[...] = jnp.zeros_like(acc_ref)

    acc_ref[...] += jnp.dot(p_ref[...], w_ref[...],
                            preferred_element_type=jnp.float32)

    @pl.when(k == pl.num_programs(2) - 1)
    def _():
        y = acc_ref[...] * scale_ref[...] + bias_ref[...]
        if relu:
            y = jnp.maximum(y, 0.0)
        o_ref[...] = y.astype(o_ref.dtype)


def _conv3x3_fused_kernel(*refs, offsets, tm, relu, has_residual):
    """Fused 3x3 / stride-1 conv via 9 shifted row-block MXU dots.

    refs = (xw, w, scale, bias[, residual], out, acc):
      xw   : (window, C)   bf16 haloed row-window for this M block
      w    : (9, C, tn)    bf16 per-tap weight slabs
      scale: (1, tn) f32,  bias: (1, tn) f32   (folded BN, applied in f32)
      residual (optional): (tm, tn) bf16
      out  : (tm, tn), acc : (tm, tn) f32 VMEM scratch
    """
    if has_residual:
        xw_ref, w_ref, scale_ref, bias_ref, r_ref, o_ref, acc_ref = refs
    else:
        xw_ref, w_ref, scale_ref, bias_ref, o_ref, acc_ref = refs
        r_ref = None

    acc_ref[...] = jnp.dot(xw_ref[pl.ds(offsets[0], tm), :], w_ref[0],
                           preferred_element_type=jnp.float32)
    for idx in range(1, len(offsets)):
        acc_ref[...] += jnp.dot(xw_ref[pl.ds(offsets[idx], tm), :], w_ref[idx],
                                preferred_element_type=jnp.float32)

    y = acc_ref[...] * scale_ref[...] + bias_ref[...]
    if relu:
        y = jnp.maximum(y, 0.0)                                  # conv's ReLU
    if has_residual:
        y = jnp.maximum(y + r_ref[...].astype(jnp.float32), 0.0)  # +res, final ReLU
    o_ref[...] = y.astype(o_ref.dtype)


# ----------------------------------------------------------------------------
# Fused 3x3 / stride-1 conv + BN (+ReLU) (+residual add + final ReLU)
# ----------------------------------------------------------------------------
def conv3x3_bn_act_fused(x_nhwc, w_oihw, bn, relu, residual_nhwc=None,
                         out_dtype=jnp.float32, compute_dtype=jnp.bfloat16,
                         tm_target=512):
    """3x3, stride 1, pad 1 conv computed on the full padded (Hp, Wp) grid.

    Output rows live on the padded grid; border rows are garbage and sliced off
    afterwards.  The LHS is staged once as per-block haloed row-windows
    (~(1 + 2*(W+3)/tm)x the activation — vs 9x for im2col).
    """
    assert w_oihw.shape[2:] == (3, 3)
    N, H, W, _ = x_nhwc.shape
    Cout, cin = w_oihw.shape[0], w_oihw.shape[1]
    Hp, Wp = H + 2, W + 2
    Mflat = N * Hp * Wp

    C8 = _round_up(cin, 8)                 # true channels only (review item 2)
    Cout_p = _round_up(Cout, 128)          # lane-dense output

    # Tile sizes.  NOTE: raise tm to 1024 on v6e (plus vmem_limit_bytes); use
    # tn=128 on v5e; on v7x keep nblk * (Cout_p//tn) >= 2 for both TCs.
    tm = tm_target if Mflat >= tm_target else _round_up(Mflat, 8)
    nblk = -(-Mflat // tm)
    Mout_p = nblk * tm
    tn = 256 if Cout_p % 256 == 0 else 128

    halo = _round_up(Wp + 1, 4)            # 2*halo multiple of 8 -> window % 8
    window = tm + 2 * halo

    # Flattened, spatially padded, channel-trimmed bf16 activation.
    x = x_nhwc[..., :cin].astype(compute_dtype)
    x = jnp.pad(x, ((0, 0), (1, 1), (1, 1), (0, C8 - cin)))
    x2 = x.reshape(Mflat, C8)
    x2 = jnp.pad(x2, ((halo, halo + (Mout_p - Mflat)), (0, 0)))

    # Haloed row-windows, one per M block (the only LHS staging in HBM).
    # TODO(synk): zero-copy version = memory_space=pl.ANY + manual haloed DMA.
    row_idx = (jnp.arange(nblk)[:, None] * tm
               + jnp.arange(window)[None, :]).reshape(-1)
    xw = jnp.take(x2, row_idx, axis=0)                 # (nblk*window, C8) bf16

    # Per-tap row offsets inside a window; tap order (ki, kj) row-major.
    offsets = tuple(halo + di * Wp + dj
                    for di in (-1, 0, 1) for dj in (-1, 0, 1))

    # Weights: (Cout, Cin, 3, 3) -> (9, C8, Cout_p) bf16 (BN scale NOT folded).
    wk = jnp.transpose(w_oihw, (2, 3, 1, 0)).reshape(9, cin, Cout)
    wk = jnp.pad(wk, ((0, 0), (0, C8 - cin), (0, Cout_p - Cout)))
    wk = wk.astype(compute_dtype)

    scale, bias = _fold_bn(*bn)
    scale_p = jnp.pad(scale, (0, Cout_p - Cout)).reshape(1, Cout_p)
    bias_p = jnp.pad(bias, (0, Cout_p - Cout)).reshape(1, Cout_p)

    in_specs = [
        pl.BlockSpec((window, C8), lambda i, j: (i, 0)),
        pl.BlockSpec((9, C8, tn), lambda i, j: (0, 0, j)),
        pl.BlockSpec((1, tn), lambda i, j: (0, j)),
        pl.BlockSpec((1, tn), lambda i, j: (0, j)),
    ]
    args = [xw, wk, scale_p, bias_p]

    has_residual = residual_nhwc is not None
    if has_residual:
        r = residual_nhwc[..., :Cout].astype(compute_dtype)   # bf16 residual
        r = jnp.pad(r, ((0, 0), (1, 1), (1, 1), (0, Cout_p - Cout)))
        r = r.reshape(Mflat, Cout_p)
        r = jnp.pad(r, ((0, Mout_p - Mflat), (0, 0)))
        in_specs.append(pl.BlockSpec((tm, tn), lambda i, j: (i, j)))
        args.append(r)

    kernel = functools.partial(_conv3x3_fused_kernel, offsets=offsets, tm=tm,
                               relu=relu, has_residual=has_residual)

    out_flat = pl.pallas_call(
        kernel,
        out_shape=jax.ShapeDtypeStruct((Mout_p, Cout_p), out_dtype),
        grid_spec=pltpu.PrefetchScalarGridSpec(
            num_scalar_prefetch=0,
            grid=(nblk, Cout_p // tn),
            in_specs=in_specs,
            out_specs=pl.BlockSpec((tm, tn), lambda i, j: (i, j)),
            scratch_shapes=[pltpu.VMEM((tm, tn), jnp.float32)],
        ),
        compiler_params=pltpu.CompilerParams(
            dimension_semantics=("parallel", "parallel")),
    )(*args)

    out = out_flat[:Mflat].reshape(N, Hp, Wp, Cout_p)[:, 1:1 + H, 1:1 + W, :]
    return out, Cout


# ----------------------------------------------------------------------------
# Fallback conv (strided 3x3 conv1, 1x1 projection): im2col + tiled matmul
# ----------------------------------------------------------------------------
def _im2col(x_nhwc, kh, kw, stride, pad):
    if pad > 0:
        x_nhwc = jnp.pad(x_nhwc, ((0, 0), (pad, pad), (pad, pad), (0, 0)))
    N, H, W, C = x_nhwc.shape
    Ho = (H - kh) // stride + 1
    Wo = (W - kw) // stride + 1
    cols = []
    for i in range(kh):
        for j in range(kw):
            cols.append(
                x_nhwc[:, i:i + Ho * stride:stride, j:j + Wo * stride:stride, :]
            )
    patches = jnp.concatenate(cols, axis=-1)
    return patches.reshape(N * Ho * Wo, kh * kw * C), (N, Ho, Wo)


def conv_bn_act_matmul(x_nhwc, w_oihw, bn, stride, pad, relu,
                       out_dtype=jnp.float32, compute_dtype=jnp.bfloat16):
    """Conv as (bf16 patches @ bf16 W) with f32 scale/bias (+ReLU) epilogue."""
    Cout, cin, kh, kw = w_oihw.shape
    x = x_nhwc[..., :cin].astype(compute_dtype)     # bf16 staging, true channels
    patches, (N, Ho, Wo) = _im2col(x, kh, kw, stride, pad)
    M, Kd = patches.shape
    Cout_p = _round_up(Cout, 128)

    # Full-K fast path: single K grid step whenever it fits comfortably.
    if Kd <= 2048:
        Kd_p = _round_up(Kd, 8)
        tk = Kd_p
    else:
        tk = 512
        Kd_p = _round_up(Kd, tk)

    tm = 512 if M >= 512 else _round_up(M, 8)
    M_p = _round_up(M, tm)
    tn = 256 if Cout_p % 256 == 0 else 128          # v5e: prefer 128

    patches_p = jnp.pad(patches, ((0, M_p - M), (0, Kd_p - Kd)))
    w_mat = jnp.transpose(w_oihw, (2, 3, 1, 0)).reshape(Kd, Cout)
    w_mat = jnp.pad(w_mat, ((0, Kd_p - Kd), (0, Cout_p - Cout))).astype(compute_dtype)

    scale, bias = _fold_bn(*bn)
    scale_p = jnp.pad(scale, (0, Cout_p - Cout)).reshape(1, Cout_p)
    bias_p = jnp.pad(bias, (0, Cout_p - Cout)).reshape(1, Cout_p)

    out_flat = pl.pallas_call(
        functools.partial(_matmul_bn_act_kernel, relu=relu),
        out_shape=jax.ShapeDtypeStruct((M_p, Cout_p), out_dtype),
        grid_spec=pltpu.PrefetchScalarGridSpec(
            num_scalar_prefetch=0,
            grid=(M_p // tm, Cout_p // tn, Kd_p // tk),
            in_specs=[
                pl.BlockSpec((tm, tk), lambda i, j, k: (i, k)),
                pl.BlockSpec((tk, tn), lambda i, j, k: (k, j)),
                pl.BlockSpec((1, tn), lambda i, j, k: (0, j)),
                pl.BlockSpec((1, tn), lambda i, j, k: (0, j)),
            ],
            out_specs=pl.BlockSpec((tm, tn), lambda i, j, k: (i, j)),
            scratch_shapes=[pltpu.VMEM((tm, tn), jnp.float32)],
        ),
        compiler_params=pltpu.CompilerParams(
            dimension_semantics=("parallel", "parallel", "arbitrary")),
    )(patches_p, w_mat, scale_p, bias_p)

    out = out_flat[:M].reshape(N, Ho, Wo, Cout_p)
    return out, Cout


# ----------------------------------------------------------------------------
# BasicBlock forward
# ----------------------------------------------------------------------------
def basic_block_forward(x_nchw, params, stride):
    """x_nchw: (N, Cin, H, W) float32. Returns (N, Cout, Ho, Wo) float32."""
    x_nhwc = jnp.transpose(x_nchw, (0, 2, 3, 1))

    # conv1: 3x3 / stride, BN, ReLU
    if stride == 1:
        h, _ = conv3x3_bn_act_fused(x_nhwc, params["w1"], params["bn1"],
                                    relu=True, out_dtype=jnp.bfloat16)
    else:
        # TODO(synk): strided 3x3 still goes through wrapper-side im2col.
        h, _ = conv_bn_act_matmul(x_nhwc, params["w1"], params["bn1"], stride,
                                  pad=1, relu=True, out_dtype=jnp.bfloat16)

    # residual path (1x1 projection or identity), staged in bf16
    if "wr" in params:
        r, _ = conv_bn_act_matmul(x_nhwc, params["wr"], params["bnr"], stride,
                                  pad=0, relu=False, out_dtype=jnp.bfloat16)
    else:
        r = x_nhwc   # identity (stride==1, Cin==Cout per module semantics)

    # conv2: 3x3 / 1, BN, ReLU, + residual, final ReLU — one fused kernel
    out, cout = conv3x3_bn_act_fused(h, params["w2"], params["bn2"], relu=True,
                                     residual_nhwc=r, out_dtype=jnp.float32)

    out = out[..., :cout]                 # drop lane-padding channels
    return jnp.transpose(out, (0, 3, 1, 2))


# ----------------------------------------------------------------------------
# Pure-JAX reference (correctness check)
# ----------------------------------------------------------------------------
def _ref_conv(x_nchw, w, stride, pad):
    return jax.lax.conv_general_dilated(
        x_nchw, w, window_strides=(stride, stride),
        padding=((pad, pad), (pad, pad)),
        dimension_numbers=("NCHW", "OIHW", "NCHW"))


def _ref_bn(x_nchw, bn, eps=1e-5):
    gamma, beta, mean, var = bn
    scale = (gamma / jnp.sqrt(var + eps)).reshape(1, -1, 1, 1)
    bias = (beta - mean * gamma / jnp.sqrt(var + eps)).reshape(1, -1, 1, 1)
    return x_nchw * scale + bias


def basic_block_reference(x, params, stride):
    h = jax.nn.relu(_ref_bn(_ref_conv(x, params["w1"], stride, 1), params["bn1"]))
    h = jax.nn.relu(_ref_bn(_ref_conv(h, params["w2"], 1, 1), params["bn2"]))
    if "wr" in params:
        r = _ref_bn(_ref_conv(x, params["wr"], stride, 0), params["bnr"])
    else:
        r = x
    return jax.nn.relu(h + r)


# ----------------------------------------------------------------------------
# Main
# ----------------------------------------------------------------------------
if __name__ == "__main__":
    key = jax.random.PRNGKey(0)

    def bn_params(k, c):
        k1, k2, k3, k4 = jax.random.split(k, 4)
        gamma = 1.0 + 0.1 * jax.random.normal(k1, (c,), jnp.float32)
        beta = 0.1 * jax.random.normal(k2, (c,), jnp.float32)
        mean = 0.1 * jax.random.normal(k3, (c,), jnp.float32)
        var = jnp.abs(jax.random.normal(k4, (c,), jnp.float32)) + 0.5
        return (gamma, beta, mean, var)

    def make_params(k, cin, cout, stride):
        ks = jax.random.split(k, 6)
        p = {
            "w1": 0.1 * jax.random.normal(ks[0], (cout, cin, 3, 3), jnp.float32),
            "bn1": bn_params(ks[1], cout),
            "w2": 0.1 * jax.random.normal(ks[2], (cout, cout, 3, 3), jnp.float32),
            "bn2": bn_params(ks[3], cout),
        }
        if stride != 1 or cin != cout:
            p["wr"] = 0.1 * jax.random.normal(ks[4], (cout, cin, 1, 1), jnp.float32)
            p["bnr"] = bn_params(ks[5], cout)
        return p

    N, H, W = 2, 16, 16
    configs = [
        # (Cin, Cout, stride): identity residual + fully fused path,
        #                      then projection residual + strided conv1.
        (4, 4, 1),
        (4, 8, 2),
    ]

    kp, kx = jax.random.split(key)
    for idx, (cin, cout, stride) in enumerate(configs):
        kpi, kxi = jax.random.split(jax.random.fold_in(kp, idx))
        params = make_params(kpi, cin, cout, stride)
        x = jax.random.normal(kxi, (N, cin, H, W), jnp.float32)

        fwd = jax.jit(functools.partial(basic_block_forward, stride=stride))
        out = jax.block_until_ready(fwd(x, params))
        ref = jax.block_until_ready(basic_block_reference(x, params, stride))

        assert out.shape == (N, cout, H // stride, W // stride), out.shape
        # bf16 matmul inputs (f32 accumulation / epilogue) => loosened tolerance.
        max_err = float(jnp.max(jnp.abs(out - ref)))
        assert max_err < 5e-2, (
            f"cfg {(cin, cout, stride)}: mismatch vs reference, max abs err = {max_err}")

    print("KERNEL_OK")
</pallas_src>

<mosaic_0001>
module attributes {stable_mosaic.version = 11 : i64} {
  func.func @_conv3x3_fused_kernel(%arg0: i32, %arg1: i32, %arg2: memref<552x8xbf16, #tpu.memory_space<vmem>>, %arg3: memref<9x8x128xbf16, #tpu.memory_space<vmem>>, %arg4: memref<1x128xf32, #tpu.memory_space<vmem>>, %arg5: memref<1x128xf32, #tpu.memory_space<vmem>>, %arg6: memref<512x128xbf16, #tpu.memory_space<vmem>>, %arg7: memref<512x128xf32, #tpu.memory_space<vmem>>) attributes {dimension_semantics = [#tpu.dimension_semantics<parallel>, #tpu.dimension_semantics<parallel>], iteration_bounds = array<i64: 2, 1>, scalar_prefetch = 0 : i64, scratch_operands = 1 : i64, tpu.core_type = #tpu.core_type<tc>, window_params = [{transform_indices = @transform_0, window_bounds = array<i64: 552, 8>}, {transform_indices = @transform_1, window_bounds = array<i64: 9, 8, 128>}, {transform_indices = @transform_2, window_bounds = array<i64: 1, 128>}, {transform_indices = @transform_3, window_bounds = array<i64: 1, 128>}, {transform_indices = @transform_4, window_bounds = array<i64: 512, 128>}]} {
    %c1 = arith.constant 1 : index
    %c0 = arith.constant 0 : index
    %0 = vector.load %arg2[%c1, %c0] : memref<552x8xbf16, #tpu.memory_space<vmem>>, vector<512x8xbf16>
    %c0_0 = arith.constant 0 : index
    %c0_1 = arith.constant 0 : index
    %c0_2 = arith.constant 0 : index
    %1 = vector.load %arg3[%c0_0, %c0_1, %c0_2] : memref<9x8x128xbf16, #tpu.memory_space<vmem>>, vector<1x8x128xbf16>
    %2 = vector.shape_cast %1 : vector<1x8x128xbf16> to vector<8x128xbf16>
    %cst = arith.constant dense<0.000000e+00> : vector<512x128xf32>
    %3 = tpu.matmul %0, %2, %cst {dimension_numbers = #tpu.dot_dimension_numbers<[1], [0], [0], [1], [0, 0, 1, 1], [], []>} : vector<512x8xbf16>, vector<8x128xbf16>, vector<512x128xf32> -> vector<512x128xf32>
    %c0_3 = arith.constant 0 : index
    %c0_4 = arith.constant 0 : index
    %4 = vector.load %arg7[%c0_3, %c0_4] : memref<512x128xf32, #tpu.memory_space<vmem>>, vector<512x128xf32>
    tpu.vector_store %arg7[%c0_3, %c0_4], %3 {strides = array<i32>} : memref<512x128xf32, #tpu.memory_space<vmem>>, vector<512x128xf32>,
    %c0_5 = arith.constant 0 : index
    %c0_6 = arith.constant 0 : index
    %5 = vector.load %arg7[%c0_5, %c0_6] : memref<512x128xf32, #tpu.memory_space<vmem>>, vector<512x128xf32>
    %c2 = arith.constant 2 : index
    %c0_7 = arith.constant 0 : index
    %6 = vector.load %arg2[%c2, %c0_7] : memref<552x8xbf16, #tpu.memory_space<vmem>>, vector<512x8xbf16>
    %c1_8 = arith.constant 1 : index
    %c0_9 = arith.constant 0 : index
    %c0_10 = arith.constant 0 : index
    %7 = vector.load %arg3[%c1_8, %c0_9, %c0_10] : memref<9x8x128xbf16, #tpu.memory_space<vmem>>, vector<1x8x128xbf16>
    %8 = vector.shape_cast %7 : vector<1x8x128xbf16> to vector<8x128xbf16>
    %cst_11 = arith.constant dense<0.000000e+00> : vector<512x128xf32>
    %9 = tpu.matmul %6, %8, %cst_11 {dimension_numbers = #tpu.dot_dimension_numbers<[1], [0], [0], [1], [0, 0, 1, 1], [], []>} : vector<512x8xbf16>, vector<8x128xbf16>, vector<512x128xf32> -> vector<512x128xf32>
    %10 = arith.addf %5, %9 : vector<512x128xf32>
    %c0_12 = arith.constant 0 : index
    %c0_13 = arith.constant 0 : index
    %11 = vector.load %arg7[%c0_12, %c0_13] : memref<512x128xf32, #tpu.memory_space<vmem>>, vector<512x128xf32>
    tpu.vector_store %arg7[%c0_12, %c0_13], %10 {strides = array<i32>} : memref<512x128xf32, #tpu.memory_space<vmem>>, vector<512x128xf32>,
    %c0_14 = arith.constant 0 : index
    %c0_15 = arith.constant 0 : index
    %12 = vector.load %arg7[%c0_14, %c0_15] : memref<512x128xf32, #tpu.memory_space<vmem>>, vector<512x128xf32>
    %c3 = arith.constant 3 : index
    %c0_16 = arith.constant 0 : index
    %13 = vector.load %arg2[%c3, %c0_16] : memref<552x8xbf16, #tpu.memory_space<vmem>>, vector<512x8xbf16>
    %c2_17 = arith.constant 2 : index
    %c0_18 = arith.constant 0 : index
    %c0_19 = arith.constant 0 : index
    %14 = vector.load %arg3[%c2_17, %c0_18, %c0_19] : memref<9x8x128xbf16, #tpu.memory_space<vmem>>, vector<1x8x128xbf16>
    %15 = vector.shape_cast %14 : vector<1x8x128xbf16> to vector<8x128xbf16>
    %cst_20 = arith.constant dense<0.000000e+00> : vector<512x128xf32>
    %16 = tpu.matmul %13, %15, %cst_20 {dimension_numbers = #tpu.dot_dimension_numbers<[1], [0], [0], [1], [0, 0, 1, 1], [], []>} : vector<512x8xbf16>, vector<8x128xbf16>, vector<512x128xf32> -> vector<512x128xf32>
    %17 = arith.addf %12, %16 : vector<512x128xf32>
    %c0_21 = arith.constant 0 : index
    %c0_22 = arith.constant 0 : index
    %18 = vector.load %arg7[%c0_21, %c0_22] : memref<512x128xf32, #tpu.memory_space<vmem>>, vector<512x128xf32>
    tpu.vector_store %arg7[%c0_21, %c0_22], %17 {strides = array<i32>} : memref<512x128xf32, #tpu.memory_space<vmem>>, vector<512x128xf32>,
    %c0_23 = arith.constant 0 : index
    %c0_24 = arith.constant 0 : index
    %19 = vector.load %arg7[%c0_23, %c0_24] : memref<512x128xf32, #tpu.memory_space<vmem>>, vector<512x128xf32>
    %c19 = arith.constant 19 : index
    %c0_25 = arith.constant 0 : index
    %20 = vector.load %arg2[%c19, %c0_25] : memref<552x8xbf16, #tpu.memory_space<vmem>>, vector<512x8xbf16>
    %c3_26 = arith.constant 3 : index
    %c0_27 = arith.constant 0 : index
    %c0_28 = arith.constant 0 : index
    %21 = vector.load %arg3[%c3_26, %c0_27, %c0_28] : memref<9x8x128xbf16, #tpu.memory_space<vmem>>, vector<1x8x128xbf16>
    %22 = vector.shape_cast %21 : vector<1x8x128xbf16> to vector<8x128xbf16>
    %cst_29 = arith.constant dense<0.000000e+00> : vector<512x128xf32>
    %23 = tpu.matmul %20, %22, %cst_29 {dimension_numbers = #tpu.dot_dimension_numbers<[1], [0], [0], [1], [0, 0, 1, 1], [], []>} : vector<512x8xbf16>, vector<8x128xbf16>, vector<512x128xf32> -> vector<512x128xf32>
    %24 = arith.addf %19, %23 : vector<512x128xf32>
    %c0_30 = arith.constant 0 : index
    %c0_31 = arith.constant 0 : index
    %25 = vector.load %arg7[%c0_30, %c0_31] : memref<512x128xf32, #tpu.memory_space<vmem>>, vector<512x128xf32>
    tpu.vector_store %arg7[%c0_30, %c0_31], %24 {strides = array<i32>} : memref<512x128xf32, #tpu.memory_space<vmem>>, vector<512x128xf32>,
    %c0_32 = arith.constant 0 : index
    %c0_33 = arith.constant 0 : index
    %26 = vector.load %arg7[%c0_32, %c0_33] : memref<512x128xf32, #tpu.memory_space<vmem>>, vector<512x128xf32>
    %c20 = arith.constant 20 : index
    %c0_34 = arith.constant 0 : index
    %27 = vector.load %arg2[%c20, %c0_34] : memref<552x8xbf16, #tpu.memory_space<vmem>>, vector<512x8xbf16>
    %c4 = arith.constant 4 : index
    %c0_35 = arith.constant 0 : index
    %c0_36 = arith.constant 0 : index
    %28 = vector.load %arg3[%c4, %c0_35, %c0_36] : memref<9x8x128xbf16, #tpu.memory_space<vmem>>, vector<1x8x128xbf16>
    %29 = vector.shape_cast %28 : vector<1x8x128xbf16> to vector<8x128xbf16>
    %cst_37 = arith.constant dense<0.000000e+00> : vector<512x128xf32>
    %30 = tpu.matmul %27, %29, %cst_37 {dimension_numbers = #tpu.dot_dimension_numbers<[1], [0], [0], [1], [0, 0, 1, 1], [], []>} : vector<512x8xbf16>, vector<8x128xbf16>, vector<512x128xf32> -> vector<512x128xf32>
    %31 = arith.addf %26, %30 : vector<512x128xf32>
    %c0_38 = arith.constant 0 : index
    %c0_39 = arith.constant 0 : index
    %32 = vector.load %arg7[%c0_38, %c0_39] : memref<512x128xf32, #tpu.memory_space<vmem>>, vector<512x128xf32>
    tpu.vector_store %arg7[%c0_38, %c0_39], %31 {strides = array<i32>} : memref<512x128xf32, #tpu.memory_space<vmem>>, vector<512x128xf32>,
    %c0_40 = arith.constant 0 : index
    %c0_41 = arith.constant 0 : index
    %33 = vector.load %arg7[%c0_40, %c0_41] : memref<512x128xf32, #tpu.memory_space<vmem>>, vector<512x128xf32>
    %c21 = arith.constant 21 : index
    %c0_42 = arith.constant 0 : index
    %34 = vector.load %arg2[%c21, %c0_42] : memref<552x8xbf16, #tpu.memory_space<vmem>>, vector<512x8xbf16>
    %c5 = arith.constant 5 : index
    %c0_43 = arith.constant 0 : index
    %c0_44 = arith.constant 0 : index
    %35 = vector.load %arg3[%c5, %c0_43, %c0_44] : memref<9x8x128xbf16, #tpu.memory_space<vmem>>, vector<1x8x128xbf16>
    %36 = vector.shape_cast %35 : vector<1x8x128xbf16> to vector<8x128xbf16>
    %cst_45 = arith.constant dense<0.000000e+00> : vector<512x128xf32>
    %37 = tpu.matmul %34, %36, %cst_45 {dimension_numbers = #tpu.dot_dimension_numbers<[1], [0], [0], [1], [0, 0, 1, 1], [], []>} : vector<512x8xbf16>, vector<8x128xbf16>, vector<512x128xf32> -> vector<512x128xf32>
    %38 = arith.addf %33, %37 : vector<512x128xf32>
    %c0_46 = arith.constant 0 : index
    %c0_47 = arith.constant 0 : index
    %39 = vector.load %arg7[%c0_46, %c0_47] : memref<512x128xf32, #tpu.memory_space<vmem>>, vector<512x128xf32>
    tpu.vector_store %arg7[%c0_46, %c0_47], %38 {strides = array<i32>} : memref<512x128xf32, #tpu.memory_space<vmem>>, vector<512x128xf32>,
    %c0_48 = arith.constant 0 : index
    %c0_49 = arith.constant 0 : index
    %40 = vector.load %arg7[%c0_48, %c0_49] : memref<512x128xf32, #tpu.memory_space<vmem>>, vector<512x128xf32>
    %c37 = arith.constant 37 : index
    %c0_50 = arith.constant 0 : index
    %41 = vector.load %arg2[%c37, %c0_50] : memref<552x8xbf16, #tpu.memory_space<vmem>>, vector<512x8xbf16>
    %c6 = arith.constant 6 : index
    %c0_51 = arith.constant 0 : index
    %c0_52 = arith.constant 0 : index
    %42 = vector.load %arg3[%c6, %c0_51, %c0_52] : memref<9x8x128xbf16, #tpu.memory_space<vmem>>, vector<1x8x128xbf16>
    %43 = vector.shape_cast %42 : vector<1x8x128xbf16> to vector<8x128xbf16>
    %cst_53 = arith.constant dense<0.000000e+00> : vector<512x128xf32>
    %44 = tpu.matmul %41, %43, %cst_53 {dimension_numbers = #tpu.dot_dimension_numbers<[1], [0], [0], [1], [0, 0, 1, 1], [], []>} : vector<512x8xbf16>, vector<8x128xbf16>, vector<512x128xf32> -> vector<512x128xf32>
    %45 = arith.addf %40, %44 : vector<512x128xf32>
    %c0_54 = arith.constant 0 : index
    %c0_55 = arith.constant 0 : index
    %46 = vector.load %arg7[%c0_54, %c0_55] : memref<512x128xf32, #tpu.memory_space<vmem>>, vector<512x128xf32>
    tpu.vector_store %arg7[%c0_54, %c0_55], %45 {strides = array<i32>} : memref<512x128xf32, #tpu.memory_space<vmem>>, vector<512x128xf32>,
    %c0_56 = arith.constant 0 : index
    %c0_57 = arith.constant 0 : index
    %47 = vector.load %arg7[%c0_56, %c0_57] : memref<512x128xf32, #tpu.memory_space<vmem>>, vector<512x128xf32>
    %c38 = arith.constant 38 : index
    %c0_58 = arith.constant 0 : index
    %48 = vector.load %arg2[%c38, %c0_58] : memref<552x8xbf16, #tpu.memory_space<vmem>>, vector<512x8xbf16>
    %c7 = arith.constant 7 : index
    %c0_59 = arith.constant 0 : index
    %c0_60 = arith.constant 0 : index
    %49 = vector.load %arg3[%c7, %c0_59, %c0_60] : memref<9x8x128xbf16, #tpu.memory_space<vmem>>, vector<1x8x128xbf16>
    %50 = vector.shape_cast %49 : vector<1x8x128xbf16> to vector<8x128xbf16>
    %cst_61 = arith.constant dense<0.000000e+00> : vector<512x128xf32>
    %51 = tpu.matmul %48, %50, %cst_61 {dimension_numbers = #tpu.dot_dimension_numbers<[1], [0], [0], [1], [0, 0, 1, 1], [], []>} : vector<512x8xbf16>, vector<8x128xbf16>, vector<512x128xf32> -> vector<512x128xf32>
    %52 = arith.addf %47, %51 : vector<512x128xf32>
    %c0_62 = arith.constant 0 : index
    %c0_63 = arith.constant 0 : index
    %53 = vector.load %arg7[%c0_62, %c0_63] : memref<512x128xf32, #tpu.memory_space<vmem>>, vector<512x128xf32>
    tpu.vector_store %arg7[%c0_62, %c0_63], %52 {strides = array<i32>} : memref<512x128xf32, #tpu.memory_space<vmem>>, vector<512x128xf32>,
    %c0_64 = arith.constant 0 : index
    %c0_65 = arith.constant 0 : index
    %54 = vector.load %arg7[%c0_64, %c0_65] : memref<512x128xf32, #tpu.memory_space<vmem>>, vector<512x128xf32>
    %c39 = arith.constant 39 : index
    %c0_66 = arith.constant 0 : index
    %55 = vector.load %arg2[%c39, %c0_66] : memref<552x8xbf16, #tpu.memory_space<vmem>>, vector<512x8xbf16>
    %c8 = arith.constant 8 : index
    %c0_67 = arith.constant 0 : index
    %c0_68 = arith.constant 0 : index
    %56 = vector.load %arg3[%c8, %c0_67, %c0_68] : memref<9x8x128xbf16, #tpu.memory_space<vmem>>, vector<1x8x128xbf16>
    %57 = vector.shape_cast %56 : vector<1x8x128xbf16> to vector<8x128xbf16>
    %cst_69 = arith.constant dense<0.000000e+00> : vector<512x128xf32>
    %58 = tpu.matmul %55, %57, %cst_69 {dimension_numbers = #tpu.dot_dimension_numbers<[1], [0], [0], [1], [0, 0, 1, 1], [], []>} : vector<512x8xbf16>, vector<8x128xbf16>, vector<512x128xf32> -> vector<512x128xf32>
    %59 = arith.addf %54, %58 : vector<512x128xf32>
    %c0_70 = arith.constant 0 : index
    %c0_71 = arith.constant 0 : index
    %60 = vector.load %arg7[%c0_70, %c0_71] : memref<512x128xf32, #tpu.memory_space<vmem>>, vector<512x128xf32>
    tpu.vector_store %arg7[%c0_70, %c0_71], %59 {strides = array<i32>} : memref<512x128xf32, #tpu.memory_space<vmem>>, vector<512x128xf32>,
    %c0_72 = arith.constant 0 : index
    %c0_73 = arith.constant 0 : index
    %61 = vector.load %arg7[%c0_72, %c0_73] : memref<512x128xf32, #tpu.memory_space<vmem>>, vector<512x128xf32>
    %c0_74 = arith.constant 0 : index
    %c0_75 = arith.constant 0 : index
    %62 = vector.load %arg4[%c0_74, %c0_75] : memref<1x128xf32, #tpu.memory_space<vmem>>, vector<1x128xf32>
    %63 = vector.broadcast %62 : vector<1x128xf32> to vector<512x128xf32>
    %64 = arith.mulf %61, %63 : vector<512x128xf32>
    %c0_76 = arith.constant 0 : index
    %c0_77 = arith.constant 0 : index
    %65 = vector.load %arg5[%c0_76, %c0_77] : memref<1x128xf32, #tpu.memory_space<vmem>>, vector<1x128xf32>
    %66 = vector.broadcast %65 : vector<1x128xf32> to vector<512x128xf32>
    %67 = arith.addf %64, %66 : vector<512x128xf32>
    %cst_78 = arith.constant 0.000000e+00 : f32
    %68 = vector.broadcast %cst_78 : f32 to vector<512x128xf32>
    %69 = arith.maximumf %67, %68 : vector<512x128xf32>
    %70 = arith.truncf %69 : vector<512x128xf32> to vector<512x128xbf16>
    %c0_79 = arith.constant 0 : index
    %c0_80 = arith.constant 0 : index
    %71 = vector.load %arg6[%c0_79, %c0_80] : memref<512x128xbf16, #tpu.memory_space<vmem>>, vector<512x128xbf16>
    tpu.vector_store %arg6[%c0_79, %c0_80], %70 {strides = array<i32>} : memref<512x128xbf16, #tpu.memory_space<vmem>>, vector<512x128xbf16>,
    return
  }
  func.func @transform_0(%arg0: i32, %arg1: i32) -> (i32, i32) {
    %c0_i32 = arith.constant 0 : i32
    %c0_i32_0 = arith.constant 0 : i32
    return %arg0, %c0_i32 : i32, i32
  }
  func.func @transform_1(%arg0: i32, %arg1: i32) -> (i32, i32, i32) {
    %c0_i32 = arith.constant 0 : i32
    %c0_i32_0 = arith.constant 0 : i32
    %c0_i32_1 = arith.constant 0 : i32
    return %c0_i32, %c0_i32_0, %arg1 : i32, i32, i32
  }
  func.func @transform_2(%arg0: i32, %arg1: i32) -> (i32, i32) {
    %c0_i32 = arith.constant 0 : i32
    %c0_i32_0 = arith.constant 0 : i32
    return %c0_i32, %arg1 : i32, i32
  }
  func.func @transform_3(%arg0: i32, %arg1: i32) -> (i32, i32) {
    %c0_i32 = arith.constant 0 : i32
    %c0_i32_0 = arith.constant 0 : i32
    return %c0_i32, %arg1 : i32, i32
  }
  func.func @transform_4(%arg0: i32, %arg1: i32) -> (i32, i32) {
    %c0_i32 = arith.constant 0 : i32
    return %arg0, %arg1 : i32, i32
  }
}

module attributes {stable_mosaic.version = 11 : i64} {
  func.func @_conv3x3_fused_kernel(%arg0: i32, %arg1: i32, %arg2: memref<552x8xbf16, #tpu.memory_space<vmem>>, %arg3: memref<9x8x128xbf16, #tpu.memory_space<vmem>>, %arg4: memref<1x128xf32, #tpu.memory_space<vmem>>, %arg5: memref<1x128xf32, #tpu.memory_space<vmem>>, %arg6: memref<512x128xbf16, #tpu.memory_space<vmem>>, %arg7: memref<512x128xf32, #tpu.memory_space<vmem>>, %arg8: memref<512x128xf32, #tpu.memory_space<vmem>>) attributes {dimension_semantics = [#tpu.dimension_semantics<parallel>, #tpu.dimension_semantics<parallel>], iteration_bounds = array<i64: 2, 1>, scalar_prefetch = 0 : i64, scratch_operands = 1 : i64, tpu.core_type = #tpu.core_type<tc>, window_params = [{transform_indices = @transform_0, window_bounds = array<i64: 552, 8>}, {transform_indices = @transform_1, window_bounds = array<i64: 9, 8, 128>}, {transform_indices = @transform_2, window_bounds = array<i64: 1, 128>}, {transform_indices = @transform_3, window_bounds = array<i64: 1, 128>}, {transform_indices = @transform_4, window_bounds = array<i64: 512, 128>}, {transform_indices = @transform_5, window_bounds = array<i64: 512, 128>}]} {
    %c1 = arith.constant 1 : index
    %c0 = arith.constant 0 : index
    %0 = vector.load %arg2[%c1, %c0] : memref<552x8xbf16, #tpu.memory_space<vmem>>, vector<512x8xbf16>
    %c0_0 = arith.constant 0 : index
    %c0_1 = arith.constant 0 : index
    %c0_2 = arith.constant 0 : index
    %1 = vector.load %arg3[%c0_0, %c0_1, %c0_2] : memref<9x8x128xbf16, #tpu.memory_space<vmem>>, vector<1x8x128xbf16>
    %2 = vector.shape_cast %1 : vector<1x8x128xbf16> to vector<8x128xbf16>
    %cst = arith.constant dense<0.000000e+00> : vector<512x128xf32>
    %3 = tpu.matmul %0, %2, %cst {dimension_numbers = #tpu.dot_dimension_numbers<[1], [0], [0], [1], [0, 0, 1, 1], [], []>} : vector<512x8xbf16>, vector<8x128xbf16>, vector<512x128xf32> -> vector<512x128xf32>
    %c0_3 = arith.constant 0 : index
    %c0_4 = arith.constant 0 : index
    %4 = vector.load %arg8[%c0_3, %c0_4] : memref<512x128xf32, #tpu.memory_space<vmem>>, vector<512x128xf32>
    tpu.vector_store %arg8[%c0_3, %c0_4], %3 {strides = array<i32>} : memref<512x128xf32, #tpu.memory_space<vmem>>, vector<512x128xf32>,
    %c0_5 = arith.constant 0 : index
    %c0_6 = arith.constant 0 : index
    %5 = vector.load %arg8[%c0_5, %c0_6] : memref<512x128xf32, #tpu.memory_space<vmem>>, vector<512x128xf32>
    %c2 = arith.constant 2 : index
    %c0_7 = arith.constant 0 : index
    %6 = vector.load %arg2[%c2, %c0_7] : memref<552x8xbf16, #tpu.memory_space<vmem>>, vector<512x8xbf16>
    %c1_8 = arith.constant 1 : index
    %c0_9 = arith.constant 0 : index
    %c0_10 = arith.constant 0 : index
    %7 = vector.load %arg3[%c1_8, %c0_9, %c0_10] : memref<9x8x128xbf16, #tpu.memory_space<vmem>>, vector<1x8x128xbf16>
    %8 = vector.shape_cast %7 : vector<1x8x128xbf16> to vector<8x128xbf16>
    %cst_11 = arith.constant dense<0.000000e+00> : vector<512x128xf32>
    %9 = tpu.matmul %6, %8, %cst_11 {dimension_numbers = #tpu.dot_dimension_numbers<[1], [0], [0], [1], [0, 0, 1, 1], [], []>} : vector<512x8xbf16>, vector<8x128xbf16>, vector<512x128xf32> -> vector<512x128xf32>
    %10 = arith.addf %5, %9 : vector<512x128xf32>
    %c0_12 = arith.constant 0 : index
    %c0_13 = arith.constant 0 : index
    %11 = vector.load %arg8[%c0_12, %c0_13] : memref<512x128xf32, #tpu.memory_space<vmem>>, vector<512x128xf32>
    tpu.vector_store %arg8[%c0_12, %c0_13], %10 {strides = array<i32>} : memref<512x128xf32, #tpu.memory_space<vmem>>, vector<512x128xf32>,
    %c0_14 = arith.constant 0 : index
    %c0_15 = arith.constant 0 : index
    %12 = vector.load %arg8[%c0_14, %c0_15] : memref<512x128xf32, #tpu.memory_space<vmem>>, vector<512x128xf32>
    %c3 = arith.constant 3 : index
    %c0_16 = arith.constant 0 : index
    %13 = vector.load %arg2[%c3, %c0_16] : memref<552x8xbf16, #tpu.memory_space<vmem>>, vector<512x8xbf16>
    %c2_17 = arith.constant 2 : index
    %c0_18 = arith.constant 0 : index
    %c0_19 = arith.constant 0 : index
    %14 = vector.load %arg3[%c2_17, %c0_18, %c0_19] : memref<9x8x128xbf16, #tpu.memory_space<vmem>>, vector<1x8x128xbf16>
    %15 = vector.shape_cast %14 : vector<1x8x128xbf16> to vector<8x128xbf16>
    %cst_20 = arith.constant dense<0.000000e+00> : vector<512x128xf32>
    %16 = tpu.matmul %13, %15, %cst_20 {dimension_numbers = #tpu.dot_dimension_numbers<[1], [0], [0], [1], [0, 0, 1, 1], [], []>} : vector<512x8xbf16>, vector<8x128xbf16>, vector<512x128xf32> -> vector<512x128xf32>
    %17 = arith.addf %12, %16 : vector<512x128xf32>
    %c0_21 = arith.constant 0 : index
    %c0_22 = arith.constant 0 : index
    %18 = vector.load %arg8[%c0_21, %c0_22] : memref<512x128xf32, #tpu.memory_space<vmem>>, vector<512x128xf32>
    tpu.vector_store %arg8[%c0_21, %c0_22], %17 {strides = array<i32>} : memref<512x128xf32, #tpu.memory_space<vmem>>, vector<512x128xf32>,
    %c0_23 = arith.constant 0 : index
    %c0_24 = arith.constant 0 : index
    %19 = vector.load %arg8[%c0_23, %c0_24] : memref<512x128xf32, #tpu.memory_space<vmem>>, vector<512x128xf32>
    %c19 = arith.constant 19 : index
    %c0_25 = arith.constant 0 : index
    %20 = vector.load %arg2[%c19, %c0_25] : memref<552x8xbf16, #tpu.memory_space<vmem>>, vector<512x8xbf16>
    %c3_26 = arith.constant 3 : index
    %c0_27 = arith.constant 0 : index
    %c0_28 = arith.constant 0 : index
    %21 = vector.load %arg3[%c3_26, %c0_27, %c0_28] : memref<9x8x128xbf16, #tpu.memory_space<vmem>>, vector<1x8x128xbf16>
    %22 = vector.shape_cast %21 : vector<1x8x128xbf16> to vector<8x128xbf16>
    %cst_29 = arith.constant dense<0.000000e+00> : vector<512x128xf32>
    %23 = tpu.matmul %20, %22, %cst_29 {dimension_numbers = #tpu.dot_dimension_numbers<[1], [0], [0], [1], [0, 0, 1, 1], [], []>} : vector<512x8xbf16>, vector<8x128xbf16>, vector<512x128xf32> -> vector<512x128xf32>
    %24 = arith.addf %19, %23 : vector<512x128xf32>
    %c0_30 = arith.constant 0 : index
    %c0_31 = arith.constant 0 : index
    %25 = vector.load %arg8[%c0_30, %c0_31] : memref<512x128xf32, #tpu.memory_space<vmem>>, vector<512x128xf32>
    tpu.vector_store %arg8[%c0_30, %c0_31], %24 {strides = array<i32>} : memref<512x128xf32, #tpu.memory_space<vmem>>, vector<512x128xf32>,
    %c0_32 = arith.constant 0 : index
    %c0_33 = arith.constant 0 : index
    %26 = vector.load %arg8[%c0_32, %c0_33] : memref<512x128xf32, #tpu.memory_space<vmem>>, vector<512x128xf32>
    %c20 = arith.constant 20 : index
    %c0_34 = arith.constant 0 : index
    %27 = vector.load %arg2[%c20, %c0_34] : memref<552x8xbf16, #tpu.memory_space<vmem>>, vector<512x8xbf16>
    %c4 = arith.constant 4 : index
    %c0_35 = arith.constant 0 : index
    %c0_36 = arith.constant 0 : index
    %28 = vector.load %arg3[%c4, %c0_35, %c0_36] : memref<9x8x128xbf16, #tpu.memory_space<vmem>>, vector<1x8x128xbf16>
    %29 = vector.shape_cast %28 : vector<1x8x128xbf16> to vector<8x128xbf16>
    %cst_37 = arith.constant dense<0.000000e+00> : vector<512x128xf32>
    %30 = tpu.matmul %27, %29, %cst_37 {dimension_numbers = #tpu.dot_dimension_numbers<[1], [0], [0], [1], [0, 0, 1, 1], [], []>} : vector<512x8xbf16>, vector<8x128xbf16>, vector<512x128xf32> -> vector<512x128xf32>
    %31 = arith.addf %26, %30 : vector<512x128xf32>
    %c0_38 = arith.constant 0 : index
    %c0_39 = arith.constant 0 : index
    %32 = vector.load %arg8[%c0_38, %c0_39] : memref<512x128xf32, #tpu.memory_space<vmem>>, vector<512x128xf32>
    tpu.vector_store %arg8[%c0_38, %c0_39], %31 {strides = array<i32>} : memref<512x128xf32, #tpu.memory_space<vmem>>, vector<512x128xf32>,
    %c0_40 = arith.constant 0 : index
    %c0_41 = arith.constant 0 : index
    %33 = vector.load %arg8[%c0_40, %c0_41] : memref<512x128xf32, #tpu.memory_space<vmem>>, vector<512x128xf32>
    %c21 = arith.constant 21 : index
    %c0_42 = arith.constant 0 : index
    %34 = vector.load %arg2[%c21, %c0_42] : memref<552x8xbf16, #tpu.memory_space<vmem>>, vector<512x8xbf16>
    %c5 = arith.constant 5 : index
    %c0_43 = arith.constant 0 : index
    %c0_44 = arith.constant 0 : index
    %35 = vector.load %arg3[%c5, %c0_43, %c0_44] : memref<9x8x128xbf16, #tpu.memory_space<vmem>>, vector<1x8x128xbf16>
    %36 = vector.shape_cast %35 : vector<1x8x128xbf16> to vector<8x128xbf16>
    %cst_45 = arith.constant dense<0.000000e+00> : vector<512x128xf32>
    %37 = tpu.matmul %34, %36, %cst_45 {dimension_numbers = #tpu.dot_dimension_numbers<[1], [0], [0], [1], [0, 0, 1, 1], [], []>} : vector<512x8xbf16>, vector<8x128xbf16>, vector<512x128xf32> -> vector<512x128xf32>
    %38 = arith.addf %33, %37 : vector<512x128xf32>
    %c0_46 = arith.constant 0 : index
    %c0_47 = arith.constant 0 : index
    %39 = vector.load %arg8[%c0_46, %c0_47] : memref<512x128xf32, #tpu.memory_space<vmem>>, vector<512x128xf32>
    tpu.vector_store %arg8[%c0_46, %c0_47], %38 {strides = array<i32>} : memref<512x128xf32, #tpu.memory_space<vmem>>, vector<512x128xf32>,
    %c0_48 = arith.constant 0 : index
    %c0_49 = arith.constant 0 : index
    %40 = vector.load %arg8[%c0_48, %c0_49] : memref<512x128xf32, #tpu.memory_space<vmem>>, vector<512x128xf32>
    %c37 = arith.constant 37 : index
    %c0_50 = arith.constant 0 : index
    %41 = vector.load %arg2[%c37, %c0_50] : memref<552x8xbf16, #tpu.memory_space<vmem>>, vector<512x8xbf16>
    %c6 = arith.constant 6 : index
    %c0_51 = arith.constant 0 : index
    %c0_52 = arith.constant 0 : index
    %42 = vector.load %arg3[%c6, %c0_51, %c0_52] : memref<9x8x128xbf16, #tpu.memory_space<vmem>>, vector<1x8x128xbf16>
    %43 = vector.shape_cast %42 : vector<1x8x128xbf16> to vector<8x128xbf16>
    %cst_53 = arith.constant dense<0.000000e+00> : vector<512x128xf32>
    %44 = tpu.matmul %41, %43, %cst_53 {dimension_numbers = #tpu.dot_dimension_numbers<[1], [0], [0], [1], [0, 0, 1, 1], [], []>} : vector<512x8xbf16>, vector<8x128xbf16>, vector<512x128xf32> -> vector<512x128xf32>
    %45 = arith.addf %40, %44 : vector<512x128xf32>
    %c0_54 = arith.constant 0 : index
    %c0_55 = arith.constant 0 : index
    %46 = vector.load %arg8[%c0_54, %c0_55] : memref<512x128xf32, #tpu.memory_space<vmem>>, vector<512x128xf32>
    tpu.vector_store %arg8[%c0_54, %c0_55], %45 {strides = array<i32>} : memref<512x128xf32, #tpu.memory_space<vmem>>, vector<512x128xf32>,
    %c0_56 = arith.constant 0 : index
    %c0_57 = arith.constant 0 : index
    %47 = vector.load %arg8[%c0_56, %c0_57] : memref<512x128xf32, #tpu.memory_space<vmem>>, vector<512x128xf32>
    %c38 = arith.constant 38 : index
    %c0_58 = arith.constant 0 : index
    %48 = vector.load %arg2[%c38, %c0_58] : memref<552x8xbf16, #tpu.memory_space<vmem>>, vector<512x8xbf16>
    %c7 = arith.constant 7 : index
    %c0_59 = arith.constant 0 : index
    %c0_60 = arith.constant 0 : index
    %49 = vector.load %arg3[%c7, %c0_59, %c0_60] : memref<9x8x128xbf16, #tpu.memory_space<vmem>>, vector<1x8x128xbf16>
    %50 = vector.shape_cast %49 : vector<1x8x128xbf16> to vector<8x128xbf16>
    %cst_61 = arith.constant dense<0.000000e+00> : vector<512x128xf32>
    %51 = tpu.matmul %48, %50, %cst_61 {dimension_numbers = #tpu.dot_dimension_numbers<[1], [0], [0], [1], [0, 0, 1, 1], [], []>} : vector<512x8xbf16>, vector<8x128xbf16>, vector<512x128xf32> -> vector<512x128xf32>
    %52 = arith.addf %47, %51 : vector<512x128xf32>
    %c0_62 = arith.constant 0 : index
    %c0_63 = arith.constant 0 : index
    %53 = vector.load %arg8[%c0_62, %c0_63] : memref<512x128xf32, #tpu.memory_space<vmem>>, vector<512x128xf32>
    tpu.vector_store %arg8[%c0_62, %c0_63], %52 {strides = array<i32>} : memref<512x128xf32, #tpu.memory_space<vmem>>, vector<512x128xf32>,
    %c0_64 = arith.constant 0 : index
    %c0_65 = arith.constant 0 : index
    %54 = vector.load %arg8[%c0_64, %c0_65] : memref<512x128xf32, #tpu.memory_space<vmem>>, vector<512x128xf32>
    %c39 = arith.constant 39 : index
    %c0_66 = arith.constant 0 : index
    %55 = vector.load %arg2[%c39, %c0_66] : memref<552x8xbf16, #tpu.memory_space<vmem>>, vector<512x8xbf16>
    %c8 = arith.constant 8 : index
    %c0_67 = arith.constant 0 : index
    %c0_68 = arith.constant 0 : index
    %56 = vector.load %arg3[%c8, %c0_67, %c0_68] : memref<9x8x128xbf16, #tpu.memory_space<vmem>>, vector<1x8x128xbf16>
    %57 = vector.shape_cast %56 : vector<1x8x128xbf16> to vector<8x128xbf16>
    %cst_69 = arith.constant dense<0.000000e+00> : vector<512x128xf32>
    %58 = tpu.matmul %55, %57, %cst_69 {dimension_numbers = #tpu.dot_dimension_numbers<[1], [0], [0], [1], [0, 0, 1, 1], [], []>} : vector<512x8xbf16>, vector<8x128xbf16>, vector<512x128xf32> -> vector<512x128xf32>
    %59 = arith.addf %54, %58 : vector<512x128xf32>
    %c0_70 = arith.constant 0 : index
    %c0_71 = arith.constant 0 : index
    %60 = vector.load %arg8[%c0_70, %c0_71] : memref<512x128xf32, #tpu.memory_space<vmem>>, vector<512x128xf32>
    tpu.vector_store %arg8[%c0_70, %c0_71], %59 {strides = array<i32>} : memref<512x128xf32, #tpu.memory_space<vmem>>, vector<512x128xf32>,
    %c0_72 = arith.constant 0 : index
    %c0_73 = arith.constant 0 : index
    %61 = vector.load %arg8[%c0_72, %c0_73] : memref<512x128xf32, #tpu.memory_space<vmem>>, vector<512x128xf32>
    %c0_74 = arith.constant 0 : index
    %c0_75 = arith.constant 0 : index
    %62 = vector.load %arg4[%c0_74, %c0_75] : memref<1x128xf32, #tpu.memory_space<vmem>>, vector<1x128xf32>
    %63 = vector.broadcast %62 : vector<1x128xf32> to vector<512x128xf32>
    %64 = arith.mulf %61, %63 : vector<512x128xf32>
    %c0_76 = arith.constant 0 : index
    %c0_77 = arith.constant 0 : index
    %65 = vector.load %arg5[%c0_76, %c0_77] : memref<1x128xf32, #tpu.memory_space<vmem>>, vector<1x128xf32>
    %66 = vector.broadcast %65 : vector<1x128xf32> to vector<512x128xf32>
    %67 = arith.addf %64, %66 : vector<512x128xf32>
    %cst_78 = arith.constant 0.000000e+00 : f32
    %68 = vector.broadcast %cst_78 : f32 to vector<512x128xf32>
    %69 = arith.maximumf %67, %68 : vector<512x128xf32>
    %c0_79 = arith.constant 0 : index
    %c0_80 = arith.constant 0 : index
    %70 = vector.load %arg6[%c0_79, %c0_80] : memref<512x128xbf16, #tpu.memory_space<vmem>>, vector<512x128xbf16>
    %71 = arith.extf %70 : vector<512x128xbf16> to vector<512x128xf32>
    %72 = arith.addf %69, %71 : vector<512x128xf32>
    %cst_81 = arith.constant 0.000000e+00 : f32
    %73 = vector.broadcast %cst_81 : f32 to vector<512x128xf32>
    %74 = arith.maximumf %72, %73 : vector<512x128xf32>
    %c0_82 = arith.constant 0 : index
    %c0_83 = arith.constant 0 : index
    %75 = vector.load %arg7[%c0_82, %c0_83] : memref<512x128xf32, #tpu.memory_space<vmem>>, vector<512x128xf32>
    tpu.vector_store %arg7[%c0_82, %c0_83], %74 {strides = array<i32>} : memref<512x128xf32, #tpu.memory_space<vmem>>, vector<512x128xf32>,
    return
  }
  func.func @transform_0(%arg0: i32, %arg1: i32) -> (i32, i32) {
    %c0_i32 = arith.constant 0 : i32
    %c0_i32_0 = arith.constant 0 : i32
    return %arg0, %c0_i32 : i32, i32
  }
  func.func @transform_1(%arg0: i32, %arg1: i32) -> (i32, i32, i32) {
    %c0_i32 = arith.constant 0 : i32
    %c0_i32_0 = arith.constant 0 : i32
    %c0_i32_1 = arith.constant 0 : i32
    return %c0_i32, %c0_i32_0, %arg1 : i32, i32, i32
  }
  func.func @transform_2(%arg0: i32, %arg1: i32) -> (i32, i32) {
    %c0_i32 = arith.constant 0 : i32
    %c0_i32_0 = arith.constant 0 : i32
    return %c0_i32, %arg1 : i32, i32
  }
  func.func @transform_3(%arg0: i32, %arg1: i32) -> (i32, i32) {
    %c0_i32 = arith.constant 0 : i32
    %c0_i32_0 = arith.constant 0 : i32
    return %c0_i32, %arg1 : i32, i32
  }
  func.func @transform_4(%arg0: i32, %arg1: i32) -> (i32, i32) {
    %c0_i32 = arith.constant 0 : i32
    return %arg0, %arg1 : i32, i32
  }
  func.func @transform_5(%arg0: i32, %arg1: i32) -> (i32, i32) {
    %c0_i32 = arith.constant 0 : i32
    return %arg0, %arg1 : i32, i32
  }
}

</mosaic_0001>

<bundles_post_ra>
// kernel: basic_block_forward.2
= control target key start
LH: loop header
LB: loop body
LE: loop exit
PB: predicated region body
PF: predicated region fallthrough
CT: control target
= control target key end

     0   :  { %s12278_s15 = smov 0   ;;  %s12280_s16 = smov 0   ;;  %s14427_s0 = inlined_call_operand.vmem [shape: bf16[1104,8], index: 0, kind: input, shape index: {}]   ;;  %s14428_s1 = inlined_call_operand.vmem [shape: bf16[9,8,128], index: 1, kind: input, shape index: {}]   ;;  %s14429_s2 = inlined_call_operand.vmem [shape: f32[1,128], index: 2, kind: input, shape index: {}]   ;;  %s14430_s3 = inlined_call_operand.vmem [shape: f32[1,128], index: 3, kind: input, shape index: {}]   ;;  %s14431_s4 = inlined_call_operand.vmem [shape: bf16[1024,128], index: 4, kind: output, shape index: {}]  }
   0x1   :  { %s12282_s17 = smov 0  }
   0x2 LB: > { %s26_s18 = sadd.s32 1, %s12247_s16  ;;  %p10083_p0 = scmp.ge.s32.totalorder %s12251_s17, 1  ;;  %s12251_s17 = sphi %s12282_s17, %s14_s17   ;;  %s12247_s16 = sphi %s12280_s16, %s14675_s16   ;;  %s12243_s15 = sphi %s12278_s15, %s14674_s15  }
   0x3   : > { %p28_p1 = scmp.ge.s32.totalorder %s26_s18, 2  ;;  %p202_p2 = scmp.lt.s32.totalorder %s12251_s17, 3 }
   0x5   : > { %s14677_s18 = smov (%p28_p1, %s26_s18), 0  ;;  %p203_p3 = pnand %p10083_p0, %p202_p2 }
   0x7   : > { %206 = sbr.rel (%p203_p3) target bundleno = 810 (0x32a), region = 36 }
   0xc   : > { %v332_v0 = vld [vmem:[%s14428_s1] sm:$0xf]  ;;  %vm854_vm0 = vcmask 1043456   ;;  %s241_s21 = smul.u32 69, %s12243_s15  ;;  %v10152_v2 = vld [vmem:[%s14428_s1 + $0x4] sm:$0xf] }
   0xd   : > { %11897 = vmatprep.subr.msk.bf16.mxu1 %vm854_vm0, %v332_v0  ;;  %11896 = vmatprep.subr.msk.bf16.mxu0 %vm854_vm0, %v332_v0  ;;  %v856_v1 = vsel %vm854_vm0, %v332_v0, 0  ;;  %v10218_v3 = vld [vmem:[%s14428_s1 + $0x8] sm:$0xf]  ;;  %vm496_vm1 = vsmask.f32 7424  ;;  %vm757_vm2 = vcmask 64512  }
   0xe   : > { %11895 = vmatpush3.bf16.msra.mxu1 %v856_v1  ;;  %11301 = vmatpush3.bf16.msra.mxu0 %v856_v1  ;;  %p242_p4 = scmp.lt.s32.totalorder %s241_s21, 137  ;;  %v1668_v12 = vsel %vm854_vm0, %v10152_v2, 0  ;;  %v2775_v13 = vsel %vm854_vm0, %v10218_v3, 0  ;;  %v12333_v33 = vld [vmem:[%s14428_s1 + $0x10] sm:$0xf]  ;;  %vm1505_vm4 = vcmask 1046528  }
   0xf   : > { %11898 = vmatprep.subr.msk.bf16.mxu1 %vm854_vm0, %v10152_v2  ;;  %11899 = vmatprep.subr.msk.bf16.mxu0 %vm854_vm0, %v10218_v3  ;;  %v12344_v44 = vld [vmem:[%s14428_s1 + $0xc] sm:$0xf]  ;;  %vm2381_vm3 = vsmask.f32 6400  ;;  %vm4594_vm5 = vcmask 1045504   ;;  %vm7683_vm8 = vcmask 1044480  }
  0x10   : > { %s14679_s21 = smov (!%p242_p4, %s241_s21), 137  ;;  %vm5470_vm6 = vsmask.f32 5376  ;;  %vm8559_vm7 = vsmask.f32 4352  ;;  %s10085_s24 = sshll.u32 %s12243_s15, 6 }
  0x11   : > { %s10084_s26 = sshll.u32 %s14679_s21, 2  ;;  %p258_p5 = scmp.lt.s32.totalorder %s10085_s24, 127 }
  0x12   : > { %s12316_s29 = scalar_lea.vmem %s14427_s0, %s10084_s26 }
  0x13   : > { %v11930_v4 = vld [vmem:[%s12316_s29] sm:$0xff]   ;;  %v11931_v5 = vld [vmem:[%s12316_s29 + $0x8] sm:$0xff]   ;;  %v11934_v16 = vld [vmem:[%s12316_s29 + $0x10] sm:$0xff]   ;;  %s14681_s24 = smov (!%p258_p5, %s10085_s24), 127 }
  0x14   : > { %v498_v6 = vshrl.u32 %v11930_v4, 16  ;;  %v500_v7 = vshll.u32 %v11930_v4, 16  ;;  %v505_v8 = vshll.u32 %v11931_v5, 16  ;;  %v509_v9 = vshrl.u32 %v11931_v5, 16  ;;  %v11932_v10 = vld [vmem:[%s12316_s29 + $0x80] sm:$0xff]   ;;  %v11933_v11 = vld [vmem:[%s12316_s29 + $0x88] sm:$0xff]  }
  0x15   : > { %v11935_v17 = vld [vmem:[%s12316_s29 + $0x90] sm:$0xff]   ;;  %v625_v18 = vshll.u32 %v11932_v10, 16  ;;  %v629_v19 = vshrl.u32 %v11932_v10, 16  ;;  %v633_v20 = vshll.u32 %v11933_v11, 16  ;;  %v637_v21 = vshrl.u32 %v11933_v11, 16  ;;  %v11936_v28 = vld [vmem:[%s12316_s29 + $0x18] sm:$0xff]  }
  0x16   : > { %v502_v14 = vrot.slane %v500_v7, 1  ;;  %v507_v15 = vrot.slane %v505_v8, 1  ;;  %v513_v24 = vshll.u32 %v11934_v16, 16  ;;  %v641_v25 = vshll.u32 %v11935_v17, 16  ;;  %v11937_v37 = vld [vmem:[%s12316_s29 + $0x98] sm:$0xff]   ;;  %v11938_v39 = vld [vmem:[%s12316_s29 + $0x20] sm:$0xff]  }
  0x17   : > { %v12326_v26 = vrot.slane %v625_v18, 1  ;;  %v635_v27 = vrot.slane %v633_v20, 1  ;;  %v517_v29 = vshrl.u32 %v11934_v16, 16  ;;  %v521_v36 = vshll.u32 %v11936_v28, 16  ;;  %v11939_v43 = vld [vmem:[%s12316_s29 + $0xa0] sm:$0xff]   ;;  %v11940_v49 = vld [vmem:[%s12316_s29 + $0x28] sm:$0xff]  }
  0x18   : > { %v503_v22 = vor.u32 %v502_v14, %v498_v6  ;;  %v511_v23 = vor.u32 %v509_v9, %v507_v15  ;;  %v515_v31 = vrot.slane %v513_v24, 1  ;;  %v643_v32 = vrot.slane %v641_v25, 1  ;;  %v11941_v61 = vld [vmem:[%s12316_s29 + $0xa8] sm:$0xff]   ;;  %v11942_v63 = vld [vmem:[%s12316_s29 + $0x30] sm:$0xff]   ;;  %v11944_v14 = vld [vmem:[%s12316_s29 + $0x38] sm:$0xff]   ;;  %s10086_s28 = sshll.u32 %s14681_s24, 2 }
  0x19   : > { %v631_v34 = vor.u32 %v629_v19, %v12326_v26  ;;  %v639_v35 = vor.u32 %v637_v21, %v635_v27  ;;  %v645_v38 = vshrl.u32 %v11935_v17, 16  ;;  %v525_v42 = vshrl.u32 %v11936_v28, 16  ;;  %v11943_v6 = vld [vmem:[%s12316_s29 + $0xb0] sm:$0xff]   ;;  %v11946_v24 = vld [vmem:[%s12316_s29 + $0x40] sm:$0xff]   ;;  %s14207_s5 = scalar_lea.vmem %s14431_s4, %s10086_s28 }
  0x1a   : > { %v508_v30 = vsel %vm496_vm1, %v503_v22, %v507_v15  ;;  %v516_v40 = vsel %vm496_vm1, %v511_v23, %v515_v31  ;;  %v519_v41 = vor.u32 %v517_v29, %v515_v31  ;;  %v523_v47 = vrot.slane %v521_v36, 1  ;;  %v11945_v15 = vld [vmem:[%s12316_s29 + $0xb8] sm:$0xff]  }
  0x1b   : > { %11302 = vmatprep.mubr.msk.bf16.mxu0 %vm757_vm2, %v508_v30  ;;  %v636_v45 = vsel %vm496_vm1, %v631_v34, %v635_v27  ;;  %v644_v46 = vsel %vm496_vm1, %v639_v35, %v643_v32  ;;  %v647_v48 = vor.u32 %v645_v38, %v643_v32  ;;  %v649_v50 = vshll.u32 %v11937_v37, 16  ;;  %v11947_v30 = vld [vmem:[%s12316_s29 + $0xc0] sm:$0xff]   ;;  %v11948_v35 = vld [vmem:[%s12316_s29 + $0x48] sm:$0xff]  }
  0x1c   : > { %11303 = vmatmul.mubr.msk.bf16.vlgmr.msra.gmra.mxu0 %vm757_vm2, %v516_v40  ;;  %11334 = vmatprep.mubr.msk.bf16.mxu1 %vm757_vm2, %v636_v45  ;;  %v529_v51 = vshll.u32 %v11938_v39, 16  ;;  %v653_v52 = vshrl.u32 %v11937_v37, 16  ;;  %v657_v53 = vshll.u32 %v11939_v43, 16  ;;  %v524_v54 = vsel %vm496_vm1, %v519_v41, %v523_v47  ;;  %v11949_v38 = vld [vmem:[%s12316_s29 + $0xc8] sm:$0xff]  }
  0x1d   : > { %11433 = vmatpush3.bf16.msra.mxu0 %v2775_v13  ;;  %11335 = vmatmul.mubr.msk.bf16.vlgmr.msra.gmra.mxu1 %vm757_vm2, %v644_v46  ;;  %v527_v55 = vor.u32 %v525_v42, %v523_v47  ;;  %v533_v56 = vshrl.u32 %v11938_v39, 16  ;;  %v537_v57 = vshll.u32 %v11940_v49, 16  ;;  %v651_v58 = vrot.slane %v649_v50, 1  ;;  %v11950_v47 = vld [vmem:[%s12316_s29 + $0x50] sm:$0xff]  }
  0x1e   : > { %11901 = vmatprep.subr.msk.bf16.mxu0 %vm854_vm0, %v12333_v33  ;;  %11367 = vmatpush3.bf16.msra.mxu1 %v1668_v12  ;;  %v531_v59 = vrot.slane %v529_v51, 1  ;;  %v659_v60 = vrot.slane %v657_v53, 1  ;;  %v661_v62 = vshrl.u32 %v11939_v43, 16  ;;  %v541_v1 = vshrl.u32 %v11940_v49, 16 }
  0x1f   : > { %11306 = vmatprep.mubr.msk.bf16.mxu0 %vm757_vm2, %v524_v54  ;;  %v539_v0 = vrot.slane %v537_v57, 1  ;;  %11900 = vmatprep.subr.msk.bf16.mxu1 %vm854_vm0, %v12344_v44  ;;  %v652_v2 = vsel %vm496_vm1, %v647_v48, %v651_v58  ;;  %v655_v4 = vor.u32 %v653_v52, %v651_v58  ;;  %v665_v8 = vshll.u32 %v11941_v61, 16  ;;  %v11951_v52 = vld [vmem:[%s12316_s29 + $0xd0] sm:$0xff]  }
  0x20   : > { %v532_v3 = vsel %vm496_vm1, %v527_v55, %v531_v59  ;;  %v535_v5 = vor.u32 %v533_v56, %v531_v59  ;;  %11338 = vmatprep.mubr.msk.bf16.mxu1 %vm757_vm2, %v652_v2  ;;  %v663_v7 = vor.u32 %v661_v62, %v659_v60  ;;  %v545_v9 = vshll.u32 %v11942_v63, 16  ;;  %v11952_v56 = vld [vmem:[%s12316_s29 + $0x58] sm:$0xff]  }
  0x21   : > { %v660_v10 = vsel %vm496_vm1, %v655_v4, %v659_v60  ;;  %v669_v12 = vshrl.u32 %v11941_v61, 16  ;;  %v673_v13 = vshll.u32 %v11943_v6, 16  ;;  %v667_v16 = vrot.slane %v665_v8, 1  ;;  %v11953_v61 = vld [vmem:[%s12316_s29 + $0xd8] sm:$0xff]  }
  0x22   : > { %v540_v11 = vsel %vm496_vm1, %v535_v5, %v539_v0  ;;  %v547_v17 = vrot.slane %v545_v9, 1  ;;  %v549_v18 = vshrl.u32 %v11942_v63, 16  ;;  %v677_v19 = vshrl.u32 %v11943_v6, 16 }
  0x23   : > { %v543_v20 = vor.u32 %v541_v1, %v539_v0  ;;  %v675_v21 = vrot.slane %v673_v13, 1  ;;  %v553_v22 = vshll.u32 %v11944_v14, 16  ;;  %v681_v23 = vshll.u32 %v11945_v15, 16 }
  0x24   : > { %11307 = vmatmul.mubr.msk.bf16.gmra.mxu0 %vm757_vm2, %v532_v3  ;;  %v668_v25 = vsel %vm496_vm1, %v663_v7, %v667_v16  ;;  %v551_v27 = vor.u32 %v549_v18, %v547_v17  ;;  %v671_v28 = vor.u32 %v669_v12, %v667_v16  ;;  %v561_v34 = vshll.u32 %v11946_v24, 16  ;;  %v11954_v7 = vld [vmem:[%s12316_s29 + $0x60] sm:$0xff]   ;;  %v11956_v16 = vld [vmem:[%s12316_s29 + $0x68] sm:$0xff]  }
  0x25   : > { %11310 = vmatprep.mubr.msk.bf16.mxu0 %vm757_vm2, %v540_v11  ;;  %11339 = vmatmul.mubr.msk.bf16.gmra.mxu1 %vm757_vm2, %v660_v10  ;;  %v555_v29 = vrot.slane %v553_v22, 1  ;;  %v679_v31 = vor.u32 %v677_v19, %v675_v21  ;;  %v683_v32 = vrot.slane %v681_v23, 1  ;;  %v548_v36 = vsel %vm496_vm1, %v543_v20, %v547_v17  ;;  %v11955_v12 = vld [vmem:[%s12316_s29 + $0xe0] sm:$0xff]  }
  0x26   : > { %11342 = vmatprep.mubr.msk.bf16.mxu1 %vm757_vm2, %v668_v25  ;;  %v557_v37 = vshrl.u32 %v11944_v14, 16  ;;  %v689_v40 = vshll.u32 %v11947_v30, 16  ;;  %v565_v41 = vshrl.u32 %v11946_v24, 16  ;;  %v569_v42 = vshll.u32 %v11948_v35, 16 }
  0x27   : > { %v556_v39 = vsel %vm496_vm1, %v551_v27, %v555_v29  ;;  %v676_v43 = vsel %vm496_vm1, %v671_v28, %v675_v21  ;;  %v563_v45 = vrot.slane %v561_v34, 1  ;;  %v685_v46 = vshrl.u32 %v11945_v15, 16  ;;  %v11957_v21 = vld [vmem:[%s12316_s29 + $0xe8] sm:$0xff]   ;;  %v11958_v34 = vld [vmem:[%s12316_s29 + $0x70] sm:$0xff]  }
  0x28   : > { %v684_v48 = vsel %vm496_vm1, %v679_v31, %v683_v32  ;;  %v693_v49 = vshrl.u32 %v11947_v30, 16  ;;  %v697_v50 = vshll.u32 %v11949_v38, 16  ;;  %v559_v51 = vor.u32 %v557_v37, %v555_v29  ;;  %v11959_v37 = vld [vmem:[%s12316_s29 + $0xf0] sm:$0xff]  }
  0x29   : > { %v691_v53 = vrot.slane %v689_v40, 1  ;;  %v567_v54 = vor.u32 %v565_v41, %v563_v45  ;;  %v571_v55 = vrot.slane %v569_v42, 1  ;;  %v687_v57 = vor.u32 %v685_v46, %v683_v32 }
  0x2a   : > { %v577_v58 = vshll.u32 %v11950_v47, 16  ;;  %v699_v60 = vrot.slane %v697_v50, 1  ;;  %v564_v62 = vsel %vm496_vm1, %v559_v51, %v563_v45  ;;  %v573_v63 = vshrl.u32 %v11948_v35, 16  ;;  %v11966_v51 = vld [vmem:[%s12316_s29 + $0x8] sm:$0xff]  }
  0x2b   : > { %v695_v59 = vor.u32 %v693_v49, %v691_v53  ;;  %v705_v0 = vshll.u32 %v11951_v52, 16  ;;  %v572_v1 = vsel %vm496_vm1, %v567_v54, %v571_v55  ;;  %v581_v2 = vshrl.u32 %v11950_v47, 16  ;;  %v11961_v47 = vld [vmem:[%s12316_s29 + $0xf8] sm:$0xff]  }
  0x2c   : > { %11311 = vmatmul.mubr.msk.bf16.gmra.mxu0 %vm757_vm2, %v548_v36  ;;  %v585_v3 = vshll.u32 %v11952_v56, 16  ;;  %v692_v4 = vsel %vm496_vm1, %v687_v57, %v691_v53  ;;  %v579_v5 = vrot.slane %v577_v58, 1  ;;  %v701_v6 = vshrl.u32 %v11949_v38, 16  ;;  %v11965_v53 = vld [vmem:[%s12316_s29] sm:$0xfe]  }
  0x2d   : > { %11314 = vmatprep.mubr.msk.bf16.mxu0 %vm757_vm2, %v556_v39  ;;  %11343 = vmatmul.mubr.msk.bf16.gmra.mxu1 %vm757_vm2, %v676_v43  ;;  %v700_v8 = vsel %vm496_vm1, %v695_v59, %v699_v60  ;;  %v709_v9 = vshrl.u32 %v11951_v52, 16  ;;  %v713_v10 = vshll.u32 %v11953_v61, 16  ;;  %v575_v11 = vor.u32 %v573_v63, %v571_v55  ;;  %v11960_v43 = vld [vmem:[%s12316_s29 + $0x78] sm:$0xff]  }
  0x2e   : > { %11346 = vmatprep.mubr.msk.bf16.mxu1 %vm757_vm2, %v684_v48  ;;  %v707_v13 = vrot.slane %v705_v0, 1  ;;  %v583_v14 = vor.u32 %v581_v2, %v579_v5  ;;  %v587_v15 = vrot.slane %v585_v3, 1  ;;  %v703_v17 = vor.u32 %v701_v6, %v699_v60 }
  0x2f   : > { %v593_v18 = vshll.u32 %v11954_v7, 16  ;;  %v715_v20 = vrot.slane %v713_v10, 1  ;;  %v580_v22 = vsel %vm496_vm1, %v575_v11, %v579_v5  ;;  %v589_v23 = vshrl.u32 %v11952_v56, 16 }
  0x30   : > { %v711_v19 = vor.u32 %v709_v9, %v707_v13  ;;  %v721_v24 = vshll.u32 %v11955_v12, 16  ;;  %v588_v25 = vsel %vm496_vm1, %v583_v14, %v587_v15  ;;  %v597_v27 = vshrl.u32 %v11954_v7, 16  ;;  %v11962_v9 = vld [vmem:[%s12316_s29 + $0x100] ss:$0 sps:$4 sm:$0x11]  }
  0x31   : > { %v601_v28 = vshll.u32 %v11956_v16, 16  ;;  %v708_v29 = vsel %vm496_vm1, %v703_v17, %v707_v13  ;;  %v595_v30 = vrot.slane %v593_v18, 1  ;;  %v717_v31 = vshrl.u32 %v11953_v61, 16  ;;  %v12426_v13 = vld [vmem:[%s12316_s29 + $0x8] sm:$0xff]   ;;  %v11968_v17 = vld [vmem:[%s12316_s29 + $0x10] sm:$0xff]  }
  0x32   : > { %v725_v32 = vshrl.u32 %v11955_v12, 16  ;;  %v716_v35 = vsel %vm496_vm1, %v711_v19, %v715_v20  ;;  %v729_v36 = vshll.u32 %v11957_v21, 16  ;;  %v591_v38 = vor.u32 %v589_v23, %v587_v15 }
  0x33   : > { %v723_v39 = vrot.slane %v721_v24, 1  ;;  %v599_v40 = vor.u32 %v597_v27, %v595_v30  ;;  %v603_v41 = vrot.slane %v601_v28, 1  ;;  %v605_v42 = vshrl.u32 %v11956_v16, 16 }
  0x34   : > { %11315 = vmatmul.mubr.msk.bf16.gmra.mxu0 %vm757_vm2, %v564_v62  ;;  %v719_v45 = vor.u32 %v717_v31, %v715_v20  ;;  %v609_v46 = vshll.u32 %v11958_v34, 16  ;;  %v731_v49 = vrot.slane %v729_v36, 1  ;;  %v737_v50 = vshll.u32 %v11959_v37, 16  ;;  %v11970_v20 = vld [vmem:[%s12316_s29 + $0x18] sm:$0xff]  }
  0x35   : > { %11318 = vmatprep.mubr.msk.bf16.mxu0 %vm757_vm2, %v572_v1  ;;  %11347 = vmatmul.mubr.msk.bf16.gmra.mxu1 %vm757_vm2, %v692_v4  ;;  %v727_v48 = vor.u32 %v725_v32, %v723_v39  ;;  %v596_v52 = vsel %vm496_vm1, %v591_v38, %v595_v30  ;;  %v604_v54 = vsel %vm496_vm1, %v599_v40, %v603_v41  ;;  %v733_v55 = vshrl.u32 %v11957_v21, 16 }
  0x36   : > { %11350 = vmatprep.mubr.msk.bf16.mxu1 %vm757_vm2, %v700_v8  ;;  %v613_v56 = vshrl.u32 %v11958_v34, 16  ;;  %v617_v57 = vshll.u32 %v11960_v43, 16  ;;  %v724_v58 = vsel %vm496_vm1, %v719_v45, %v723_v39  ;;  %v607_v59 = vor.u32 %v605_v42, %v603_v41  ;;  %v11972_v39 = vld [vmem:[%s12316_s29 + $0x20] sm:$0xff]  }
  0x37   : > { %v611_v60 = vrot.slane %v609_v46, 1  ;;  %v745_v61 = vshll.u32 %v11961_v47, 16  ;;  %v732_v62 = vsel %vm496_vm1, %v727_v48, %v731_v49  ;;  %v739_v63 = vrot.slane %v737_v50, 1  ;;  %v11969_v50 = vld [vmem:[%s12316_s29 + $0x18] sm:$0xff]  }
  0x38   : > { %v741_v0 = vshrl.u32 %v11959_v37, 16  ;;  %v2391_v1 = vshrl.u32 %v11966_v51, 16  ;;  %v2383_v2 = vshrl.u32 %v11965_v53, 16  ;;  %v2394_v3 = vshll.u32 %v11966_v51, 16 }
  0x39   : > { %v615_v4 = vor.u32 %v613_v56, %v611_v60  ;;  %v619_v5 = vrot.slane %v617_v57, 1  ;;  %v2386_v6 = vshll.u32 %v11965_v53, 16  ;;  %v735_v7 = vor.u32 %v733_v55, %v731_v49  ;;  %v11967_v49 = vld [vmem:[%s12316_s29 + $0x10] sm:$0xff]  }
  0x3a   : > { %v747_v8 = vrot.slane %v745_v61, 1  ;;  %v612_v10 = vsel %vm496_vm1, %v607_v59, %v611_v60  ;;  %v743_v11 = vor.u32 %v741_v0, %v739_v63  ;;  %v621_v12 = vshrl.u32 %v11960_v43, 16  ;;  %v11974_v43 = vld [vmem:[%s12316_s29 + $0x28] sm:$0xff]   ;;  %v11976_v0 = vld [vmem:[%s12316_s29 + $0x30] sm:$0xff]  }
  0x3b   : > { %v2385_v14 = vrot.slane %v2383_v2, 1  ;;  %v2393_v15 = vrot.slane %v2391_v1, 1  ;;  %v2396_v16 = vrot.slane %v2394_v3, 2  ;;  %v620_v18 = vsel %vm496_vm1, %v615_v4, %v619_v5  ;;  %v11978_v3 = vld [vmem:[%s12316_s29 + $0x38] sm:$0xff]  }
  0x3c   : > { %11319 = vmatmul.mubr.msk.bf16.gmra.mxu0 %vm757_vm2, %v580_v22  ;;  %v2388_v19 = vrot.slane %v2386_v6, 2  ;;  %v740_v21 = vsel %vm496_vm1, %v735_v7, %v739_v63  ;;  %v749_v22 = vshrl.u32 %v11961_v47, 16  ;;  %v753_v23 = vshll.u32 %v11962_v9, 16  ;;  %v11973_v7 = vld [vmem:[%s12316_s29 + $0x28] sm:$0xff]  }
  0x3d   : > { %11322 = vmatprep.mubr.msk.bf16.mxu0 %vm757_vm2, %v588_v25  ;;  %11351 = vmatmul.mubr.msk.bf16.gmra.mxu1 %vm757_vm2, %v708_v29  ;;  %v748_v24 = vsel %vm496_vm1, %v743_v11, %v747_v8  ;;  %v11963_v25 = vld [vmem:[%s12316_s29] sm:$0xfe]   ;;  %v623_v27 = vor.u32 %v621_v12, %v619_v5  ;;  %v2400_v28 = vshrl.u32 %v11968_v17, 16  ;;  %v2403_v29 = vshll.u32 %v11968_v17, 16 }
  0x3e   : > { %11354 = vmatprep.mubr.msk.bf16.mxu1 %vm757_vm2, %v716_v35  ;;  %v2389_v30 = vor.u32 %v2388_v19, %v2385_v14  ;;  %v2397_v31 = vor.u32 %v2396_v16, %v2393_v15  ;;  %v2409_v32 = vshrl.u32 %v11970_v20, 16  ;;  %v2412_v34 = vshll.u32 %v11970_v20, 16  ;;  %v11971_v5 = vld [vmem:[%s12316_s29 + $0x20] sm:$0xff]   ;;  %v11975_v20 = vld [vmem:[%s12316_s29 + $0x30] sm:$0xff]  }
  0x3f   : > { %v751_v35 = vor.u32 %v749_v22, %v747_v8  ;;  %v755_v36 = vrot.slane %v753_v23, 1  ;;  %v1507_v37 = vrot.slane %v12426_v13, 1  ;;  %v1506_v38 = vrot.slane %v11963_v25, 1  ;;  %v11980_v15 = vld [vmem:[%s12316_s29 + $0x40] sm:$0xff]   ;;  %v11982_v23 = vld [vmem:[%s12316_s29 + $0x48] sm:$0xff]   ;;  %v11977_v25 = vld [vmem:[%s12316_s29 + $0x38] sm:$0xff]  }
  0x40   : > { %v628_v40 = vsel %vm496_vm1, %v623_v27, %v12326_v26  ;;  %v2402_v41 = vrot.slane %v2400_v28, 1  ;;  %v2405_v42 = vrot.slane %v2403_v29, 2  ;;  %v2398_v45 = vsel %vm2381_vm3, %v2389_v30, %v2397_v31 }
  0x41   : > { %v2411_v46 = vrot.slane %v2409_v32, 1  ;;  %v2414_v47 = vrot.slane %v2412_v34, 2  ;;  %v756_v48 = vsel %vm496_vm1, %v751_v35, %v755_v36  ;;  %v1508_v51 = vsel %vm1505_vm4, %v1506_v38, %v1507_v37  ;;  %v11984_v38 = vld [vmem:[%s12316_s29 + $0x50] sm:$0xff]  }
  0x42   : > { %v2421_v53 = vshll.u32 %v11972_v39, 16  ;;  %v2406_v26 = vor.u32 %v2405_v42, %v2402_v41  ;;  %v2430_v56 = vshll.u32 %v11974_v43, 16  ;;  %v1509_v57 = vrot.slane %v11967_v49, 1  ;;  %v11986_v41 = vld [vmem:[%s12316_s29 + $0x58] sm:$0xff]   ;;  %v11981_v49 = vld [vmem:[%s12316_s29 + $0x48] sm:$0xff]  }
  0x43   : > { %v2415_v55 = vor.u32 %v2414_v47, %v2411_v46  ;;  %v1511_v59 = vrot.slane %v11969_v50, 1  ;;  %v3881_v6 = vsel %vm854_vm0, %v12344_v44, 0  ;;  %v2436_v9 = vshrl.u32 %v11976_v0, 16  ;;  %v11979_v47 = vld [vmem:[%s12316_s29 + $0x40] sm:$0xff]  }
  0x44   : > { %11323 = vmatmul.mubr.msk.bf16.gmra.mxu0 %vm757_vm2, %v596_v52  ;;  %v2418_v52 = vshrl.u32 %v11972_v39, 16  ;;  %v2423_v61 = vrot.slane %v2421_v53, 2  ;;  %v2432_v2 = vrot.slane %v2430_v56, 2  ;;  %v1510_v4 = vsel %vm1505_vm4, %v1507_v37, %v1509_v57 }
  0x45   : > { %11326 = vmatprep.mubr.msk.bf16.mxu0 %vm757_vm2, %v604_v54  ;;  %11355 = vmatmul.mubr.msk.bf16.gmra.mxu1 %vm757_vm2, %v724_v58  ;;  %v2427_v54 = vshrl.u32 %v11974_v43, 16  ;;  %v4757_v58 = vsel %vm854_vm0, %v12333_v33, 0  ;;  %v2416_v1 = vsel %vm2381_vm3, %v2406_v26, %v2415_v55  ;;  %v1512_v33 = vsel %vm1505_vm4, %v1509_v57, %v1511_v59 }
  0x46   : > { %11358 = vmatprep.mubr.msk.bf16.mxu1 %vm757_vm2, %v732_v62  ;;  %v2420_v60 = vrot.slane %v2418_v52, 1  ;;  %v2407_v62 = vsel %vm2381_vm3, %v2397_v31, %v2406_v26  ;;  %v2445_v12 = vshrl.u32 %v11978_v3, 16  ;;  %v2448_v13 = vshll.u32 %v11978_v3, 16 }
  0x47   : > { %v2429_v63 = vrot.slane %v2427_v54, 1  ;;  %v1513_v44 = vrot.slane %v11971_v5, 1  ;;  %v1515_v14 = vrot.slane %v11973_v7, 1  ;;  %v2438_v17 = vrot.slane %v2436_v9, 1 }
  0x48   : > { %v2424_v8 = vor.u32 %v2423_v61, %v2420_v60  ;;  %v2450_v22 = vrot.slane %v2448_v13, 2  ;;  %v2454_v28 = vshrl.u32 %v11980_v15, 16  ;;  %v2457_v30 = vshll.u32 %v11980_v15, 16  ;;  %v11988_v61 = vld [vmem:[%s12316_s29 + $0x60] sm:$0xff]   ;;  %v11994_v15 = vld [vmem:[%s12316_s29 + $0x78] sm:$0xff]  }
  0x49   : > { %v2433_v11 = vor.u32 %v2432_v2, %v2429_v63  ;;  %v1516_v27 = vsel %vm1505_vm4, %v1513_v44, %v1515_v14  ;;  %v2463_v32 = vshrl.u32 %v11982_v23, 16  ;;  %v2466_v34 = vshll.u32 %v11982_v23, 16  ;;  %v11983_v2 = vld [vmem:[%s12316_s29 + $0x50] sm:$0xff]  }
  0x4a   : > { %v2425_v16 = vsel %vm2381_vm3, %v2415_v55, %v2424_v8  ;;  %v1517_v35 = vrot.slane %v11975_v20, 1  ;;  %v1519_v36 = vrot.slane %v11977_v25, 1  ;;  %v2456_v37 = vrot.slane %v2454_v28, 1  ;;  %v11987_v20 = vld [vmem:[%s12316_s29 + $0x60] sm:$0xff]  }
  0x4b   : > { %v2434_v19 = vsel %vm2381_vm3, %v2424_v8, %v2433_v11  ;;  %v2465_v43 = vrot.slane %v2463_v32, 1  ;;  %v2472_v50 = vshrl.u32 %v11984_v38, 16  ;;  %v2475_v52 = vshll.u32 %v11984_v38, 16 }
  0x4c   : > { %11327 = vmatmul.mubr.msk.bf16.gmra.mxu0 %vm757_vm2, %v612_v10  ;;  %v2439_v10 = vshll.u32 %v11976_v0, 16  ;;  %v1518_v46 = vsel %vm1505_vm4, %v1515_v14, %v1517_v35  ;;  %v2481_v53 = vshrl.u32 %v11986_v41, 16  ;;  %v2484_v54 = vshll.u32 %v11986_v41, 16  ;;  %v11990_v0 = vld [vmem:[%s12316_s29 + $0x68] sm:$0xff]  }
  0x4d   : > { %11330 = vmatprep.mubr.msk.bf16.mxu0 %vm757_vm2, %v620_v18  ;;  %11359 = vmatmul.mubr.msk.bf16.gmra.mxu1 %vm757_vm2, %v740_v21  ;;  %v2447_v21 = vrot.slane %v2445_v12, 1  ;;  %v1521_v55 = vrot.slane %v11979_v47, 1  ;;  %v1523_v56 = vrot.slane %v11981_v49, 1  ;;  %v2499_v8 = vshrl.u32 %v11990_v0, 16  ;;  %v11992_v12 = vld [vmem:[%s12316_s29 + $0x70] sm:$0xff]  }
  0x4e   : > { %11362 = vmatprep.mubr.msk.bf16.mxu1 %vm757_vm2, %v748_v24  ;;  %v2441_v18 = vrot.slane %v2439_v10, 2  ;;  %v1514_v24 = vsel %vm1505_vm4, %v1511_v59, %v1513_v44  ;;  %v2477_v59 = vrot.slane %v2475_v52, 2  ;;  %v2483_v60 = vrot.slane %v2481_v53, 1 }
  0x4f   : > { %v2451_v31 = vor.u32 %v2450_v22, %v2447_v21  ;;  %v2486_v63 = vrot.slane %v2484_v54, 2  ;;  %v1524_v3 = vsel %vm1505_vm4, %v1521_v55, %v1523_v56  ;;  %v2502_v9 = vshll.u32 %v11990_v0, 16  ;;  %v11989_v22 = vld [vmem:[%s12316_s29 + $0x68] sm:$0xff]  }
  0x50   : > { %v2442_v29 = vor.u32 %v2441_v18, %v2438_v17  ;;  %v1525_v10 = vrot.slane %v11983_v2, 1  ;;  %v2501_v17 = vrot.slane %v2499_v8, 1  ;;  %v2508_v23 = vshrl.u32 %v11992_v12, 16  ;;  %v11997_v0 = vld [vmem:[%s12316_s29 + $0x88] sm:$0xff]   ;;  %v12004_v8 = vld [vmem:[%s12316_s29 + $0xa0] sm:$0xff]  }
  0x51   : > { %v2487_v7 = vor.u32 %v2486_v63, %v2483_v60  ;;  %v2504_v18 = vrot.slane %v2502_v9, 2  ;;  %v2511_v25 = vshll.u32 %v11992_v12, 16  ;;  %v12002_v60 = vld [vmem:[%s12316_s29 + $0x98] sm:$0xff]  }
  0x52   : > { %v2443_v39 = vsel %vm2381_vm3, %v2433_v11, %v2442_v29  ;;  %v2452_v42 = vsel %vm2381_vm3, %v2442_v29, %v2451_v31  ;;  %v2520_v29 = vshll.u32 %v11994_v15, 16  ;;  %v2510_v32 = vrot.slane %v2508_v23, 1 }
  0x53   : > { %v2505_v28 = vor.u32 %v2504_v18, %v2501_v17  ;;  %v12001_v17 = vld [vmem:[%s12316_s29 + $0x98] sm:$0xff]  }
  0x54   : > { %11331 = vmatmul.mubr.msk.bf16.gmra.mxu0 %vm757_vm2, %v628_v40  ;;  %v2459_v40 = vrot.slane %v2457_v30, 2  ;;  %v1529_v30 = vrot.slane %v11987_v20, 1  ;;  %v12552_v20 = vld [vmem:[%s14428_s1 + $0x14] sm:$0xf] }
  0x55   : > { %11434 = vmatprep.mubr.msk.bf16.mxu0 %vm757_vm2, %v2398_v45  ;;  %11363 = vmatmul.mubr.msk.bf16.gmra.mxu1 %vm757_vm2, %v756_v48  ;;  %v2468_v45 = vrot.slane %v2466_v34, 2  ;;  %v1520_v48 = vsel %vm1505_vm4, %v1517_v35, %v1519_v36  ;;  %v11996_v34 = vld [vmem:[%s12316_s29 + $0x80] sm:$0xff]  }
  0x56   : > { %11368 = vmatprep.mubr.msk.bf16.mxu1 %vm757_vm2, %v1508_v51  ;;  %v2460_v51 = vor.u32 %v2459_v40, %v2456_v37  ;;  %v11998_v40 = vld [vmem:[%s12316_s29 + $0x88] sm:$0xff]  }
  0x57   : > { %v2469_v26 = vor.u32 %v2468_v45, %v2465_v43  ;;  %v11993_v45 = vld [vmem:[%s12316_s29 + $0x78] sm:$0xff]  }
  0x58   : > { %v2461_v57 = vsel %vm2381_vm3, %v2451_v31, %v2460_v51  ;;  %v1531_v31 = vrot.slane %v11989_v22, 1  ;;  %v1535_v53 = vrot.slane %v11993_v45, 1  ;;  %v2565_v22 = vshll.u32 %v12004_v8, 16 }
  0x5a   : > { %v1532_v43 = vsel %vm1505_vm4, %v1529_v30, %v1531_v31 }
  0x5c   : > { %11435 = vmatmul.mubr.msk.bf16.vlgmr.msra.gmra.mxu0 %vm757_vm2, %v2407_v62  ;;  %v2470_v62 = vsel %vm2381_vm3, %v2460_v51, %v2469_v26  ;;  %v2538_v51 = vshll.u32 %v11998_v40, 16 }
  0x5d   : > { %11565 = vmatpush3.bf16.msra.mxu0 %v4757_v58  ;;  %11438 = vmatprep.mubr.msk.bf16.mxu0 %vm757_vm2, %v2416_v1  ;;  %v2474_v58 = vrot.slane %v2472_v50, 1  ;;  %v1522_v1 = vsel %vm1505_vm4, %v1519_v36, %v1521_v55  ;;  %v2513_v36 = vrot.slane %v2511_v25, 2  ;;  %v2535_v50 = vshrl.u32 %v11998_v40, 16 }
  0x5e   : > { %11369 = vmatmul.mubr.msk.bf16.vlgmr.msra.gmra.mxu1 %vm757_vm2, %v1510_v4  ;;  %v11985_v4 = vld [vmem:[%s12316_s29 + $0x58] sm:$0xff]  }
  0x5f   : > { %11499 = vmatpush3.bf16.msra.mxu1 %v3881_v6  ;;  %11372 = vmatprep.mubr.msk.bf16.mxu1 %vm757_vm2, %v1512_v33  ;;  %v2478_v5 = vor.u32 %v2477_v59, %v2474_v58  ;;  %v2490_v6 = vshrl.u32 %v11988_v61, 16  ;;  %v2493_v33 = vshll.u32 %v11988_v61, 16  ;;  %v1527_v11 = vrot.slane %v11985_v4, 1 }
  0x60   : > { %v2514_v47 = vor.u32 %v2513_v36, %v2510_v32  ;;  %v2537_v58 = vrot.slane %v2535_v50, 1  ;;  %v2540_v59 = vrot.slane %v2538_v51, 2  ;;  %11902 = vmatprep.subr.msk.bf16.mxu1 %vm854_vm0, %v12552_v20 }
  0x61   : > { %v2479_v13 = vsel %vm2381_vm3, %v2469_v26, %v2478_v5  ;;  %v2492_v44 = vrot.slane %v2490_v6, 1  ;;  %v2495_v14 = vrot.slane %v2493_v33, 2  ;;  %v1528_v21 = vsel %vm1505_vm4, %v1525_v10, %v1527_v11 }
  0x62   : > { %v1530_v41 = vsel %vm1505_vm4, %v1527_v11, %v1529_v30  ;;  %v2515_v54 = vsel %vm2381_vm3, %v2505_v28, %v2514_v47  ;;  %v2541_v4 = vor.u32 %v2540_v59, %v2537_v58  ;;  %v2556_v6 = vshll.u32 %v12002_v60, 16  ;;  %v12008_v30 = vld [vmem:[%s12316_s29 + $0xb0] sm:$0xff]   ;;  %v12014_v58 = vld [vmem:[%s12316_s29 + $0xc8] sm:$0xff]  }
  0x64   : > { %11439 = vmatmul.mubr.msk.bf16.gmra.mxu0 %vm757_vm2, %v2425_v16  ;;  %v2488_v16 = vsel %vm2381_vm3, %v2478_v5, %v2487_v7  ;;  %v2553_v5 = vshrl.u32 %v12002_v60, 16  ;;  %v12007_v60 = vld [vmem:[%s12316_s29 + $0xb0] sm:$0xff]  }
  0x65   : > { %11442 = vmatprep.mubr.msk.bf16.mxu0 %vm757_vm2, %v2434_v19  ;;  %v1526_v19 = vsel %vm1505_vm4, %v1523_v56, %v1525_v10  ;;  %v12000_v56 = vld [vmem:[%s12316_s29 + $0x90] sm:$0xff]  }
  0x66   : > { %11373 = vmatmul.mubr.msk.bf16.gmra.mxu1 %vm757_vm2, %v1514_v24  ;;  %v2496_v24 = vor.u32 %v2495_v14, %v2492_v44  ;;  %v2544_v2 = vshrl.u32 %v12000_v56, 16  ;;  %v2558_v44 = vrot.slane %v2556_v6, 2  ;;  %v12006_v14 = vld [vmem:[%s12316_s29 + $0xa8] sm:$0xff]  }
  0x67   : > { %11376 = vmatprep.mubr.msk.bf16.mxu1 %vm757_vm2, %v1516_v27  ;;  %v2517_v27 = vshrl.u32 %v11994_v15, 16  ;;  %v2574_v25 = vshll.u32 %v12006_v14, 16 }
  0x68   : > { %v2497_v35 = vsel %vm2381_vm3, %v2487_v7, %v2496_v24  ;;  %v2506_v38 = vsel %vm2381_vm3, %v2496_v24, %v2505_v28  ;;  %v1539_v7 = vrot.slane %v11997_v0, 1  ;;  %v2546_v10 = vrot.slane %v2544_v2, 1 }
  0x69   : > { %v2519_v37 = vrot.slane %v2517_v27, 1  ;;  %v2571_v24 = vshrl.u32 %v12006_v14, 16  ;;  %v1543_v28 = vrot.slane %v12001_v17, 1  ;;  %v12011_v14 = vld [vmem:[%s12316_s29 + $0xc0] sm:$0xff]  }
  0x6c   : > { %11443 = vmatmul.mubr.msk.bf16.gmra.mxu0 %vm757_vm2, %v2443_v39  ;;  %v2522_v39 = vrot.slane %v2520_v29, 2 }
  0x6d   : > { %11446 = vmatprep.mubr.msk.bf16.mxu0 %vm757_vm2, %v2452_v42  ;;  %v11991_v42 = vld [vmem:[%s12316_s29 + $0x70] sm:$0xff]  }
  0x6e   : > { %11377 = vmatmul.mubr.msk.bf16.gmra.mxu1 %vm757_vm2, %v1518_v46  ;;  %v2526_v46 = vshrl.u32 %v11996_v34, 16  ;;  %v2523_v49 = vor.u32 %v2522_v39, %v2519_v37  ;;  %v1533_v52 = vrot.slane %v11991_v42, 1  ;;  %v12003_v37 = vld [vmem:[%s12316_s29 + $0xa0] sm:$0xff]   ;;  %v2576_v39 = vrot.slane %v2574_v25, 2  ;;  %v12005_v42 = vld [vmem:[%s12316_s29 + $0xa8] sm:$0xff]  }
  0x6f   : > { %11380 = vmatprep.mubr.msk.bf16.mxu1 %vm757_vm2, %v1520_v48  ;;  %v2529_v48 = vshll.u32 %v11996_v34, 16  ;;  %v2567_v34 = vrot.slane %v2565_v22, 2  ;;  %v1545_v50 = vrot.slane %v12003_v37, 1  ;;  %v1547_v51 = vrot.slane %v12005_v42, 1  ;;  %v12020_v25 = vld [vmem:[%s12316_s29 + $0xe0] sm:$0xff]  }
  0x70   : > { %v2528_v26 = vrot.slane %v2526_v46, 1  ;;  %v1534_v61 = vsel %vm1505_vm4, %v1531_v31, %v1533_v52  ;;  %v1536_v63 = vsel %vm1505_vm4, %v1533_v52, %v1535_v53  ;;  %v12563_v31 = vld [vmem:[%s14428_s1 + $0x18] sm:$0xf]  ;;  %v2583_v46 = vshll.u32 %v12008_v30, 16  ;;  %v12012_v52 = vld [vmem:[%s12316_s29 + $0xc0] sm:$0xff]  }
  0x71   : > { %v2531_v55 = vrot.slane %v2529_v48, 2  ;;  %11903 = vmatprep.subr.msk.bf16.mxu0 %vm854_vm0, %v12563_v31  ;;  %v1546_v59 = vsel %vm1505_vm4, %v1543_v28, %v1545_v50  ;;  %v2637_v42 = vshll.u32 %v12020_v25, 16 }
  0x74   : > { %11447 = vmatmul.mubr.msk.bf16.gmra.mxu0 %vm757_vm2, %v2461_v57  ;;  %v2524_v57 = vsel %vm2381_vm3, %v2514_v47, %v2523_v49 }
  0x75   : > { %11450 = vmatprep.mubr.msk.bf16.mxu0 %vm757_vm2, %v2470_v62  ;;  %v11995_v62 = vld [vmem:[%s12316_s29 + $0x80] sm:$0xff]  }
  0x76   : > { %11381 = vmatmul.mubr.msk.bf16.gmra.mxu1 %vm757_vm2, %v1522_v1  ;;  %v2532_v1 = vor.u32 %v2531_v55, %v2528_v26  ;;  %v1537_v33 = vrot.slane %v11995_v62, 1  ;;  %v12009_v62 = vld [vmem:[%s12316_s29 + $0xb8] sm:$0xff]  }
  0x77   : > { %11384 = vmatprep.mubr.msk.bf16.mxu1 %vm757_vm2, %v1524_v3  ;;  %v2547_v3 = vshll.u32 %v12000_v56, 16  ;;  %v1551_v6 = vrot.slane %v12009_v62, 1 }
  0x78   : > { %v2533_v9 = vsel %vm2381_vm3, %v2523_v49, %v2532_v1  ;;  %v2542_v12 = vsel %vm2381_vm3, %v2532_v1, %v2541_v4  ;;  %v1538_v15 = vsel %vm1505_vm4, %v1535_v53, %v1537_v33  ;;  %v1540_v18 = vsel %vm1505_vm4, %v1537_v33, %v1539_v7 }
  0x79   : > { %v2549_v11 = vrot.slane %v2547_v3, 2  ;;  %v2601_v1 = vshll.u32 %v12012_v52, 16  ;;  %v2607_v3 = vshrl.u32 %v12014_v58, 16 }
  0x7c   : > { %11451 = vmatmul.mubr.msk.bf16.gmra.mxu0 %vm757_vm2, %v2479_v13  ;;  %v2555_v13 = vrot.slane %v2553_v5, 1  ;;  %v1549_v5 = vrot.slane %v12007_v60, 1 }
  0x7d   : > { %11454 = vmatprep.mubr.msk.bf16.mxu0 %vm757_vm2, %v2488_v16  ;;  %v11999_v16 = vld [vmem:[%s12316_s29 + $0x90] sm:$0xff]  }
  0x7e   : > { %11385 = vmatmul.mubr.msk.bf16.gmra.mxu1 %vm757_vm2, %v1526_v19  ;;  %v2562_v19 = vshrl.u32 %v12004_v8, 16  ;;  %v2559_v23 = vor.u32 %v2558_v44, %v2555_v13  ;;  %v1541_v27 = vrot.slane %v11999_v16, 1  ;;  %v2603_v8 = vrot.slane %v2601_v1, 2  ;;  %v12018_v13 = vld [vmem:[%s12316_s29 + $0xd8] sm:$0xff]   ;;  %v12013_v16 = vld [vmem:[%s12316_s29 + $0xc8] sm:$0xff]  }
  0x7f   : > { %11388 = vmatprep.mubr.msk.bf16.mxu1 %vm757_vm2, %v1528_v21  ;;  %v2550_v21 = vor.u32 %v2549_v11, %v2546_v10  ;;  %v2609_v11 = vrot.slane %v2607_v3, 1  ;;  %v1550_v44 = vsel %vm1505_vm4, %v1547_v51, %v1549_v5  ;;  %v2625_v22 = vshrl.u32 %v12018_v13, 16  ;;  %v12028_v1 = vld [vmem:[%s12316_s29 + $0x100] ss:$0 sps:$4 sm:$0x33]  }
  0x80   : > { %v2564_v29 = vrot.slane %v2562_v19, 1  ;;  %v1542_v40 = vsel %vm1505_vm4, %v1539_v7, %v1541_v27 }
  0x81   : > { %v2551_v32 = vsel %vm2381_vm3, %v2541_v4, %v2550_v21  ;;  %v2560_v36 = vsel %vm2381_vm3, %v2550_v21, %v2559_v23  ;;  %v2610_v4 = vshll.u32 %v12014_v58, 16  ;;  %v12019_v58 = vld [vmem:[%s12316_s29 + $0xe0] sm:$0xff]  }
  0x82   : > { %v2568_v45 = vor.u32 %v2567_v34, %v2564_v29 }
  0x84   : > { %11455 = vmatmul.mubr.msk.bf16.gmra.mxu0 %vm757_vm2, %v2497_v35  ;;  %v12010_v35 = vld [vmem:[%s12316_s29 + $0xb8] sm:$0xff]   ;;  %v2569_v53 = vsel %vm2381_vm3, %v2559_v23, %v2568_v45  ;;  %v2628_v23 = vshll.u32 %v12018_v13, 16  ;;  %v2670_v13 = vshrl.u32 %v12028_v1, 16 }
  0x85   : > { %11458 = vmatprep.mubr.msk.bf16.mxu0 %vm757_vm2, %v2506_v38  ;;  %v2573_v38 = vrot.slane %v2571_v24, 1  ;;  %v2589_v47 = vshrl.u32 %v12010_v35, 16  ;;  %v2592_v49 = vshll.u32 %v12010_v35, 16  ;;  %v1553_v24 = vrot.slane %v12011_v14, 1  ;;  %v12015_v35 = vld [vmem:[%s12316_s29 + $0xd0] sm:$0xff]  }
  0x86   : > { %11389 = vmatmul.mubr.msk.bf16.gmra.mxu1 %vm757_vm2, %v1530_v41  ;;  %v1544_v41 = vsel %vm1505_vm4, %v1541_v27, %v1543_v28  ;;  %v1555_v27 = vrot.slane %v12013_v16, 1  ;;  %v2630_v37 = vrot.slane %v2628_v23, 2  ;;  %v2672_v23 = vrot.slane %v2670_v13, 1 }
  0x87   : > { %11392 = vmatprep.mubr.msk.bf16.mxu1 %vm757_vm2, %v1532_v43  ;;  %v2580_v43 = vshrl.u32 %v12008_v30, 16  ;;  %v2577_v48 = vor.u32 %v2576_v39, %v2573_v38  ;;  %v2591_v55 = vrot.slane %v2589_v47, 1  ;;  %v1554_v38 = vsel %vm1505_vm4, %v1551_v6, %v1553_v24  ;;  %v12017_v39 = vld [vmem:[%s12316_s29 + $0xd8] sm:$0xff]  }
  0x88   : > { %v1557_v47 = vrot.slane %v12015_v35, 1  ;;  %v6970_v13 = vsel %vm854_vm0, %v12563_v31, 0 }
  0x89   : > { %v2582_v26 = vrot.slane %v2580_v43, 1  ;;  %v2578_v56 = vsel %vm2381_vm3, %v2568_v45, %v2577_v48 }
  0x8c   : > { %11459 = vmatmul.mubr.msk.bf16.gmra.mxu0 %vm757_vm2, %v2515_v54  ;;  %v2585_v54 = vrot.slane %v2583_v46, 2 }
  0x8d   : > { %11462 = vmatprep.mubr.msk.bf16.mxu0 %vm757_vm2, %v2524_v57  ;;  %v2594_v57 = vrot.slane %v2592_v49, 2  ;;  %v1559_v49 = vrot.slane %v12017_v39, 1 }
  0x8e   : > { %11393 = vmatmul.mubr.msk.bf16.gmra.mxu1 %vm757_vm2, %v1534_v61  ;;  %v1548_v61 = vsel %vm1505_vm4, %v1545_v50, %v1547_v51  ;;  %v2586_v0 = vor.u32 %v2585_v54, %v2582_v26  ;;  %v2639_v51 = vrot.slane %v2637_v42, 2 }
  0x8f   : > { %11396 = vmatprep.mubr.msk.bf16.mxu1 %vm757_vm2, %v1536_v63  ;;  %v2598_v63 = vshrl.u32 %v12012_v52, 16  ;;  %v2595_v2 = vor.u32 %v2594_v57, %v2591_v55  ;;  %v12024_v52 = vld [vmem:[%s12316_s29 + $0xf0] sm:$0xff]   ;;  %v1558_v57 = vsel %vm1505_vm4, %v1555_v27, %v1557_v47  ;;  %v1560_v60 = vsel %vm1505_vm4, %v1557_v47, %v1559_v49 }
  0x90   : > { %v2587_v7 = vsel %vm2381_vm3, %v2577_v48, %v2586_v0 }
  0x91   : > { %v2600_v33 = vrot.slane %v2598_v63, 1  ;;  %v2596_v10 = vsel %vm2381_vm3, %v2586_v0, %v2595_v2  ;;  %v2652_v63 = vshrl.u32 %v12024_v52, 16  ;;  %v2655_v0 = vshll.u32 %v12024_v52, 16 }
  0x93   : > { %v2604_v17 = vor.u32 %v2603_v8, %v2600_v33  ;;  %v12629_v33 = vld [vmem:[%s12316_s29 + $0xf8] sm:$0xff]  }
  0x94   : > { %11463 = vmatmul.mubr.msk.bf16.gmra.mxu0 %vm757_vm2, %v2533_v9  ;;  %v12016_v9 = vld [vmem:[%s12316_s29 + $0xd0] sm:$0xff]  }
  0x95   : > { %11466 = vmatprep.mubr.msk.bf16.mxu0 %vm757_vm2, %v2542_v12  ;;  %v2612_v12 = vrot.slane %v2610_v4, 2  ;;  %v2619_v19 = vshll.u32 %v12016_v9, 16  ;;  %v2605_v28 = vsel %vm2381_vm3, %v2595_v2, %v2604_v17  ;;  %v1561_v4 = vrot.slane %v12019_v58, 1 }
  0x96   : > { %11397 = vmatmul.mubr.msk.bf16.gmra.mxu1 %vm757_vm2, %v1538_v15  ;;  %v1552_v15 = vsel %vm1505_vm4, %v1549_v5, %v1551_v6  ;;  %v12023_v6 = vld [vmem:[%s12316_s29 + $0xf0] sm:$0xff]  }
  0x97   : > { %11400 = vmatprep.mubr.msk.bf16.mxu1 %vm757_vm2, %v1540_v18  ;;  %v2616_v18 = vshrl.u32 %v12016_v9, 16  ;;  %v2613_v21 = vor.u32 %v2612_v12, %v2609_v11  ;;  %v2621_v30 = vrot.slane %v2619_v19, 2  ;;  %v2654_v9 = vrot.slane %v2652_v63, 1  ;;  %v12039_v63 = vld [vmem:[%s12316_s29 + $0x30] sm:$0xff]  }
  0x98   : > { %v1562_v14 = vsel %vm1505_vm4, %v1559_v49, %v1561_v4  ;;  %v1565_v19 = vrot.slane %v12023_v6, 1 }
  0x99   : > { %v2618_v29 = vrot.slane %v2616_v18, 1  ;;  %v2614_v34 = vsel %vm2381_vm3, %v2604_v17, %v2613_v21  ;;  %v12030_v17 = vld [vmem:[%s12316_s29 + $0x10] sm:$0xff]  }
  0x9b   : > { %v2622_v43 = vor.u32 %v2621_v30, %v2618_v29  ;;  %v3500_v29 = vshll.u32 %v12030_v17, 16 }
  0x9c   : > { %11467 = vmatmul.mubr.msk.bf16.gmra.mxu0 %vm757_vm2, %v2551_v32  ;;  %v12022_v32 = vld [vmem:[%s12316_s29 + $0xe8] sm:$0xff]  }
  0x9d   : > { %11470 = vmatprep.mubr.msk.bf16.mxu0 %vm757_vm2, %v2560_v36  ;;  %v2627_v36 = vrot.slane %v2625_v22, 1  ;;  %v2643_v45 = vshrl.u32 %v12022_v32, 16  ;;  %v2646_v46 = vshll.u32 %v12022_v32, 16  ;;  %v12027_v32 = vld [vmem:[%s12316_s29 + $0x100] ss:$0 sps:$4 sm:$0x11]  }
  0x9e   : > { %11401 = vmatmul.mubr.msk.bf16.gmra.mxu1 %vm757_vm2, %v1542_v40  ;;  %v2634_v40 = vshrl.u32 %v12020_v25, 16 }
  0x9f   : > { %11404 = vmatprep.mubr.msk.bf16.mxu1 %vm757_vm2, %v1544_v41  ;;  %v1556_v41 = vsel %vm1505_vm4, %v1553_v24, %v1555_v27  ;;  %v2631_v48 = vor.u32 %v2630_v37, %v2627_v36  ;;  %v2645_v26 = vrot.slane %v2643_v45, 1  ;;  %v2648_v54 = vrot.slane %v2646_v46, 2  ;;  %v12032_v36 = vld [vmem:[%s12316_s29 + $0x10] sm:$0xff]   ;;  %v12033_v37 = vld [vmem:[%s12316_s29 + $0x18] sm:$0xff]   ;;  %v12035_v45 = vld [vmem:[%s12316_s29 + $0x20] sm:$0xff]  }
  0xa0   : > { %v2636_v50 = vrot.slane %v2634_v40, 1  ;;  %v3506_v49 = vshrl.u32 %v12033_v37, 16 }
  0xa1   : > { %v2632_v55 = vsel %vm2381_vm3, %v2622_v43, %v2631_v48  ;;  %v2649_v62 = vor.u32 %v2648_v54, %v2645_v26  ;;  %v3515_v26 = vshrl.u32 %v12035_v45, 16  ;;  %v3518_v54 = vshll.u32 %v12035_v45, 16  ;;  %v12045_v45 = vld [vmem:[%s12316_s29 + $0x48] sm:$0xff]  }
  0xa4   : > { %11471 = vmatmul.mubr.msk.bf16.gmra.mxu0 %vm757_vm2, %v2569_v53  ;;  %v2623_v53 = vsel %vm2381_vm3, %v2613_v21, %v2622_v43  ;;  %v1567_v21 = vrot.slane %v12629_v33, 1  ;;  %v3502_v43 = vrot.slane %v3500_v29, 2 }
  0xa5   : > { %11474 = vmatprep.mubr.msk.bf16.mxu0 %vm757_vm2, %v2578_v56  ;;  %v12026_v56 = vld [vmem:[%s12316_s29 + $0xf8] sm:$0xff]  }
  0xa6   : > { %11405 = vmatmul.mubr.msk.bf16.gmra.mxu1 %vm757_vm2, %v1546_v59  ;;  %v12021_v59 = vld [vmem:[%s12316_s29 + $0xe8] sm:$0xff]   ;;  %v2661_v2 = vshrl.u32 %v12026_v56, 16  ;;  %v2664_v3 = vshll.u32 %v12026_v56, 16  ;;  %v1568_v40 = vsel %vm1505_vm4, %v1565_v19, %v1567_v21  ;;  %v12034_v56 = vld [vmem:[%s12316_s29 + $0x18] sm:$0xff]  }
  0xa7   : > { %11408 = vmatprep.mubr.msk.bf16.mxu1 %vm757_vm2, %v1548_v61  ;;  %v2640_v61 = vor.u32 %v2639_v51, %v2636_v50  ;;  %v1563_v5 = vrot.slane %v12021_v59, 1  ;;  %v1569_v50 = vrot.slane %v12027_v32, 1  ;;  %v3509_v51 = vshll.u32 %v12033_v37, 16 }
  0xa8   : > { %v2663_v11 = vrot.slane %v2661_v2, 1  ;;  %v2666_v12 = vrot.slane %v2664_v3, 2  ;;  %v3508_v59 = vrot.slane %v3506_v49, 1  ;;  %v3520_v2 = vrot.slane %v3518_v54, 2  ;;  %v12047_v49 = vld [vmem:[%s12316_s29 + $0x50] sm:$0xff]  }
  0xa9   : > { %v2650_v8 = vsel %vm2381_vm3, %v2640_v61, %v2649_v62  ;;  %v1564_v16 = vsel %vm1505_vm4, %v1561_v4, %v1563_v5  ;;  %v4598_v3 = vrot.slane %v12034_v56, 2 }
  0xaa   : > { %v2667_v22 = vor.u32 %v2666_v12, %v2663_v11  ;;  %v5864_v11 = vsel %vm854_vm0, %v12552_v20, 0  ;;  %v12038_v12 = vld [vmem:[%s12316_s29 + $0x28] sm:$0xff]  }
  0xab   : > { %v4602_v31 = vrot.slane %v12038_v12, 2  ;;  %v12049_v12 = vld [vmem:[%s12316_s29 + $0x58] sm:$0xff]  }
  0xac   : > { %11475 = vmatmul.mubr.msk.bf16.gmra.mxu0 %vm757_vm2, %v2587_v7  ;;  %v2641_v7 = vsel %vm2381_vm3, %v2631_v48, %v2640_v61  ;;  %v4596_v48 = vrot.slane %v12032_v36, 2  ;;  %v1570_v61 = vsel %vm1505_vm4, %v1567_v21, %v1569_v50 }
  0xad   : > { %11478 = vmatprep.mubr.msk.bf16.mxu0 %vm757_vm2, %v2596_v10  ;;  %v2657_v10 = vrot.slane %v2655_v0, 2 }
  0xae   : > { %11409 = vmatmul.mubr.msk.bf16.gmra.mxu1 %vm757_vm2, %v1550_v44  ;;  %v2673_v44 = vshll.u32 %v12028_v1, 16  ;;  %v3517_v1 = vrot.slane %v3515_v26, 1 }
  0xaf   : > { %11412 = vmatprep.mubr.msk.bf16.mxu1 %vm757_vm2, %v1552_v15  ;;  %v12029_v15 = vld [vmem:[%s12316_s29 + $0x8] sm:$0xfe]   ;;  %v2658_v18 = vor.u32 %v2657_v10, %v2654_v9  ;;  %v3536_v9 = vshll.u32 %v12039_v63, 16  ;;  %v4599_v10 = vsel %vm4594_vm5, %v4596_v48, %v4598_v3 }
  0xb0   : > { %v2675_v24 = vrot.slane %v2673_v44, 2  ;;  %v3489_v25 = vshrl.u32 %v12029_v15, 16  ;;  %v3492_v27 = vshll.u32 %v12029_v15, 16 }
  0xb1   : > { %v2659_v30 = vsel %vm2381_vm3, %v2649_v62, %v2658_v18  ;;  %v2668_v35 = vsel %vm2381_vm3, %v2658_v18, %v2667_v22  ;;  %v3511_v62 = vrot.slane %v3509_v51, 2  ;;  %v3538_v20 = vrot.slane %v3536_v9, 2 }
  0xb2   : > { %v3491_v39 = vrot.slane %v3489_v25, 1  ;;  %v2676_v46 = vor.u32 %v2675_v24, %v2672_v23  ;;  %v12043_v23 = vld [vmem:[%s12316_s29 + $0x40] sm:$0xff]  }
  0xb3   : > { %v3512_v6 = vor.u32 %v3511_v62, %v3508_v59  ;;  %v3551_v36 = vshrl.u32 %v12043_v23, 16  ;;  %v3554_v37 = vshll.u32 %v12043_v23, 16 }
  0xb4   : > { %11479 = vmatmul.mubr.msk.bf16.gmra.mxu0 %vm757_vm2, %v2605_v28  ;;  %v3497_v28 = vshrl.u32 %v12030_v17, 16 }
  0xb5   : > { %11482 = vmatprep.mubr.msk.bf16.mxu0 %vm757_vm2, %v2614_v34  ;;  %v12031_v34 = vld [vmem:[%s12316_s29 + $0x8] sm:$0xfc]   ;;  %v3556_v26 = vrot.slane %v3554_v37, 2 }
  0xb6   : > { %11413 = vmatmul.mubr.msk.bf16.gmra.mxu1 %vm757_vm2, %v1554_v38  ;;  %v1566_v38 = vsel %vm1505_vm4, %v1563_v5, %v1565_v19  ;;  %v3499_v42 = vrot.slane %v3497_v28, 1  ;;  %v4595_v47 = vrot.slane %v12031_v34, 2  ;;  %v12041_v19 = vld [vmem:[%s12316_s29 + $0x38] sm:$0xff]  }
  0xb7   : > { %11416 = vmatprep.mubr.msk.bf16.mxu1 %vm757_vm2, %v1556_v41  ;;  %v3494_v41 = vrot.slane %v3492_v27, 2  ;;  %v3542_v29 = vshrl.u32 %v12041_v19, 16 }
  0xb8   : > { %v4597_v58 = vsel %vm4594_vm5, %v4595_v47, %v4596_v48 }
  0xb9   : > { %v3495_v52 = vor.u32 %v3494_v41, %v3491_v39  ;;  %v12042_v39 = vld [vmem:[%s12316_s29 + $0x38] sm:$0xff]   ;;  %v3544_v47 = vrot.slane %v3542_v29, 1 }
  0xba   : > { %v4606_v54 = vrot.slane %v12042_v39, 2 }
  0xbc   : > { %11483 = vmatmul.mubr.msk.bf16.gmra.mxu0 %vm757_vm2, %v2623_v53  ;;  %v3503_v53 = vor.u32 %v3502_v43, %v3499_v42  ;;  %v12701_v43 = vld [vmem:[%s12316_s29 + $0x40] sm:$0xff]  }
  0xbd   : > { %11486 = vmatprep.mubr.msk.bf16.mxu0 %vm757_vm2, %v2632_v55  ;;  %v2677_v55 = vsel %vm2381_vm3, %v2667_v22, %v2676_v46 }
  0xbe   : > { %11417 = vmatmul.mubr.msk.bf16.gmra.mxu1 %vm757_vm2, %v1558_v57  ;;  %v12036_v57 = vld [vmem:[%s12316_s29 + $0x20] sm:$0xff]   ;;  %v3504_v0 = vsel %vm2381_vm3, %v3495_v52, %v3503_v53  ;;  %v3513_v15 = vsel %vm2381_vm3, %v3503_v53, %v3512_v6  ;;  %v3553_v53 = vrot.slane %v3551_v36, 1 }
  0xbf   : > { %11420 = vmatprep.mubr.msk.bf16.mxu1 %vm757_vm2, %v1560_v60  ;;  %v12037_v60 = vld [vmem:[%s12316_s29 + $0x28] sm:$0xff]   ;;  %v4600_v4 = vrot.slane %v12036_v57, 2  ;;  %v4608_v57 = vrot.slane %v12701_v43, 2 }
  0xc0   : > { %v3524_v5 = vshrl.u32 %v12037_v60, 16  ;;  %v3527_v33 = vshll.u32 %v12037_v60, 16  ;;  %v3563_v60 = vshll.u32 %v12045_v45, 16 }
  0xc1   : > { %v4601_v44 = vsel %vm4594_vm5, %v4598_v3, %v4600_v4  ;;  %v12046_v3 = vld [vmem:[%s12316_s29 + $0x48] sm:$0xff]  }
  0xc2   : > { %v3529_v17 = vrot.slane %v3527_v33, 2  ;;  %v12732_v33 = vld [vmem:[%s12316_s29 + $0x50] sm:$0xff]  }
  0xc4   : > { %11487 = vmatmul.mubr.msk.bf16.gmra.mxu0 %vm757_vm2, %v2641_v7  ;;  %v3533_v7 = vshrl.u32 %v12039_v63, 16 }
  0xc5   : > { %11490 = vmatprep.mubr.msk.bf16.mxu0 %vm757_vm2, %v2650_v8  ;;  %v3521_v8 = vor.u32 %v3520_v2, %v3517_v1  ;;  %v3572_v1 = vshll.u32 %v12047_v49, 16 }
  0xc6   : > { %11421 = vmatmul.mubr.msk.bf16.gmra.mxu1 %vm757_vm2, %v1562_v14  ;;  %v12040_v14 = vld [vmem:[%s12316_s29 + $0x30] sm:$0xff]   ;;  %v3535_v18 = vrot.slane %v3533_v7, 1  ;;  %v10548_v7 = vld [vmem:[%s14428_s1 + $0x1c] sm:$0xf] }
  0xc7   : > { %11424 = vmatprep.mubr.msk.bf16.mxu1 %vm757_vm2, %v1564_v16  ;;  %v3526_v16 = vrot.slane %v3524_v5, 1  ;;  %v3522_v22 = vsel %vm2381_vm3, %v3512_v6, %v3521_v8  ;;  %v4604_v27 = vrot.slane %v12040_v14, 2  ;;  %v4609_v6 = vsel %vm4594_vm5, %v4606_v54, %v4608_v57 }
  0xc9   : > { %v3530_v28 = vor.u32 %v3529_v17, %v3526_v16  ;;  %v4605_v42 = vsel %vm4594_vm5, %v4602_v31, %v4604_v27  ;;  %v4607_v2 = vsel %vm4594_vm5, %v4604_v27, %v4606_v54  ;;  %v12051_v16 = vld [vmem:[%s12316_s29 + $0x60] sm:$0xff]   ;;  %v4610_v17 = vrot.slane %v12046_v3, 2 }
  0xca   : > { %v3581_v27 = vshll.u32 %v12049_v12, 16  ;;  %v3590_v36 = vshll.u32 %v12051_v16, 16 }
  0xcb   : > { %v3531_v46 = vsel %vm2381_vm3, %v3521_v8, %v3530_v28  ;;  %v4611_v37 = vsel %vm4594_vm5, %v4608_v57, %v4610_v17 }
  0xcc   : > { %11491 = vmatmul.mubr.msk.bf16.gmra.mxu0 %vm757_vm2, %v2659_v30  ;;  %v3545_v30 = vshll.u32 %v12041_v19, 16 }
  0xcd   : > { %11494 = vmatprep.mubr.msk.bf16.mxu0 %vm757_vm2, %v2668_v35  ;;  %v3539_v35 = vor.u32 %v3538_v20, %v3535_v18  ;;  %v10614_v18 = vld [vmem:[%s14428_s1 + $0x20] sm:$0xf]  ;;  %v4612_v20 = vrot.slane %v12732_v33, 2 }
  0xce   : > { %11425 = vmatmul.mubr.msk.bf16.gmra.mxu1 %vm757_vm2, %v1566_v38  ;;  %v4603_v38 = vsel %vm4594_vm5, %v4600_v4, %v4602_v31  ;;  %v3547_v48 = vrot.slane %v3545_v30, 2  ;;  %v3578_v31 = vshrl.u32 %v12049_v12, 16 }
  0xcf   : > { %11428 = vmatprep.mubr.msk.bf16.mxu1 %vm757_vm2, %v1568_v40  ;;  %v3540_v52 = vsel %vm2381_vm3, %v3530_v28, %v3539_v35  ;;  %v4613_v43 = vsel %vm4594_vm5, %v4610_v17, %v4612_v20  ;;  %v12057_v17 = vld [vmem:[%s12316_s29 + $0x78] sm:$0xff]  }
  0xd0   : > { %v3548_v59 = vor.u32 %v3547_v48, %v3544_v47  ;;  %v3580_v47 = vrot.slane %v3578_v31, 1  ;;  %v3583_v48 = vrot.slane %v3581_v27, 2  ;;  %v12059_v27 = vld [vmem:[%s12316_s29 + $0x80] sm:$0xff]  }
  0xd2   : > { %v3549_v8 = vsel %vm2381_vm3, %v3539_v35, %v3548_v59  ;;  %v3587_v35 = vshrl.u32 %v12051_v16, 16  ;;  %v12056_v16 = vld [vmem:[%s12316_s29 + $0x70] sm:$0xff]  }
  0xd4   : > { %11495 = vmatmul.mubr.msk.bf16.gmra.mxu0 %vm757_vm2, %v2677_v55  ;;  %v3589_v57 = vrot.slane %v3587_v35, 1 }
  0xd5   : > { %11566 = vmatprep.mubr.msk.bf16.mxu0 %vm757_vm2, %v4597_v58  ;;  %v3560_v58 = vshrl.u32 %v12045_v45, 16  ;;  %v12052_v45 = vld [vmem:[%s12316_s29 + $0x60] sm:$0xff]  }
  0xd6   : > { %11429 = vmatmul.mubr.msk.bf16.gmra.mxu1 %vm757_vm2, %v1570_v61  ;;  %v3569_v61 = vshrl.u32 %v12047_v49, 16  ;;  %v12053_v49 = vld [vmem:[%s12316_s29 + $0x68] sm:$0xff]  }
  0xd7   : > { %11500 = vmatprep.mubr.msk.bf16.mxu1 %vm757_vm2, %v3504_v0  ;;  %v3557_v0 = vor.u32 %v3556_v26, %v3553_v53  ;;  %v3562_v9 = vrot.slane %v3560_v58, 1  ;;  %v3592_v58 = vrot.slane %v3590_v36, 2  ;;  %v3599_v3 = vshll.u32 %v12053_v49, 16 }
  0xd9   : > { %v3558_v14 = vsel %vm2381_vm3, %v3548_v59, %v3557_v0  ;;  %v3601_v31 = vrot.slane %v3599_v3, 2 }
  0xdc   : > { %v12677_v21 = vpop.f32.mrf.mxu0  ;;  %11567 = vmatmul.mubr.msk.bf16.vlgmr.msra.gmra.mxu0 %vm757_vm2, %v4599_v10  ;;  %v3565_v10 = vrot.slane %v3563_v60, 2 }
  0xdd   : > { %11697 = vmatpush3.bf16.msra.mxu0 %v6970_v13  ;;  %11570 = vmatprep.mubr.msk.bf16.mxu0 %vm757_vm2, %v4601_v44  ;;  %v12683_v24 = vpop.f32.mrf.mxu1 }
  0xde   : > { %11501 = vmatmul.mubr.msk.bf16.vlgmr.msra.gmra.mxu1 %vm757_vm2, %v3513_v15  ;;  %v12686_v25 = vpop.f32.mrf.mxu0  ;;  %v3574_v15 = vrot.slane %v3572_v1, 2  ;;  %11905 = vmatprep.subr.msk.bf16.mxu0 %vm854_vm0, %v10614_v18  ;;  %v3566_v23 = vor.u32 %v3565_v10, %v3562_v9  ;;  %v3584_v1 = vor.u32 %v3583_v48, %v3580_v47  ;;  %v3614_v47 = vshrl.u32 %v12057_v17, 16 }
  0xdf   : > { %11631 = vmatpush3.bf16.msra.mxu1 %v5864_v11  ;;  %11504 = vmatprep.mubr.msk.bf16.mxu1 %vm757_vm2, %v3522_v22  ;;  %v12689_v32 = vpop.f32.mrf.mxu1  ;;  %v3571_v11 = vrot.slane %v3569_v61, 1 }
  0xe0   : > { %v12691_v34 = vpop.f32.mrf.mxu0  ;;  %11904 = vmatprep.subr.msk.bf16.mxu1 %vm854_vm0, %v10548_v7  ;;  %v3593_v7 = vor.u32 %v3592_v58, %v3589_v57 }
  0xe1   : > { %v12695_v40 = vpop.f32.mrf.mxu1  ;;  %v3575_v30 = vor.u32 %v3574_v15, %v3571_v11  ;;  %v12054_v11 = vld [vmem:[%s12316_s29 + $0x68] sm:$0xff]  }
  0xe2   : > { %v12697_v41 = vpop.f32.mrf.mxu0 }
  0xe3   : > { %v12706_v50 = vpop.f32.mrf.mxu1  ;;  %v3576_v54 = vsel %vm2381_vm3, %v3566_v23, %v3575_v30  ;;  %v3585_v18 = vsel %vm2381_vm3, %v3575_v30, %v3584_v1 }
  0xe4   : > { %14433 = vst [vmem:[#allocation3_spill] sm:$0xff] %v12706_v50  ;;  %v12708_v51 = vpop.f32.mrf.mxu0  ;;  %11571 = vmatmul.mubr.msk.bf16.gmra.mxu0 %vm757_vm2, %v4603_v38  ;;  %v12050_v38 = vld [vmem:[%s12316_s29 + $0x58] sm:$0xff]  }
  0xe5   : > { %11574 = vmatprep.mubr.msk.bf16.mxu0 %vm757_vm2, %v4605_v42  ;;  %v12713_v55 = vpop.f32.mrf.mxu1  ;;  %v4614_v59 = vrot.slane %v12050_v38, 2 }
  0xe6   : > { %14434 = vst [vmem:[#allocation4_spill] sm:$0xff] %v12713_v55  ;;  %11505 = vmatmul.mubr.msk.bf16.gmra.mxu1 %vm757_vm2, %v3531_v46  ;;  %v12716_v56 = vpop.f32.mrf.mxu0  ;;  %v3567_v46 = vsel %vm2381_vm3, %v3557_v0, %v3566_v23  ;;  %v4616_v0 = vrot.slane %v12052_v45, 2 }
  0xe7   : > { %11508 = vmatprep.mubr.msk.bf16.mxu1 %vm757_vm2, %v3540_v52  ;;  %v12720_v62 = vpop.f32.mrf.mxu1  ;;  %v12055_v52 = vld [vmem:[%s12316_s29 + $0x70] sm:$0xff]   ;;  %v4615_v10 = vsel %vm4594_vm5, %v4612_v20, %v4614_v59  ;;  %v3594_v20 = vsel %vm2381_vm3, %v3584_v1, %v3593_v7 }
  0xe8   : > { %14435 = vst [vmem:[#allocation5_spill] sm:$0xff] %v12720_v62  ;;  %v12722_v63 = vpop.f32.mrf.mxu0  ;;  %v3608_v9 = vshll.u32 %v12055_v52, 16  ;;  %v4617_v15 = vsel %vm4594_vm5, %v4614_v59, %v4616_v0  ;;  %v3626_v59 = vshll.u32 %v12059_v27, 16 }
  0xe9   : > { %v12726_v4 = vpop.f32.mrf.mxu1 }
  0xea   : > { %14436 = vst [vmem:[#allocation6_spill] sm:$0xff] %v12726_v4  ;;  %v12728_v5 = vpop.f32.mrf.mxu0  ;;  %v3610_v38 = vrot.slane %v3608_v9, 2  ;;  %v12077_v4 = vld [vmem:[%s12316_s29 + $0xc8] sm:$0xff]  }
  0xeb   : > { %v12740_v13 = vpop.f32.mrf.mxu1  ;;  %v3704_v50 = vshrl.u32 %v12077_v4, 16 }
  0xec   : > { %14437 = vst [vmem:[#allocation7_spill] sm:$0xff] %v12740_v13  ;;  %v12742_v44 = vpop.f32.mrf.mxu0  ;;  %11575 = vmatmul.mubr.msk.bf16.gmra.mxu0 %vm757_vm2, %v4607_v2  ;;  %v3596_v2 = vshrl.u32 %v12053_v49, 16  ;;  %v3617_v49 = vshll.u32 %v12057_v17, 16 }
  0xed   : > { %11578 = vmatprep.mubr.msk.bf16.mxu0 %vm757_vm2, %v4609_v6  ;;  %v12751_v19 = vpop.f32.mrf.mxu1 }
  0xee   : > { %14438 = vst [vmem:[#allocation8_spill] sm:$0xff] %v12751_v19  ;;  %11509 = vmatmul.mubr.msk.bf16.gmra.mxu1 %vm757_vm2, %v3549_v8  ;;  %v12754_v22 = vpop.f32.mrf.mxu0  ;;  %v3605_v8 = vshrl.u32 %v12055_v52, 16  ;;  %v3598_v23 = vrot.slane %v3596_v2, 1  ;;  %v3623_v52 = vshrl.u32 %v12059_v27, 16  ;;  %v12058_v2 = vld [vmem:[%s12316_s29 + $0x78] sm:$0xff]   ;;  %v3619_v17 = vrot.slane %v3617_v49, 2 }
  0xef   : > { %11512 = vmatprep.mubr.msk.bf16.mxu1 %vm757_vm2, %v3558_v14  ;;  %v12759_v28 = vpop.f32.mrf.mxu1  ;;  %v3628_v27 = vrot.slane %v3626_v59, 2 }
  0xf0   : > { %14439 = vst [vmem:[#allocation9_spill] sm:$0xff] %v12759_v28  ;;  %v12761_v29 = vpop.f32.mrf.mxu0  ;;  %v3602_v48 = vor.u32 %v3601_v31, %v3598_v23  ;;  %v12073_v28 = vld [vmem:[%s12316_s29 + $0xb8] sm:$0xff]  }
  0xf1   : > { %v12765_v39 = vpop.f32.mrf.mxu1 }
  0xf2   : > { %14440 = vst [vmem:[#allocation10_spill] sm:$0xff] %v12765_v39  ;;  %v12767_v42 = vpop.f32.mrf.mxu0  ;;  %v12909_v39 = vld [vmem:[%s12316_s29 + $0xb0] sm:$0xff]  }
  0xf3   : > { %v12774_v53 = vpop.f32.mrf.mxu1  ;;  %v4636_v19 = vrot.slane %v12909_v39, 2 }
  0xf4   : > { %14441 = vst [vmem:[#allocation11_spill] sm:$0xff] %v12774_v53  ;;  %v12776_v26 = vpop.f32.mrf.mxu0  ;;  %11579 = vmatmul.mubr.msk.bf16.gmra.mxu0 %vm757_vm2, %v4611_v37  ;;  %v3607_v37 = vrot.slane %v3605_v8, 1 }
  0xf5   : > { %11582 = vmatprep.mubr.msk.bf16.mxu0 %vm757_vm2, %v4613_v43  ;;  %v12781_v60 = vpop.f32.mrf.mxu1  ;;  %v4618_v43 = vrot.slane %v12054_v11, 2  ;;  %v12061_v11 = vld [vmem:[%s12316_s29 + $0x88] sm:$0xff]  }
  0xf6   : > { %14442 = vst [vmem:[#allocation12_spill] sm:$0xff] %v12781_v60  ;;  %11513 = vmatmul.mubr.msk.bf16.gmra.mxu1 %vm757_vm2, %v3567_v46  ;;  %v12784_v61 = vpop.f32.mrf.mxu0  ;;  %v4620_v46 = vrot.slane %v12056_v16, 2  ;;  %v3611_v58 = vor.u32 %v3610_v38, %v3607_v37  ;;  %v3616_v16 = vrot.slane %v3614_v47, 1  ;;  %v4622_v37 = vrot.slane %v12058_v2, 2  ;;  %v12071_v60 = vld [vmem:[%s12316_s29 + $0xb0] sm:$0xff]  }
  0xf7   : > { %11516 = vmatprep.mubr.msk.bf16.mxu1 %vm757_vm2, %v3576_v54  ;;  %v12787_v6 = vpop.f32.mrf.mxu1  ;;  %v4619_v1 = vsel %vm4594_vm5, %v4616_v0, %v4618_v43  ;;  %v3632_v47 = vshrl.u32 %v12061_v11, 16 }
  0xf8   : > { %14443 = vst [vmem:[#allocation13_spill] sm:$0xff] %v12787_v6  ;;  %v12789_v33 = vpop.f32.mrf.mxu0  ;;  %v4621_v9 = vsel %vm4594_vm5, %v4618_v43, %v4620_v46  ;;  %v3612_v0 = vsel %vm2381_vm3, %v3602_v48, %v3611_v58  ;;  %v3620_v49 = vor.u32 %v3619_v17, %v3616_v16  ;;  %v12064_v17 = vld [vmem:[%s12316_s29 + $0x90] sm:$0xff]  }
  0xf9   : > { %v12793_v12 = vpop.f32.mrf.mxu1  ;;  %v3634_v16 = vrot.slane %v3632_v47, 1 }
  0xfa   : > { %14444 = vst [vmem:[#allocation14_spill] sm:$0xff] %v12793_v12  ;;  %v12795_v14 = vpop.f32.mrf.mxu0 }
  0xfb   : > { %v12802_v35 = vpop.f32.mrf.mxu1 }
  0xfc   : > { %14445 = vst [vmem:[#allocation15_spill] sm:$0xff] %v12802_v35  ;;  %v12804_v36 = vpop.f32.mrf.mxu0  ;;  %11583 = vmatmul.mubr.msk.bf16.gmra.mxu0 %vm757_vm2, %v4615_v10  ;;  %v12060_v10 = vld [vmem:[%s12316_s29 + $0x80] sm:$0xff]  }
  0xfd   : > { %11586 = vmatprep.mubr.msk.bf16.mxu0 %vm757_vm2, %v4617_v15  ;;  %v12809_v45 = vpop.f32.mrf.mxu1  ;;  %v3603_v15 = vsel %vm2381_vm3, %v3593_v7, %v3602_v48  ;;  %v4624_v43 = vrot.slane %v12060_v10, 2  ;;  %v3635_v48 = vshll.u32 %v12061_v11, 16  ;;  %v3621_v11 = vsel %vm2381_vm3, %v3611_v58, %v3620_v49 }
  0xfe   : > { %14446 = vst [vmem:[#allocation16_spill] sm:$0xff] %v12809_v45  ;;  %11517 = vmatmul.mubr.msk.bf16.gmra.mxu1 %vm757_vm2, %v3585_v18  ;;  %v12812_v30 = vpop.f32.mrf.mxu0  ;;  %v3625_v18 = vrot.slane %v3623_v52, 1 }
  0xff   : > { %11520 = vmatprep.mubr.msk.bf16.mxu1 %vm757_vm2, %v3594_v20  ;;  %v12815_v54 = vpop.f32.mrf.mxu1  ;;  %v12063_v20 = vld [vmem:[%s12316_s29 + $0x90] sm:$0xff]  }
 0x100   : > { %14447 = vst [vmem:[#allocation17_spill] sm:$0xff] %v12815_v54  ;;  %v12817_v57 = vpop.f32.mrf.mxu0  ;;  %v3641_v2 = vshrl.u32 %v12063_v20, 16 }
 0x101   : > { %v12821_v3 = vpop.f32.mrf.mxu1 }
 0x102   : > { %14448 = vst [vmem:[#allocation18_spill] sm:$0xff] %v12821_v3  ;;  %v12823_v8 = vpop.f32.mrf.mxu0  ;;  %v12065_v3 = vld [vmem:[%s12316_s29 + $0x98] sm:$0xff]  }
 0x103   : > { %v12829_v23 = vpop.f32.mrf.mxu1 }
 0x104   : > { %14449 = vst [vmem:[#allocation19_spill] sm:$0xff] %v12829_v23  ;;  %v12831_v31 = vpop.f32.mrf.mxu0  ;;  %11587 = vmatmul.mubr.msk.bf16.gmra.mxu0 %vm757_vm2, %v4619_v1  ;;  %v3629_v1 = vor.u32 %v3628_v27, %v3625_v18  ;;  %v3643_v27 = vrot.slane %v3641_v2, 1  ;;  %v12066_v2 = vld [vmem:[%s12316_s29 + $0x98] sm:$0xff]  }
 0x105   : > { %11590 = vmatprep.mubr.msk.bf16.mxu0 %vm757_vm2, %v4621_v9  ;;  %v12837_v38 = vpop.f32.mrf.mxu1  ;;  %v3644_v9 = vshll.u32 %v12063_v20, 16 }
 0x106   : > { %14450 = vst [vmem:[#allocation20_spill] sm:$0xff] %v12837_v38  ;;  %11521 = vmatmul.mubr.msk.bf16.gmra.mxu1 %vm757_vm2, %v3603_v15  ;;  %v12840_v7 = vpop.f32.mrf.mxu0  ;;  %v4623_v38 = vsel %vm4594_vm5, %v4620_v46, %v4622_v37  ;;  %v12062_v15 = vld [vmem:[%s12316_s29 + $0x88] sm:$0xff]   ;;  %v3630_v46 = vsel %vm2381_vm3, %v3620_v49, %v3629_v1  ;;  %v3653_v49 = vshll.u32 %v12065_v3, 16 }
 0x107   : > { %11524 = vmatprep.mubr.msk.bf16.mxu1 %vm757_vm2, %v3612_v0  ;;  %v12843_v52 = vpop.f32.mrf.mxu1  ;;  %v4625_v0 = vsel %vm4594_vm5, %v4622_v37, %v4624_v43  ;;  %v3646_v20 = vrot.slane %v3644_v9, 2  ;;  %v4626_v37 = vrot.slane %v12062_v15, 2 }
 0x108   : > { %14451 = vst [vmem:[#allocation21_spill] sm:$0xff] %v12843_v52  ;;  %v12845_v59 = vpop.f32.mrf.mxu0  ;;  %v3637_v52 = vrot.slane %v3635_v48, 2  ;;  %v4628_v48 = vrot.slane %v12064_v17, 2 }
 0x109   : > { %v12849_v23 = vpop.f32.mrf.mxu1  ;;  %v3647_v15 = vor.u32 %v3646_v20, %v3643_v27 }
 0x10a   : > { %14452 = vst [vmem:[#allocation22_spill] sm:$0xff] %v12849_v23  ;;  %v12851_v10 = vpop.f32.mrf.mxu0  ;;  %v12067_v23 = vld [vmem:[%s12316_s29 + $0xa0] sm:$0xff]  }
 0x10b   : > { %v12857_v54 = vpop.f32.mrf.mxu1  ;;  %v3662_v35 = vshll.u32 %v12067_v23, 16 }
 0x10c   : > { %14453 = vst [vmem:[#allocation23_spill] sm:$0xff] %v12857_v54  ;;  %v12859_v18 = vpop.f32.mrf.mxu0  ;;  %11591 = vmatmul.mubr.msk.bf16.gmra.mxu0 %vm757_vm2, %v4623_v38  ;;  %v3638_v38 = vor.u32 %v3637_v52, %v3634_v16  ;;  %v3650_v54 = vshrl.u32 %v12065_v3, 16  ;;  %v4629_v52 = vsel %vm4594_vm5, %v4626_v37, %v4628_v48  ;;  %v12884_v16 = vld [vmem:[%s12316_s29 + $0xa0] sm:$0xff]  }
 0x10d   : > { %11594 = vmatprep.mubr.msk.bf16.mxu0 %vm757_vm2, %v4625_v0  ;;  %v12865_v47 = vpop.f32.mrf.mxu1  ;;  %v3659_v0 = vshrl.u32 %v12067_v23, 16 }
 0x10e   : > { %14454 = vst [vmem:[#allocation24_spill] sm:$0xff] %v12865_v47  ;;  %11525 = vmatmul.mubr.msk.bf16.gmra.mxu1 %vm757_vm2, %v3621_v11  ;;  %v12868_v58 = vpop.f32.mrf.mxu0  ;;  %v4627_v47 = vsel %vm4594_vm5, %v4624_v43, %v4626_v37  ;;  %v12069_v11 = vld [vmem:[%s12316_s29 + $0xa8] sm:$0xff]   ;;  %v3639_v3 = vsel %vm2381_vm3, %v3629_v1, %v3638_v38  ;;  %v3648_v23 = vsel %vm2381_vm3, %v3638_v38, %v3647_v15  ;;  %v4630_v43 = vrot.slane %v12066_v2, 2 }
 0x10f   : > { %11528 = vmatprep.mubr.msk.bf16.mxu1 %vm757_vm2, %v3630_v46  ;;  %v12872_v9 = vpop.f32.mrf.mxu1  ;;  %v3652_v46 = vrot.slane %v3650_v54, 1  ;;  %v3661_v20 = vrot.slane %v3659_v0, 1  ;;  %v3668_v37 = vshrl.u32 %v12069_v11, 16  ;;  %v3671_v53 = vshll.u32 %v12069_v11, 16  ;;  %v12070_v0 = vld [vmem:[%s12316_s29 + $0xa8] sm:$0xff]  }
 0x110   : > { %14455 = vst [vmem:[#allocation25_spill] sm:$0xff] %v12872_v9  ;;  %v12874_v45 = vpop.f32.mrf.mxu0  ;;  %v3655_v9 = vrot.slane %v3653_v49, 2  ;;  %v3677_v11 = vshrl.u32 %v12071_v60, 16 }
 0x111   : > { %v12878_v12 = vpop.f32.mrf.mxu1 }
 0x112   : > { %14456 = vst [vmem:[#allocation26_spill] sm:$0xff] %v12878_v12  ;;  %v12880_v17 = vpop.f32.mrf.mxu0  ;;  %v3664_v12 = vrot.slane %v3662_v35, 2  ;;  %v3656_v38 = vor.u32 %v3655_v9, %v3652_v46 }
 0x113   : > { %v12887_v6 = vpop.f32.mrf.mxu1 }
 0x114   : > { %14457 = vst [vmem:[#allocation27_spill] sm:$0xff] %v12887_v6  ;;  %v12889_v27 = vpop.f32.mrf.mxu0  ;;  %11595 = vmatmul.mubr.msk.bf16.gmra.mxu0 %vm757_vm2, %v4627_v47  ;;  %v4632_v47 = vrot.slane %v12884_v16, 2  ;;  %v3665_v2 = vor.u32 %v3664_v12, %v3661_v20  ;;  %v3670_v6 = vrot.slane %v3668_v37, 1  ;;  %v3657_v46 = vsel %vm2381_vm3, %v3647_v15, %v3656_v38 }
 0x115   : > { %11598 = vmatprep.mubr.msk.bf16.mxu0 %vm757_vm2, %v4629_v52  ;;  %v12895_v54 = vpop.f32.mrf.mxu1  ;;  %v3680_v52 = vshll.u32 %v12071_v60, 16 }
 0x116   : > { %14458 = vst [vmem:[#allocation28_spill] sm:$0xff] %v12895_v54  ;;  %11529 = vmatmul.mubr.msk.bf16.gmra.mxu1 %vm757_vm2, %v3639_v3  ;;  %v12898_v1 = vpop.f32.mrf.mxu0  ;;  %v4631_v54 = vsel %vm4594_vm5, %v4628_v48, %v4630_v43  ;;  %v3673_v3 = vrot.slane %v3671_v53, 2  ;;  %v4633_v9 = vsel %vm4594_vm5, %v4630_v43, %v4632_v47  ;;  %v3666_v53 = vsel %vm2381_vm3, %v3656_v38, %v3665_v2 }
 0x117   : > { %11532 = vmatprep.mubr.msk.bf16.mxu1 %vm757_vm2, %v3648_v23  ;;  %v12902_v35 = vpop.f32.mrf.mxu1  ;;  %v3679_v48 = vrot.slane %v3677_v11, 1  ;;  %v3682_v20 = vrot.slane %v3680_v52, 2  ;;  %v3686_v43 = vshrl.u32 %v12073_v28, 16 }
 0x118   : > { %14459 = vst [vmem:[#allocation29_spill] sm:$0xff] %v12902_v35  ;;  %v12904_v49 = vpop.f32.mrf.mxu0  ;;  %v12075_v35 = vld [vmem:[%s12316_s29 + $0xc0] sm:$0xff]   ;;  %v3674_v37 = vor.u32 %v3673_v3, %v3670_v6 }
 0x119   : > { %v12912_v16 = vpop.f32.mrf.mxu1  ;;  %v3695_v38 = vshrl.u32 %v12075_v35, 16  ;;  %v3698_v11 = vshll.u32 %v12075_v35, 16  ;;  %v12937_v35 = vld [vmem:[%s12316_s29 + $0xc0] sm:$0xff]  }
 0x11a   : > { %14460 = vst [vmem:[#allocation30_spill] sm:$0xff] %v12912_v16  ;;  %v12914_v23 = vpop.f32.mrf.mxu0  ;;  %v4634_v16 = vrot.slane %v12070_v0, 2  ;;  %v3683_v0 = vor.u32 %v3682_v20, %v3679_v48 }
 0x11b   : > { %v12919_v12 = vpop.f32.mrf.mxu1  ;;  %v3700_v20 = vrot.slane %v3698_v11, 2  ;;  %v4640_v11 = vrot.slane %v12937_v35, 2  ;;  %v12963_v35 = vld [vmem:[%s12316_s29 + $0xd0] sm:$0xff]  }
 0x11c   : > { %14461 = vst [vmem:[#allocation31_spill] sm:$0xff] %v12919_v12  ;;  %v11436_v60 = vpop.f32.mrf.mxu0  ;;  %11599 = vmatmul.mubr.msk.bf16.gmra.mxu0 %vm757_vm2, %v4631_v54  ;;  %v3689_v12 = vshll.u32 %v12073_v28, 16  ;;  %v12074_v28 = vld [vmem:[%s12316_s29 + $0xb8] sm:$0xff]  }
 0x11d   : > { %11602 = vmatprep.mubr.msk.bf16.mxu0 %vm757_vm2, %v4633_v9  ;;  %v3675_v9 = vsel %vm2381_vm3, %v3665_v2, %v3674_v37 }
 0x11e   : > { %v11370_v13 = vpop.f32.mrf.mxu1  ;;  %11533 = vmatmul.mubr.msk.bf16.gmra.mxu1 %vm757_vm2, %v3657_v46  ;;  %v2811_v15 = vpop.f32.mrf.mxu0  ;;  %v4635_v46 = vsel %vm4594_vm5, %v4632_v47, %v4634_v16  ;;  %v3691_v55 = vrot.slane %v3689_v12, 2 }
 0x11f   : > { %v1961_v54 = vadd.f32 %v11370_v13, %v12677_v21  ;;  %11536 = vmatprep.mubr.msk.bf16.mxu1 %vm757_vm2, %v3666_v53  ;;  %v4637_v13 = vsel %vm4594_vm5, %v4634_v16, %v4636_v19  ;;  %v3688_v53 = vrot.slane %v3686_v43, 1  ;;  %v12079_v16 = vld [vmem:[%s12316_s29 + $0xd0] sm:$0xff]  }
 0x120   : > { %v1704_v52 = vpop.f32.mrf.mxu1  ;;  %v11437_v6 = vpop.f32.mrf.mxu0 }
 0x121   : > { %v12929_v3 = vadd.f32 %v11436_v60, %v1961_v54  ;;  %v1959_v39 = vadd.f32 %v1704_v52, %v12686_v25  ;;  %v3697_v25 = vrot.slane %v3695_v38, 1  ;;  %v3684_v54 = vsel %vm2381_vm3, %v3674_v37, %v3683_v0 }
 0x122   : > { %v11371_v62 = vpop.f32.mrf.mxu1  ;;  %v2814_v21 = vpop.f32.mrf.mxu0  ;;  %v3707_v52 = vshll.u32 %v12077_v4, 16  ;;  %v3692_v38 = vor.u32 %v3691_v55, %v3688_v53 }
 0x123   : > { %v12939_v48 = vadd.f32 %v2811_v15, %v1959_v39  ;;  %v1962_v60 = vadd.f32 %v11371_v62, %v12691_v34  ;;  %v4638_v15 = vrot.slane %v12074_v28, 2  ;;  %v12081_v39 = vld [vmem:[%s12316_s29 + $0xd8] sm:$0xff]  }
 0x124   : > { %v1707_v2 = vpop.f32.mrf.mxu1  ;;  %v11440_v47 = vpop.f32.mrf.mxu0  ;;  %11603 = vmatmul.mubr.msk.bf16.gmra.mxu0 %vm757_vm2, %v4635_v46  ;;  %v12078_v46 = vld [vmem:[%s12316_s29 + $0xc8] sm:$0xff]  }
 0x125   : > { %v12945_v12 = vadd.f32 %v11437_v6, %v1962_v60  ;;  %v1960_v43 = vadd.f32 %v1707_v2, %v12697_v41  ;;  %11606 = vmatprep.mubr.msk.bf16.mxu0 %vm757_vm2, %v4637_v13  ;;  %v3701_v41 = vor.u32 %v3700_v20, %v3697_v25  ;;  %v3706_v6 = vrot.slane %v3704_v50, 1 }
 0x126   : > { %v11374_v34 = vpop.f32.mrf.mxu1  ;;  %11537 = vmatmul.mubr.msk.bf16.gmra.mxu1 %vm757_vm2, %v3675_v9  ;;  %v2827_v62 = vpop.f32.mrf.mxu0  ;;  %v3709_v60 = vrot.slane %v3707_v52, 2  ;;  %v3713_v9 = vshrl.u32 %v12079_v16, 16  ;;  %v3716_v2 = vshll.u32 %v12079_v16, 16  ;;  %v3693_v50 = vsel %vm2381_vm3, %v3683_v0, %v3692_v38 }
 0x127   : > { %14462 = vst [vmem:[#allocation32_spill] sm:$0xff] %v12945_v12  ;;  %v12952_v4 = vadd.f32 %v2814_v21, %v1960_v43  ;;  %v1965_v37 = vadd.f32 %v11374_v34, %v12708_v51  ;;  %11540 = vmatprep.mubr.msk.bf16.mxu1 %vm757_vm2, %v3684_v54  ;;  %v12083_v12 = vld [vmem:[%s12316_s29 + $0xe0] sm:$0xff]   ;;  %v4639_v21 = vsel %vm4594_vm5, %v4636_v19, %v4638_v15  ;;  %v3722_v20 = vshrl.u32 %v12081_v39, 16 }
 0x128   : > { %v1720_v28 = vpop.f32.mrf.mxu1  ;;  %v11441_v13 = vpop.f32.mrf.mxu0  ;;  %v4641_v25 = vsel %vm4594_vm5, %v4638_v15, %v4640_v11  ;;  %v3725_v54 = vshll.u32 %v12081_v39, 16  ;;  %v3702_v16 = vsel %vm2381_vm3, %v3692_v38, %v3701_v41  ;;  %v3718_v0 = vrot.slane %v3716_v2, 2  ;;  %v12085_v15 = vld [vmem:[%s12316_s29 + $0xe8] sm:$0xff]   ;;  %v12087_v2 = vld [vmem:[%s12316_s29 + $0xf0] sm:$0xff]  }
 0x129   : > { %14463 = vst [vmem:[#allocation33_spill] sm:$0xff] %v12952_v4  ;;  %v12958_v55 = vadd.f32 %v11440_v47, %v1965_v37  ;;  %v1963_v53 = vadd.f32 %v1720_v28, %v12716_v56  ;;  %v4642_v56 = vrot.slane %v12078_v46, 2  ;;  %v3710_v37 = vor.u32 %v3709_v60, %v3706_v6 }
 0x12a   : > { %v11375_v51 = vpop.f32.mrf.mxu1  ;;  %v2830_v43 = vpop.f32.mrf.mxu0  ;;  %v3715_v28 = vrot.slane %v3713_v9, 1  ;;  %v3734_v38 = vshll.u32 %v12083_v12, 16  ;;  %v3724_v46 = vrot.slane %v3722_v20, 1  ;;  %v3727_v60 = vrot.slane %v3725_v54, 2  ;;  %v12082_v9 = vld [vmem:[%s12316_s29 + $0xd8] sm:$0xff]  }
 0x12b   : > { %14464 = vst [vmem:[#allocation34_spill] sm:$0xff] %v12958_v55  ;;  %v12967_v52 = vadd.f32 %v2827_v62, %v1963_v53  ;;  %v1966_v47 = vadd.f32 %v11375_v51, %v12722_v63  ;;  %v3731_v55 = vshrl.u32 %v12083_v12, 16  ;;  %v4644_v63 = vrot.slane %v12963_v35, 2 }
 0x12c   : > { %v1723_v34 = vpop.f32.mrf.mxu1  ;;  %v11444_v19 = vpop.f32.mrf.mxu0  ;;  %11607 = vmatmul.mubr.msk.bf16.gmra.mxu0 %vm757_vm2, %v4639_v21  ;;  %v12089_v21 = vld [vmem:[%s12316_s29 + $0xf8] sm:$0xff]   ;;  %v3711_v51 = vsel %vm2381_vm3, %v3701_v41, %v3710_v37  ;;  %v3740_v20 = vshrl.u32 %v12085_v15, 16  ;;  %v3749_v41 = vshrl.u32 %v12087_v2, 16 }
 0x12d   : > { %v12973_v4 = vadd.f32 %v11441_v13, %v1966_v47  ;;  %v1964_v62 = vadd.f32 %v1723_v34, %v12728_v5  ;;  %11610 = vmatprep.mubr.msk.bf16.mxu0 %vm757_vm2, %v4641_v25  ;;  %v4643_v5 = vsel %vm4594_vm5, %v4640_v11, %v4642_v56  ;;  %v3733_v25 = vrot.slane %v3731_v55, 1  ;;  %v12989_v47 = vld [vmem:[%s12316_s29 + $0xe0] sm:$0xff]  }
 0x12e   : > { %v11378_v39 = vpop.f32.mrf.mxu1  ;;  %11541 = vmatmul.mubr.msk.bf16.gmra.mxu1 %vm757_vm2, %v3693_v50  ;;  %v2843_v6 = vpop.f32.mrf.mxu0  ;;  %v3719_v50 = vor.u32 %v3718_v0, %v3715_v28  ;;  %v3736_v34 = vrot.slane %v3734_v38, 2  ;;  %v4645_v11 = vsel %vm4594_vm5, %v4642_v56, %v4644_v63  ;;  %v3752_v0 = vshll.u32 %v12087_v2, 16 }
 0x12f   : > { %v12981_v53 = vadd.f32 %v2830_v43, %v1964_v62  ;;  %v1969_v13 = vadd.f32 %v11378_v39, %v12742_v44  ;;  %11544 = vmatprep.mubr.msk.bf16.mxu1 %vm757_vm2, %v3702_v16  ;;  %v3743_v44 = vshll.u32 %v12085_v15, 16  ;;  %v3728_v39 = vor.u32 %v3727_v60, %v3724_v46  ;;  %v13002_v46 = vld [vmem:[%s12316_s29 + $0xe8] sm:$0xff]   ;;  %v12091_v60 = vld [vmem:[%s12316_s29 + $0x100] sm:$0xff]  }
 0x130   : > { %v1736_v35 = vpop.f32.mrf.mxu1  ;;  %v11445_v12 = vpop.f32.mrf.mxu0  ;;  %v3720_v15 = vsel %vm2381_vm3, %v3710_v37, %v3719_v50  ;;  %v14432_v56 = vrot.slane %v12989_v47, 2  ;;  %v3737_v2 = vor.u32 %v3736_v34, %v3733_v25  ;;  %v3754_v34 = vrot.slane %v3752_v0, 2 }
 0x131   : > { %14465 = vst [vmem:[#allocation35_spill] sm:$0xff] %v12981_v53  ;;  %v12991_v54 = vadd.f32 %v11444_v19, %v1969_v13  ;;  %v1967_v43 = vadd.f32 %v1736_v35, %v12754_v22  ;;  %v4646_v53 = vrot.slane %v12082_v9, 2  ;;  %v3758_v19 = vshrl.u32 %v12089_v21, 16 }
 0x132   : > { %v11379_v62 = vpop.f32.mrf.mxu1  ;;  %v2846_v16 = vpop.f32.mrf.mxu0  ;;  %v3742_v13 = vrot.slane %v3740_v20, 1  ;;  %v3745_v35 = vrot.slane %v3743_v44, 2  ;;  %v4650_v0 = vrot.slane %v13002_v46, 2 }
 0x133   : > { %v12995_v28 = vadd.f32 %v2843_v6, %v1967_v43  ;;  %v1970_v55 = vadd.f32 %v11379_v62, %v12761_v29  ;;  %v3761_v6 = vshll.u32 %v12089_v21, 16  ;;  %v13010_v43 = vld [vmem:[%s12316_s29 + $0xf0] sm:$0xff]   ;;  %v3729_v21 = vsel %vm2381_vm3, %v3719_v50, %v3728_v39 }
 0x134   : > { %v1739_v22 = vpop.f32.mrf.mxu1  ;;  %v11448_v38 = vpop.f32.mrf.mxu0  ;;  %11611 = vmatmul.mubr.msk.bf16.gmra.mxu0 %vm757_vm2, %v4643_v5  ;;  %v13013_v5 = vld [vmem:[%s12316_s29 + $0xf8] sm:$0xff]   ;;  %v3751_v62 = vrot.slane %v3749_v41, 1  ;;  %v3760_v44 = vrot.slane %v3758_v19, 1  ;;  %v13027_v41 = vld [vmem:[%s12316_s29 + $0x100] sm:$0xff]   ;;  %v12096_v19 = vld [vmem:[%s12316_s29 + $0x10] sm:$0xff]  }
 0x135   : > { %14466 = vst [vmem:[#allocation36_spill] sm:$0xff] %v12995_v28  ;;  %v13005_v9 = vadd.f32 %v11445_v12, %v1970_v55  ;;  %v1968_v29 = vadd.f32 %v1739_v22, %v12767_v42  ;;  %11614 = vmatprep.mubr.msk.bf16.mxu0 %vm757_vm2, %v4645_v11  ;;  %v4647_v12 = vsel %vm4594_vm5, %v4644_v63, %v4646_v53  ;;  %v12093_v55 = vld [vmem:[%s12316_s29 + $0x108] ss:$0 sps:$4 sm:$0x33]   ;;  %v3763_v50 = vrot.slane %v3761_v6, 2 }
 0x136   : > { %v11382_v37 = vpop.f32.mrf.mxu1  ;;  %11545 = vmatmul.mubr.msk.bf16.gmra.mxu1 %vm757_vm2, %v3711_v51  ;;  %v2859_v20 = vpop.f32.mrf.mxu0  ;;  %v4649_v51 = vsel %vm4594_vm5, %v4646_v53, %v14432_v56  ;;  %v3770_v63 = vshll.u32 %v12091_v60, 16  ;;  %v4652_v28 = vrot.slane %v13010_v43, 2  ;;  %v3776_v53 = vshrl.u32 %v12093_v55, 16 }
 0x137   : > { %14467 = vst [vmem:[#allocation37_spill] sm:$0xff] %v13005_v9  ;;  %v13019_v42 = vadd.f32 %v2846_v16, %v1968_v29  ;;  %v1973_v25 = vadd.f32 %v11382_v37, %v12776_v26  ;;  %11548 = vmatprep.mubr.msk.bf16.mxu1 %vm757_vm2, %v3720_v15  ;;  %v3767_v9 = vshrl.u32 %v12091_v60, 16  ;;  %v3738_v26 = vsel %vm2381_vm3, %v3728_v39, %v3737_v2 }
 0x138   : > { %v1752_v11 = vpop.f32.mrf.mxu1  ;;  %v11449_v22 = vpop.f32.mrf.mxu0  ;;  %v3779_v6 = vshll.u32 %v12093_v55, 16  ;;  %v3764_v46 = vor.u32 %v3763_v50, %v3760_v44  ;;  %v3778_v44 = vrot.slane %v3776_v53, 1 }
 0x139   : > { %14468 = vst [vmem:[#allocation38_spill] sm:$0xff] %v13019_v42  ;;  %v13029_v16 = vadd.f32 %v11448_v38, %v1973_v25  ;;  %v1971_v29 = vadd.f32 %v1752_v11, %v12784_v61  ;;  %v3746_v42 = vor.u32 %v3745_v35, %v3742_v13  ;;  %v3755_v25 = vor.u32 %v3754_v34, %v3751_v62 }
 0x13a   : > { %v11383_v15 = vpop.f32.mrf.mxu1  ;;  %v2862_v37 = vpop.f32.mrf.mxu0  ;;  %v4654_v61 = vrot.slane %v13013_v5, 2  ;;  %v3769_v56 = vrot.slane %v3767_v9, 1  ;;  %v3772_v13 = vrot.slane %v3770_v63, 2  ;;  %v4656_v35 = vrot.slane %v13027_v41, 2  ;;  %v12098_v41 = vld [vmem:[%s12316_s29 + $0x18] sm:$0xff]  }
 0x13b   : > { %v13036_v60 = vadd.f32 %v2859_v20, %v1971_v29  ;;  %v1974_v38 = vadd.f32 %v11383_v15, %v12789_v33  ;;  %v12094_v33 = vld [vmem:[%s12316_s29 + $0x108] ss:$0 sps:$4 sm:$0x33]   ;;  %v5480_v62 = vshrl.u32 %v12096_v19, 16  ;;  %v14471_v9 = vrot.slane %v12989_v47, 2 }
 0x13c   : > { %v1755_v11 = vpop.f32.mrf.mxu1  ;;  %v11452_v39 = vpop.f32.mrf.mxu0  ;;  %11615 = vmatmul.mubr.msk.bf16.gmra.mxu0 %vm757_vm2, %v4647_v12  ;;  %v3747_v12 = vsel %vm2381_vm3, %v3737_v2, %v3746_v42  ;;  %v5483_v63 = vshll.u32 %v12096_v19, 16  ;;  %v3756_v47 = vsel %vm2381_vm3, %v3746_v42, %v3755_v25  ;;  %v13061_v15 = vsel %vm2381_vm3, %v3755_v25, %v3764_v46 }
 0x13d   : > { %14469 = vst [vmem:[#allocation39_spill] sm:$0xff] %v13036_v60  ;;  %v13042_v43 = vadd.f32 %v11449_v22, %v1974_v38  ;;  %v1972_v20 = vadd.f32 %v1755_v11, %v12795_v14  ;;  %11618 = vmatprep.mubr.msk.bf16.mxu0 %vm757_vm2, %v4649_v51  ;;  %v4651_v34 = vsel %vm4594_vm5, %v14471_v9, %v4650_v0  ;;  %v3781_v22 = vrot.slane %v3779_v6, 2  ;;  %v12095_v14 = vld [vmem:[%s12316_s29 + $0x8] sm:$0xfc]   ;;  %v12099_v6 = vld [vmem:[%s12316_s29 + $0x18] sm:$0xff]  }
 0x13e   : > { %v11386_v5 = vpop.f32.mrf.mxu1  ;;  %11549 = vmatmul.mubr.msk.bf16.gmra.mxu1 %vm757_vm2, %v3729_v21  ;;  %v2875_v55 = vpop.f32.mrf.mxu0  ;;  %v4653_v21 = vsel %vm4594_vm5, %v4650_v0, %v4652_v28  ;;  %v13064_v53 = vsel %vm4594_vm5, %v4652_v28, %v4654_v61  ;;  %v3773_v19 = vor.u32 %v3772_v13, %v3769_v56  ;;  %v4658_v38 = vrot.slane %v12094_v33, 2 }
 0x13f   : > { %14470 = vst [vmem:[#allocation40_spill] sm:$0xff] %v13042_v43  ;;  %v13053_v50 = vadd.f32 %v2862_v37, %v1972_v20  ;;  %v1977_v51 = vadd.f32 %v11386_v5, %v12804_v36  ;;  %11552 = vmatprep.mubr.msk.bf16.mxu1 %vm757_vm2, %v3738_v26  ;;  %v13067_v37 = vsel %vm4594_vm5, %v4654_v61, %v4656_v35  ;;  %v12097_v36 = vld [vmem:[%s12316_s29 + $0x10] sm:$0xfc]   ;;  %v5472_v5 = vshrl.u32 %v12095_v14, 16 }
 0x140   : > { %v1768_v2 = vpop.f32.mrf.mxu1  ;;  %v11453_v29 = vpop.f32.mrf.mxu0  ;;  %v3782_v42 = vor.u32 %v3781_v22, %v3778_v44  ;;  %v5475_v25 = vshll.u32 %v12095_v14, 16  ;;  %v5482_v9 = vrot.slane %v5480_v62, 2  ;;  %v5485_v61 = vrot.slane %v5483_v63, 3  ;;  %v12100_v22 = vld [vmem:[%s12316_s29 + $0x20] sm:$0xff]  }
 0x141   : > { %14472 = vst [vmem:[#allocation41_spill] sm:$0xff] %v13053_v50  ;;  %v13071_v26 = vadd.f32 %v11452_v39, %v1977_v51  ;;  %v1975_v0 = vadd.f32 %v1768_v2, %v12812_v30  ;;  %v6586_v43 = vshrl.u32 %v12098_v41, 16  ;;  %v6578_v30 = vshrl.u32 %v12097_v36, 16 }
 0x142   : > { %v11387_v11 = vpop.f32.mrf.mxu1  ;;  %v2878_v20 = vpop.f32.mrf.mxu0  ;;  %v6581_v56 = vshll.u32 %v12097_v36, 16  ;;  %v6589_v13 = vshll.u32 %v12098_v41, 16  ;;  %v5489_v33 = vshrl.u32 %v12099_v6, 16  ;;  %v13088_v51 = vsel %vm2381_vm3, %v3773_v19, %v3782_v42 }
 0x143   : > { %v13074_v50 = vadd.f32 %v2875_v55, %v1975_v0  ;;  %v1978_v28 = vadd.f32 %v11387_v11, %v12817_v57  ;;  %v13083_v57 = vsel %vm2381_vm3, %v3764_v46, %v3773_v19  ;;  %v5492_v55 = vshll.u32 %v12099_v6, 16 }
 0x144   : > { %v1771_v60 = vpop.f32.mrf.mxu1  ;;  %v11456_v39 = vpop.f32.mrf.mxu0  ;;  %11619 = vmatmul.mubr.msk.bf16.gmra.mxu0 %vm757_vm2, %v4651_v34  ;;  %v13091_v63 = vsel %vm4594_vm5, %v4656_v35, %v4658_v38  ;;  %v13098_v2 = vor.u32 %v5485_v61, %v5482_v9  ;;  %v6580_v0 = vrot.slane %v6578_v30, 2  ;;  %v6583_v19 = vrot.slane %v6581_v56, 3  ;;  %v12103_v61 = vld [vmem:[%s12316_s29 + $0x28] sm:$0xff]  }
 0x145   : > { %v13078_v44 = vadd.f32 %v11453_v29, %v1978_v28  ;;  %v1976_v62 = vadd.f32 %v1771_v60, %v12823_v8  ;;  %11622 = vmatprep.mubr.msk.bf16.mxu0 %vm757_vm2, %v4653_v21  ;;  %v5474_v8 = vrot.slane %v5472_v5, 2  ;;  %v5477_v60 = vrot.slane %v5475_v25, 3  ;;  %v12101_v21 = vld [vmem:[%s12316_s29 + $0x20] sm:$0xff]  }
 0x146   : > { %v11390_v14 = vpop.f32.mrf.mxu1  ;;  %11553 = vmatmul.mubr.msk.bf16.gmra.mxu1 %vm757_vm2, %v3747_v12  ;;  %v2891_v34 = vpop.f32.mrf.mxu0  ;;  %v6588_v29 = vrot.slane %v6586_v43, 2  ;;  %v12102_v12 = vld [vmem:[%s12316_s29 + $0x28] sm:$0xff]   ;;  %v6591_v35 = vrot.slane %v6589_v13, 3  ;;  %v5491_v38 = vrot.slane %v5489_v33, 2  ;;  %v5494_v42 = vrot.slane %v5492_v55, 3 }
 0x147   : > { %v13094_v41 = vadd.f32 %v2878_v20, %v1976_v62  ;;  %v1981_v46 = vadd.f32 %v11390_v14, %v12831_v31  ;;  %11556 = vmatprep.mubr.msk.bf16.mxu1 %vm757_vm2, %v3756_v47  ;;  %v6595_v5 = vshrl.u32 %v12100_v22, 16  ;;  %v5478_v47 = vor.u32 %v5477_v60, %v5474_v8  ;;  %v12104_v8 = vld [vmem:[%s12316_s29 + $0x30] sm:$0xff]  }
 0x148   : > { %v1784_v36 = vpop.f32.mrf.mxu1  ;;  %v11457_v6 = vpop.f32.mrf.mxu0  ;;  %v6598_v9 = vshll.u32 %v12100_v22, 16  ;;  %v5498_v28 = vshrl.u32 %v12101_v21, 16  ;;  %v5501_v43 = vshll.u32 %v12101_v21, 16  ;;  %v6604_v56 = vshrl.u32 %v12102_v12, 16  ;;  %v12227_v22 = vld [vmem:[%s14428_s1 + $0x1c] sm:$0xf] }
 0x149   : > { %v13101_v11 = vadd.f32 %v11456_v39, %v1981_v46  ;;  %v1979_v20 = vadd.f32 %v1784_v36, %v12840_v7  ;;  %v6607_v13 = vshll.u32 %v12102_v12, 16  ;;  %v6584_v7 = vor.u32 %v6583_v19, %v6580_v0 }
 0x14a   : > { %v11391_v31 = vpop.f32.mrf.mxu1  ;;  %v2894_v25 = vpop.f32.mrf.mxu0  ;;  %v13110_v55 = vor.u32 %v6591_v35, %v6588_v29  ;;  %v13116_v14 = vsel %vm854_vm0, %v12227_v22, 0  ;;  %v5495_v21 = vor.u32 %v5494_v42, %v5491_v38  ;;  %v6597_v46 = vrot.slane %v6595_v5, 2 }
 0x14b   : > { %v13105_v62 = vadd.f32 %v2891_v34, %v1979_v20  ;;  %v1982_v30 = vadd.f32 %v11391_v31, %v12845_v59  ;;  %v12228_v59 = vld [vmem:[%s14428_s1 + $0x20] sm:$0xf]  ;;  %v6600_v36 = vrot.slane %v6598_v9, 3  ;;  %v5500_v0 = vrot.slane %v5498_v28, 2  ;;  %v12106_v20 = vld [vmem:[%s12316_s29 + $0x38] sm:$0xff]  }
 0x14c   : > { %v1787_v39 = vpop.f32.mrf.mxu1  ;;  %v11460_v33 = vpop.f32.mrf.mxu0  ;;  %11623 = vmatmul.mubr.msk.bf16.gmra.mxu0 %vm757_vm2, %v13064_v53  ;;  %v13122_v34 = vsel %vm854_vm0, %v12228_v59, 0  ;;  %v5503_v19 = vrot.slane %v5501_v43, 3  ;;  %v5507_v35 = vshrl.u32 %v12103_v61, 16  ;;  %v6609_v38 = vrot.slane %v6607_v13, 3  ;;  %v12105_v43 = vld [vmem:[%s12316_s29 + $0x30] sm:$0xff]  }
 0x14d   : > { %v13125_v53 = vadd.f32 %v11457_v6, %v1982_v30  ;;  %v1980_v60 = vadd.f32 %v1787_v39, %v12851_v10  ;;  %11626 = vmatprep.mubr.msk.bf16.mxu0 %vm757_vm2, %v13067_v37  ;;  %v6606_v37 = vrot.slane %v6604_v56, 2  ;;  %v5510_v31 = vshll.u32 %v12103_v61, 16  ;;  %v12107_v56 = vld [vmem:[%s12316_s29 + $0x38] sm:$0xff]  }
 0x14e   : > { %v11394_v29 = vpop.f32.mrf.mxu1  ;;  %11557 = vmatmul.mubr.msk.bf16.gmra.mxu1 %vm757_vm2, %v13061_v15  ;;  %v2907_v12 = vpop.f32.mrf.mxu0  ;;  %v5487_v15 = vsel %vm5470_vm6, %v5478_v47, %v13098_v2  ;;  %v6613_v9 = vshrl.u32 %v12104_v8, 16  ;;  %v6616_v28 = vshll.u32 %v12104_v8, 16  ;;  %v6601_v47 = vor.u32 %v6600_v36, %v6597_v46 }
 0x14f   : > { %v13133_v6 = vadd.f32 %v2894_v25, %v1980_v60  ;;  %v1985_v10 = vadd.f32 %v11394_v29, %v12859_v18  ;;  %11560 = vmatprep.mubr.msk.bf16.mxu1 %vm757_vm2, %v13083_v57  ;;  %v6593_v18 = vsel %vm5470_vm6, %v6584_v7, %v13110_v55  ;;  %v13148_v57 = vsel %vm5470_vm6, %v13098_v2, %v5495_v21 }
 0x150   : > { %v1800_v42 = vpop.f32.mrf.mxu1  ;;  %v11461_v5 = vpop.f32.mrf.mxu0  ;;  %v13151_v61 = vor.u32 %v5503_v19, %v5500_v0  ;;  %v6622_v22 = vshrl.u32 %v12106_v20, 16  ;;  %v6625_v59 = vshll.u32 %v12106_v20, 16  ;;  %v13156_v8 = vor.u32 %v6609_v38, %v6606_v37  ;;  %v12108_v0 = vld [vmem:[%s12316_s29 + $0x40] sm:$0xff]  }
 0x151   : > { %v13141_v30 = vadd.f32 %v11460_v33, %v1985_v10  ;;  %v1983_v25 = vadd.f32 %v1800_v42, %v12868_v58  ;;  %v5509_v7 = vrot.slane %v5507_v35, 2  ;;  %v5512_v2 = vrot.slane %v5510_v31, 3  ;;  %v12109_v31 = vld [vmem:[%s12316_s29 + $0x40] sm:$0xff]  }
 0x152   : > { %v11395_v13 = vpop.f32.mrf.mxu1  ;;  %v2910_v39 = vpop.f32.mrf.mxu0  ;;  %v6615_v10 = vrot.slane %v6613_v9, 2  ;;  %v6618_v46 = vrot.slane %v6616_v28, 3  ;;  %v5516_v36 = vshrl.u32 %v12105_v43, 16  ;;  %v5525_v35 = vshrl.u32 %v12107_v56, 16 }
 0x153   : > { %v13153_v33 = vadd.f32 %v2907_v12, %v1983_v25  ;;  %v1986_v58 = vadd.f32 %v11395_v13, %v12874_v45  ;;  %v5519_v45 = vshll.u32 %v12105_v43, 16  ;;  %v6602_v37 = vsel %vm5470_vm6, %v13110_v55, %v6601_v47  ;;  %v12110_v43 = vld [vmem:[%s12316_s29 + $0x48] sm:$0xff]  }
 0x154   : > { %v1803_v60 = vpop.f32.mrf.mxu1  ;;  %v11464_v29 = vpop.f32.mrf.mxu0  ;;  %11627 = vmatmul.mubr.msk.bf16.gmra.mxu0 %vm757_vm2, %v13091_v63  ;;  %v6624_v38 = vrot.slane %v6622_v22, 2  ;;  %v6627_v42 = vrot.slane %v6625_v59, 3  ;;  %v5505_v28 = vsel %vm5470_vm6, %v5495_v21, %v13151_v61  ;;  %v6631_v13 = vshrl.u32 %v12108_v0, 16  ;;  %v12111_v22 = vld [vmem:[%s12316_s29 + $0x48] sm:$0xff]   ;;  %v12112_v21 = vld [vmem:[%s12316_s29 + $0x50] sm:$0xff]  }
 0x155   : > { %v13161_v19 = vadd.f32 %v11461_v5, %v1986_v58  ;;  %v1984_v12 = vadd.f32 %v1803_v60, %v12880_v17  ;;  %11698 = vmatprep.mubr.msk.bf16.mxu0 %vm757_vm2, %v6593_v18  ;;  %v5528_v5 = vshll.u32 %v12107_v56, 16  ;;  %v13179_v18 = vor.u32 %v5512_v2, %v5509_v7  ;;  %v13189_v2 = vld [vmem:[%s12316_s29 + $0x50] sm:$0xff]  }
 0x156   : > { %v11398_v20 = vpop.f32.mrf.mxu1  ;;  %11561 = vmatmul.mubr.msk.bf16.gmra.mxu1 %vm757_vm2, %v13088_v51  ;;  %v2923_v63 = vpop.f32.mrf.mxu0  ;;  %v6611_v51 = vsel %vm5470_vm6, %v6601_v47, %v13156_v8  ;;  %v5518_v56 = vrot.slane %v5516_v36, 2  ;;  %v6619_v59 = vor.u32 %v6618_v46, %v6615_v10  ;;  %v5521_v58 = vrot.slane %v5519_v45, 3 }
 0x157   : > { %v13170_v9 = vadd.f32 %v2910_v39, %v1984_v12  ;;  %v1989_v17 = vadd.f32 %v11398_v20, %v12889_v27  ;;  %11632 = vmatprep.mubr.msk.bf16.mxu1 %vm757_vm2, %v5487_v15  ;;  %v6634_v39 = vshll.u32 %v12108_v0, 16  ;;  %v13186_v47 = vor.u32 %v6627_v42, %v6624_v38 }
 0x158   : > { %v1816_v55 = vpop.f32.mrf.mxu1  ;;  %v11465_v25 = vpop.f32.mrf.mxu0  ;;  %v5527_v20 = vrot.slane %v5525_v35, 2  ;;  %v5534_v7 = vshrl.u32 %v12109_v31, 16  ;;  %v6633_v10 = vrot.slane %v6631_v13, 2  ;;  %v6643_v45 = vshll.u32 %v12110_v43, 16 }
 0x159   : > { %14473 = vst [vmem:[#allocation42_spill] sm:$0xff] %v13170_v9  ;;  %v13182_v27 = vadd.f32 %v11464_v29, %v1989_v17  ;;  %v1987_v15 = vadd.f32 %v1816_v55, %v12898_v1  ;;  %v5530_v9 = vrot.slane %v5528_v5, 3  ;;  %v5537_v29 = vshll.u32 %v12109_v31, 16 }
 0x15a   : > { %v11399_v60 = vpop.f32.mrf.mxu1  ;;  %v2926_v12 = vpop.f32.mrf.mxu0  ;;  %v6640_v17 = vshrl.u32 %v12110_v43, 16  ;;  %v6636_v46 = vrot.slane %v6634_v39, 3  ;;  %v5543_v38 = vshrl.u32 %v12111_v22, 16  ;;  %v5522_v43 = vor.u32 %v5521_v58, %v5518_v56 }
 0x15b   : > { %14474 = vst [vmem:[#allocation43_spill] sm:$0xff] %v13182_v27  ;;  %v13191_v36 = vadd.f32 %v2923_v63, %v1987_v15  ;;  %v1990_v0 = vadd.f32 %v11399_v60, %v12904_v49  ;;  %v5546_v63 = vshll.u32 %v12111_v22, 16  ;;  %v6649_v49 = vshrl.u32 %v12112_v21, 16  ;;  %v12114_v15 = vld [vmem:[%s12316_s29 + $0x58] sm:$0xff]  }
 0x15c   : > { %v1819_v27 = vpop.f32.mrf.mxu1  ;;  %v11468_v1 = vpop.f32.mrf.mxu0  ;;  %11699 = vmatmul.mubr.msk.bf16.vlgmr.msra.gmra.mxu0 %vm757_vm2, %v6602_v37  ;;  %v6620_v37 = vsel %vm5470_vm6, %v13156_v8, %v6619_v59  ;;  %v6652_v55 = vshll.u32 %v12112_v21, 16  ;;  %v6629_v8 = vsel %vm5470_vm6, %v6619_v59, %v13186_v47  ;;  %v5539_v56 = vrot.slane %v5537_v29, 3 }
 0x15d   : > { %v13195_v42 = vadd.f32 %v11465_v25, %v1990_v0  ;;  %v1988_v35 = vadd.f32 %v1819_v27, %v12914_v23  ;;  %11829 = vmatpush3.bf16.msra.mxu0 %v13122_v34  ;;  %11702 = vmatprep.mubr.msk.bf16.mxu0 %vm757_vm2, %v6611_v51  ;;  %v5552_v25 = vshrl.u32 %v13189_v2, 16  ;;  %v13210_v51 = vor.u32 %v5530_v9, %v5527_v20  ;;  %v12116_v0 = vld [vmem:[%s12316_s29 + $0x60] sm:$0xff]  }
 0x15e   : > { %v11402_v5 = vpop.f32.mrf.mxu1  ;;  %11633 = vmatmul.mubr.msk.bf16.vlgmr.msra.gmra.mxu1 %vm757_vm2, %v13148_v57  ;;  %v2939_v31 = vpop.f32.mrf.mxu0  ;;  %v5536_v57 = vrot.slane %v5534_v7, 2  ;;  %v6642_v22 = vrot.slane %v6640_v17, 2  ;;  %v6645_v27 = vrot.slane %v6643_v45, 3  ;;  %v13220_v9 = vrot.slane %v5546_v63, 3  ;;  %v13234_v45 = vld [vmem:[%s12316_s29 + $0x60] sm:$0xff]  }
 0x15f   : > { %v13205_v23 = vadd.f32 %v2926_v12, %v1988_v35  ;;  %v1993_v34 = vadd.f32 %v11402_v5, %v12683_v24  ;;  %11763 = vmatpush3.bf16.msra.mxu1 %v13116_v14  ;;  %11636 = vmatprep.mubr.msk.bf16.mxu1 %vm757_vm2, %v5505_v28  ;;  %v13218_v14 = vrot.slane %v5543_v38, 2  ;;  %v12115_v28 = vld [vmem:[%s12316_s29 + $0x58] sm:$0xff]   ;;  %v6637_v12 = vor.u32 %v6636_v46, %v6633_v10 }
 0x160   : > { %v1832_v13 = vpop.f32.mrf.mxu1  ;;  %v11469_v39 = vpop.f32.mrf.mxu0  ;;  %v6651_v20 = vrot.slane %v6649_v49, 2  ;;  %v6654_v59 = vrot.slane %v6652_v55, 3  ;;  %v13223_v7 = vrot.slane %v5552_v25, 2  ;;  %v5523_v10 = vsel %vm5470_vm6, %v13179_v18, %v5522_v43 }
 0x161   : > { %v13215_v58 = vadd.f32 %v11468_v1, %v1993_v34  ;;  %v1991_v24 = vadd.f32 %v1832_v13, %v12689_v32  ;;  %v5514_v32 = vsel %vm5470_vm6, %v13151_v61, %v13179_v18  ;;  %v5555_v1 = vshll.u32 %v13189_v2, 16  ;;  %v14476_v61 = vld [vmem:[#allocation3_spill] sm:$0xff]  ;;  %v12118_v13 = vld [vmem:[%s12316_s29 + $0x68] sm:$0xff]  }
 0x162   : > { %v11403_v21 = vpop.f32.mrf.mxu1  ;;  %v2942_v60 = vpop.f32.mrf.mxu0  ;;  %v5532_v46 = vsel %vm5470_vm6, %v5522_v43, %v13210_v51  ;;  %v6661_v63 = vshll.u32 %v12114_v15, 16  ;;  %v5561_v2 = vshrl.u32 %v12115_v28, 16  ;;  %v6638_v18 = vsel %vm5470_vm6, %v13186_v47, %v6637_v12 }
 0x163   : > { %v13226_v29 = vadd.f32 %v2939_v31, %v1991_v24  ;;  %v1994_v17 = vadd.f32 %v11403_v21, %v12695_v40  ;;  %v6658_v40 = vshrl.u32 %v12114_v15, 16  ;;  %v5564_v31 = vshll.u32 %v12115_v28, 16  ;;  %v14478_v15 = vld [vmem:[#allocation4_spill] sm:$0xff] }
 0x164   : > { %v1835_v38 = vpop.f32.mrf.mxu1  ;;  %v11472_v35 = vpop.f32.mrf.mxu0  ;;  %11703 = vmatmul.mubr.msk.bf16.gmra.mxu0 %vm757_vm2, %v6620_v37  ;;  %v13248_v25 = vor.u32 %v5539_v56, %v5536_v57  ;;  %v6646_v43 = vor.u32 %v6645_v27, %v6642_v22  ;;  %v6667_v34 = vshrl.u32 %v12116_v0, 16  ;;  %v5570_v28 = vshrl.u32 %v13234_v45, 16  ;;  %v12119_v56 = vld [vmem:[%s12316_s29 + $0x68] sm:$0xff]   ;;  %v14480_v27 = vld [vmem:[#allocation5_spill] sm:$0xff] }
 0x165   : > { %v13241_v49 = vadd.f32 %v11469_v39, %v1994_v17  ;;  %v1992_v5 = vadd.f32 %v1835_v38, %v14476_v61  ;;  %11706 = vmatprep.mubr.msk.bf16.mxu0 %vm757_vm2, %v6629_v8  ;;  %v6670_v8 = vshll.u32 %v12116_v0, 16  ;;  %v5557_v47 = vrot.slane %v5555_v1, 3 }
 0x166   : > { %v11406_v55 = vpop.f32.mrf.mxu1  ;;  %11637 = vmatmul.mubr.msk.bf16.gmra.mxu1 %vm757_vm2, %v5514_v32  ;;  %v2955_v37 = vpop.f32.mrf.mxu0  ;;  %v6655_v32 = vor.u32 %v6654_v59, %v6651_v20  ;;  %v6660_v38 = vrot.slane %v6658_v40, 2  ;;  %v6663_v57 = vrot.slane %v6661_v63, 3  ;;  %v13260_v61 = vrot.slane %v5561_v2, 2  ;;  %v12120_v59 = vld [vmem:[%s12316_s29 + $0x70] sm:$0xff]  }
 0x167   : > { %14475 = vst [vmem:[#allocation44_spill] sm:$0xff] %v13241_v49  ;;  %v13251_v39 = vadd.f32 %v2942_v60, %v1992_v5  ;;  %v1997_v24 = vadd.f32 %v11406_v55, %v14478_v15  ;;  %11640 = vmatprep.mubr.msk.bf16.mxu1 %vm757_vm2, %v5523_v10  ;;  %v13262_v5 = vrot.slane %v5564_v31, 3  ;;  %v6647_v55 = vsel %vm5470_vm6, %v6637_v12, %v6646_v43 }
 0x168   : > { %v1848_v21 = vpop.f32.mrf.mxu1  ;;  %v11473_v17 = vpop.f32.mrf.mxu0  ;;  %v6669_v15 = vrot.slane %v6667_v34, 2  ;;  %v6676_v20 = vshrl.u32 %v12118_v13, 16  ;;  %v6672_v63 = vrot.slane %v6670_v8, 3  ;;  %v5541_v12 = vsel %vm5470_vm6, %v13210_v51, %v13248_v25  ;;  %v12121_v8 = vld [vmem:[%s12316_s29 + $0x70] sm:$0xff]  }
 0x169   : > { %14477 = vst [vmem:[#allocation3_spill] sm:$0xff] %v13251_v39  ;;  %v13257_v22 = vadd.f32 %v11472_v35, %v1997_v24  ;;  %v1995_v60 = vadd.f32 %v1848_v21, %v14480_v27  ;;  %v5573_v39 = vshll.u32 %v13234_v45, 16  ;;  %v14482_v35 = vld [vmem:[#allocation6_spill] sm:$0xff]  ;;  %v5572_v24 = vrot.slane %v5570_v28, 2  ;;  %v14484_v27 = vld [vmem:[#allocation7_spill] sm:$0xff] }
 0x16a   : > { %v11407_v10 = vpop.f32.mrf.mxu1  ;;  %v2958_v0 = vpop.f32.mrf.mxu0  ;;  %v6679_v31 = vshll.u32 %v12118_v13, 16  ;;  %v5579_v34 = vshrl.u32 %v12119_v56, 16  ;;  %v6664_v51 = vor.u32 %v6663_v57, %v6660_v38  ;;  %v12123_v38 = vld [vmem:[%s12316_s29 + $0x78] sm:$0xff]  }
 0x16b   : > { %14479 = vst [vmem:[#allocation4_spill] sm:$0xff] %v13257_v22  ;;  %v13267_v1 = vadd.f32 %v2955_v37, %v1995_v60  ;;  %v1998_v40 = vadd.f32 %v11407_v10, %v14482_v35  ;;  %v5582_v37 = vshll.u32 %v12119_v56, 16  ;;  %v5575_v13 = vrot.slane %v5573_v39, 3  ;;  %v14486_v35 = vld [vmem:[#allocation8_spill] sm:$0xff] }
 0x16c   : > { %v1851_v2 = vpop.f32.mrf.mxu1  ;;  %v11476_v21 = vpop.f32.mrf.mxu0  ;;  %11707 = vmatmul.mubr.msk.bf16.gmra.mxu0 %vm757_vm2, %v6638_v18  ;;  %v5549_v18 = vor.u32 %v13220_v9, %v13218_v14  ;;  %v6685_v10 = vshrl.u32 %v12120_v59, 16  ;;  %v6656_v56 = vsel %vm5470_vm6, %v6646_v43, %v6655_v32  ;;  %v6681_v14 = vrot.slane %v6679_v31, 3  ;;  %v12124_v31 = vld [vmem:[%s12316_s29 + $0x80] sm:$0xff]  }
 0x16d   : > { %14481 = vst [vmem:[#allocation5_spill] sm:$0xff] %v13267_v1  ;;  %v13274_v45 = vadd.f32 %v11473_v17, %v1998_v40  ;;  %v1996_v22 = vadd.f32 %v1851_v2, %v14484_v27  ;;  %11710 = vmatprep.mubr.msk.bf16.mxu0 %vm757_vm2, %v6647_v55  ;;  %v6678_v55 = vrot.slane %v6676_v20, 2  ;;  %v12122_v2 = vld [vmem:[%s12316_s29 + $0x78] sm:$0xff]   ;;  %v13289_v9 = vrot.slane %v5579_v34, 2 }
 0x16e   : > { %v11410_v28 = vpop.f32.mrf.mxu1  ;;  %11641 = vmatmul.mubr.msk.bf16.gmra.mxu1 %vm757_vm2, %v5532_v46  ;;  %v2971_v60 = vpop.f32.mrf.mxu0  ;;  %v6688_v39 = vshll.u32 %v12120_v59, 16  ;;  %v14489_v59 = vld [vmem:[#allocation10_spill] sm:$0xff]  ;;  %v6697_v1 = vshll.u32 %v12122_v2, 16 }
 0x16f   : > { %14483 = vst [vmem:[#allocation6_spill] sm:$0xff] %v13274_v45  ;;  %v13282_v17 = vadd.f32 %v2958_v0, %v1996_v22  ;;  %v2001_v40 = vadd.f32 %v11410_v28, %v14486_v35  ;;  %11644 = vmatprep.mubr.msk.bf16.mxu1 %vm757_vm2, %v5541_v12  ;;  %v5558_v45 = vor.u32 %v5557_v47, %v13223_v7  ;;  %v14488_v22 = vld [vmem:[#allocation9_spill] sm:$0xff]  ;;  %v13295_v28 = vrot.slane %v5582_v37, 3 }
 0x170   : > { %v1864_v27 = vpop.f32.mrf.mxu1  ;;  %v11477_v46 = vpop.f32.mrf.mxu0  ;;  %v5588_v12 = vshrl.u32 %v12121_v8, 16  ;;  %v5550_v35 = vsel %vm5470_vm6, %v13248_v25, %v5549_v18  ;;  %v6673_v7 = vor.u32 %v6672_v63, %v6669_v15  ;;  %v6687_v47 = vrot.slane %v6685_v10, 2 }
 0x171   : > { %14485 = vst [vmem:[#allocation7_spill] sm:$0xff] %v13282_v17  ;;  %v13292_v57 = vadd.f32 %v11476_v21, %v2001_v40  ;;  %v1999_v0 = vadd.f32 %v1864_v27, %v14488_v22  ;;  %v6665_v17 = vsel %vm5470_vm6, %v6655_v32, %v6664_v51  ;;  %v5591_v40 = vshll.u32 %v12121_v8, 16  ;;  %v14490_v32 = vld [vmem:[#allocation11_spill] sm:$0xff] }
 0x172   : > { %v11411_v43 = vpop.f32.mrf.mxu1  ;;  %v2974_v20 = vpop.f32.mrf.mxu0  ;;  %v5559_v22 = vsel %vm5470_vm6, %v5549_v18, %v5558_v45  ;;  %v5597_v25 = vshrl.u32 %v12123_v38, 16  ;;  %v6690_v63 = vrot.slane %v6688_v39, 3  ;;  %v6682_v18 = vor.u32 %v6681_v14, %v6678_v55  ;;  %v14494_v55 = vld [vmem:[#allocation13_spill] sm:$0xff] }
 0x173   : > { %14487 = vst [vmem:[#allocation8_spill] sm:$0xff] %v13292_v57  ;;  %v13301_v34 = vadd.f32 %v2971_v60, %v1999_v0  ;;  %v2002_v21 = vadd.f32 %v11411_v43, %v14489_v59  ;;  %v6694_v57 = vshrl.u32 %v12122_v2, 16  ;;  %v5600_v60 = vshll.u32 %v12123_v38, 16  ;;  %v14492_v59 = vld [vmem:[#allocation12_spill] sm:$0xff] }
 0x174   : > { %v1867_v27 = vpop.f32.mrf.mxu1  ;;  %v11480_v37 = vpop.f32.mrf.mxu0  ;;  %11711 = vmatmul.mubr.msk.bf16.gmra.mxu0 %vm757_vm2, %v6656_v56  ;;  %v5567_v56 = vor.u32 %v13262_v5, %v13260_v61  ;;  %v13313_v0 = vor.u32 %v5575_v13, %v5572_v24  ;;  %v5590_v2 = vrot.slane %v5588_v12, 2  ;;  %v5593_v39 = vrot.slane %v5591_v40, 3  ;;  %v12126_v38 = vld [vmem:[%s12316_s29 + $0x88] sm:$0xff]  }
 0x175   : > { %v13306_v49 = vadd.f32 %v11477_v46, %v2002_v21  ;;  %v2000_v15 = vadd.f32 %v1867_v27, %v14490_v32  ;;  %11714 = vmatprep.mubr.msk.bf16.mxu0 %vm757_vm2, %v6665_v17  ;;  %v12125_v46 = vld [vmem:[%s12316_s29 + $0x80] sm:$0xff]   ;;  %v6674_v17 = vsel %vm5470_vm6, %v6664_v51, %v6673_v7  ;;  %v6696_v32 = vrot.slane %v6694_v57, 2 }
 0x176   : > { %v11414_v8 = vpop.f32.mrf.mxu1  ;;  %11645 = vmatmul.mubr.msk.bf16.gmra.mxu1 %vm757_vm2, %v5550_v35  ;;  %v2987_v10 = vpop.f32.mrf.mxu0  ;;  %v6699_v61 = vrot.slane %v6697_v1, 3  ;;  %v13322_v5 = vrot.slane %v5597_v25, 2  ;;  %v6703_v24 = vshrl.u32 %v12124_v31, 16  ;;  %v13327_v12 = vrot.slane %v5600_v60, 3  ;;  %v12127_v1 = vld [vmem:[%s12316_s29 + $0x88] sm:$0xff]  }
 0x177   : > { %v13316_v43 = vadd.f32 %v2974_v20, %v2000_v15  ;;  %v2005_v21 = vadd.f32 %v11414_v8, %v14492_v59  ;;  %11648 = vmatprep.mubr.msk.bf16.mxu1 %vm757_vm2, %v5559_v22  ;;  %v6706_v20 = vshll.u32 %v12124_v31, 16  ;;  %v5568_v40 = vsel %vm5470_vm6, %v5558_v45, %v5567_v56  ;;  %v14495_v59 = vld [vmem:[#allocation14_spill] sm:$0xff]  ;;  %v12128_v45 = vld [vmem:[%s12316_s29 + $0x90] sm:$0xff]  }
 0x178   : > { %v1880_v35 = vpop.f32.mrf.mxu1  ;;  %v11481_v27 = vpop.f32.mrf.mxu0  ;;  %v6683_v15 = vsel %vm5470_vm6, %v6673_v7, %v6682_v18  ;;  %v6691_v8 = vor.u32 %v6690_v63, %v6687_v47  ;;  %v5606_v57 = vshrl.u32 %v12125_v46, 16  ;;  %v5577_v31 = vsel %vm5470_vm6, %v5567_v56, %v13313_v0  ;;  %v14497_v7 = vld [vmem:[#allocation15_spill] sm:$0xff] }
 0x179   : > { %14491 = vst [vmem:[#allocation9_spill] sm:$0xff] %v13316_v43  ;;  %v13324_v13 = vadd.f32 %v11480_v37, %v2005_v21  ;;  %v2003_v14 = vadd.f32 %v1880_v35, %v14494_v55  ;;  %v5609_v21 = vshll.u32 %v12125_v46, 16  ;;  %v6705_v55 = vrot.slane %v6703_v24, 2 }
 0x17a   : > { %v11415_v22 = vpop.f32.mrf.mxu1  ;;  %v2990_v51 = vpop.f32.mrf.mxu0  ;;  %v6708_v63 = vrot.slane %v6706_v20, 3  ;;  %v6700_v56 = vor.u32 %v6699_v61, %v6696_v32  ;;  %v5608_v24 = vrot.slane %v5606_v57, 2  ;;  %v6692_v20 = vsel %vm5470_vm6, %v6682_v18, %v6691_v8  ;;  %v12130_v32 = vld [vmem:[%s12316_s29 + $0x98] sm:$0xff]  }
 0x17b   : > { %14493 = vst [vmem:[#allocation10_spill] sm:$0xff] %v13324_v13  ;;  %v13332_v25 = vadd.f32 %v2987_v10, %v2003_v14  ;;  %v2006_v37 = vadd.f32 %v11415_v22, %v14495_v59  ;;  %v6712_v13 = vshrl.u32 %v12126_v38, 16  ;;  %v6715_v10 = vshll.u32 %v12126_v38, 16  ;;  %v14499_v59 = vld [vmem:[#allocation16_spill] sm:$0xff] }
 0x17c   : > { %v1883_v35 = vpop.f32.mrf.mxu1  ;;  %v11484_v60 = vpop.f32.mrf.mxu0  ;;  %11715 = vmatmul.mubr.msk.bf16.gmra.mxu0 %vm757_vm2, %v6674_v17  ;;  %v5585_v17 = vor.u32 %v13295_v28, %v13289_v9  ;;  %v5615_v22 = vshrl.u32 %v12127_v1, 16  ;;  %v5611_v38 = vrot.slane %v5609_v21, 3  ;;  %v5618_v9 = vshll.u32 %v12127_v1, 16 }
 0x17d   : > { %v13339_v43 = vadd.f32 %v11481_v27, %v2006_v37  ;;  %v2004_v47 = vadd.f32 %v1883_v35, %v14497_v7  ;;  %11718 = vmatprep.mubr.msk.bf16.mxu0 %vm757_vm2, %v6683_v15  ;;  %v12129_v15 = vld [vmem:[%s12316_s29 + $0x90] sm:$0xff]   ;;  %v5594_v7 = vor.u32 %v5593_v39, %v5590_v2  ;;  %v6721_v28 = vshrl.u32 %v12128_v45, 16  ;;  %v13362_v2 = vld [vmem:[%s12316_s29 + $0x98] sm:$0xff]  }
 0x17e   : > { %v11418_v46 = vpop.f32.mrf.mxu1  ;;  %11649 = vmatmul.mubr.msk.bf16.gmra.mxu1 %vm757_vm2, %v5568_v40  ;;  %v3003_v14 = vpop.f32.mrf.mxu0  ;;  %v5586_v18 = vsel %vm5470_vm6, %v13313_v0, %v5585_v17  ;;  %v6701_v21 = vsel %vm5470_vm6, %v6691_v8, %v6700_v56  ;;  %v5603_v8 = vor.u32 %v13327_v12, %v13322_v5 }
 0x17f   : > { %14496 = vst [vmem:[#allocation11_spill] sm:$0xff] %v13339_v43  ;;  %v13346_v27 = vadd.f32 %v2990_v51, %v2004_v47  ;;  %v2009_v37 = vadd.f32 %v11418_v46, %v14499_v59  ;;  %11652 = vmatprep.mubr.msk.bf16.mxu1 %vm757_vm2, %v5577_v31  ;;  %v6714_v43 = vrot.slane %v6712_v13, 2  ;;  %v14501_v51 = vld [vmem:[#allocation17_spill] sm:$0xff]  ;;  %v6717_v47 = vrot.slane %v6715_v10, 3  ;;  %v14503_v13 = vld [vmem:[#allocation18_spill] sm:$0xff] }
 0x180   : > { %v1896_v35 = vpop.f32.mrf.mxu1  ;;  %v11485_v40 = vpop.f32.mrf.mxu0  ;;  %v6724_v46 = vshll.u32 %v12128_v45, 16  ;;  %v5595_v0 = vsel %vm5470_vm6, %v5585_v17, %v5594_v7 }
 0x181   : > { %14498 = vst [vmem:[#allocation12_spill] sm:$0xff] %v13346_v27  ;;  %v13353_v61 = vadd.f32 %v11484_v60, %v2009_v37  ;;  %v2007_v57 = vadd.f32 %v1896_v35, %v14501_v51  ;;  %v13359_v27 = vrot.slane %v5615_v22, 2  ;;  %v6709_v60 = vor.u32 %v6708_v63, %v6705_v55  ;;  %v13368_v35 = vld [vmem:[%s12316_s29 + $0xa0] sm:$0xff]  }
 0x182   : > { %v11419_v31 = vpop.f32.mrf.mxu1  ;;  %v3006_v59 = vpop.f32.mrf.mxu0  ;;  %v5624_v37 = vshrl.u32 %v12129_v15, 16  ;;  %v5627_v22 = vshll.u32 %v12129_v15, 16  ;;  %v6730_v51 = vshrl.u32 %v12130_v32, 16  ;;  %v5620_v55 = vrot.slane %v5618_v9, 3  ;;  %v14507_v15 = vld [vmem:[#allocation20_spill] sm:$0xff] }
 0x183   : > { %14500 = vst [vmem:[#allocation13_spill] sm:$0xff] %v13353_v61  ;;  %v13364_v39 = vadd.f32 %v3003_v14, %v2007_v57  ;;  %v2010_v1 = vadd.f32 %v11419_v31, %v14503_v13  ;;  %v14505_v14 = vld [vmem:[#allocation19_spill] sm:$0xff]  ;;  %v6733_v63 = vshll.u32 %v12130_v32, 16  ;;  %v13379_v13 = vor.u32 %v5611_v38, %v5608_v24 }
 0x184   : > { %v1899_v45 = vpop.f32.mrf.mxu1  ;;  %v11488_v10 = vpop.f32.mrf.mxu0  ;;  %11719 = vmatmul.mubr.msk.bf16.gmra.mxu0 %vm757_vm2, %v6692_v20  ;;  %v6718_v17 = vor.u32 %v6717_v47, %v6714_v43  ;;  %v6726_v5 = vrot.slane %v6724_v46, 3  ;;  %v5633_v9 = vshrl.u32 %v13362_v2, 16  ;;  %v12133_v32 = vld [vmem:[%s12316_s29 + $0xa0] sm:$0xff]   ;;  %v5626_v24 = vrot.slane %v5624_v37, 2  ;;  %v14509_v46 = vld [vmem:[#allocation21_spill] sm:$0xff] }
 0x185   : > { %14502 = vst [vmem:[#allocation14_spill] sm:$0xff] %v13364_v39  ;;  %v13374_v61 = vadd.f32 %v11485_v40, %v2010_v1  ;;  %v2008_v57 = vadd.f32 %v1899_v45, %v14505_v14  ;;  %11722 = vmatprep.mubr.msk.bf16.mxu0 %vm757_vm2, %v6701_v21  ;;  %v6723_v39 = vrot.slane %v6721_v28, 2  ;;  %v6710_v21 = vsel %vm5470_vm6, %v6700_v56, %v6709_v60  ;;  %v12134_v14 = vld [vmem:[%s12316_s29 + $0xa8] sm:$0xff]  }
 0x186   : > { %v11422_v31 = vpop.f32.mrf.mxu1  ;;  %11653 = vmatmul.mubr.msk.bf16.gmra.mxu1 %vm757_vm2, %v5586_v18  ;;  %v3019_v20 = vpop.f32.mrf.mxu0  ;;  %v5629_v38 = vrot.slane %v5627_v22, 3  ;;  %v6732_v43 = vrot.slane %v6730_v51, 2  ;;  %v6739_v28 = vshrl.u32 %v13368_v35, 16  ;;  %v6735_v45 = vrot.slane %v6733_v63, 3  ;;  %v13398_v22 = vld [vmem:[%s12316_s29 + $0xa8] sm:$0xff]  }
 0x187   : > { %14504 = vst [vmem:[#allocation15_spill] sm:$0xff] %v13374_v61  ;;  %v13381_v12 = vadd.f32 %v3006_v59, %v2008_v57  ;;  %v2013_v40 = vadd.f32 %v11422_v31, %v14507_v15  ;;  %11656 = vmatprep.mubr.msk.bf16.mxu1 %vm757_vm2, %v5595_v0  ;;  %v5636_v0 = vshll.u32 %v13362_v2, 16  ;;  %v5604_v31 = vsel %vm5470_vm6, %v5594_v7, %v5603_v8 }
 0x188   : > { %v1912_v1 = vpop.f32.mrf.mxu1  ;;  %v11489_v18 = vpop.f32.mrf.mxu0  ;;  %v6719_v15 = vsel %vm5470_vm6, %v6709_v60, %v6718_v17  ;;  %v6742_v37 = vshll.u32 %v13368_v35, 16  ;;  %v5642_v63 = vshrl.u32 %v12133_v32, 16  ;;  %v5613_v7 = vsel %vm5470_vm6, %v5603_v8, %v13379_v13  ;;  %v14513_v35 = vld [vmem:[#allocation23_spill] sm:$0xff] }
 0x189   : > { %14506 = vst [vmem:[#allocation16_spill] sm:$0xff] %v13381_v12  ;;  %v13389_v47 = vadd.f32 %v11488_v10, %v2013_v40  ;;  %v2011_v59 = vadd.f32 %v1912_v1, %v14509_v46  ;;  %v6727_v12 = vor.u32 %v6726_v5, %v6723_v39  ;;  %v14511_v10 = vld [vmem:[#allocation22_spill] sm:$0xff]  ;;  %v5635_v1 = vrot.slane %v5633_v9, 2 }
 0x18a   : > { %v11423_v56 = vpop.f32.mrf.mxu1  ;;  %v3022_v57 = vpop.f32.mrf.mxu0  ;;  %v5645_v60 = vshll.u32 %v12133_v32, 16  ;;  %v6744_v8 = vrot.slane %v6742_v37, 3  ;;  %v5651_v32 = vshrl.u32 %v13398_v22, 16  ;;  %v14517_v37 = vld [vmem:[#allocation25_spill] sm:$0xff] }
 0x18b   : > { %14508 = vst [vmem:[#allocation17_spill] sm:$0xff] %v13389_v47  ;;  %v13400_v51 = vadd.f32 %v3019_v20, %v2011_v59  ;;  %v2014_v40 = vadd.f32 %v11423_v56, %v14511_v10  ;;  %v6741_v47 = vrot.slane %v6739_v28, 2  ;;  %v6748_v20 = vshrl.u32 %v12134_v14, 16  ;;  %v14515_v28 = vld [vmem:[#allocation24_spill] sm:$0xff] }
 0x18c   : > { %v1915_v46 = vpop.f32.mrf.mxu1  ;;  %v11492_v2 = vpop.f32.mrf.mxu0  ;;  %11723 = vmatmul.mubr.msk.bf16.gmra.mxu0 %vm757_vm2, %v6710_v21  ;;  %v6751_v59 = vshll.u32 %v12134_v14, 16  ;;  %v5621_v21 = vor.u32 %v5620_v55, %v13359_v27  ;;  %v6736_v10 = vor.u32 %v6735_v45, %v6732_v43  ;;  %v6728_v14 = vsel %vm5470_vm6, %v6718_v17, %v6727_v12  ;;  %v12137_v45 = vld [vmem:[%s12316_s29 + $0xb0] sm:$0xff]  }
 0x18d   : > { %14510 = vst [vmem:[#allocation18_spill] sm:$0xff] %v13400_v51  ;;  %v13406_v39 = vadd.f32 %v11489_v18, %v2014_v40  ;;  %v2012_v5 = vadd.f32 %v1915_v46, %v14513_v35  ;;  %11726 = vmatprep.mubr.msk.bf16.mxu0 %vm757_vm2, %v6719_v15  ;;  %v5638_v15 = vrot.slane %v5636_v0, 3  ;;  %v12136_v46 = vld [vmem:[%s12316_s29 + $0xb0] sm:$0xff]   ;;  %v5644_v27 = vrot.slane %v5642_v63, 2 }
 0x18e   : > { %v11426_v9 = vpop.f32.mrf.mxu1  ;;  %11657 = vmatmul.mubr.msk.bf16.gmra.mxu1 %vm757_vm2, %v5604_v31  ;;  %v3035_v56 = vpop.f32.mrf.mxu0  ;;  %v5647_v55 = vrot.slane %v5645_v60, 3  ;;  %v5654_v43 = vshll.u32 %v13398_v22, 16  ;;  %v5622_v0 = vsel %vm5470_vm6, %v13379_v13, %v5621_v21  ;;  %v5653_v63 = vrot.slane %v5651_v32, 2  ;;  %v12139_v60 = vld [vmem:[%s12316_s29 + $0xb8] sm:$0xff]  }
 0x18f   : > { %14512 = vst [vmem:[#allocation19_spill] sm:$0xff] %v13406_v39  ;;  %v13413_v18 = vadd.f32 %v3022_v57, %v2012_v5  ;;  %v2017_v40 = vadd.f32 %v11426_v9, %v14515_v28  ;;  %11660 = vmatprep.mubr.msk.bf16.mxu1 %vm757_vm2, %v5613_v7  ;;  %v5630_v39 = vor.u32 %v5629_v38, %v5626_v24  ;;  %v6750_v9 = vrot.slane %v6748_v20, 2  ;;  %v12138_v7 = vld [vmem:[%s12316_s29 + $0xb8] sm:$0xff]  }
 0x190   : > { %v1928_v31 = vpop.f32.mrf.mxu1  ;;  %v11493_v35 = vpop.f32.mrf.mxu0  ;;  %v6753_v28 = vrot.slane %v6751_v59, 3  ;;  %v6737_v24 = vsel %vm5470_vm6, %v6727_v12, %v6736_v10  ;;  %v6745_v38 = vor.u32 %v6744_v8, %v6741_v47  ;;  %v14518_v22 = vld [vmem:[#allocation26_spill] sm:$0xff]  ;;  %v5660_v13 = vshrl.u32 %v12137_v45, 16  ;;  %v14520_v47 = vld [vmem:[#allocation27_spill] sm:$0xff] }
 0x191   : > { %14514 = vst [vmem:[#allocation20_spill] sm:$0xff] %v13413_v18  ;;  %v13421_v57 = vadd.f32 %v11492_v2, %v2017_v40  ;;  %v2015_v5 = vadd.f32 %v1928_v31, %v14517_v37  ;;  %v6757_v40 = vshrl.u32 %v12136_v46, 16  ;;  %v5631_v59 = vsel %vm5470_vm6, %v5621_v21, %v5630_v39 }
 0x192   : > { %v11427_v18 = vpop.f32.mrf.mxu1  ;;  %v3038_v17 = vpop.f32.mrf.mxu0  ;;  %v5639_v37 = vor.u32 %v5638_v15, %v5635_v1  ;;  %v5663_v61 = vshll.u32 %v12137_v45, 16  ;;  %v6769_v32 = vshll.u32 %v12138_v7, 16  ;;  %v6754_v21 = vor.u32 %v6753_v28, %v6750_v9  ;;  %v12140_v1 = vld [vmem:[%s12316_s29 + $0xc0] sm:$0xff]  }
 0x193   : > { %14516 = vst [vmem:[#allocation21_spill] sm:$0xff] %v13421_v57  ;;  %v13429_v51 = vadd.f32 %v3035_v56, %v2015_v5  ;;  %v2018_v2 = vadd.f32 %v11427_v18, %v14518_v22  ;;  %v6760_v57 = vshll.u32 %v12136_v46, 16  ;;  %v6766_v56 = vshrl.u32 %v12138_v7, 16 }
 0x194   : > { %v1931_v31 = vpop.f32.mrf.mxu1  ;;  %v11496_v20 = vpop.f32.mrf.mxu0  ;;  %11727 = vmatmul.mubr.msk.bf16.gmra.mxu0 %vm757_vm2, %v6728_v14  ;;  %v6746_v14 = vsel %vm5470_vm6, %v6736_v10, %v6745_v38  ;;  %v5648_v5 = vor.u32 %v5647_v55, %v5644_v27  ;;  %v5656_v22 = vrot.slane %v5654_v43, 3  ;;  %v5672_v10 = vshll.u32 %v12139_v60, 16  ;;  %v14524_v55 = vld [vmem:[#allocation29_spill] sm:$0xff] }
 0x195   : > { %v13434_v12 = vadd.f32 %v11493_v35, %v2018_v2  ;;  %v2016_v8 = vadd.f32 %v1931_v31, %v14520_v47  ;;  %11730 = vmatprep.mubr.msk.bf16.mxu0 %vm757_vm2, %v6737_v24  ;;  %v14522_v35 = vld [vmem:[#allocation28_spill] sm:$0xff]  ;;  %v6759_v2 = vrot.slane %v6757_v40, 2  ;;  %v6762_v24 = vrot.slane %v6760_v57, 3 }
 0x196   : > { %v11430_v18 = vpop.f32.mrf.mxu1  ;;  %11661 = vmatmul.mubr.msk.bf16.gmra.mxu1 %vm757_vm2, %v5622_v0  ;;  %v3051_v46 = vpop.f32.mrf.mxu0  ;;  %v5662_v0 = vrot.slane %v5660_v13, 2  ;;  %v5665_v47 = vrot.slane %v5663_v61, 3  ;;  %v6768_v9 = vrot.slane %v6766_v56, 2  ;;  %v6771_v28 = vrot.slane %v6769_v32, 3  ;;  %v14525_v61 = vld [vmem:[#allocation30_spill] sm:$0xff] }
 0x197   : > { %14519 = vst [vmem:[#allocation22_spill] sm:$0xff] %v13434_v12  ;;  %v13441_v15 = vadd.f32 %v3038_v17, %v2016_v8  ;;  %v2021_v45 = vadd.f32 %v11430_v18, %v14522_v35  ;;  %11664 = vmatprep.mubr.msk.bf16.mxu1 %vm757_vm2, %v5631_v59  ;;  %v5669_v12 = vshrl.u32 %v12139_v60, 16  ;;  %v5640_v59 = vsel %vm5470_vm6, %v5630_v39, %v5639_v37  ;;  %v12141_v18 = vld [vmem:[%s12316_s29 + $0xc0] sm:$0xff]   ;;  %v12142_v35 = vld [vmem:[%s12316_s29 + $0xc8] sm:$0xff]  }
 0x198   : > { %v1944_v7 = vpop.f32.mrf.mxu1  ;;  %v11497_v31 = vpop.f32.mrf.mxu0  ;;  %v5649_v57 = vsel %vm5470_vm6, %v5639_v37, %v5648_v5  ;;  %v6755_v40 = vsel %vm5470_vm6, %v6745_v38, %v6754_v21  ;;  %v5657_v56 = vor.u32 %v5656_v22, %v5653_v63  ;;  %v6763_v32 = vor.u32 %v6762_v24, %v6759_v2  ;;  %v14527_v38 = vld [vmem:[#allocation31_spill] sm:$0xff] }
 0x199   : > { %14521 = vst [vmem:[#allocation23_spill] sm:$0xff] %v13441_v15  ;;  %v13445_v27 = vadd.f32 %v11496_v20, %v2021_v45  ;;  %v2019_v43 = vadd.f32 %v1944_v7, %v14524_v55  ;;  %v6775_v20 = vshrl.u32 %v12140_v1, 16  ;;  %v6778_v45 = vshll.u32 %v12140_v1, 16 }
 0x19a   : > { %v11431_v17 = vpop.f32.mrf.mxu1  ;;  %v3054_v8 = vpop.f32.mrf.mxu0  ;;  %v13457_v55 = vor.u32 %v5665_v47, %v5662_v0  ;;  %v5671_v39 = vrot.slane %v5669_v12, 2  ;;  %v5681_v63 = vshll.u32 %v12141_v18, 16  ;;  %v6784_v22 = vshrl.u32 %v12142_v35, 16 }
 0x19b   : > { %14523 = vst [vmem:[#allocation24_spill] sm:$0xff] %v13445_v27  ;;  %v13453_v13 = vadd.f32 %v3051_v46, %v2019_v43  ;;  %v2022_v60 = vadd.f32 %v11431_v17, %v14525_v61  ;;  %v6772_v46 = vor.u32 %v6771_v28, %v6768_v9  ;;  %v5674_v43 = vrot.slane %v5672_v10, 3  ;;  %v12143_v28 = vld [vmem:[%s12316_s29 + $0xc8] sm:$0xff]  }
 0x19c   : > { %v1947_v27 = vpop.f32.mrf.mxu1  ;;  %v11568_v7 = vpop.f32.mrf.mxu0  ;;  %11731 = vmatmul.mubr.msk.bf16.gmra.mxu0 %vm757_vm2, %v6746_v14  ;;  %v5678_v14 = vshrl.u32 %v12141_v18, 16  ;;  %v6787_v2 = vshll.u32 %v12142_v35, 16  ;;  %v6780_v0 = vrot.slane %v6778_v45, 3  ;;  %v6764_v9 = vsel %vm5470_vm6, %v6754_v21, %v6763_v32  ;;  %v12146_v45 = vld [vmem:[%s12316_s29 + $0xd8] sm:$0xff]  }
 0x19d   : > { %v13459_v37 = vadd.f32 %v11497_v31, %v2022_v60  ;;  %v2020_v15 = vadd.f32 %v1947_v27, %v14527_v38  ;;  %11734 = vmatprep.mubr.msk.bf16.mxu0 %vm757_vm2, %v6755_v40  ;;  %v6777_v31 = vrot.slane %v6775_v20, 2  ;;  %v5658_v27 = vsel %vm5470_vm6, %v5648_v5, %v5657_v56  ;;  %v14530_v38 = vld [vmem:[#allocation32_spill] sm:$0xff] }
 0x19e   : > { %v11502_v17 = vpop.f32.mrf.mxu1  ;;  %11665 = vmatmul.mubr.msk.bf16.gmra.mxu1 %vm757_vm2, %v5640_v59  ;;  %v4793_v1 = vpop.f32.mrf.mxu0  ;;  %v12144_v59 = vld [vmem:[%s12316_s29 + $0xd0] sm:$0xff]   ;;  %v5680_v61 = vrot.slane %v5678_v14, 2  ;;  %v5683_v60 = vrot.slane %v5681_v63, 3  ;;  %v6786_v20 = vrot.slane %v6784_v22, 2  ;;  %v6789_v5 = vrot.slane %v6787_v2, 3 }
 0x19f   : > { %14526 = vst [vmem:[#allocation25_spill] sm:$0xff] %v13459_v37  ;;  %v13464_v12 = vadd.f32 %v3054_v8, %v2020_v15  ;;  %v4174_v24 = vadd.f32 %v11502_v17, %v12929_v3  ;;  %11668 = vmatprep.mubr.msk.bf16.mxu1 %vm757_vm2, %v5649_v57  ;;  %v5667_v3 = vsel %vm5470_vm6, %v5657_v56, %v13457_v55  ;;  %v12145_v57 = vld [vmem:[%s12316_s29 + $0xd0] sm:$0xff]   ;;  %v5687_v56 = vshrl.u32 %v12143_v28, 16 }
 0x1a0   : > { %v3917_v47 = vpop.f32.mrf.mxu1  ;;  %v11569_v10 = vpop.f32.mrf.mxu0  ;;  %v6773_v8 = vsel %vm5470_vm6, %v6763_v32, %v6772_v46  ;;  %v5675_v17 = vor.u32 %v5674_v43, %v5671_v39  ;;  %v5690_v32 = vshll.u32 %v12143_v28, 16  ;;  %v14531_v14 = vld [vmem:[#allocation33_spill] sm:$0xff]  ;;  %v5699_v22 = vshll.u32 %v12145_v57, 16 }
 0x1a1   : > { %14528 = vst [vmem:[#allocation26_spill] sm:$0xff] %v13464_v12  ;;  %v13472_v40 = vadd.f32 %v11568_v7, %v4174_v24  ;;  %v4172_v15 = vadd.f32 %v3917_v47, %v12939_v48  ;;  %v6781_v24 = vor.u32 %v6780_v0, %v6777_v31  ;;  %v6796_v12 = vshll.u32 %v12144_v59, 16 }
 0x1a2   : > { %v11503_v18 = vpop.f32.mrf.mxu1  ;;  %v4796_v35 = vpop.f32.mrf.mxu0  ;;  %v5684_v43 = vor.u32 %v5683_v60, %v5680_v61  ;;  %v6790_v31 = vor.u32 %v6789_v5, %v6786_v20  ;;  %v6802_v0 = vshrl.u32 %v12146_v45, 16  ;;  %v5689_v61 = vrot.slane %v5687_v56, 2 }
 0x1a3   : > { %14529 = vst [vmem:[#allocation27_spill] sm:$0xff] %v13472_v40  ;;  %v13480_v21 = vadd.f32 %v4793_v1, %v4172_v15  ;;  %v4175_v7 = vadd.f32 %v11503_v18, %v14530_v38  ;;  %v6793_v40 = vshrl.u32 %v12144_v59, 16  ;;  %v5696_v1 = vshrl.u32 %v12145_v57, 16  ;;  %v12148_v57 = vld [vmem:[%s12316_s29 + $0xe0] sm:$0xff]  }
 0x1a4   : > { %v3920_v48 = vpop.f32.mrf.mxu1  ;;  %v11572_v47 = vpop.f32.mrf.mxu0  ;;  %11735 = vmatmul.mubr.msk.bf16.gmra.mxu0 %vm757_vm2, %v6764_v9  ;;  %v6805_v9 = vshll.u32 %v12146_v45, 16  ;;  %v5676_v15 = vsel %vm5470_vm6, %v13457_v55, %v5675_v17  ;;  %v5692_v60 = vrot.slane %v5690_v32, 3  ;;  %v6798_v5 = vrot.slane %v6796_v12, 3 }
 0x1a5   : > { %v13484_v37 = vadd.f32 %v11569_v10, %v4175_v7  ;;  %v4173_v63 = vadd.f32 %v3920_v48, %v14531_v14  ;;  %11738 = vmatprep.mubr.msk.bf16.mxu0 %vm757_vm2, %v6773_v8  ;;  %v14532_v10 = vld [vmem:[#allocation34_spill] sm:$0xff]  ;;  %v6782_v8 = vsel %vm5470_vm6, %v6772_v46, %v6781_v24  ;;  %v6795_v20 = vrot.slane %v6793_v40, 2 }
 0x1a6   : > { %v11506_v2 = vpop.f32.mrf.mxu1  ;;  %11669 = vmatmul.mubr.msk.bf16.gmra.mxu1 %vm757_vm2, %v5658_v27  ;;  %v4809_v39 = vpop.f32.mrf.mxu0  ;;  %v5698_v7 = vrot.slane %v5696_v1, 2  ;;  %v12147_v48 = vld [vmem:[%s12316_s29 + $0xd8] sm:$0xff]   ;;  %v5685_v46 = vsel %vm5470_vm6, %v5675_v17, %v5684_v43  ;;  %v6807_v56 = vrot.slane %v6805_v9, 3  ;;  %v6811_v40 = vshrl.u32 %v12148_v57, 16 }
 0x1a7   : > { %v13489_v28 = vadd.f32 %v4796_v35, %v4173_v63  ;;  %v4178_v59 = vadd.f32 %v11506_v2, %v14532_v10  ;;  %11672 = vmatprep.mubr.msk.bf16.mxu1 %vm757_vm2, %v5667_v3  ;;  %v12150_v35 = vld [vmem:[%s12316_s29 + $0xe8] sm:$0xff]   ;;  %v5701_v3 = vrot.slane %v5699_v22, 3  ;;  %v6791_v63 = vsel %vm5470_vm6, %v6781_v24, %v6790_v31  ;;  %v12149_v10 = vld [vmem:[%s12316_s29 + $0xe0] sm:$0xff]  }
 0x1a8   : > { %v3933_v27 = vpop.f32.mrf.mxu1  ;;  %v11573_v18 = vpop.f32.mrf.mxu0  ;;  %v6804_v2 = vrot.slane %v6802_v0, 2  ;;  %v5693_v1 = vor.u32 %v5692_v60, %v5689_v61  ;;  %v6799_v22 = vor.u32 %v6798_v5, %v6795_v20  ;;  %v14534_v24 = vld [vmem:[#allocation35_spill] sm:$0xff]  ;;  %v5714_v61 = vshrl.u32 %v12149_v10, 16 }
 0x1a9   : > { %v13498_v45 = vadd.f32 %v11572_v47, %v4178_v59  ;;  %v4176_v38 = vadd.f32 %v3933_v27, %v12967_v52  ;;  %v6814_v47 = vshll.u32 %v12148_v57, 16  ;;  %v6820_v27 = vshrl.u32 %v12150_v35, 16 }
 0x1aa   : > { %v11507_v14 = vpop.f32.mrf.mxu1  ;;  %v4812_v55 = vpop.f32.mrf.mxu0  ;;  %v5717_v60 = vshll.u32 %v12149_v10, 16  ;;  %v6813_v5 = vrot.slane %v6811_v40, 2  ;;  %v14537_v10 = vld [vmem:[#allocation36_spill] sm:$0xff]  ;;  %v12153_v40 = vld [vmem:[%s12316_s29 + $0xf0] sm:$0xff]  }
 0x1ab   : > { %14533 = vst [vmem:[#allocation28_spill] sm:$0xff] %v13498_v45  ;;  %v13505_v32 = vadd.f32 %v4809_v39, %v4176_v38  ;;  %v4179_v12 = vadd.f32 %v11507_v14, %v12973_v4  ;;  %v6823_v45 = vshll.u32 %v12150_v35, 16  ;;  %v13513_v39 = vor.u32 %v5701_v3, %v5698_v7  ;;  %v12151_v7 = vld [vmem:[%s12316_s29 + $0xe8] sm:$0xff]  }
 0x1ac   : > { %v3936_v59 = vpop.f32.mrf.mxu1  ;;  %v11576_v52 = vpop.f32.mrf.mxu0  ;;  %11739 = vmatmul.mubr.msk.bf16.gmra.mxu0 %vm757_vm2, %v6782_v8  ;;  %v5705_v4 = vshrl.u32 %v12147_v48, 16  ;;  %v6808_v38 = vor.u32 %v6807_v56, %v6804_v2  ;;  %v5708_v8 = vshll.u32 %v12147_v48, 16  ;;  %v6816_v35 = vrot.slane %v6814_v47, 3  ;;  %v12152_v56 = vld [vmem:[%s12316_s29 + $0xf0] sm:$0xff]  }
 0x1ad   : > { %v13509_v17 = vadd.f32 %v11573_v18, %v4179_v12  ;;  %v4177_v0 = vadd.f32 %v3936_v59, %v14534_v24  ;;  %11742 = vmatprep.mubr.msk.bf16.mxu0 %vm757_vm2, %v6791_v63  ;;  %v6800_v63 = vsel %vm5470_vm6, %v6790_v31, %v6799_v22  ;;  %v6822_v48 = vrot.slane %v6820_v27, 2  ;;  %v12154_v31 = vld [vmem:[%s12316_s29 + $0xf8] sm:$0xff]  }
 0x1ae   : > { %v11510_v9 = vpop.f32.mrf.mxu1  ;;  %11673 = vmatmul.mubr.msk.bf16.gmra.mxu1 %vm757_vm2, %v5676_v15  ;;  %v4825_v57 = vpop.f32.mrf.mxu0  ;;  %v5694_v15 = vsel %vm5470_vm6, %v5684_v43, %v5693_v1  ;;  %v6825_v2 = vrot.slane %v6823_v45, 3  ;;  %v5707_v12 = vrot.slane %v5705_v4, 2  ;;  %v6809_v24 = vsel %vm5470_vm6, %v6799_v22, %v6808_v38  ;;  %v14539_v45 = vld [vmem:[#allocation37_spill] sm:$0xff] }
 0x1af   : > { %v13516_v20 = vadd.f32 %v4812_v55, %v4177_v0  ;;  %v4182_v18 = vadd.f32 %v11510_v9, %v12991_v54  ;;  %11676 = vmatprep.mubr.msk.bf16.mxu1 %vm757_vm2, %v5685_v46  ;;  %v5703_v46 = vsel %vm5470_vm6, %v5693_v1, %v13513_v39  ;;  %v5710_v43 = vrot.slane %v5708_v8, 3 }
 0x1b0   : > { %v3949_v3 = vpop.f32.mrf.mxu1  ;;  %v11577_v14 = vpop.f32.mrf.mxu0  ;;  %v5716_v0 = vrot.slane %v5714_v61, 2  ;;  %v5719_v9 = vrot.slane %v5717_v60, 3  ;;  %v13536_v1 = vor.u32 %v6825_v2, %v6822_v48  ;;  %v5726_v4 = vshll.u32 %v12151_v7, 16  ;;  %v14541_v61 = vld [vmem:[#allocation38_spill] sm:$0xff] }
 0x1b1   : > { %14535 = vst [vmem:[#allocation29_spill] sm:$0xff] %v13516_v20  ;;  %v13524_v55 = vadd.f32 %v11576_v52, %v4182_v18  ;;  %v4180_v54 = vadd.f32 %v3949_v3, %v14537_v10  ;;  %v6817_v18 = vor.u32 %v6816_v35, %v6813_v5  ;;  %v6829_v20 = vshrl.u32 %v12152_v56, 16  ;;  %v12155_v2 = vld [vmem:[%s12316_s29 + $0xf8] sm:$0xff]  }
 0x1b2   : > { %v11511_v47 = vpop.f32.mrf.mxu1  ;;  %v4828_v59 = vpop.f32.mrf.mxu0  ;;  %v6832_v22 = vshll.u32 %v12152_v56, 16  ;;  %v6841_v48 = vshll.u32 %v12154_v31, 16 }
 0x1b3   : > { %14536 = vst [vmem:[#allocation30_spill] sm:$0xff] %v13524_v55  ;;  %v13532_v27 = vadd.f32 %v4825_v57, %v4180_v54  ;;  %v4183_v52 = vadd.f32 %v11511_v47, %v14539_v45  ;;  %v5723_v55 = vshrl.u32 %v12151_v7, 16  ;;  %v5732_v57 = vshrl.u32 %v12153_v40, 16 }
 0x1b4   : > { %v3952_v3 = vpop.f32.mrf.mxu1  ;;  %v11580_v10 = vpop.f32.mrf.mxu0  ;;  %11743 = vmatmul.mubr.msk.bf16.gmra.mxu0 %vm757_vm2, %v6800_v63  ;;  %v5735_v54 = vshll.u32 %v12153_v40, 16  ;;  %v5711_v47 = vor.u32 %v5710_v43, %v5707_v12  ;;  %v13543_v63 = vor.u32 %v5719_v9, %v5716_v0  ;;  %v6838_v7 = vshrl.u32 %v12154_v31, 16  ;;  %v12158_v31 = vld [vmem:[%s12316_s29 + $0x108] sm:$0xff]  }
 0x1b5   : > { %14538 = vst [vmem:[#allocation31_spill] sm:$0xff] %v13532_v27  ;;  %v13538_v8 = vadd.f32 %v11577_v14, %v4183_v52  ;;  %v4181_v60 = vadd.f32 %v3952_v3, %v14541_v61  ;;  %11746 = vmatprep.mubr.msk.bf16.mxu0 %vm757_vm2, %v6809_v24  ;;  %v6818_v40 = vsel %vm5470_vm6, %v6808_v38, %v6817_v18  ;;  %v5725_v24 = vrot.slane %v5723_v55, 2  ;;  %v12156_v52 = vld [vmem:[%s12316_s29 + $0x100] sm:$0xff]  }
 0x1b6   : > { %v11514_v5 = vpop.f32.mrf.mxu1  ;;  %11677 = vmatmul.mubr.msk.bf16.gmra.mxu1 %vm757_vm2, %v5694_v15  ;;  %v4841_v35 = vpop.f32.mrf.mxu0  ;;  %v6827_v12 = vsel %vm5470_vm6, %v6817_v18, %v13536_v1  ;;  %v5728_v43 = vrot.slane %v5726_v4, 3  ;;  %v6831_v0 = vrot.slane %v6829_v20, 2  ;;  %v6834_v9 = vrot.slane %v6832_v22, 3  ;;  %v14544_v3 = vld [vmem:[#allocation39_spill] sm:$0xff]  ;;  %v14546_v18 = vld [vmem:[#allocation40_spill] sm:$0xff] }
 0x1b7   : > { %14540 = vst [vmem:[#allocation32_spill] sm:$0xff] %v13538_v8  ;;  %v13546_v14 = vadd.f32 %v4828_v59, %v4181_v60  ;;  %v4186_v56 = vadd.f32 %v11514_v5, %v13029_v16  ;;  %11680 = vmatprep.mubr.msk.bf16.mxu1 %vm757_vm2, %v5703_v46  ;;  %v5734_v61 = vrot.slane %v5732_v57, 2  ;;  %v5737_v46 = vrot.slane %v5735_v54, 3  ;;  %v12157_v22 = vld [vmem:[%s12316_s29 + $0x100] sm:$0xff]  }
 0x1b8   : > { %v3965_v45 = vpop.f32.mrf.mxu1  ;;  %v11581_v15 = vpop.f32.mrf.mxu0  ;;  %v6840_v55 = vrot.slane %v6838_v7, 2  ;;  %v6843_v5 = vrot.slane %v6841_v48, 3  ;;  %v5744_v8 = vshll.u32 %v12155_v2, 16  ;;  %v5712_v4 = vsel %vm5470_vm6, %v13513_v39, %v5711_v47 }
 0x1b9   : > { %14542 = vst [vmem:[#allocation33_spill] sm:$0xff] %v13546_v14  ;;  %v13555_v59 = vadd.f32 %v11580_v10, %v4186_v56  ;;  %v4184_v16 = vadd.f32 %v3965_v45, %v14544_v3  ;;  %v5741_v14 = vshrl.u32 %v12155_v2, 16  ;;  %v5721_v10 = vsel %vm5470_vm6, %v5711_v47, %v13543_v63 }
 0x1ba   : > { %v11515_v60 = vpop.f32.mrf.mxu1  ;;  %v4844_v38 = vpop.f32.mrf.mxu0  ;;  %v6847_v54 = vshrl.u32 %v12156_v52, 16  ;;  %v6850_v7 = vshll.u32 %v12156_v52, 16  ;;  %v6856_v48 = vshrl.u32 %v12158_v31, 16  ;;  %v6859_v45 = vshll.u32 %v12158_v31, 16 }
 0x1bb   : > { %14543 = vst [vmem:[#allocation34_spill] sm:$0xff] %v13555_v59  ;;  %v13558_v27 = vadd.f32 %v4841_v35, %v4184_v16  ;;  %v4187_v20 = vadd.f32 %v11515_v60, %v14546_v18  ;;  %v14547_v35 = vld [vmem:[#allocation41_spill] sm:$0xff]  ;;  %v5729_v16 = vor.u32 %v5728_v43, %v5725_v24  ;;  %v6835_v39 = vor.u32 %v6834_v9, %v6831_v0 }
 0x1bc   : > { %v3968_v56 = vpop.f32.mrf.mxu1  ;;  %v11584_v57 = vpop.f32.mrf.mxu0  ;;  %11747 = vmatmul.mubr.msk.bf16.gmra.mxu0 %vm757_vm2, %v6818_v40  ;;  %v5738_v18 = vor.u32 %v5737_v46, %v5734_v61  ;;  %v5743_v59 = vrot.slane %v5741_v14, 2  ;;  %v5746_v40 = vrot.slane %v5744_v8, 3  ;;  %v5750_v31 = vshrl.u32 %v12157_v22, 16  ;;  %v12160_v46 = vld [vmem:[%s12316_s29 + $0x110] ss:$0 sps:$4 sm:$0x77]  }
 0x1bd   : > { %14545 = vst [vmem:[#allocation35_spill] sm:$0xff] %v13558_v27  ;;  %v13567_v2 = vadd.f32 %v11581_v15, %v4187_v20  ;;  %v4185_v3 = vadd.f32 %v3968_v56, %v14547_v35  ;;  %11750 = vmatprep.mubr.msk.bf16.mxu0 %vm757_vm2, %v6827_v12  ;;  %v6844_v27 = vor.u32 %v6843_v5, %v6840_v55  ;;  %v5753_v12 = vshll.u32 %v12157_v22, 16  ;;  %v12164_v22 = vld [vmem:[%s12316_s29 + $0x18] sm:$0xff]  }
 0x1be   : > { %v11518_v60 = vpop.f32.mrf.mxu1  ;;  %11681 = vmatmul.mubr.msk.bf16.gmra.mxu1 %vm757_vm2, %v5712_v4  ;;  %v4857_v47 = vpop.f32.mrf.mxu0  ;;  %v6849_v0 = vrot.slane %v6847_v54, 2  ;;  %v6852_v9 = vrot.slane %v6850_v7, 3  ;;  %v6858_v20 = vrot.slane %v6856_v48, 2  ;;  %v6861_v61 = vrot.slane %v6859_v45, 3 }
 0x1bf   : > { %v13572_v52 = vadd.f32 %v4844_v38, %v4185_v3  ;;  %v4190_v15 = vadd.f32 %v11518_v60, %v13071_v26  ;;  %11684 = vmatprep.mubr.msk.bf16.mxu1 %vm757_vm2, %v5721_v10  ;;  %v6836_v26 = vsel %vm5470_vm6, %v13536_v1, %v6835_v39  ;;  %v5730_v5 = vsel %vm5470_vm6, %v13543_v63, %v5729_v16  ;;  %v12163_v10 = vld [vmem:[%s12316_s29 + $0x10] sm:$0xf8]   ;;  %v12159_v7 = vld [vmem:[%s12316_s29 + $0x108] ss:$0 sps:$4 sm:$0x77]  }
 0x1c0   : > { %v3981_v24 = vpop.f32.mrf.mxu1  ;;  %v11585_v43 = vpop.f32.mrf.mxu0  ;;  %v6845_v4 = vsel %vm5470_vm6, %v6835_v39, %v6844_v27  ;;  %v5739_v54 = vsel %vm5470_vm6, %v5729_v16, %v5738_v18  ;;  %v6853_v45 = vor.u32 %v6852_v9, %v6849_v0  ;;  %v5752_v35 = vrot.slane %v5750_v31, 2 }
 0x1c1   : > { %v13576_v14 = vadd.f32 %v11584_v57, %v4190_v15  ;;  %v4188_v8 = vadd.f32 %v3981_v24, %v13074_v50  ;;  %v5747_v50 = vor.u32 %v5746_v40, %v5743_v59  ;;  %v5755_v3 = vrot.slane %v5753_v12, 3 }
 0x1c2   : > { %v11519_v38 = vpop.f32.mrf.mxu1  ;;  %v4860_v55 = vpop.f32.mrf.mxu0  ;;  %v13593_v63 = vor.u32 %v6861_v61, %v6858_v20  ;;  %v8561_v40 = vshrl.u32 %v12163_v10, 16  ;;  %v8564_v15 = vshll.u32 %v12163_v10, 16  ;;  %v8569_v24 = vshrl.u32 %v12164_v22, 16 }
 0x1c3   : > { %v13587_v56 = vadd.f32 %v4857_v47, %v4188_v8  ;;  %v4191_v57 = vadd.f32 %v11519_v38, %v13078_v44  ;;  %v6865_v44 = vshrl.u32 %v12160_v46, 16  ;;  %v6868_v47 = vshll.u32 %v12160_v46, 16  ;;  %v12166_v38 = vld [vmem:[%s12316_s29 + $0x20] sm:$0xff]  }
 0x1c4   : > { %v3984_v48 = vpop.f32.mrf.mxu1  ;;  %v11588_v1 = vpop.f32.mrf.mxu0  ;;  %11751 = vmatmul.mubr.msk.bf16.gmra.mxu0 %vm757_vm2, %v6836_v26  ;;  %v8572_v31 = vshll.u32 %v12164_v22, 16  ;;  %v5762_v0 = vshll.u32 %v12159_v7, 16  ;;  %v5748_v61 = vsel %vm5470_vm6, %v5738_v18, %v5747_v50  ;;  %v6854_v8 = vsel %vm5470_vm6, %v6844_v27, %v6853_v45  ;;  %v12168_v27 = vld [vmem:[%s12316_s29 + $0x28] sm:$0xff]  }
 0x1c5   : > { %v13595_v39 = vadd.f32 %v11585_v43, %v4191_v57  ;;  %v4189_v60 = vadd.f32 %v3984_v48, %v13094_v41  ;;  %11754 = vmatprep.mubr.msk.bf16.mxu0 %vm757_vm2, %v6845_v4  ;;  %v5759_v41 = vshrl.u32 %v12159_v7, 16  ;;  %v5756_v26 = vor.u32 %v5755_v3, %v5752_v35 }
 0x1c6   : > { %v11522_v16 = vpop.f32.mrf.mxu1  ;;  %11685 = vmatmul.mubr.msk.bf16.gmra.mxu1 %vm757_vm2, %v5730_v5  ;;  %v4873_v59 = vpop.f32.mrf.mxu0  ;;  %v6863_v46 = vsel %vm5470_vm6, %v6853_v45, %v13593_v63  ;;  %v6867_v5 = vrot.slane %v6865_v44, 2  ;;  %v6870_v4 = vrot.slane %v6868_v47, 3  ;;  %v8563_v57 = vrot.slane %v8561_v40, 3  ;;  %v12161_v44 = vld [vmem:[%s12316_s29 + $0x10] sm:$0xf8]   ;;  %v13620_v47 = vld [vmem:[%s12316_s29 + $0x18] sm:$0xff]  }
 0x1c7   : > { %v13600_v12 = vadd.f32 %v4860_v55, %v4189_v60  ;;  %v4194_v43 = vadd.f32 %v11522_v16, %v13101_v11  ;;  %11688 = vmatprep.mubr.msk.bf16.mxu1 %vm757_vm2, %v5739_v54  ;;  %v8566_v54 = vrot.slane %v8564_v15, 4  ;;  %v8571_v18 = vrot.slane %v8569_v24, 3 }
 0x1c8   : > { %v3997_v9 = vpop.f32.mrf.mxu1  ;;  %v11589_v20 = vpop.f32.mrf.mxu0  ;;  %v8574_v7 = vrot.slane %v8572_v31, 4  ;;  %v5761_v35 = vrot.slane %v5759_v41, 2  ;;  %v8578_v16 = vshrl.u32 %v12166_v38, 16  ;;  %v8581_v40 = vshll.u32 %v12166_v38, 16 }
 0x1c9   : > { %v13609_v55 = vadd.f32 %v11588_v1, %v4194_v43  ;;  %v4192_v11 = vadd.f32 %v3997_v9, %v13105_v62  ;;  %v5764_v1 = vrot.slane %v5762_v0, 3  ;;  %v5757_v62 = vsel %vm5470_vm6, %v5747_v50, %v5756_v26 }
 0x1ca   : > { %v11523_v10 = vpop.f32.mrf.mxu1  ;;  %v4876_v22 = vpop.f32.mrf.mxu0  ;;  %v8567_v43 = vor.u32 %v8566_v54, %v8563_v57  ;;  %v8575_v41 = vor.u32 %v8574_v7, %v8571_v18  ;;  %v8587_v0 = vshrl.u32 %v12168_v27, 16  ;;  %v8590_v50 = vshll.u32 %v12168_v27, 16 }
 0x1cb   : > { %v13613_v48 = vadd.f32 %v4873_v59, %v4192_v11  ;;  %v4195_v45 = vadd.f32 %v11523_v10, %v13125_v53  ;;  %v6871_v53 = vor.u32 %v6870_v4, %v6867_v5  ;;  %v7684_v38 = vrot.slane %v12161_v44, 3 }
 0x1cc   : > { %v4000_v3 = vpop.f32.mrf.mxu1  ;;  %v11592_v60 = vpop.f32.mrf.mxu0  ;;  %11755 = vmatmul.mubr.msk.bf16.gmra.mxu0 %vm757_vm2, %v6854_v8  ;;  %v8580_v11 = vrot.slane %v8578_v16, 3  ;;  %v8583_v5 = vrot.slane %v8581_v40, 4  ;;  %v8576_v18 = vsel %vm8559_vm7, %v8567_v43, %v8575_v41  ;;  %v8589_v7 = vrot.slane %v8587_v0, 3  ;;  %v14548_v40 = vld [vmem:[#allocation42_spill] sm:$0xff] }
 0x1cd   : > { %v13622_v15 = vadd.f32 %v11589_v20, %v4195_v45  ;;  %v4193_v59 = vadd.f32 %v4000_v3, %v13133_v6  ;;  %11758 = vmatprep.mubr.msk.bf16.mxu0 %vm757_vm2, %v6863_v46  ;;  %v5765_v20 = vor.u32 %v5764_v1, %v5761_v35  ;;  %v8592_v27 = vrot.slane %v8590_v50, 4  ;;  %v12172_v45 = vld [vmem:[%s12316_s29 + $0x38] sm:$0xff]  }
 0x1ce   : > { %v11526_v24 = vpop.f32.mrf.mxu1  ;;  %11689 = vmatmul.mubr.msk.bf16.gmra.mxu1 %vm757_vm2, %v5748_v61  ;;  %v4889_v31 = vpop.f32.mrf.mxu0  ;;  %v7685_v61 = vrot.slane %v13620_v47, 3  ;;  %v8584_v44 = vor.u32 %v8583_v5, %v8580_v11  ;;  %v13648_v47 = vld [vmem:[%s12316_s29 + $0x28] sm:$0xff]   ;;  %v8605_v43 = vshrl.u32 %v12172_v45, 16  ;;  %v8608_v0 = vshll.u32 %v12172_v45, 16 }
 0x1cf   : > { %v13627_v9 = vadd.f32 %v4876_v22, %v4193_v59  ;;  %v4198_v8 = vadd.f32 %v11526_v24, %v13141_v30  ;;  %11692 = vmatprep.mubr.msk.bf16.mxu1 %vm757_vm2, %v5757_v62  ;;  %v6872_v30 = vsel %vm5470_vm6, %v13593_v63, %v6871_v53  ;;  %v12170_v22 = vld [vmem:[%s12316_s29 + $0x30] sm:$0xff]   ;;  %v5766_v3 = vsel %vm5470_vm6, %v5756_v26, %v5765_v20 }
 0x1d0   : > { %v4013_v6 = vpop.f32.mrf.mxu1  ;;  %v11593_v46 = vpop.f32.mrf.mxu0  ;;  %v7686_v63 = vsel %vm7683_vm8, %v7684_v38, %v7685_v61  ;;  %v8596_v53 = vshrl.u32 %v12170_v22, 16  ;;  %v8585_v11 = vsel %vm8559_vm7, %v8575_v41, %v8584_v44  ;;  %v7689_v5 = vrot.slane %v13648_v47, 3 }
 0x1d1   : > { %v13632_v4 = vadd.f32 %v11592_v60, %v4198_v8  ;;  %v4196_v10 = vadd.f32 %v4013_v6, %v13153_v33  ;;  %v12165_v33 = vld [vmem:[%s12316_s29 + $0x20] sm:$0xff]   ;;  %v8607_v45 = vrot.slane %v8605_v43, 3 }
 0x1d2   : > { %v11527_v57 = vpop.f32.mrf.mxu1  ;;  %v4892_v54 = vpop.f32.mrf.mxu0  ;;  %v14549_v8 = vld [vmem:[#allocation43_spill] sm:$0xff]  ;;  %v7687_v6 = vrot.slane %v12165_v33, 3 }
 0x1d3   : > { %v13640_v35 = vadd.f32 %v4889_v31, %v4196_v10  ;;  %v4199_v1 = vadd.f32 %v11527_v57, %v13161_v19  ;;  %v8599_v19 = vshll.u32 %v12170_v22, 16  ;;  %v8593_v31 = vor.u32 %v8592_v27, %v8589_v7  ;;  %v12174_v10 = vld [vmem:[%s12316_s29 + $0x40] sm:$0xff]  }
 0x1d4   : > { %v4016_v60 = vpop.f32.mrf.mxu1  ;;  %v11596_v62 = vpop.f32.mrf.mxu0  ;;  %11759 = vmatmul.mubr.msk.bf16.gmra.mxu0 %vm757_vm2, %v6872_v30  ;;  %v8598_v57 = vrot.slane %v8596_v53, 3 }
 0x1d5   : > { %v13650_v16 = vadd.f32 %v11593_v46, %v4199_v1  ;;  %v4197_v59 = vadd.f32 %v4016_v60, %v14548_v40  ;;  %11830 = vmatprep.mubr.msk.bf16.mxu0 %vm757_vm2, %v8576_v18  ;;  %v8594_v27 = vsel %vm8559_vm7, %v8584_v44, %v8593_v31  ;;  %v8610_v1 = vrot.slane %v8608_v0, 4  ;;  %v13675_v40 = vld [vmem:[%s12316_s29 + $0x38] sm:$0xff]  }
 0x1d6   : > { %v11530_v26 = vpop.f32.mrf.mxu1  ;;  %11693 = vmatmul.mubr.msk.bf16.gmra.mxu1 %vm757_vm2, %v5766_v3  ;;  %v4905_v24 = vpop.f32.mrf.mxu0  ;;  %v12176_v3 = vld [vmem:[%s12316_s29 + $0x48] sm:$0xff]   ;;  %v7688_v60 = vsel %vm7683_vm8, %v7685_v61, %v7687_v6  ;;  %v8617_v44 = vshll.u32 %v12174_v10, 16 }
 0x1d7   : > { %v13655_v50 = vadd.f32 %v4892_v54, %v4197_v59  ;;  %v4202_v20 = vadd.f32 %v11530_v26, %v14549_v8  ;;  %11764 = vmatprep.mubr.msk.bf16.mxu1 %vm757_vm2, %v7686_v63  ;;  %v8601_v54 = vrot.slane %v8599_v19, 4  ;;  %v8614_v59 = vshrl.u32 %v12174_v10, 16 }
 0x1d8   : > { %v4029_v46 = vpop.f32.mrf.mxu1  ;;  %v11597_v38 = vpop.f32.mrf.mxu0  ;;  %v8623_v43 = vshrl.u32 %v12176_v3, 16  ;;  %v8626_v0 = vshll.u32 %v12176_v3, 16  ;;  %v8619_v10 = vrot.slane %v8617_v44, 4  ;;  %v12180_v3 = vld [vmem:[%s12316_s29 + $0x58] sm:$0xff]  }
 0x1d9   : > { %v13662_v30 = vadd.f32 %v11596_v62, %v4202_v20  ;;  %v4200_v22 = vadd.f32 %v4029_v46, %v13191_v36  ;;  %v12169_v62 = vld [vmem:[%s12316_s29 + $0x30] sm:$0xff]   ;;  %v7690_v36 = vsel %vm7683_vm8, %v7687_v6, %v7689_v5 }
 0x1da   : > { %v11531_v18 = vpop.f32.mrf.mxu1  ;;  %v4908_v7 = vpop.f32.mrf.mxu0  ;;  %v7691_v6 = vrot.slane %v12169_v62, 3 }
 0x1db   : > { %v13667_v33 = vadd.f32 %v4905_v24, %v4200_v22  ;;  %v4203_v41 = vadd.f32 %v11531_v18, %v13195_v42  ;;  %v8602_v42 = vor.u32 %v8601_v54, %v8598_v57  ;;  %v8611_v24 = vor.u32 %v8610_v1, %v8607_v45  ;;  %v12178_v18 = vld [vmem:[%s12316_s29 + $0x50] sm:$0xff]  }
 0x1dc   : > { %v4032_v63 = vpop.f32.mrf.mxu1  ;;  %v11600_v47 = vpop.f32.mrf.mxu0  ;;  %11831 = vmatmul.mubr.msk.bf16.vlgmr.msra.gmra.mxu0 %vm757_vm2, %v8585_v11  ;;  %v8616_v11 = vrot.slane %v8614_v59, 3  ;;  %v8625_v45 = vrot.slane %v8623_v43, 3  ;;  %v8628_v1 = vrot.slane %v8626_v0, 4  ;;  %v13702_v59 = vld [vmem:[%s12316_s29 + $0x48] sm:$0xff]  }
 0x1dd   : > { %v13677_v53 = vadd.f32 %v11597_v38, %v4203_v41  ;;  %v4201_v19 = vadd.f32 %v4032_v63, %v13205_v23  ;;  %11834 = vmatprep.mubr.msk.bf16.mxu0 %vm757_vm2, %v8594_v27  ;;  %v7693_v38 = vrot.slane %v13675_v40, 3  ;;  %v8603_v54 = vsel %vm8559_vm7, %v8593_v31, %v8602_v42 }
 0x1de   : > { %v11534_v26 = vpop.f32.mrf.mxu1  ;;  %11765 = vmatmul.mubr.msk.bf16.vlgmr.msra.gmra.mxu1 %vm757_vm2, %v7688_v60  ;;  %v4921_v61 = vpop.f32.mrf.mxu0  ;;  %v8612_v27 = vsel %vm8559_vm7, %v8602_v42, %v8611_v24  ;;  %v14550_v60 = vld [vmem:[#allocation44_spill] sm:$0xff]  ;;  %v7692_v63 = vsel %vm7683_vm8, %v7689_v5, %v7691_v6  ;;  %v8620_v40 = vor.u32 %v8619_v10, %v8616_v11  ;;  %v8629_v0 = vor.u32 %v8628_v1, %v8625_v45  ;;  %v14554_v45 = vld [vmem:[#allocation5_spill] sm:$0xff] }
 0x1df   : > { %v13682_v8 = vadd.f32 %v4908_v7, %v4201_v19  ;;  %v4206_v20 = vadd.f32 %v11534_v26, %v13215_v58  ;;  %11768 = vmatprep.mubr.msk.bf16.mxu1 %vm757_vm2, %v7690_v36  ;;  %v7694_v31 = vsel %vm7683_vm8, %v7691_v6, %v7693_v38  ;;  %v14551_v19 = vld [vmem:[#allocation3_spill] sm:$0xff]  ;;  %v8632_v26 = vshrl.u32 %v12178_v18, 16  ;;  %v14552_v11 = vld [vmem:[#allocation4_spill] sm:$0xff] }
 0x1e0   : > { %v4045_v23 = vpop.f32.mrf.mxu1  ;;  %v11601_v46 = vpop.f32.mrf.mxu0 }
 0x1e1   : > { %v13687_v22 = vadd.f32 %v11600_v47, %v4206_v20  ;;  %v4204_v57 = vadd.f32 %v4045_v23, %v13226_v29  ;;  %v12173_v47 = vld [vmem:[%s12316_s29 + $0x40] sm:$0xff]   ;;  %v8641_v20 = vshrl.u32 %v12180_v3, 16  ;;  %v8644_v23 = vshll.u32 %v12180_v3, 16 }
 0x1e2   : > { %v11535_v58 = vpop.f32.mrf.mxu1  ;;  %v4924_v7 = vpop.f32.mrf.mxu0 }
 0x1e3   : > { %v13694_v41 = vadd.f32 %v4921_v61, %v4204_v57  ;;  %v4207_v62 = vadd.f32 %v11535_v58, %v14550_v60  ;;  %v8635_v61 = vshll.u32 %v12178_v18, 16  ;;  %v8621_v58 = vsel %vm8559_vm7, %v8611_v24, %v8620_v40  ;;  %v14556_v24 = vld [vmem:[#allocation6_spill] sm:$0xff] }
 0x1e4   : > { %v4048_v36 = vpop.f32.mrf.mxu1  ;;  %v11604_v29 = vpop.f32.mrf.mxu0  ;;  %11835 = vmatmul.mubr.msk.bf16.gmra.mxu0 %vm757_vm2, %v8603_v54  ;;  %v7697_v18 = vrot.slane %v13702_v59, 3 }
 0x1e5   : > { %v13704_v44 = vadd.f32 %v11601_v46, %v4207_v62  ;;  %v4205_v42 = vadd.f32 %v4048_v36, %v14551_v19  ;;  %11838 = vmatprep.mubr.msk.bf16.mxu0 %vm757_vm2, %v8612_v27  ;;  %v7695_v46 = vrot.slane %v12173_v47, 3  ;;  %v12182_v27 = vld [vmem:[%s12316_s29 + $0x60] sm:$0xff]   ;;  %v8637_v3 = vrot.slane %v8635_v61, 4  ;;  %v12184_v19 = vld [vmem:[%s12316_s29 + $0x68] sm:$0xff]   ;;  %v13729_v61 = vld [vmem:[%s12316_s29 + $0x58] sm:$0xff]  }
 0x1e6   : > { %v11538_v5 = vpop.f32.mrf.mxu1  ;;  %11769 = vmatmul.mubr.msk.bf16.gmra.mxu1 %vm757_vm2, %v7692_v63  ;;  %v4937_v43 = vpop.f32.mrf.mxu0  ;;  %v8630_v36 = vsel %vm8559_vm7, %v8620_v40, %v8629_v0  ;;  %v8643_v47 = vrot.slane %v8641_v20, 3  ;;  %v8653_v40 = vshll.u32 %v12182_v27, 16 }
 0x1e7   : > { %v13709_v6 = vadd.f32 %v4924_v7, %v4205_v42  ;;  %v4210_v10 = vadd.f32 %v11538_v5, %v14552_v11  ;;  %11772 = vmatprep.mubr.msk.bf16.mxu1 %vm757_vm2, %v7694_v31  ;;  %v8634_v7 = vrot.slane %v8632_v26, 3  ;;  %v8646_v31 = vrot.slane %v8644_v23, 4  ;;  %v14557_v23 = vld [vmem:[#allocation7_spill] sm:$0xff] }
 0x1e8   : > { %v4061_v57 = vpop.f32.mrf.mxu1  ;;  %v11605_v54 = vpop.f32.mrf.mxu0  ;;  %v7696_v59 = vsel %vm7683_vm8, %v7693_v38, %v7695_v46  ;;  %v7698_v26 = vsel %vm7683_vm8, %v7695_v46, %v7697_v18 }
 0x1e9   : > { %v13716_v60 = vadd.f32 %v11604_v29, %v4210_v10  ;;  %v4208_v1 = vadd.f32 %v4061_v57, %v14554_v45  ;;  %v12177_v29 = vld [vmem:[%s12316_s29 + $0x50] sm:$0xff]   ;;  %v8650_v57 = vshrl.u32 %v12182_v27, 16  ;;  %v8638_v45 = vor.u32 %v8637_v3, %v8634_v7 }
 0x1ea   : > { %v11539_v62 = vpop.f32.mrf.mxu1  ;;  %v4940_v63 = vpop.f32.mrf.mxu0  ;;  %v7701_v7 = vrot.slane %v13729_v61, 3 }
 0x1eb   : > { %14553 = vst [vmem:[#allocation36_spill] sm:$0xff] %v13716_v60  ;;  %v13721_v42 = vadd.f32 %v4937_v43, %v4208_v1  ;;  %v4211_v5 = vadd.f32 %v11539_v62, %v14556_v24  ;;  %v8647_v62 = vor.u32 %v8646_v31, %v8643_v47  ;;  %v8662_v24 = vshll.u32 %v12184_v19, 16  ;;  %v12186_v31 = vld [vmem:[%s12316_s29 + $0x70] sm:$0xff]  }
 0x1ec   : > { %v4064_v11 = vpop.f32.mrf.mxu1  ;;  %v11608_v10 = vpop.f32.mrf.mxu0  ;;  %11839 = vmatmul.mubr.msk.bf16.gmra.mxu0 %vm757_vm2, %v8621_v58  ;;  %v8659_v58 = vshrl.u32 %v12184_v19, 16  ;;  %v8652_v3 = vrot.slane %v8650_v57, 3 }
 0x1ed   : > { %14555 = vst [vmem:[#allocation37_spill] sm:$0xff] %v13721_v42  ;;  %v13731_v20 = vadd.f32 %v11605_v54, %v4211_v5  ;;  %v4209_v43 = vadd.f32 %v4064_v11, %v14557_v23  ;;  %11842 = vmatprep.mubr.msk.bf16.mxu0 %vm757_vm2, %v8630_v36  ;;  %v14558_v42 = vld [vmem:[#allocation8_spill] sm:$0xff]  ;;  %v7699_v54 = vrot.slane %v12177_v29, 3  ;;  %v8655_v36 = vrot.slane %v8653_v40, 4  ;;  %v12188_v23 = vld [vmem:[%s12316_s29 + $0x78] sm:$0xff]  }
 0x1ee   : > { %v11542_v1 = vpop.f32.mrf.mxu1  ;;  %11773 = vmatmul.mubr.msk.bf16.gmra.mxu1 %vm757_vm2, %v7696_v59  ;;  %v4953_v38 = vpop.f32.mrf.mxu0  ;;  %v8648_v11 = vsel %vm8559_vm7, %v8638_v45, %v8647_v62  ;;  %v8661_v29 = vrot.slane %v8659_v58, 3  ;;  %v14561_v58 = vld [vmem:[#allocation9_spill] sm:$0xff] }
 0x1ef   : > { %v13736_v46 = vadd.f32 %v4940_v63, %v4209_v43  ;;  %v4214_v60 = vadd.f32 %v11542_v1, %v14558_v42  ;;  %11776 = vmatprep.mubr.msk.bf16.mxu1 %vm757_vm2, %v7698_v26  ;;  %v8639_v63 = vsel %vm8559_vm7, %v8629_v0, %v8638_v45  ;;  %v8664_v26 = vrot.slane %v8662_v24, 4  ;;  %v13756_v1 = vld [vmem:[%s12316_s29 + $0x68] sm:$0xff]  }
 0x1f0   : > { %v4077_v27 = vpop.f32.mrf.mxu1  ;;  %v11609_v5 = vpop.f32.mrf.mxu0  ;;  %v7702_v0 = vsel %vm7683_vm8, %v7699_v54, %v7701_v7  ;;  %v8656_v40 = vor.u32 %v8655_v36, %v8652_v3  ;;  %v14563_v3 = vld [vmem:[#allocation10_spill] sm:$0xff] }
 0x1f1   : > { %v13741_v59 = vadd.f32 %v11608_v10, %v4214_v60  ;;  %v4212_v47 = vadd.f32 %v4077_v27, %v13301_v34  ;;  %v7700_v60 = vsel %vm7683_vm8, %v7697_v18, %v7699_v54  ;;  %v12181_v10 = vld [vmem:[%s12316_s29 + $0x60] sm:$0xff]  }
 0x1f2   : > { %v11543_v19 = vpop.f32.mrf.mxu1  ;;  %v4956_v42 = vpop.f32.mrf.mxu0 }
 0x1f3   : > { %v13748_v43 = vadd.f32 %v4953_v38, %v4212_v47  ;;  %v4215_v61 = vadd.f32 %v11543_v19, %v13306_v49  ;;  %v8668_v38 = vshrl.u32 %v12186_v31, 16  ;;  %v8671_v49 = vshll.u32 %v12186_v31, 16 }
 0x1f4   : > { %v4080_v57 = vpop.f32.mrf.mxu1  ;;  %v11612_v34 = vpop.f32.mrf.mxu0  ;;  %11843 = vmatmul.mubr.msk.bf16.gmra.mxu0 %vm757_vm2, %v8639_v63  ;;  %v8665_v47 = vor.u32 %v8664_v26, %v8661_v29  ;;  %v8677_v63 = vshrl.u32 %v12188_v23, 16  ;;  %v8680_v19 = vshll.u32 %v12188_v23, 16  ;;  %v7705_v31 = vrot.slane %v13756_v1, 3 }
 0x1f5   : > { %14559 = vst [vmem:[#allocation38_spill] sm:$0xff] %v13748_v43  ;;  %v13758_v45 = vadd.f32 %v11609_v5, %v4215_v61  ;;  %v4213_v24 = vadd.f32 %v4080_v57, %v14561_v58  ;;  %11846 = vmatprep.mubr.msk.bf16.mxu0 %vm757_vm2, %v8648_v11  ;;  %v7703_v5 = vrot.slane %v12181_v10, 3  ;;  %v8657_v57 = vsel %vm8559_vm7, %v8647_v62, %v8656_v40  ;;  %v14566_v62 = vld [vmem:[#allocation11_spill] sm:$0xff] }
 0x1f6   : > { %v11546_v18 = vpop.f32.mrf.mxu1  ;;  %11777 = vmatmul.mubr.msk.bf16.gmra.mxu1 %vm757_vm2, %v7700_v60  ;;  %v4969_v27 = vpop.f32.mrf.mxu0  ;;  %v12190_v60 = vld [vmem:[%s12316_s29 + $0x80] sm:$0xff]   ;;  %v8673_v26 = vrot.slane %v8671_v49, 4  ;;  %v8679_v10 = vrot.slane %v8677_v63, 3 }
 0x1f7   : > { %14560 = vst [vmem:[#allocation39_spill] sm:$0xff] %v13758_v45  ;;  %v13763_v54 = vadd.f32 %v4956_v42, %v4213_v24  ;;  %v4218_v36 = vadd.f32 %v11546_v18, %v14563_v3  ;;  %11780 = vmatprep.mubr.msk.bf16.mxu1 %vm757_vm2, %v7702_v0  ;;  %v8670_v42 = vrot.slane %v8668_v38, 3  ;;  %v8666_v0 = vsel %vm8559_vm7, %v8656_v40, %v8665_v47  ;;  %v12192_v3 = vld [vmem:[%s12316_s29 + $0x88] sm:$0xff]   ;;  %v13783_v38 = vld [vmem:[%s12316_s29 + $0x78] sm:$0xff]  }
 0x1f8   : > { %v4093_v61 = vpop.f32.mrf.mxu1  ;;  %v11613_v11 = vpop.f32.mrf.mxu0  ;;  %v8682_v18 = vrot.slane %v8680_v19, 4  ;;  %v7704_v1 = vsel %vm7683_vm8, %v7701_v7, %v7703_v5  ;;  %v8686_v49 = vshrl.u32 %v12190_v60, 16  ;;  %v8689_v40 = vshll.u32 %v12190_v60, 16  ;;  %v14568_v19 = vld [vmem:[#allocation12_spill] sm:$0xff] }
 0x1f9   : > { %14562 = vst [vmem:[#allocation40_spill] sm:$0xff] %v13763_v54  ;;  %v13770_v58 = vadd.f32 %v11612_v34, %v4218_v36  ;;  %v4216_v29 = vadd.f32 %v4093_v61, %v13332_v25  ;;  %v12185_v34 = vld [vmem:[%s12316_s29 + $0x70] sm:$0xff]   ;;  %v7706_v25 = vsel %vm7683_vm8, %v7703_v5, %v7705_v31  ;;  %v8674_v61 = vor.u32 %v8673_v26, %v8670_v42 }
 0x1fa   : > { %v11547_v23 = vpop.f32.mrf.mxu1  ;;  %v4972_v24 = vpop.f32.mrf.mxu0  ;;  %v7709_v42 = vrot.slane %v13783_v38, 3  ;;  %v8688_v26 = vrot.slane %v8686_v49, 3  ;;  %v14574_v38 = vld [vmem:[#allocation15_spill] sm:$0xff] }
 0x1fb   : > { %14564 = vst [vmem:[#allocation41_spill] sm:$0xff] %v13770_v58  ;;  %v13775_v54 = vadd.f32 %v4969_v27, %v4216_v29  ;;  %v4219_v45 = vadd.f32 %v11547_v23, %v14566_v62  ;;  %v8683_v23 = vor.u32 %v8682_v18, %v8679_v10  ;;  %v8698_v62 = vshll.u32 %v12192_v3, 16  ;;  %v14572_v10 = vld [vmem:[#allocation14_spill] sm:$0xff] }
 0x1fc   : > { %v4096_v36 = vpop.f32.mrf.mxu1  ;;  %v11616_v58 = vpop.f32.mrf.mxu0  ;;  %11847 = vmatmul.mubr.msk.bf16.gmra.mxu0 %vm757_vm2, %v8657_v57  ;;  %v8695_v57 = vshrl.u32 %v12192_v3, 16  ;;  %v12194_v3 = vld [vmem:[%s12316_s29 + $0x90] sm:$0xff]  }
 0x1fd   : > { %14565 = vst [vmem:[#allocation42_spill] sm:$0xff] %v13775_v54  ;;  %v13785_v63 = vadd.f32 %v11613_v11, %v4219_v45  ;;  %v4217_v27 = vadd.f32 %v4096_v36, %v14568_v19  ;;  %11850 = vmatprep.mubr.msk.bf16.mxu0 %vm757_vm2, %v8666_v0  ;;  %v14570_v54 = vld [vmem:[#allocation13_spill] sm:$0xff]  ;;  %v7707_v45 = vrot.slane %v12185_v34, 3  ;;  %v8691_v0 = vrot.slane %v8689_v40, 4 }
 0x1fe   : > { %v11550_v29 = vpop.f32.mrf.mxu1  ;;  %11781 = vmatmul.mubr.msk.bf16.gmra.mxu1 %vm757_vm2, %v7704_v1  ;;  %v4985_v7 = vpop.f32.mrf.mxu0  ;;  %v8697_v34 = vrot.slane %v8695_v57, 3  ;;  %v8700_v19 = vrot.slane %v8698_v62, 4  ;;  %v14576_v57 = vld [vmem:[#allocation16_spill] sm:$0xff] }
 0x1ff   : > { %14567 = vst [vmem:[#allocation43_spill] sm:$0xff] %v13785_v63  ;;  %v13790_v5 = vadd.f32 %v4972_v24, %v4217_v27  ;;  %v4222_v43 = vadd.f32 %v11550_v29, %v14570_v54  ;;  %11784 = vmatprep.mubr.msk.bf16.mxu1 %vm757_vm2, %v7706_v25  ;;  %v8675_v24 = vsel %vm8559_vm7, %v8665_v47, %v8674_v61  ;;  %v12196_v27 = vld [vmem:[%s12316_s29 + $0x98] sm:$0xff]  }
 0x200   : > { %v4109_v11 = vpop.f32.mrf.mxu1  ;;  %v11617_v60 = vpop.f32.mrf.mxu0  ;;  %v8684_v25 = vsel %vm8559_vm7, %v8674_v61, %v8683_v23  ;;  %v7710_v47 = vsel %vm7683_vm8, %v7707_v45, %v7709_v42 }
 0x201   : > { %14569 = vst [vmem:[#allocation44_spill] sm:$0xff] %v13790_v5  ;;  %v13795_v1 = vadd.f32 %v11616_v58, %v4222_v43  ;;  %v4220_v18 = vadd.f32 %v4109_v11, %v14572_v10  ;;  %v7708_v43 = vsel %vm7683_vm8, %v7705_v31, %v7707_v45  ;;  %v12189_v58 = vld [vmem:[%s12316_s29 + $0x80] sm:$0xff]   ;;  %v8692_v10 = vor.u32 %v8691_v0, %v8688_v26  ;;  %v14578_v26 = vld [vmem:[#allocation17_spill] sm:$0xff] }
 0x202   : > { %v11551_v54 = vpop.f32.mrf.mxu1  ;;  %v4988_v36 = vpop.f32.mrf.mxu0 }
 0x203   : > { %14571 = vst [vmem:[#allocation3_spill] sm:$0xff] %v13795_v1  ;;  %v13802_v29 = vadd.f32 %v4985_v7, %v4220_v18  ;;  %v4223_v49 = vadd.f32 %v11551_v54, %v14574_v38  ;;  %v13810_v1 = vld [vmem:[%s12316_s29 + $0x88] sm:$0xff]   ;;  %v8704_v7 = vshrl.u32 %v12194_v3, 16  ;;  %v8707_v18 = vshll.u32 %v12194_v3, 16 }
 0x204   : > { %v4112_v40 = vpop.f32.mrf.mxu1  ;;  %v11620_v11 = vpop.f32.mrf.mxu0  ;;  %11851 = vmatmul.mubr.msk.bf16.gmra.mxu0 %vm757_vm2, %v8675_v24  ;;  %v8701_v38 = vor.u32 %v8700_v19, %v8697_v34  ;;  %v8713_v24 = vshrl.u32 %v12196_v27, 16  ;;  %v7713_v3 = vrot.slane %v13810_v1, 3  ;;  %v14580_v34 = vld [vmem:[#allocation18_spill] sm:$0xff] }
 0x205   : > { %14573 = vst [vmem:[#allocation4_spill] sm:$0xff] %v13802_v29  ;;  %v13812_v61 = vadd.f32 %v11617_v60, %v4223_v49  ;;  %v4221_v62 = vadd.f32 %v4112_v40, %v14576_v57  ;;  %11854 = vmatprep.mubr.msk.bf16.mxu0 %vm757_vm2, %v8684_v25  ;;  %v8716_v29 = vshll.u32 %v12196_v27, 16  ;;  %v7711_v60 = vrot.slane %v12189_v58, 3 }
 0x206   : > { %v11554_v31 = vpop.f32.mrf.mxu1  ;;  %11785 = vmatmul.mubr.msk.bf16.gmra.mxu1 %vm757_vm2, %v7708_v43  ;;  %v5001_v54 = vpop.f32.mrf.mxu0  ;;  %v8693_v40 = vsel %vm8559_vm7, %v8683_v23, %v8692_v10  ;;  %v12198_v43 = vld [vmem:[%s12316_s29 + $0xa0] sm:$0xff]   ;;  %v8709_v27 = vrot.slane %v8707_v18, 4  ;;  %v8715_v58 = vrot.slane %v8713_v24, 3  ;;  %v13837_v18 = vld [vmem:[%s12316_s29 + $0x98] sm:$0xff]  }
 0x207   : > { %14575 = vst [vmem:[#allocation5_spill] sm:$0xff] %v13812_v61  ;;  %v13817_v45 = vadd.f32 %v4988_v36, %v4221_v62  ;;  %v4226_v0 = vadd.f32 %v11554_v31, %v14578_v26  ;;  %11788 = vmatprep.mubr.msk.bf16.mxu1 %vm757_vm2, %v7710_v47  ;;  %v8706_v36 = vrot.slane %v8704_v7, 3  ;;  %v8702_v47 = vsel %vm8559_vm7, %v8692_v10, %v8701_v38  ;;  %v14582_v23 = vld [vmem:[#allocation19_spill] sm:$0xff] }
 0x208   : > { %v4125_v49 = vpop.f32.mrf.mxu1  ;;  %v11621_v25 = vpop.f32.mrf.mxu0  ;;  %v8718_v26 = vrot.slane %v8716_v29, 4  ;;  %v7712_v1 = vsel %vm7683_vm8, %v7709_v42, %v7711_v60  ;;  %v7714_v7 = vsel %vm7683_vm8, %v7711_v60, %v7713_v3  ;;  %v8725_v10 = vshll.u32 %v12198_v43, 16  ;;  %v14583_v29 = vld [vmem:[#allocation20_spill] sm:$0xff] }
 0x209   : > { %14577 = vst [vmem:[#allocation6_spill] sm:$0xff] %v13817_v45  ;;  %v13824_v57 = vadd.f32 %v11620_v11, %v4226_v0  ;;  %v4224_v19 = vadd.f32 %v4125_v49, %v14580_v34  ;;  %v12200_v45 = vld [vmem:[%s12316_s29 + $0xa8] sm:$0xff]   ;;  %v12193_v11 = vld [vmem:[%s12316_s29 + $0x90] sm:$0xff]   ;;  %v8722_v49 = vshrl.u32 %v12198_v43, 16  ;;  %v8710_v34 = vor.u32 %v8709_v27, %v8706_v36 }
 0x20a   : > { %v11555_v62 = vpop.f32.mrf.mxu1  ;;  %v5004_v31 = vpop.f32.mrf.mxu0  ;;  %v7717_v36 = vrot.slane %v13837_v18, 3  ;;  %v14587_v18 = vld [vmem:[#allocation22_spill] sm:$0xff] }
 0x20b   : > { %14579 = vst [vmem:[#allocation7_spill] sm:$0xff] %v13824_v57  ;;  %v13829_v61 = vadd.f32 %v5001_v54, %v4224_v19  ;;  %v4227_v5 = vadd.f32 %v11555_v62, %v14582_v23  ;;  %v8719_v62 = vor.u32 %v8718_v26, %v8715_v58  ;;  %v8734_v23 = vshll.u32 %v12200_v45, 16 }
 0x20c   : > { %v4128_v0 = vpop.f32.mrf.mxu1  ;;  %v11624_v57 = vpop.f32.mrf.mxu0  ;;  %11855 = vmatmul.mubr.msk.bf16.gmra.mxu0 %vm757_vm2, %v8693_v40  ;;  %v8731_v40 = vshrl.u32 %v12200_v45, 16  ;;  %v8724_v27 = vrot.slane %v8722_v49, 3  ;;  %v8711_v45 = vsel %vm8559_vm7, %v8701_v38, %v8710_v34 }
 0x20d   : > { %14581 = vst [vmem:[#allocation8_spill] sm:$0xff] %v13829_v61  ;;  %v13839_v24 = vadd.f32 %v11621_v25, %v4227_v5  ;;  %v4225_v54 = vadd.f32 %v4128_v0, %v14583_v29  ;;  %11858 = vmatprep.mubr.msk.bf16.mxu0 %vm757_vm2, %v8702_v47  ;;  %v14584_v61 = vld [vmem:[#allocation21_spill] sm:$0xff]  ;;  %v7715_v5 = vrot.slane %v12193_v11, 3  ;;  %v8727_v47 = vrot.slane %v8725_v10, 4  ;;  %v12204_v29 = vld [vmem:[%s12316_s29 + $0xb8] sm:$0xff]  }
 0x20e   : > { %v11558_v19 = vpop.f32.mrf.mxu1  ;;  %11789 = vmatmul.mubr.msk.bf16.gmra.mxu1 %vm757_vm2, %v7712_v1  ;;  %v5017_v42 = vpop.f32.mrf.mxu0  ;;  %v8720_v0 = vsel %vm8559_vm7, %v8710_v34, %v8719_v62  ;;  %v8733_v11 = vrot.slane %v8731_v40, 3  ;;  %v14589_v40 = vld [vmem:[#allocation23_spill] sm:$0xff] }
 0x20f   : > { %v13844_v60 = vadd.f32 %v5004_v31, %v4225_v54  ;;  %v4230_v63 = vadd.f32 %v11558_v19, %v14584_v61  ;;  %11792 = vmatprep.mubr.msk.bf16.mxu1 %vm757_vm2, %v7714_v7  ;;  %v12202_v31 = vld [vmem:[%s12316_s29 + $0xb0] sm:$0xff]   ;;  %v8736_v7 = vrot.slane %v8734_v23, 4  ;;  %v7718_v38 = vsel %vm7683_vm8, %v7715_v5, %v7717_v36 }
 0x210   : > { %v4141_v25 = vpop.f32.mrf.mxu1  ;;  %v11625_v43 = vpop.f32.mrf.mxu0  ;;  %v8728_v19 = vor.u32 %v8727_v47, %v8724_v27  ;;  %v14591_v27 = vld [vmem:[#allocation24_spill] sm:$0xff] }
 0x211   : > { %v13849_v1 = vadd.f32 %v11624_v57, %v4230_v63  ;;  %v4228_v58 = vadd.f32 %v4141_v25, %v13429_v51  ;;  %v7716_v63 = vsel %vm7683_vm8, %v7713_v3, %v7715_v5  ;;  %v12197_v57 = vld [vmem:[%s12316_s29 + $0xa0] sm:$0xff]   ;;  %v13864_v25 = vld [vmem:[%s12316_s29 + $0xa8] sm:$0xff]  }
 0x212   : > { %v11559_v61 = vpop.f32.mrf.mxu1  ;;  %v5020_v26 = vpop.f32.mrf.mxu0 }
 0x213   : > { %14585 = vst [vmem:[#allocation9_spill] sm:$0xff] %v13849_v1  ;;  %v13856_v54 = vadd.f32 %v5017_v42, %v4228_v58  ;;  %v4231_v49 = vadd.f32 %v11559_v61, %v14587_v18  ;;  %v8740_v42 = vshrl.u32 %v12202_v31, 16  ;;  %v8743_v58 = vshll.u32 %v12202_v31, 16 }
 0x214   : > { %v4144_v10 = vpop.f32.mrf.mxu1  ;;  %v11628_v51 = vpop.f32.mrf.mxu0  ;;  %11859 = vmatmul.mubr.msk.bf16.gmra.mxu0 %vm757_vm2, %v8711_v45  ;;  %v8737_v18 = vor.u32 %v8736_v7, %v8733_v11  ;;  %v8749_v45 = vshrl.u32 %v12204_v29, 16  ;;  %v7721_v31 = vrot.slane %v13864_v25, 3 }
 0x215   : > { %14586 = vst [vmem:[#allocation10_spill] sm:$0xff] %v13856_v54  ;;  %v13866_v34 = vadd.f32 %v11625_v43, %v4231_v49  ;;  %v4229_v23 = vadd.f32 %v4144_v10, %v14589_v40  ;;  %11862 = vmatprep.mubr.msk.bf16.mxu0 %vm757_vm2, %v8720_v0  ;;  %v8752_v54 = vshll.u32 %v12204_v29, 16  ;;  %v7719_v43 = vrot.slane %v12197_v57, 3 }
 0x216   : > { %v11562_v3 = vpop.f32.mrf.mxu1  ;;  %11793 = vmatmul.mubr.msk.bf16.gmra.mxu1 %vm757_vm2, %v7716_v63  ;;  %v5033_v61 = vpop.f32.mrf.mxu0  ;;  %v8729_v10 = vsel %vm8559_vm7, %v8719_v62, %v8728_v19  ;;  %v12206_v63 = vld [vmem:[%s12316_s29 + $0xc0] sm:$0xff]   ;;  %v8745_v7 = vrot.slane %v8743_v58, 4  ;;  %v8751_v57 = vrot.slane %v8749_v45, 3  ;;  %v14594_v62 = vld [vmem:[#allocation25_spill] sm:$0xff] }
 0x217   : > { %14588 = vst [vmem:[#allocation11_spill] sm:$0xff] %v13866_v34  ;;  %v13871_v5 = vadd.f32 %v5020_v26, %v4229_v23  ;;  %v4234_v47 = vadd.f32 %v11562_v3, %v14591_v27  ;;  %11796 = vmatprep.mubr.msk.bf16.mxu1 %vm757_vm2, %v7718_v38  ;;  %v8742_v26 = vrot.slane %v8740_v42, 3  ;;  %v8738_v38 = vsel %vm8559_vm7, %v8728_v19, %v8737_v18  ;;  %v12208_v27 = vld [vmem:[%s12316_s29 + $0xc8] sm:$0xff]   ;;  %v13891_v42 = vld [vmem:[%s12316_s29 + $0xb8] sm:$0xff]  }
 0x218   : > { %v4157_v49 = vpop.f32.mrf.mxu1  ;;  %v11629_v0 = vpop.f32.mrf.mxu0  ;;  %v8754_v3 = vrot.slane %v8752_v54, 4  ;;  %v7720_v25 = vsel %vm7683_vm8, %v7717_v36, %v7719_v43  ;;  %v8758_v58 = vshrl.u32 %v12206_v63, 16  ;;  %v8761_v19 = vshll.u32 %v12206_v63, 16  ;;  %v14595_v54 = vld [vmem:[#allocation26_spill] sm:$0xff] }
 0x219   : > { %14590 = vst [vmem:[#allocation12_spill] sm:$0xff] %v13871_v5  ;;  %v13878_v40 = vadd.f32 %v11628_v51, %v4234_v47  ;;  %v4232_v11 = vadd.f32 %v4157_v49, %v13453_v13  ;;  %v12201_v51 = vld [vmem:[%s12316_s29 + $0xb0] sm:$0xff]   ;;  %v7722_v13 = vsel %vm7683_vm8, %v7719_v43, %v7721_v31  ;;  %v8746_v49 = vor.u32 %v8745_v7, %v8742_v26 }
 0x21a   : > { %v11563_v29 = vpop.f32.mrf.mxu1  ;;  %v5036_v23 = vpop.f32.mrf.mxu0  ;;  %v7725_v26 = vrot.slane %v13891_v42, 3  ;;  %v8760_v7 = vrot.slane %v8758_v58, 3 }
 0x21b   : > { %14592 = vst [vmem:[#allocation13_spill] sm:$0xff] %v13878_v40  ;;  %v13883_v5 = vadd.f32 %v5033_v61, %v4232_v11  ;;  %v4235_v34 = vadd.f32 %v11563_v29, %v14594_v62  ;;  %v8755_v29 = vor.u32 %v8754_v3, %v8751_v57  ;;  %v8770_v62 = vshll.u32 %v12208_v27, 16  ;;  %v12210_v3 = vld [vmem:[%s12316_s29 + $0xd0] sm:$0xff]  }
 0x21c   : > { %v4160_v47 = vpop.f32.mrf.mxu1  ;;  %v11700_v40 = vpop.f32.mrf.mxu0  ;;  %11863 = vmatmul.mubr.msk.bf16.gmra.mxu0 %vm757_vm2, %v8729_v10  ;;  %v8767_v10 = vshrl.u32 %v12208_v27, 16 }
 0x21d   : > { %14593 = vst [vmem:[#allocation14_spill] sm:$0xff] %v13883_v5  ;;  %v13893_v45 = vadd.f32 %v11629_v0, %v4235_v34  ;;  %v4233_v61 = vadd.f32 %v4160_v47, %v14595_v54  ;;  %11866 = vmatprep.mubr.msk.bf16.mxu0 %vm757_vm2, %v8738_v38  ;;  %v14596_v5 = vld [vmem:[#allocation27_spill] sm:$0xff]  ;;  %v7723_v34 = vrot.slane %v12201_v51, 3  ;;  %v8763_v38 = vrot.slane %v8761_v19, 4  ;;  %v12212_v54 = vld [vmem:[%s12316_s29 + $0xd8] sm:$0xff]  }
 0x21e   : > { %v11634_v11 = vpop.f32.mrf.mxu1  ;;  %11797 = vmatmul.mubr.msk.bf16.gmra.mxu1 %vm757_vm2, %v7720_v25  ;;  %v7006_v36 = vpop.f32.mrf.mxu0  ;;  %v8756_v47 = vsel %vm8559_vm7, %v8746_v49, %v8755_v29  ;;  %v8769_v51 = vrot.slane %v8767_v10, 3 }
 0x21f   : > { %v13898_v43 = vadd.f32 %v5036_v23, %v4233_v61  ;;  %v6157_v1 = vadd.f32 %v11634_v11, %v14596_v5  ;;  %11800 = vmatprep.mubr.msk.bf16.mxu1 %vm757_vm2, %v7722_v13  ;;  %v8747_v23 = vsel %vm8559_vm7, %v8737_v18, %v8746_v49  ;;  %v8772_v13 = vrot.slane %v8770_v62, 4  ;;  %v13918_v11 = vld [vmem:[%s12316_s29 + $0xc8] sm:$0xff]  }
 0x220   : > { %v5900_v0 = vpop.f32.mrf.mxu1  ;;  %v11701_v63 = vpop.f32.mrf.mxu0  ;;  %v7726_v18 = vsel %vm7683_vm8, %v7723_v34, %v7725_v26  ;;  %v8764_v19 = vor.u32 %v8763_v38, %v8760_v7  ;;  %v14598_v7 = vld [vmem:[#allocation28_spill] sm:$0xff] }
 0x221   : > { %v13903_v25 = vadd.f32 %v11700_v40, %v6157_v1  ;;  %v6155_v57 = vadd.f32 %v5900_v0, %v13480_v21  ;;  %v7724_v1 = vsel %vm7683_vm8, %v7721_v31, %v7723_v34  ;;  %v12205_v40 = vld [vmem:[%s12316_s29 + $0xc0] sm:$0xff]   ;;  %v8773_v0 = vor.u32 %v8772_v13, %v8769_v51 }
 0x222   : > { %v11635_v5 = vpop.f32.mrf.mxu1  ;;  %v7009_v27 = vpop.f32.mrf.mxu0 }
 0x223   : > { %v13910_v61 = vadd.f32 %v7006_v36, %v6155_v57  ;;  %v6158_v42 = vadd.f32 %v11635_v5, %v13484_v37  ;;  %v8776_v36 = vshrl.u32 %v12210_v3, 16  ;;  %v8779_v37 = vshll.u32 %v12210_v3, 16 }
 0x224   : > { %v5903_v58 = vpop.f32.mrf.mxu1  ;;  %v11704_v21 = vpop.f32.mrf.mxu0  ;;  %11867 = vmatmul.mubr.msk.bf16.gmra.mxu0 %vm757_vm2, %v8747_v23  ;;  %v8785_v57 = vshrl.u32 %v12212_v54, 16  ;;  %v8788_v23 = vshll.u32 %v12212_v54, 16  ;;  %v7729_v3 = vrot.slane %v13918_v11, 3 }
 0x225   : > { %v13920_v49 = vadd.f32 %v11701_v63, %v6158_v42  ;;  %v6156_v10 = vadd.f32 %v5903_v58, %v13489_v28  ;;  %11870 = vmatprep.mubr.msk.bf16.mxu0 %vm757_vm2, %v8756_v47  ;;  %v7727_v28 = vrot.slane %v12205_v40, 3  ;;  %v8765_v47 = vsel %vm8559_vm7, %v8755_v29, %v8764_v19  ;;  %v12214_v42 = vld [vmem:[%s12316_s29 + $0xe0] sm:$0xff]  }
 0x226   : > { %v11638_v31 = vpop.f32.mrf.mxu1  ;;  %11801 = vmatmul.mubr.msk.bf16.gmra.mxu1 %vm757_vm2, %v7724_v1  ;;  %v7022_v62 = vpop.f32.mrf.mxu0  ;;  %v8781_v13 = vrot.slane %v8779_v37, 4  ;;  %v8787_v40 = vrot.slane %v8785_v57, 3  ;;  %v8794_v37 = vshrl.u32 %v12214_v42, 16 }
 0x227   : > { %v13925_v34 = vadd.f32 %v7009_v27, %v6156_v10  ;;  %v6161_v38 = vadd.f32 %v11638_v31, %v14598_v7  ;;  %11804 = vmatprep.mubr.msk.bf16.mxu1 %vm757_vm2, %v7726_v18  ;;  %v8778_v27 = vrot.slane %v8776_v36, 3  ;;  %v8774_v18 = vsel %vm8559_vm7, %v8764_v19, %v8773_v0  ;;  %v12216_v31 = vld [vmem:[%s12316_s29 + $0xe8] sm:$0xff]   ;;  %v13945_v36 = vld [vmem:[%s12316_s29 + $0xd8] sm:$0xff]  }
 0x228   : > { %v5916_v63 = vpop.f32.mrf.mxu1  ;;  %v11705_v5 = vpop.f32.mrf.mxu0  ;;  %v8790_v10 = vrot.slane %v8788_v23, 4  ;;  %v7728_v11 = vsel %vm7683_vm8, %v7725_v26, %v7727_v28  ;;  %v8797_v19 = vshll.u32 %v12214_v42, 16  ;;  %v14601_v23 = vld [vmem:[#allocation29_spill] sm:$0xff] }
 0x229   : > { %14597 = vst [vmem:[#allocation15_spill] sm:$0xff] %v13925_v34  ;;  %v13932_v1 = vadd.f32 %v11704_v21, %v6161_v38  ;;  %v6159_v51 = vadd.f32 %v5916_v63, %v13505_v32  ;;  %v12209_v21 = vld [vmem:[%s12316_s29 + $0xd0] sm:$0xff]   ;;  %v7730_v32 = vsel %vm7683_vm8, %v7727_v28, %v7729_v3 }
 0x22a   : > { %v11639_v54 = vpop.f32.mrf.mxu1  ;;  %v7025_v58 = vpop.f32.mrf.mxu0 }
 0x22b   : > { %14599 = vst [vmem:[#allocation16_spill] sm:$0xff] %v13932_v1  ;;  %v13937_v7 = vadd.f32 %v7022_v62, %v6159_v51  ;;  %v6162_v29 = vadd.f32 %v11639_v54, %v13509_v17  ;;  %v8782_v17 = vor.u32 %v8781_v13, %v8778_v27  ;;  %v8791_v51 = vor.u32 %v8790_v10, %v8787_v40  ;;  %v14604_v40 = vld [vmem:[#allocation31_spill] sm:$0xff] }
 0x22c   : > { %v5919_v38 = vpop.f32.mrf.mxu1  ;;  %v11708_v1 = vpop.f32.mrf.mxu0  ;;  %11871 = vmatmul.mubr.msk.bf16.gmra.mxu0 %vm757_vm2, %v8765_v47  ;;  %v8803_v47 = vshrl.u32 %v12216_v31, 16  ;;  %v8806_v54 = vshll.u32 %v12216_v31, 16  ;;  %v7733_v27 = vrot.slane %v13945_v36, 3  ;;  %v8796_v13 = vrot.slane %v8794_v37, 3  ;;  %v12218_v31 = vld [vmem:[%s12316_s29 + $0xf0] sm:$0xff]   ;;  %v14606_v36 = vld [vmem:[#allocation32_spill] sm:$0xff] }
 0x22d   : > { %14600 = vst [vmem:[#allocation17_spill] sm:$0xff] %v13937_v7  ;;  %v13947_v57 = vadd.f32 %v11705_v5, %v6162_v29  ;;  %v6160_v62 = vadd.f32 %v5919_v38, %v14601_v23  ;;  %11874 = vmatprep.mubr.msk.bf16.mxu0 %vm757_vm2, %v8774_v18  ;;  %v14602_v7 = vld [vmem:[#allocation30_spill] sm:$0xff]  ;;  %v7731_v5 = vrot.slane %v12209_v21, 3  ;;  %v8799_v18 = vrot.slane %v8797_v19, 4 }
 0x22e   : > { %v11642_v63 = vpop.f32.mrf.mxu1  ;;  %11805 = vmatmul.mubr.msk.bf16.gmra.mxu1 %vm757_vm2, %v7728_v11  ;;  %v7038_v26 = vpop.f32.mrf.mxu0  ;;  %v8805_v21 = vrot.slane %v8803_v47, 3  ;;  %v8808_v23 = vrot.slane %v8806_v54, 4  ;;  %v14608_v47 = vld [vmem:[#allocation33_spill] sm:$0xff] }
 0x22f   : > { %v13952_v28 = vadd.f32 %v7025_v58, %v6160_v62  ;;  %v6165_v34 = vadd.f32 %v11642_v63, %v14602_v7  ;;  %11808 = vmatprep.mubr.msk.bf16.mxu1 %vm757_vm2, %v7730_v32  ;;  %v8783_v58 = vsel %vm8559_vm7, %v8773_v0, %v8782_v17  ;;  %v8792_v32 = vsel %vm8559_vm7, %v8782_v17, %v8791_v51  ;;  %v12220_v62 = vld [vmem:[%s12316_s29 + $0xf8] sm:$0xff]  }
 0x230   : > { %v5932_v42 = vpop.f32.mrf.mxu1  ;;  %v11709_v29 = vpop.f32.mrf.mxu0  ;;  %v7734_v0 = vsel %vm7683_vm8, %v7731_v5, %v7733_v27 }
 0x231   : > { %v13957_v11 = vadd.f32 %v11708_v1, %v6165_v34  ;;  %v6163_v10 = vadd.f32 %v5932_v42, %v14604_v40  ;;  %v7732_v34 = vsel %vm7683_vm8, %v7729_v3, %v7731_v5  ;;  %v12213_v1 = vld [vmem:[%s12316_s29 + $0xe0] sm:$0xff]   ;;  %v8800_v40 = vor.u32 %v8799_v18, %v8796_v13  ;;  %v14610_v13 = vld [vmem:[#allocation34_spill] sm:$0xff] }
 0x232   : > { %v11643_v7 = vpop.f32.mrf.mxu1  ;;  %v7041_v38 = vpop.f32.mrf.mxu0 }
 0x233   : > { %14603 = vst [vmem:[#allocation18_spill] sm:$0xff] %v13957_v11  ;;  %v13964_v63 = vadd.f32 %v7038_v26, %v6163_v10  ;;  %v6166_v37 = vadd.f32 %v11643_v7, %v14606_v36  ;;  %v13972_v11 = vld [vmem:[%s12316_s29 + $0xe8] sm:$0xff]   ;;  %v8812_v26 = vshrl.u32 %v12218_v31, 16  ;;  %v8815_v10 = vshll.u32 %v12218_v31, 16 }
 0x234   : > { %v5935_v19 = vpop.f32.mrf.mxu1  ;;  %v11712_v42 = vpop.f32.mrf.mxu0  ;;  %11875 = vmatmul.mubr.msk.bf16.gmra.mxu0 %vm757_vm2, %v8783_v58  ;;  %v8809_v36 = vor.u32 %v8808_v23, %v8805_v21  ;;  %v8821_v58 = vshrl.u32 %v12220_v62, 16  ;;  %v7737_v31 = vrot.slane %v13972_v11, 3  ;;  %v14612_v21 = vld [vmem:[#allocation35_spill] sm:$0xff] }
 0x235   : > { %14605 = vst [vmem:[#allocation19_spill] sm:$0xff] %v13964_v63  ;;  %v13974_v17 = vadd.f32 %v11709_v29, %v6166_v37  ;;  %v6164_v54 = vadd.f32 %v5935_v19, %v14608_v47  ;;  %11878 = vmatprep.mubr.msk.bf16.mxu0 %vm757_vm2, %v8792_v32  ;;  %v8824_v63 = vshll.u32 %v12220_v62, 16  ;;  %v7735_v29 = vrot.slane %v12213_v1, 3 }
 0x236   : > { %v11646_v3 = vpop.f32.mrf.mxu1  ;;  %11809 = vmatmul.mubr.msk.bf16.gmra.mxu1 %vm757_vm2, %v7732_v34  ;;  %v7054_v7 = vpop.f32.mrf.mxu0  ;;  %v8801_v19 = vsel %vm8559_vm7, %v8791_v51, %v8800_v40  ;;  %v12222_v34 = vld [vmem:[%s12316_s29 + $0x100] sm:$0xff]   ;;  %v8817_v62 = vrot.slane %v8815_v10, 4  ;;  %v8823_v1 = vrot.slane %v8821_v58, 3  ;;  %v13999_v10 = vld [vmem:[%s12316_s29 + $0xf8] sm:$0xff]  }
 0x237   : > { %14607 = vst [vmem:[#allocation20_spill] sm:$0xff] %v13974_v17  ;;  %v13979_v5 = vadd.f32 %v7041_v38, %v6164_v54  ;;  %v6169_v18 = vadd.f32 %v11646_v3, %v14610_v13  ;;  %11812 = vmatprep.mubr.msk.bf16.mxu1 %vm757_vm2, %v7734_v0  ;;  %v8814_v38 = vrot.slane %v8812_v26, 3  ;;  %v8810_v0 = vsel %vm8559_vm7, %v8800_v40, %v8809_v36 }
 0x238   : > { %v5948_v37 = vpop.f32.mrf.mxu1  ;;  %v11713_v32 = vpop.f32.mrf.mxu0  ;;  %v8826_v13 = vrot.slane %v8824_v63, 4  ;;  %v7736_v11 = vsel %vm7683_vm8, %v7733_v27, %v7735_v29  ;;  %v7738_v26 = vsel %vm7683_vm8, %v7735_v29, %v7737_v31  ;;  %v8833_v40 = vshll.u32 %v12222_v34, 16 }
 0x239   : > { %14609 = vst [vmem:[#allocation21_spill] sm:$0xff] %v13979_v5  ;;  %v13986_v47 = vadd.f32 %v11712_v42, %v6169_v18  ;;  %v6167_v23 = vadd.f32 %v5948_v37, %v14612_v21  ;;  %v12224_v5 = vld [vmem:[%s12316_s29 + $0x108] sm:$0xff]   ;;  %v12217_v42 = vld [vmem:[%s12316_s29 + $0xf0] sm:$0xff]   ;;  %v8830_v37 = vshrl.u32 %v12222_v34, 16 }
 0x23a   : > { %v11647_v54 = vpop.f32.mrf.mxu1  ;;  %v7057_v3 = vpop.f32.mrf.mxu0  ;;  %v8827_v21 = vor.u32 %v8826_v13, %v8823_v1 }
 0x23b   : > { %14611 = vst [vmem:[#allocation22_spill] sm:$0xff] %v13986_v47  ;;  %v13991_v17 = vadd.f32 %v7054_v7, %v6167_v23  ;;  %v6170_v51 = vadd.f32 %v11647_v54, %v13567_v2  ;;  %v8818_v2 = vor.u32 %v8817_v62, %v8814_v38  ;;  %v8842_v23 = vshll.u32 %v12224_v5, 16 }
 0x23c   : > { %v5951_v18 = vpop.f32.mrf.mxu1  ;;  %v11716_v47 = vpop.f32.mrf.mxu0  ;;  %11879 = vmatmul.mubr.msk.bf16.gmra.mxu0 %vm757_vm2, %v8801_v19  ;;  %v8839_v19 = vshrl.u32 %v12224_v5, 16  ;;  %v7741_v38 = vrot.slane %v13999_v10, 3  ;;  %v8832_v62 = vrot.slane %v8830_v37, 3 }
 0x23d   : > { %v14001_v58 = vadd.f32 %v11713_v32, %v6170_v51  ;;  %v6168_v63 = vadd.f32 %v5951_v18, %v13572_v52  ;;  %11882 = vmatprep.mubr.msk.bf16.mxu0 %vm757_vm2, %v8810_v0  ;;  %v7739_v32 = vrot.slane %v12217_v42, 3  ;;  %v8835_v0 = vrot.slane %v8833_v40, 4 }
 0x23e   : > { %v11650_v7 = vpop.f32.mrf.mxu1  ;;  %11813 = vmatmul.mubr.msk.bf16.gmra.mxu1 %vm757_vm2, %v7736_v11  ;;  %v7070_v27 = vpop.f32.mrf.mxu0  ;;  %v8819_v5 = vsel %vm8559_vm7, %v8809_v36, %v8818_v2  ;;  %v8828_v11 = vsel %vm8559_vm7, %v8818_v2, %v8827_v21  ;;  %v8841_v42 = vrot.slane %v8839_v19, 3  ;;  %v8844_v18 = vrot.slane %v8842_v23, 4 }
 0x23f   : > { %v14006_v29 = vadd.f32 %v7057_v3, %v6168_v63  ;;  %v6173_v54 = vadd.f32 %v11650_v7, %v13576_v14  ;;  %11816 = vmatprep.mubr.msk.bf16.mxu1 %vm757_vm2, %v7738_v26  ;;  %v12226_v3 = vld [vmem:[%s12316_s29 + $0x110] ss:$0 sps:$4 sm:$0xff]   ;;  %v7740_v37 = vsel %vm7683_vm8, %v7737_v31, %v7739_v32  ;;  %v8836_v36 = vor.u32 %v8835_v0, %v8832_v62  ;;  %v12223_v7 = vld [vmem:[%s12316_s29 + $0x108] sm:$0xff]  }
 0x240   : > { %v5964_v34 = vpop.f32.mrf.mxu1  ;;  %v11717_v52 = vpop.f32.mrf.mxu0  ;;  %v8851_v19 = vshll.u32 %v12226_v3, 16  ;;  %v8845_v23 = vor.u32 %v8844_v18, %v8841_v42  ;;  %v7745_v0 = vrot.slane %v12223_v7, 3 }
 0x241   : > { %v14011_v51 = vadd.f32 %v11716_v47, %v6173_v54  ;;  %v6171_v1 = vadd.f32 %v5964_v34, %v13587_v56  ;;  %v12221_v47 = vld [vmem:[%s12316_s29 + $0x100] sm:$0xff]   ;;  %v7742_v56 = vsel %vm7683_vm8, %v7739_v32, %v7741_v38 }
 0x242   : > { %v11651_v13 = vpop.f32.mrf.mxu1  ;;  %v7073_v14 = vpop.f32.mrf.mxu0  ;;  %v7743_v32 = vrot.slane %v12221_v47, 3  ;;  %v8846_v18 = vsel %vm8559_vm7, %v8836_v36, %v8845_v23  ;;  %v12225_v47 = vld [vmem:[%s12316_s29 + $0x110] ss:$0 sps:$4 sm:$0x77]  }
 0x243   : > { %v14017_v26 = vadd.f32 %v7070_v27, %v6171_v1  ;;  %v6174_v10 = vadd.f32 %v11651_v13, %v13595_v39  ;;  %v8848_v27 = vshrl.u32 %v12226_v3, 16 }
 0x244   : > { %v5967_v40 = vpop.f32.mrf.mxu1  ;;  %v11720_v63 = vpop.f32.mrf.mxu0  ;;  %11883 = vmatmul.mubr.msk.bf16.gmra.mxu0 %vm757_vm2, %v8819_v5 }
 0x245   : > { %v14025_v54 = vadd.f32 %v11717_v52, %v6174_v10  ;;  %v6172_v2 = vadd.f32 %v5967_v40, %v13600_v12  ;;  %11886 = vmatprep.mubr.msk.bf16.mxu0 %vm757_vm2, %v8828_v11  ;;  %v8837_v12 = vsel %vm8559_vm7, %v8827_v21, %v8836_v36  ;;  %v8850_v13 = vrot.slane %v8848_v27, 3 }
 0x246   : > { %v11654_v39 = vpop.f32.mrf.mxu1  ;;  %11817 = vmatmul.mubr.msk.bf16.gmra.mxu1 %vm757_vm2, %v7740_v37  ;;  %v7086_v31 = vpop.f32.mrf.mxu0  ;;  %v8853_v11 = vrot.slane %v8851_v19, 4  ;;  %v7744_v37 = vsel %vm7683_vm8, %v7741_v38, %v7743_v32  ;;  %v7747_v27 = vrot.slane %v12225_v47, 3 }
 0x247   : > { %v14030_v34 = vadd.f32 %v7073_v14, %v6172_v2  ;;  %v6177_v1 = vadd.f32 %v11654_v39, %v13609_v55  ;;  %11820 = vmatprep.mubr.msk.bf16.mxu1 %vm757_vm2, %v7742_v56 }
 0x248   : > { %v5980_v52 = vpop.f32.mrf.mxu1  ;;  %v11721_v62 = vpop.f32.mrf.mxu0  ;;  %v8854_v36 = vor.u32 %v8853_v11, %v8850_v13 }
 0x249   : > { %v14035_v5 = vadd.f32 %v11720_v63, %v6177_v1  ;;  %v6175_v3 = vadd.f32 %v5980_v52, %v13613_v48  ;;  %v7746_v63 = vsel %vm7683_vm8, %v7743_v32, %v7745_v0 }
 0x24a   : > { %v11655_v42 = vpop.f32.mrf.mxu1  ;;  %v7089_v14 = vpop.f32.mrf.mxu0  ;;  %v8855_v1 = vsel %vm8559_vm7, %v8845_v23, %v8854_v36 }
 0x24b   : > { %v14039_v55 = vadd.f32 %v7086_v31, %v6175_v3  ;;  %v6178_v10 = vadd.f32 %v11655_v42, %v13622_v15  ;;  %v7748_v3 = vsel %vm7683_vm8, %v7745_v0, %v7747_v27 }
 0x24c   : > { %v5983_v40 = vpop.f32.mrf.mxu1  ;;  %v11724_v21 = vpop.f32.mrf.mxu0  ;;  %11887 = vmatmul.mubr.msk.bf16.gmra.mxu0 %vm757_vm2, %v8837_v12 }
 0x24d   : > { %v14046_v48 = vadd.f32 %v11721_v62, %v6178_v10  ;;  %v6176_v56 = vadd.f32 %v5983_v40, %v13627_v9  ;;  %11890 = vmatprep.mubr.msk.bf16.mxu0 %vm757_vm2, %v8846_v18 }
 0x24e   : > { %v11658_v7 = vpop.f32.mrf.mxu1  ;;  %11821 = vmatmul.mubr.msk.bf16.gmra.mxu1 %vm757_vm2, %v7744_v37  ;;  %v7102_v15 = vpop.f32.mrf.mxu0 }
 0x24f   : > { %v14051_v2 = vadd.f32 %v7089_v14, %v6176_v56  ;;  %v6181_v38 = vadd.f32 %v11658_v7, %v13632_v4  ;;  %11824 = vmatprep.mubr.msk.bf16.mxu1 %vm757_vm2, %v7746_v63 }
 0x250   : > { %v5996_v19 = vpop.f32.mrf.mxu1  ;;  %v11725_v39 = vpop.f32.mrf.mxu0 }
 0x251   : > { %v14055_v31 = vadd.f32 %v11724_v21, %v6181_v38  ;;  %v6179_v9 = vadd.f32 %v5996_v19, %v13640_v35 }
 0x252   : > { %v11659_v32 = vpop.f32.mrf.mxu1  ;;  %v7105_v52 = vpop.f32.mrf.mxu0 }
 0x253   : > { %v14059_v62 = vadd.f32 %v7102_v15, %v6179_v9  ;;  %v6182_v12 = vadd.f32 %v11659_v32, %v13650_v16 }
 0x254   : > { %v5999_v4 = vpop.f32.mrf.mxu1  ;;  %v11728_v13 = vpop.f32.mrf.mxu0  ;;  %11891 = vmatmul.mubr.msk.bf16.gmra.mxu0 %vm757_vm2, %v8855_v1 }
 0x255   : > { %v14064_v11 = vadd.f32 %v11725_v39, %v6182_v12  ;;  %v6180_v42 = vadd.f32 %v5999_v4, %v13655_v50 }
 0x256   : > { %v11662_v14 = vpop.f32.mrf.mxu1  ;;  %11825 = vmatmul.mubr.msk.bf16.gmra.mxu1 %vm757_vm2, %v7748_v3  ;;  %v7118_v35 = vpop.f32.mrf.mxu0 }
 0x257   : > { %v14068_v23 = vadd.f32 %v7105_v52, %v6180_v42  ;;  %v6185_v18 = vadd.f32 %v11662_v14, %v13662_v30  ;;  %v14613_v14 = vld [vmem:[#allocation36_spill] sm:$0xff] }
 0x258   : > { %v6012_v10 = vpop.f32.mrf.mxu1  ;;  %v11729_v16 = vpop.f32.mrf.mxu0 }
 0x259   : > { %v14071_v37 = vadd.f32 %v11728_v13, %v6185_v18  ;;  %v6183_v0 = vadd.f32 %v6012_v10, %v13667_v33 }
 0x25a   : > { %v11663_v47 = vpop.f32.mrf.mxu1  ;;  %v7121_v40 = vpop.f32.mrf.mxu0 }
 0x25b   : > { %v14074_v21 = vadd.f32 %v7118_v35, %v6183_v0  ;;  %v6186_v50 = vadd.f32 %v11663_v47, %v13677_v53 }
 0x25c   : > { %v6015_v63 = vpop.f32.mrf.mxu1  ;;  %v11732_v56 = vpop.f32.mrf.mxu0 }
 0x25d   : > { %v14077_v36 = vadd.f32 %v11729_v16, %v6186_v50  ;;  %v6184_v7 = vadd.f32 %v6015_v63, %v13682_v8  ;;  %v14614_v16 = vld [vmem:[#allocation37_spill] sm:$0xff] }
 0x25e   : > { %v11666_v15 = vpop.f32.mrf.mxu1  ;;  %v7134_v30 = vpop.f32.mrf.mxu0 }
 0x25f   : > { %v14080_v38 = vadd.f32 %v7121_v40, %v6184_v7  ;;  %v6189_v27 = vadd.f32 %v11666_v15, %v13687_v22 }
 0x260   : > { %v6028_v19 = vpop.f32.mrf.mxu1  ;;  %v11733_v33 = vpop.f32.mrf.mxu0 }
 0x261   : > { %v14083_v39 = vadd.f32 %v11732_v56, %v6189_v27  ;;  %v6187_v9 = vadd.f32 %v6028_v19, %v13694_v41 }
 0x262   : > { %v11667_v1 = vpop.f32.mrf.mxu1  ;;  %v7137_v53 = vpop.f32.mrf.mxu0 }
 0x263   : > { %v14086_v32 = vadd.f32 %v7134_v30, %v6187_v9  ;;  %v6190_v52 = vadd.f32 %v11667_v1, %v13704_v44 }
 0x264   : > { %v6031_v12 = vpop.f32.mrf.mxu1  ;;  %v11736_v8 = vpop.f32.mrf.mxu0 }
 0x265   : > { %v14089_v3 = vadd.f32 %v11733_v33, %v6190_v52  ;;  %v6188_v4 = vadd.f32 %v6031_v12, %v13709_v6 }
 0x266   : > { %v11670_v13 = vpop.f32.mrf.mxu1  ;;  %v7150_v22 = vpop.f32.mrf.mxu0 }
 0x267   : > { %v14092_v42 = vadd.f32 %v7137_v53, %v6188_v4  ;;  %v6193_v35 = vadd.f32 %v11670_v13, %v14613_v14  ;;  %v14615_v53 = vld [vmem:[#allocation38_spill] sm:$0xff]  ;;  %v14616_v4 = vld [vmem:[#allocation39_spill] sm:$0xff] }
 0x268   : > { %v6044_v18 = vpop.f32.mrf.mxu1  ;;  %v11737_v41 = vpop.f32.mrf.mxu0 }
 0x269   : > { %v14095_v10 = vadd.f32 %v11736_v8, %v6193_v35  ;;  %v6191_v0 = vadd.f32 %v6044_v18, %v14614_v16  ;;  %v14617_v35 = vld [vmem:[#allocation40_spill] sm:$0xff] }
 0x26a   : > { %v11671_v47 = vpop.f32.mrf.mxu1  ;;  %v7153_v44 = vpop.f32.mrf.mxu0 }
 0x26b   : > { %v14098_v40 = vadd.f32 %v7150_v22, %v6191_v0  ;;  %v6194_v50 = vadd.f32 %v11671_v47, %v13731_v20  ;;  %v14618_v0 = vld [vmem:[#allocation41_spill] sm:$0xff] }
 0x26c   : > { %v6047_v63 = vpop.f32.mrf.mxu1  ;;  %v11740_v6 = vpop.f32.mrf.mxu0 }
 0x26d   : > { %v14101_v56 = vadd.f32 %v11737_v41, %v6194_v50  ;;  %v6192_v7 = vadd.f32 %v6047_v63, %v13736_v46 }
 0x26e   : > { %v11674_v15 = vpop.f32.mrf.mxu1  ;;  %v7166_v30 = vpop.f32.mrf.mxu0 }
 0x26f   : > { %v14104_v27 = vadd.f32 %v7153_v44, %v6192_v7  ;;  %v6197_v19 = vadd.f32 %v11674_v15, %v13741_v59 }
 0x270   : > { %v6060_v33 = vpop.f32.mrf.mxu1  ;;  %v11741_v9 = vpop.f32.mrf.mxu0 }
 0x271   : > { %v14107_v1 = vadd.f32 %v11740_v6, %v6197_v19  ;;  %v6195_v52 = vadd.f32 %v6060_v33, %v14615_v53  ;;  %v14619_v6 = vld [vmem:[#allocation42_spill] sm:$0xff]  ;;  %v14620_v33 = vld [vmem:[#allocation43_spill] sm:$0xff] }
 0x272   : > { %v11675_v12 = vpop.f32.mrf.mxu1  ;;  %v7169_v20 = vpop.f32.mrf.mxu0 }
 0x273   : > { %v14110_v8 = vadd.f32 %v7166_v30, %v6195_v52  ;;  %v6198_v13 = vadd.f32 %v11675_v12, %v14616_v4 }
 0x274   : > { %v6063_v22 = vpop.f32.mrf.mxu1  ;;  %v11744_v46 = vpop.f32.mrf.mxu0 }
 0x275   : > { %v14113_v14 = vadd.f32 %v11741_v9, %v6198_v13  ;;  %v6196_v18 = vadd.f32 %v6063_v22, %v14617_v35 }
 0x276   : > { %v11678_v41 = vpop.f32.mrf.mxu1  ;;  %v7182_v59 = vpop.f32.mrf.mxu0 }
 0x277   : > { %v14116_v16 = vadd.f32 %v7169_v20, %v6196_v18  ;;  %v6201_v47 = vadd.f32 %v11678_v41, %v14618_v0  ;;  %v14621_v20 = vld [vmem:[#allocation44_spill] sm:$0xff] }
 0x278   : > { %v6076_v44 = vpop.f32.mrf.mxu1  ;;  %v11745_v50 = vpop.f32.mrf.mxu0 }
 0x279   : > { %v14119_v63 = vadd.f32 %v11744_v46, %v6201_v47  ;;  %v6199_v7 = vadd.f32 %v6076_v44, %v14619_v6  ;;  %v14623_v46 = vld [vmem:[#allocation3_spill] sm:$0xff] }
 0x27a   : > { %v11679_v15 = vpop.f32.mrf.mxu1  ;;  %v7185_v30 = vpop.f32.mrf.mxu0 }
 0x27b   : > { %v14122_v19 = vadd.f32 %v7182_v59, %v6199_v7  ;;  %v6202_v9 = vadd.f32 %v11679_v15, %v14620_v33  ;;  %v14625_v59 = vld [vmem:[#allocation4_spill] sm:$0xff] }
 0x27c   : > { %v6079_v53 = vpop.f32.mrf.mxu1  ;;  %v11748_v52 = vpop.f32.mrf.mxu0 }
 0x27d   : > { %v14125_v12 = vadd.f32 %v11745_v50, %v6202_v9  ;;  %v6200_v4 = vadd.f32 %v6079_v53, %v14621_v20  ;;  %v14627_v50 = vld [vmem:[#allocation5_spill] sm:$0xff] }
 0x27e   : > { %v11682_v13 = vpop.f32.mrf.mxu1  ;;  %v7198_v22 = vpop.f32.mrf.mxu0 }
 0x27f   : > { %v14128_v35 = vadd.f32 %v7185_v30, %v6200_v4  ;;  %v6205_v18 = vadd.f32 %v11682_v13, %v14623_v46  ;;  %v14628_v30 = vld [vmem:[#allocation6_spill] sm:$0xff] }
 0x280   : > { %v6092_v41 = vpop.f32.mrf.mxu1  ;;  %v11749_v0 = vpop.f32.mrf.mxu0 }
 0x281   : > { %14622 = vst [vmem:[#allocation23_spill] sm:$0xff] %v14128_v35  ;;  %v14131_v47 = vadd.f32 %v11748_v52, %v6205_v18  ;;  %v6203_v44 = vadd.f32 %v6092_v41, %v14625_v59  ;;  %v14630_v52 = vld [vmem:[#allocation7_spill] sm:$0xff] }
 0x282   : > { %v11683_v6 = vpop.f32.mrf.mxu1  ;;  %v7201_v7 = vpop.f32.mrf.mxu0 }
 0x283   : > { %14624 = vst [vmem:[#allocation24_spill] sm:$0xff] %v14131_v47  ;;  %v14134_v15 = vadd.f32 %v7198_v22, %v6203_v44  ;;  %v6206_v33 = vadd.f32 %v11683_v6, %v14627_v50  ;;  %v14632_v22 = vld [vmem:[#allocation8_spill] sm:$0xff] }
 0x284   : > { %v6095_v9 = vpop.f32.mrf.mxu1  ;;  %v11752_v53 = vpop.f32.mrf.mxu0 }
 0x285   : > { %14626 = vst [vmem:[#allocation25_spill] sm:$0xff] %v14134_v15  ;;  %v14137_v20 = vadd.f32 %v11749_v0, %v6206_v33  ;;  %v6204_v4 = vadd.f32 %v6095_v9, %v14628_v30 }
 0x286   : > { %v11686_v35 = vpop.f32.mrf.mxu1  ;;  %v7214_v13 = vpop.f32.mrf.mxu0 }
 0x287   : > { %v14140_v46 = vadd.f32 %v7201_v7, %v6204_v4  ;;  %v6209_v18 = vadd.f32 %v11686_v35, %v14630_v52 }
 0x288   : > { %v6108_v47 = vpop.f32.mrf.mxu1  ;;  %v11753_v41 = vpop.f32.mrf.mxu0 }
 0x289   : > { %14629 = vst [vmem:[#allocation26_spill] sm:$0xff] %v14140_v46  ;;  %v14143_v59 = vadd.f32 %v11752_v53, %v6209_v18  ;;  %v6207_v44 = vadd.f32 %v6108_v47, %v14632_v22  ;;  %v14636_v53 = vld [vmem:[#allocation9_spill] sm:$0xff] }
 0x28a   : > { %v11687_v15 = vpop.f32.mrf.mxu1  ;;  %v7217_v6 = vpop.f32.mrf.mxu0 }
 0x28b   : > { %14631 = vst [vmem:[#allocation27_spill] sm:$0xff] %v14143_v59  ;;  %v14146_v50 = vadd.f32 %v7214_v13, %v6207_v44  ;;  %v6210_v0 = vadd.f32 %v11687_v15, %v13839_v24  ;;  %v14638_v13 = vld [vmem:[#allocation10_spill] sm:$0xff] }
 0x28c   : > { %v6111_v33 = vpop.f32.mrf.mxu1  ;;  %v11756_v9 = vpop.f32.mrf.mxu0 }
 0x28d   : > { %14633 = vst [vmem:[#allocation28_spill] sm:$0xff] %v14146_v50  ;;  %v14149_v30 = vadd.f32 %v11753_v41, %v6210_v0  ;;  %v6208_v7 = vadd.f32 %v6111_v33, %v13844_v60  ;;  %v14640_v41 = vld [vmem:[#allocation11_spill] sm:$0xff] }
 0x28e   : > { %v11690_v4 = vpop.f32.mrf.mxu1  ;;  %v7230_v35 = vpop.f32.mrf.mxu0 }
 0x28f   : > { %14634 = vst [vmem:[#allocation29_spill] sm:$0xff] %v14149_v30  ;;  %v14152_v52 = vadd.f32 %v7217_v6, %v6208_v7  ;;  %v6213_v18 = vadd.f32 %v11690_v4, %v14636_v53  ;;  %v14642_v6 = vld [vmem:[#allocation12_spill] sm:$0xff] }
 0x290   : > { %v6124_v59 = vpop.f32.mrf.mxu1  ;;  %v11757_v47 = vpop.f32.mrf.mxu0 }
 0x291   : > { %14635 = vst [vmem:[#allocation30_spill] sm:$0xff] %v14152_v52  ;;  %v14155_v22 = vadd.f32 %v11756_v9, %v6213_v18  ;;  %v6211_v44 = vadd.f32 %v6124_v59, %v14638_v13  ;;  %v14644_v9 = vld [vmem:[#allocation13_spill] sm:$0xff] }
 0x292   : > { %v11691_v50 = vpop.f32.mrf.mxu1  ;;  %v7233_v24 = vpop.f32.mrf.mxu0 }
 0x293   : > { %14637 = vst [vmem:[#allocation31_spill] sm:$0xff] %v14155_v22  ;;  %v14158_v15 = vadd.f32 %v7230_v35, %v6211_v44  ;;  %v6214_v0 = vadd.f32 %v11691_v50, %v14640_v41  ;;  %v14646_v35 = vld [vmem:[#allocation14_spill] sm:$0xff] }
 0x294   : > { %v6127_v30 = vpop.f32.mrf.mxu1  ;;  %v11760_v60 = vpop.f32.mrf.mxu0 }
 0x295   : > { %14639 = vst [vmem:[#allocation32_spill] sm:$0xff] %v14158_v15  ;;  %v14161_v33 = vadd.f32 %v11757_v47, %v6214_v0  ;;  %v6212_v7 = vadd.f32 %v6127_v30, %v14642_v6 }
 0x296   : > { %v11694_v52 = vpop.f32.mrf.mxu1  ;;  %v7246_v4 = vpop.f32.mrf.mxu0 }
 0x297   : > { %14641 = vst [vmem:[#allocation33_spill] sm:$0xff] %v14161_v33  ;;  %v14164_v53 = vadd.f32 %v7233_v24, %v6212_v7  ;;  %v6217_v18 = vadd.f32 %v11694_v52, %v14644_v9 }
 0x298   : > { %v6140_v59 = vpop.f32.mrf.mxu1  ;;  %v11761_v13 = vpop.f32.mrf.mxu0 }
 0x299   : > { %14643 = vst [vmem:[#allocation34_spill] sm:$0xff] %v14164_v53  ;;  %v14167_v22 = vadd.f32 %v11760_v60, %v6217_v18  ;;  %v6215_v44 = vadd.f32 %v6140_v59, %v14646_v35 }
 0x29a   : > { %v11695_v50 = vpop.f32.mrf.mxu1  ;;  %v7249_v41 = vpop.f32.mrf.mxu0 }
 0x29b   : > { %14645 = vst [vmem:[#allocation35_spill] sm:$0xff] %v14167_v22  ;;  %v14170_v15 = vadd.f32 %v7246_v4, %v6215_v44  ;;  %v6218_v47 = vadd.f32 %v11695_v50, %v13893_v45  ;;  %v14183_v4 = vld [vmem:[%s14429_s2] ss:$0 sm:$0xff] }
 0x29c   : > { %v6143_v30 = vpop.f32.mrf.mxu1  ;;  %v11832_v0 = vpop.f32.mrf.mxu0  ;;  %v14190_v50 = vld [vmem:[%s14430_s3] ss:$0 sm:$0xff] }
 0x29d   : > { %14647 = vst [vmem:[#allocation36_spill] sm:$0xff] %v14170_v15  ;;  %v14173_v6 = vadd.f32 %v11761_v13, %v6218_v47  ;;  %v6216_v24 = vadd.f32 %v6143_v30, %v13898_v43 }
 0x29e   : > { %v11766_v7 = vpop.f32.mrf.mxu1  ;;  %v8989_v52 = vpop.f32.mrf.mxu0 }
 0x29f   : > { %14648 = vst [vmem:[#allocation37_spill] sm:$0xff] %v14173_v6  ;;  %v14177_v9 = vadd.f32 %v7249_v41, %v6216_v24  ;;  %v8139_v60 = vadd.f32 %v11766_v7, %v13903_v25 }
 0x2a0   : > { %v7882_v18 = vpop.f32.mrf.mxu1  ;;  %v11833_v45 = vpop.f32.mrf.mxu0 }
 0x2a1   : > { %14649 = vst [vmem:[#allocation38_spill] sm:$0xff] %v14177_v9  ;;  %v9246_v59 = vadd.f32 %v11832_v0, %v8139_v60  ;;  %v8137_v13 = vadd.f32 %v7882_v18, %v13910_v61  ;;  %v14650_v61 = vld [vmem:[#allocation15_spill] sm:$0xff] }
 0x2a2   : > { %v11767_v35 = vpop.f32.mrf.mxu1  ;;  %v8992_v43 = vpop.f32.mrf.mxu0 }
 0x2a3   : > { %v9445_v44 = vmul.f32 %v14183_v4, %v9246_v59  ;;  %v9244_v25 = vadd.f32 %v8989_v52, %v8137_v13  ;;  %v8140_v41 = vadd.f32 %v11767_v35, %v13920_v49  ;;  %v14651_v52 = vld [vmem:[#allocation16_spill] sm:$0xff] }
 0x2a4   : > { %v7885_v47 = vpop.f32.mrf.mxu1  ;;  %v11836_v30 = vpop.f32.mrf.mxu0 }
 0x2a5   : > { %v9443_v24 = vmul.f32 %v14183_v4, %v9244_v25  ;;  %v9247_v0 = vadd.f32 %v11833_v45, %v8140_v41  ;;  %v8138_v7 = vadd.f32 %v7885_v47, %v14650_v61  ;;  %v9516_v60 = vadd.f32 %v14190_v50, %v9445_v44  ;;  %v14652_v41 = vld [vmem:[#allocation17_spill] sm:$0xff] }
 0x2a6   : > { %v11770_v18 = vpop.f32.mrf.mxu1  ;;  %v9005_v59 = vpop.f32.mrf.mxu0 }
 0x2a7   : > { %v9446_v9 = vmul.f32 %v14183_v4, %v9247_v0  ;;  %v9245_v6 = vadd.f32 %v8992_v43, %v8138_v7  ;;  %v9514_v15 = vadd.f32 %v14190_v50, %v9443_v24  ;;  %v8143_v13 = vadd.f32 %v11770_v18, %v14651_v52 }
 0x2a8   : > { %v7898_v49 = vpop.f32.mrf.mxu1  ;;  %v11837_v35 = vpop.f32.mrf.mxu0  ;;  %v9580_v61 = vmax.f32 %v9516_v60, 0.0 }
 0x2a9   : > { %v9517_v25 = vadd.f32 %v14190_v50, %v9446_v9  ;;  %v9444_v45 = vmul.f32 %v14183_v4, %v9245_v6  ;;  %v8141_v47 = vadd.f32 %v7898_v49, %v14652_v41  ;;  %v9250_v44 = vadd.f32 %v11836_v30, %v8143_v13 }
 0x2aa   : > { %v11771_v22 = vpop.f32.mrf.mxu1  ;;  %v9008_v53 = vpop.f32.mrf.mxu0  ;;  %v9578_v7 = vmax.f32 %v9514_v15, 0.0 }
 0x2ab   : > { %v9581_v33 = vmax.f32 %v9517_v25, 0.0  ;;  %v9515_v43 = vadd.f32 %v14190_v50, %v9444_v45  ;;  %v9248_v0 = vadd.f32 %v9005_v59, %v8141_v47  ;;  %v8144_v24 = vadd.f32 %v11771_v22, %v13947_v57  ;;  %v14653_v45 = vld [vmem:[#allocation18_spill] sm:$0xff] }
 0x2ac   : > { %v9449_v6 = vmul.f32 %v14183_v4, %v9250_v44  ;;  %v7901_v9 = vpop.f32.mrf.mxu1  ;;  %v11840_v60 = vpop.f32.mrf.mxu0 }
 0x2ad   : > { %v10820_v30 = vpack.c.bf16 %v9581_v33, %v9580_v61  ;;  %v9579_v18 = vmax.f32 %v9515_v43, 0.0  ;;  %v9447_v52 = vmul.f32 %v14183_v4, %v9248_v0  ;;  %v9251_v13 = vadd.f32 %v11837_v35, %v8144_v24  ;;  %v14654_v43 = vld [vmem:[#allocation19_spill] sm:$0xff] }
 0x2ae   : > { %v9520_v59 = vadd.f32 %v14190_v50, %v9449_v6  ;;  %v8142_v57 = vadd.f32 %v7901_v9, %v13952_v28  ;;  %v11774_v22 = vpop.f32.mrf.mxu1  ;;  %v9021_v15 = vpop.f32.mrf.mxu0 }
 0x2af   : > { %10972 = vst [vmem:[%s14207_s5 + $0x8] sm:$0xff] %v10820_v30   ;;  %v10815_v49 = vpack.c.bf16 %v9579_v18, %v9578_v7  ;;  %v9450_v25 = vmul.f32 %v14183_v4, %v9251_v13  ;;  %v8147_v41 = vadd.f32 %v11774_v22, %v14653_v45  ;;  %v9518_v33 = vadd.f32 %v14190_v50, %v9447_v52  ;;  %v14655_v18 = vld [vmem:[#allocation20_spill] sm:$0xff] }
 0x2b0   : > { %v9249_v47 = vadd.f32 %v9008_v53, %v8142_v57  ;;  %v7914_v44 = vpop.f32.mrf.mxu1  ;;  %v11841_v46 = vpop.f32.mrf.mxu0  ;;  %v9584_v28 = vmax.f32 %v9520_v59, 0.0 }
 0x2b1   : > { %10816 = vst [vmem:[%s14207_s5] sm:$0xff] %v10815_v49   ;;  %v9521_v35 = vadd.f32 %v14190_v50, %v9450_v25  ;;  %v9254_v61 = vadd.f32 %v11840_v60, %v8147_v41  ;;  %v8145_v0 = vadd.f32 %v7914_v44, %v14654_v43  ;;  %v9582_v49 = vmax.f32 %v9518_v33, 0.0  ;;  %v14657_v43 = vld [vmem:[#allocation22_spill] sm:$0xff] }
 0x2b2   : > { %v9448_v24 = vmul.f32 %v14183_v4, %v9249_v47  ;;  %v11775_v6 = vpop.f32.mrf.mxu1  ;;  %v9024_v7 = vpop.f32.mrf.mxu0  ;;  %v14656_v47 = vld [vmem:[#allocation21_spill] sm:$0xff] }
 0x2b3   : > { %v9585_v9 = vmax.f32 %v9521_v35, 0.0  ;;  %v9453_v30 = vmul.f32 %v14183_v4, %v9254_v61  ;;  %v9252_v53 = vadd.f32 %v9021_v15, %v8145_v0  ;;  %v8148_v13 = vadd.f32 %v11775_v6, %v14655_v18 }
 0x2b4   : > { %v9519_v57 = vadd.f32 %v14190_v50, %v9448_v24  ;;  %v7917_v52 = vpop.f32.mrf.mxu1  ;;  %v11844_v22 = vpop.f32.mrf.mxu0 }
 0x2b5   : > { %v10830_v60 = vpack.c.bf16 %v9585_v9, %v9584_v28  ;;  %v9255_v25 = vadd.f32 %v11841_v46, %v8148_v13  ;;  %v9524_v59 = vadd.f32 %v14190_v50, %v9453_v30  ;;  %v9451_v41 = vmul.f32 %v14183_v4, %v9252_v53 }
 0x2b6   : > { %v9583_v45 = vmax.f32 %v9519_v57, 0.0  ;;  %v8146_v44 = vadd.f32 %v7917_v52, %v14656_v47  ;;  %v11778_v35 = vpop.f32.mrf.mxu1  ;;  %v9037_v61 = vpop.f32.mrf.mxu0 }
 0x2b7   : > { %10974 = vst [vmem:[%s14207_s5 + $0x18] sm:$0xff] %v10830_v60   ;;  %v9454_v15 = vmul.f32 %v14183_v4, %v9255_v25  ;;  %v8151_v0 = vadd.f32 %v11778_v35, %v14657_v43  ;;  %v9588_v53 = vmax.f32 %v9524_v59, 0.0  ;;  %v9522_v18 = vadd.f32 %v14190_v50, %v9451_v41 }
 0x2b8   : > { %v10825_v24 = vpack.c.bf16 %v9583_v45, %v9582_v49  ;;  %v9253_v6 = vadd.f32 %v9024_v7, %v8146_v44  ;;  %v7930_v33 = vpop.f32.mrf.mxu1  ;;  %v11845_v28 = vpop.f32.mrf.mxu0 }
 0x2b9   : > { %v9525_v46 = vadd.f32 %v14190_v50, %v9454_v15  ;;  %v9258_v9 = vadd.f32 %v11844_v22, %v8151_v0  ;;  %v8149_v30 = vadd.f32 %v7930_v33, %v13991_v17  ;;  %v9586_v41 = vmax.f32 %v9522_v18, 0.0 }
 0x2ba   : > { %10973 = vst [vmem:[%s14207_s5 + $0x10] sm:$0xff] %v10825_v24   ;;  %v9452_v13 = vmul.f32 %v14183_v4, %v9253_v6  ;;  %v11779_v57 = vpop.f32.mrf.mxu1  ;;  %v9040_v52 = vpop.f32.mrf.mxu0 }
 0x2bb   : > { %v9589_v60 = vmax.f32 %v9525_v46, 0.0  ;;  %v9457_v49 = vmul.f32 %v14183_v4, %v9258_v9  ;;  %v9256_v7 = vadd.f32 %v9037_v61, %v8149_v30  ;;  %v8152_v25 = vadd.f32 %v11779_v57, %v14001_v58 }
 0x2bc   : > { %v9523_v45 = vadd.f32 %v14190_v50, %v9452_v13  ;;  %v7933_v22 = vpop.f32.mrf.mxu1  ;;  %v11848_v47 = vpop.f32.mrf.mxu0 }
 0x2bd   : > { %v10840_v17 = vpack.c.bf16 %v9589_v60, %v9588_v53  ;;  %v9455_v59 = vmul.f32 %v14183_v4, %v9256_v7  ;;  %v9259_v44 = vadd.f32 %v11845_v28, %v8152_v25  ;;  %v9528_v15 = vadd.f32 %v14190_v50, %v9457_v49 }
 0x2be   : > { %v9587_v35 = vmax.f32 %v9523_v45, 0.0  ;;  %v8150_v43 = vadd.f32 %v7933_v22, %v14006_v29  ;;  %v11782_v0 = vpop.f32.mrf.mxu1  ;;  %v9053_v24 = vpop.f32.mrf.mxu0 }
 0x2bf   : > { %10976 = vst [vmem:[%s14207_s5 + $0x28] sm:$0xff] %v10840_v17   ;;  %v9458_v58 = vmul.f32 %v14183_v4, %v9259_v44  ;;  %v8155_v61 = vadd.f32 %v11782_v0, %v14011_v51  ;;  %v9526_v28 = vadd.f32 %v14190_v50, %v9455_v59  ;;  %v9592_v29 = vmax.f32 %v9528_v15, 0.0 }
 0x2c0   : > { %v10835_v6 = vpack.c.bf16 %v9587_v35, %v9586_v41  ;;  %v9257_v33 = vadd.f32 %v9040_v52, %v8150_v43  ;;  %v7946_v46 = vpop.f32.mrf.mxu1  ;;  %v11849_v9 = vpop.f32.mrf.mxu0 }
 0x2c1   : > { %v9529_v30 = vadd.f32 %v14190_v50, %v9458_v58  ;;  %v9262_v53 = vadd.f32 %v11848_v47, %v8155_v61  ;;  %v8153_v18 = vadd.f32 %v7946_v46, %v14017_v26  ;;  %v9590_v47 = vmax.f32 %v9526_v28, 0.0 }
 0x2c2   : > { %10975 = vst [vmem:[%s14207_s5 + $0x20] sm:$0xff] %v10835_v6   ;;  %v9456_v13 = vmul.f32 %v14183_v4, %v9257_v33  ;;  %v11783_v57 = vpop.f32.mrf.mxu1  ;;  %v9056_v60 = vpop.f32.mrf.mxu0 }
 0x2c3   : > { %v9593_v49 = vmax.f32 %v9529_v30, 0.0  ;;  %v9461_v51 = vmul.f32 %v14183_v4, %v9262_v53  ;;  %v9260_v52 = vadd.f32 %v9053_v24, %v8153_v18  ;;  %v8156_v7 = vadd.f32 %v11783_v57, %v14025_v54 }
 0x2c4   : > { %v9527_v25 = vadd.f32 %v14190_v50, %v9456_v13  ;;  %v7949_v45 = vpop.f32.mrf.mxu1  ;;  %v11852_v22 = vpop.f32.mrf.mxu0 }
 0x2c5   : > { %v10850_v17 = vpack.c.bf16 %v9593_v49, %v9592_v29  ;;  %v9263_v26 = vadd.f32 %v11849_v9, %v8156_v7  ;;  %v9532_v44 = vadd.f32 %v14190_v50, %v9461_v51  ;;  %v9459_v41 = vmul.f32 %v14183_v4, %v9260_v52 }
 0x2c6   : > { %v9591_v59 = vmax.f32 %v9527_v25, 0.0  ;;  %v8154_v35 = vadd.f32 %v7949_v45, %v14030_v34  ;;  %v11786_v15 = vpop.f32.mrf.mxu1  ;;  %v9069_v43 = vpop.f32.mrf.mxu0 }
 0x2c7   : > { %10978 = vst [vmem:[%s14207_s5 + $0x38] sm:$0xff] %v10850_v17   ;;  %v9462_v54 = vmul.f32 %v14183_v4, %v9263_v26  ;;  %v8159_v0 = vadd.f32 %v11786_v15, %v14035_v5  ;;  %v9596_v28 = vmax.f32 %v9532_v44, 0.0  ;;  %v9530_v34 = vadd.f32 %v14190_v50, %v9459_v41 }
 0x2c8   : > { %v10845_v24 = vpack.c.bf16 %v9591_v59, %v9590_v47  ;;  %v9261_v58 = vadd.f32 %v9056_v60, %v8154_v35  ;;  %v7962_v61 = vpop.f32.mrf.mxu1  ;;  %v11853_v6 = vpop.f32.mrf.mxu0 }
 0x2c9   : > { %v9533_v33 = vadd.f32 %v14190_v50, %v9462_v54  ;;  %v9266_v46 = vadd.f32 %v11852_v22, %v8159_v0  ;;  %v8157_v9 = vadd.f32 %v7962_v61, %v14039_v55  ;;  %v9594_v25 = vmax.f32 %v9530_v34, 0.0 }
 0x2ca   : > { %10977 = vst [vmem:[%s14207_s5 + $0x30] sm:$0xff] %v10845_v24   ;;  %v9460_v30 = vmul.f32 %v14183_v4, %v9261_v58  ;;  %v11787_v53 = vpop.f32.mrf.mxu1  ;;  %v9072_v18 = vpop.f32.mrf.mxu0 }
 0x2cb   : > { %v9597_v29 = vmax.f32 %v9533_v33, 0.0  ;;  %v9465_v5 = vmul.f32 %v14183_v4, %v9266_v46  ;;  %v9264_v13 = vadd.f32 %v9069_v43, %v8157_v9  ;;  %v8160_v57 = vadd.f32 %v11787_v53, %v14046_v48 }
 0x2cc   : > { %v9531_v60 = vadd.f32 %v14190_v50, %v9460_v30  ;;  %v7965_v49 = vpop.f32.mrf.mxu1  ;;  %v11856_v51 = vpop.f32.mrf.mxu0 }
 0x2cd   : > { %v10860_v55 = vpack.c.bf16 %v9597_v29, %v9596_v28  ;;  %v9463_v52 = vmul.f32 %v14183_v4, %v9264_v13  ;;  %v9267_v7 = vadd.f32 %v11853_v6, %v8160_v57  ;;  %v9536_v22 = vadd.f32 %v14190_v50, %v9465_v5 }
 0x2ce   : > { %v9595_v45 = vmax.f32 %v9531_v60, 0.0  ;;  %v8158_v47 = vadd.f32 %v7965_v49, %v14051_v2  ;;  %v11790_v17 = vpop.f32.mrf.mxu1  ;;  %v9085_v26 = vpop.f32.mrf.mxu0 }
 0x2cf   : > { %10980 = vst [vmem:[%s14207_s5 + $0x48] sm:$0xff] %v10860_v55   ;;  %v9466_v48 = vmul.f32 %v14183_v4, %v9267_v7  ;;  %v8163_v59 = vadd.f32 %v11790_v17, %v14055_v31  ;;  %v9534_v43 = vadd.f32 %v14190_v50, %v9463_v52  ;;  %v9600_v2 = vmax.f32 %v9536_v22, 0.0 }
 0x2d0   : > { %v10855_v44 = vpack.c.bf16 %v9595_v45, %v9594_v25  ;;  %v9265_v41 = vadd.f32 %v9072_v18, %v8158_v47  ;;  %v7978_v35 = vpop.f32.mrf.mxu1  ;;  %v11857_v15 = vpop.f32.mrf.mxu0 }
 0x2d1   : > { %v9537_v54 = vadd.f32 %v14190_v50, %v9466_v48  ;;  %v9270_v0 = vadd.f32 %v11856_v51, %v8163_v59  ;;  %v8161_v24 = vadd.f32 %v7978_v35, %v14059_v62  ;;  %v9598_v53 = vmax.f32 %v9534_v43, 0.0 }
 0x2d2   : > { %10979 = vst [vmem:[%s14207_s5 + $0x40] sm:$0xff] %v10855_v44   ;;  %v9464_v58 = vmul.f32 %v14183_v4, %v9265_v41  ;;  %v11791_v61 = vpop.f32.mrf.mxu1  ;;  %v9088_v6 = vpop.f32.mrf.mxu0 }
 0x2d3   : > { %v9601_v33 = vmax.f32 %v9537_v54, 0.0  ;;  %v9469_v31 = vmul.f32 %v14183_v4, %v9270_v0  ;;  %v9268_v46 = vadd.f32 %v9085_v26, %v8161_v24  ;;  %v8164_v9 = vadd.f32 %v11791_v61, %v14064_v11 }
 0x2d4   : > { %v9535_v28 = vadd.f32 %v14190_v50, %v9464_v58  ;;  %v7981_v34 = vpop.f32.mrf.mxu1  ;;  %v11860_v30 = vpop.f32.mrf.mxu0 }
 0x2d5   : > { %v10870_v18 = vpack.c.bf16 %v9601_v33, %v9600_v2  ;;  %v9271_v62 = vadd.f32 %v11857_v15, %v8164_v9  ;;  %v9540_v5 = vadd.f32 %v14190_v50, %v9469_v31  ;;  %v9467_v13 = vmul.f32 %v14183_v4, %v9268_v46 }
 0x2d6   : > { %v9599_v29 = vmax.f32 %v9535_v28, 0.0  ;;  %v8162_v57 = vadd.f32 %v7981_v34, %v14068_v23  ;;  %v11794_v60 = vpop.f32.mrf.mxu1  ;;  %v9101_v49 = vpop.f32.mrf.mxu0 }
 0x2d7   : > { %10982 = vst [vmem:[%s14207_s5 + $0x58] sm:$0xff] %v10870_v18   ;;  %v9470_v11 = vmul.f32 %v14183_v4, %v9271_v62  ;;  %v8167_v51 = vadd.f32 %v11794_v60, %v14071_v37  ;;  %v9604_v17 = vmax.f32 %v9540_v5, 0.0  ;;  %v9538_v23 = vadd.f32 %v14190_v50, %v9467_v13 }
 0x2d8   : > { %v10865_v55 = vpack.c.bf16 %v9599_v29, %v9598_v53  ;;  %v9269_v52 = vadd.f32 %v9088_v6, %v8162_v57  ;;  %v7994_v7 = vpop.f32.mrf.mxu1  ;;  %v11861_v25 = vpop.f32.mrf.mxu0 }
 0x2d9   : > { %v9541_v45 = vadd.f32 %v14190_v50, %v9470_v11  ;;  %v9274_v22 = vadd.f32 %v11860_v30, %v8167_v51  ;;  %v8165_v47 = vadd.f32 %v7994_v7, %v14074_v21  ;;  %v9602_v2 = vmax.f32 %v9538_v23, 0.0 }
 0x2da   : > { %10981 = vst [vmem:[%s14207_s5 + $0x50] sm:$0xff] %v10865_v55   ;;  %v9468_v26 = vmul.f32 %v14183_v4, %v9269_v52  ;;  %v11795_v48 = vpop.f32.mrf.mxu1  ;;  %v9104_v59 = vpop.f32.mrf.mxu0 }
 0x2db   : > { %v9605_v44 = vmax.f32 %v9541_v45, 0.0  ;;  %v9473_v37 = vmul.f32 %v14183_v4, %v9274_v22  ;;  %v9272_v41 = vadd.f32 %v9101_v49, %v8165_v47  ;;  %v8168_v35 = vadd.f32 %v11795_v48, %v14077_v36 }
 0x2dc   : > { %v9539_v15 = vadd.f32 %v14190_v50, %v9468_v26  ;;  %v7997_v43 = vpop.f32.mrf.mxu1  ;;  %v11864_v54 = vpop.f32.mrf.mxu0 }
 0x2dd   : > { %v10880_v21 = vpack.c.bf16 %v9605_v44, %v9604_v17  ;;  %v9471_v0 = vmul.f32 %v14183_v4, %v9272_v41  ;;  %v9275_v24 = vadd.f32 %v11861_v25, %v8168_v35  ;;  %v9544_v61 = vadd.f32 %v14190_v50, %v9473_v37 }
 0x2de   : > { %v9603_v58 = vmax.f32 %v9539_v15, 0.0  ;;  %v8166_v6 = vadd.f32 %v7997_v43, %v14080_v38  ;;  %v11798_v33 = vpop.f32.mrf.mxu1  ;;  %v9117_v31 = vpop.f32.mrf.mxu0 }
 0x2df   : > { %10984 = vst [vmem:[%s14207_s5 + $0x68] sm:$0xff] %v10880_v21   ;;  %v9474_v36 = vmul.f32 %v14183_v4, %v9275_v24  ;;  %v8171_v46 = vadd.f32 %v11798_v33, %v14083_v39  ;;  %v9542_v53 = vadd.f32 %v14190_v50, %v9471_v0  ;;  %v9608_v38 = vmax.f32 %v9544_v61, 0.0 }
 0x2e0   : > { %v10875_v9 = vpack.c.bf16 %v9603_v58, %v9602_v2  ;;  %v9273_v28 = vadd.f32 %v9104_v59, %v8166_v6  ;;  %v8010_v34 = vpop.f32.mrf.mxu1  ;;  %v11865_v30 = vpop.f32.mrf.mxu0 }
 0x2e1   : > { %v9545_v18 = vadd.f32 %v14190_v50, %v9474_v36  ;;  %v9278_v62 = vadd.f32 %v11864_v54, %v8171_v46  ;;  %v8169_v29 = vadd.f32 %v8010_v34, %v14086_v32  ;;  %v9606_v7 = vmax.f32 %v9542_v53, 0.0 }
 0x2e2   : > { %10983 = vst [vmem:[%s14207_s5 + $0x60] sm:$0xff] %v10875_v9   ;;  %v9472_v5 = vmul.f32 %v14183_v4, %v9273_v28  ;;  %v11799_v13 = vpop.f32.mrf.mxu1  ;;  %v9120_v57 = vpop.f32.mrf.mxu0 }
 0x2e3   : > { %v9609_v60 = vmax.f32 %v9545_v18, 0.0  ;;  %v9477_v39 = vmul.f32 %v14183_v4, %v9278_v62  ;;  %v9276_v49 = vadd.f32 %v9117_v31, %v8169_v29  ;;  %v8172_v11 = vadd.f32 %v11799_v13, %v14089_v3 }
 0x2e4   : > { %v9543_v51 = vadd.f32 %v14190_v50, %v9472_v5  ;;  %v8013_v55 = vpop.f32.mrf.mxu1  ;;  %v11868_v52 = vpop.f32.mrf.mxu0 }
 0x2e5   : > { %v10890_v25 = vpack.c.bf16 %v9609_v60, %v9608_v38  ;;  %v9279_v32 = vadd.f32 %v11865_v30, %v8172_v11  ;;  %v9548_v22 = vadd.f32 %v14190_v50, %v9477_v39  ;;  %v9475_v47 = vmul.f32 %v14183_v4, %v9276_v49 }
 0x2e6   : > { %v9607_v45 = vmax.f32 %v9543_v51, 0.0  ;;  %v8170_v17 = vadd.f32 %v8013_v55, %v14092_v42  ;;  %v11802_v23 = vpop.f32.mrf.mxu1  ;;  %v9133_v26 = vpop.f32.mrf.mxu0 }
 0x2e7   : > { %10986 = vst [vmem:[%s14207_s5 + $0x78] sm:$0xff] %v10890_v25   ;;  %v9478_v3 = vmul.f32 %v14183_v4, %v9279_v32  ;;  %v8175_v48 = vadd.f32 %v11802_v23, %v14095_v10  ;;  %v9612_v54 = vmax.f32 %v9548_v22, 0.0  ;;  %v9546_v42 = vadd.f32 %v14190_v50, %v9475_v47 }
 0x2e8   : > { %v10885_v59 = vpack.c.bf16 %v9607_v45, %v9606_v7  ;;  %v9277_v44 = vadd.f32 %v9120_v57, %v8170_v17  ;;  %v8026_v37 = vpop.f32.mrf.mxu1  ;;  %v11869_v41 = vpop.f32.mrf.mxu0 }
 0x2e9   : > { %v9549_v35 = vadd.f32 %v14190_v50, %v9478_v3  ;;  %v9282_v15 = vadd.f32 %v11868_v52, %v8175_v48  ;;  %v8173_v43 = vadd.f32 %v8026_v37, %v14098_v40  ;;  %v9610_v9 = vmax.f32 %v9546_v42, 0.0 }
 0x2ea   : > { %10985 = vst [vmem:[%s14207_s5 + $0x70] sm:$0xff] %v10885_v59   ;;  %v9476_v21 = vmul.f32 %v14183_v4, %v9277_v44  ;;  %v11803_v0 = vpop.f32.mrf.mxu1  ;;  %v9136_v24 = vpop.f32.mrf.mxu0 }
 0x2eb   : > { %v9613_v2 = vmax.f32 %v9549_v35, 0.0  ;;  %v9481_v10 = vmul.f32 %v14183_v4, %v9282_v15  ;;  %v9280_v58 = vadd.f32 %v9133_v26, %v8173_v43  ;;  %v8176_v61 = vadd.f32 %v11803_v0, %v14101_v56 }
 0x2ec   : > { %v9547_v6 = vadd.f32 %v14190_v50, %v9476_v21  ;;  %v8029_v33 = vpop.f32.mrf.mxu1  ;;  %v11872_v31 = vpop.f32.mrf.mxu0 }
 0x2ed   : > { %v10900_v40 = vpack.c.bf16 %v9613_v2, %v9612_v54  ;;  %v9479_v36 = vmul.f32 %v14183_v4, %v9280_v58  ;;  %v9283_v46 = vadd.f32 %v11869_v41, %v8176_v61  ;;  %v9552_v34 = vadd.f32 %v14190_v50, %v9481_v10 }
 0x2ee   : > { %v9611_v28 = vmax.f32 %v9547_v6, 0.0  ;;  %v8174_v30 = vadd.f32 %v8029_v33, %v14104_v27  ;;  %v11806_v53 = vpop.f32.mrf.mxu1  ;;  %v9149_v18 = vpop.f32.mrf.mxu0 }
 0x2ef   : > { %10988 = vst [vmem:[%s14207_s5 + $0x88] sm:$0xff] %v10900_v40   ;;  %v9482_v56 = vmul.f32 %v14183_v4, %v9283_v46  ;;  %v8179_v62 = vadd.f32 %v11806_v53, %v14107_v1  ;;  %v9550_v57 = vadd.f32 %v14190_v50, %v9479_v36  ;;  %v9616_v27 = vmax.f32 %v9552_v34, 0.0 }
 0x2f0   : > { %v10895_v29 = vpack.c.bf16 %v9611_v28, %v9610_v9  ;;  %v9281_v38 = vadd.f32 %v9136_v24, %v8174_v30  ;;  %v8042_v5 = vpop.f32.mrf.mxu1  ;;  %v11873_v13 = vpop.f32.mrf.mxu0  ;;  %v14658_v30 = vld [vmem:[#allocation23_spill] sm:$0xff] }
 0x2f1   : > { %v9553_v60 = vadd.f32 %v14190_v50, %v9482_v56  ;;  %v9286_v39 = vadd.f32 %v11872_v31, %v8179_v62  ;;  %v8177_v49 = vadd.f32 %v8042_v5, %v14110_v8  ;;  %v9614_v47 = vmax.f32 %v9550_v57, 0.0  ;;  %v14659_v62 = vld [vmem:[#allocation24_spill] sm:$0xff] }
 0x2f2   : > { %10987 = vst [vmem:[%s14207_s5 + $0x80] sm:$0xff] %v10895_v29   ;;  %v9480_v11 = vmul.f32 %v14183_v4, %v9281_v38  ;;  %v11807_v51 = vpop.f32.mrf.mxu1  ;;  %v9152_v55 = vpop.f32.mrf.mxu0 }
 0x2f3   : > { %v9617_v52 = vmax.f32 %v9553_v60, 0.0  ;;  %v9485_v1 = vmul.f32 %v14183_v4, %v9286_v39  ;;  %v9284_v7 = vadd.f32 %v9149_v18, %v8177_v49  ;;  %v8180_v25 = vadd.f32 %v11807_v51, %v14113_v14 }
 0x2f4   : > { %v9551_v32 = vadd.f32 %v14190_v50, %v9480_v11  ;;  %v8045_v45 = vpop.f32.mrf.mxu1  ;;  %v11876_v22 = vpop.f32.mrf.mxu0 }
 0x2f5   : > { %v10910_v17 = vpack.c.bf16 %v9617_v52, %v9616_v27  ;;  %v9287_v8 = vadd.f32 %v11873_v13, %v8180_v25  ;;  %v9556_v26 = vadd.f32 %v14190_v50, %v9485_v1  ;;  %v9483_v3 = vmul.f32 %v14183_v4, %v9284_v7  ;;  %v14660_v27 = vld [vmem:[#allocation25_spill] sm:$0xff] }
 0x2f6   : > { %v9615_v23 = vmax.f32 %v9551_v32, 0.0  ;;  %v8178_v48 = vadd.f32 %v8045_v45, %v14116_v16  ;;  %v11810_v59 = vpop.f32.mrf.mxu1  ;;  %v9165_v44 = vpop.f32.mrf.mxu0 }
 0x2f7   : > { %10990 = vst [vmem:[%s14207_s5 + $0x98] sm:$0xff] %v10910_v17   ;;  %v9486_v14 = vmul.f32 %v14183_v4, %v9287_v8  ;;  %v8183_v37 = vadd.f32 %v11810_v59, %v14119_v63  ;;  %v9620_v0 = vmax.f32 %v9556_v26, 0.0  ;;  %v9554_v16 = vadd.f32 %v14190_v50, %v9483_v3 }
 0x2f8   : > { %v10905_v41 = vpack.c.bf16 %v9615_v23, %v9614_v47  ;;  %v9285_v35 = vadd.f32 %v9152_v55, %v8178_v48  ;;  %v8058_v15 = vpop.f32.mrf.mxu1  ;;  %v11877_v43 = vpop.f32.mrf.mxu0 }
 0x2f9   : > { %v9557_v54 = vadd.f32 %v14190_v50, %v9486_v14  ;;  %v9290_v42 = vadd.f32 %v11876_v22, %v8183_v37  ;;  %v8181_v21 = vadd.f32 %v8058_v15, %v14122_v19  ;;  %v9618_v9 = vmax.f32 %v9554_v16, 0.0 }
 0x2fa   : > { %10989 = vst [vmem:[%s14207_s5 + $0x90] sm:$0xff] %v10905_v41   ;;  %v9484_v24 = vmul.f32 %v14183_v4, %v9285_v35  ;;  %v11811_v2 = vpop.f32.mrf.mxu1  ;;  %v9168_v10 = vpop.f32.mrf.mxu0  ;;  %v14662_v35 = vld [vmem:[#allocation27_spill] sm:$0xff] }
 0x2fb   : > { %v9621_v58 = vmax.f32 %v9557_v54, 0.0  ;;  %v9489_v63 = vmul.f32 %v14183_v4, %v9290_v42  ;;  %v9288_v61 = vadd.f32 %v9165_v44, %v8181_v21  ;;  %v8184_v6 = vadd.f32 %v11811_v2, %v14125_v12  ;;  %v14661_v44 = vld [vmem:[#allocation26_spill] sm:$0xff] }
 0x2fc   : > { %v9555_v33 = vadd.f32 %v14190_v50, %v9484_v24  ;;  %v8061_v31 = vpop.f32.mrf.mxu1  ;;  %v11880_v40 = vpop.f32.mrf.mxu0  ;;  %v14663_v24 = vld [vmem:[#allocation28_spill] sm:$0xff] }
 0x2fd   : > { %v10920_v19 = vpack.c.bf16 %v9621_v58, %v9620_v0  ;;  %v9487_v36 = vmul.f32 %v14183_v4, %v9288_v61  ;;  %v9291_v46 = vadd.f32 %v11877_v43, %v8184_v6  ;;  %v9560_v34 = vadd.f32 %v14190_v50, %v9489_v63 }
 0x2fe   : > { %v9619_v28 = vmax.f32 %v9555_v33, 0.0  ;;  %v8182_v53 = vadd.f32 %v8061_v31, %v14658_v30  ;;  %v11814_v18 = vpop.f32.mrf.mxu1  ;;  %v9181_v56 = vpop.f32.mrf.mxu0 }
 0x2ff   : > { %10992 = vst [vmem:[%s14207_s5 + $0xa8] sm:$0xff] %v10920_v19   ;;  %v9490_v12 = vmul.f32 %v14183_v4, %v9291_v46  ;;  %v8187_v29 = vadd.f32 %v11814_v18, %v14659_v62  ;;  %v9558_v60 = vadd.f32 %v14190_v50, %v9487_v36  ;;  %v9624_v51 = vmax.f32 %v9560_v34, 0.0  ;;  %v14664_v19 = vld [vmem:[#allocation29_spill] sm:$0xff]  ;;  %v14665_v62 = vld [vmem:[#allocation30_spill] sm:$0xff] }
 0x300   : > { %v10915_v38 = vpack.c.bf16 %v9619_v28, %v9618_v9  ;;  %v9289_v5 = vadd.f32 %v9168_v10, %v8182_v53  ;;  %v8074_v13 = vpop.f32.mrf.mxu1  ;;  %v11881_v57 = vpop.f32.mrf.mxu0 }
 0x301   : > { %v9561_v39 = vadd.f32 %v14190_v50, %v9490_v12  ;;  %v9294_v49 = vadd.f32 %v11880_v40, %v8187_v29  ;;  %v8185_v11 = vadd.f32 %v8074_v13, %v14660_v27  ;;  %v9622_v8 = vmax.f32 %v9558_v60, 0.0 }
 0x302   : > { %10991 = vst [vmem:[%s14207_s5 + $0xa0] sm:$0xff] %v10915_v38   ;;  %v9488_v55 = vmul.f32 %v14183_v4, %v9289_v5  ;;  %v11815_v52 = vpop.f32.mrf.mxu1  ;;  %v9184_v1 = vpop.f32.mrf.mxu0 }
 0x303   : > { %v9625_v7 = vmax.f32 %v9561_v39, 0.0  ;;  %v9493_v25 = vmul.f32 %v14183_v4, %v9294_v49  ;;  %v9292_v32 = vadd.f32 %v9181_v56, %v8185_v11  ;;  %v8188_v45 = vadd.f32 %v11815_v52, %v14137_v20 }
 0x304   : > { %v9559_v22 = vadd.f32 %v14190_v50, %v9488_v55  ;;  %v8077_v47 = vpop.f32.mrf.mxu1  ;;  %v11884_v17 = vpop.f32.mrf.mxu0 }
 0x305   : > { %v10930_v23 = vpack.c.bf16 %v9625_v7, %v9624_v51  ;;  %v9295_v26 = vadd.f32 %v11881_v57, %v8188_v45  ;;  %v9564_v48 = vadd.f32 %v14190_v50, %v9493_v25  ;;  %v9491_v59 = vmul.f32 %v14183_v4, %v9292_v32  ;;  %v14666_v57 = vld [vmem:[#allocation31_spill] sm:$0xff] }
 0x306   : > { %v9623_v3 = vmax.f32 %v9559_v22, 0.0  ;;  %v8186_v14 = vadd.f32 %v8077_v47, %v14661_v44  ;;  %v11818_v37 = vpop.f32.mrf.mxu1  ;;  %v9197_v41 = vpop.f32.mrf.mxu0 }
 0x307   : > { %10994 = vst [vmem:[%s14207_s5 + $0xb8] sm:$0xff] %v10930_v23   ;;  %v9494_v20 = vmul.f32 %v14183_v4, %v9295_v26  ;;  %v8191_v15 = vadd.f32 %v11818_v37, %v14662_v35  ;;  %v9628_v10 = vmax.f32 %v9564_v48, 0.0  ;;  %v9562_v58 = vadd.f32 %v14190_v50, %v9491_v59  ;;  %v14668_v23 = vld [vmem:[#allocation33_spill] sm:$0xff] }
 0x308   : > { %v10925_v43 = vpack.c.bf16 %v9623_v3, %v9622_v8  ;;  %v9293_v54 = vadd.f32 %v9184_v1, %v8186_v14  ;;  %v8090_v42 = vpop.f32.mrf.mxu1  ;;  %v11885_v21 = vpop.f32.mrf.mxu0  ;;  %v14667_v1 = vld [vmem:[#allocation32_spill] sm:$0xff] }
 0x309   : > { %v9565_v0 = vadd.f32 %v14190_v50, %v9494_v20  ;;  %v9298_v16 = vadd.f32 %v11884_v17, %v8191_v15  ;;  %v8189_v2 = vadd.f32 %v8090_v42, %v14663_v24  ;;  %v9626_v18 = vmax.f32 %v9562_v58, 0.0  ;;  %v14669_v15 = vld [vmem:[#allocation34_spill] sm:$0xff] }
 0x30a   : > { %10993 = vst [vmem:[%s14207_s5 + $0xb0] sm:$0xff] %v10925_v43   ;;  %v9492_v63 = vmul.f32 %v14183_v4, %v9293_v54  ;;  %v11819_v61 = vpop.f32.mrf.mxu1  ;;  %v9200_v6 = vpop.f32.mrf.mxu0 }
 0x30b   : > { %v9629_v33 = vmax.f32 %v9565_v0, 0.0  ;;  %v9497_v31 = vmul.f32 %v14183_v4, %v9298_v16  ;;  %v9296_v40 = vadd.f32 %v9197_v41, %v8189_v2  ;;  %v8192_v36 = vadd.f32 %v11819_v61, %v14664_v19  ;;  %v14671_v61 = vld [vmem:[#allocation36_spill] sm:$0xff] }
 0x30c   : > { %v9563_v46 = vadd.f32 %v14190_v50, %v9492_v63  ;;  %v8093_v9 = vpop.f32.mrf.mxu1  ;;  %v11888_v28 = vpop.f32.mrf.mxu0 }
 0x30d   : > { %v10940_v34 = vpack.c.bf16 %v9629_v33, %v9628_v10  ;;  %v9495_v30 = vmul.f32 %v14183_v4, %v9296_v40  ;;  %v9299_v53 = vadd.f32 %v11885_v21, %v8192_v36  ;;  %v9568_v12 = vadd.f32 %v14190_v50, %v9497_v31  ;;  %v14670_v21 = vld [vmem:[#allocation35_spill] sm:$0xff] }
 0x30e   : > { %v9627_v56 = vmax.f32 %v9563_v46, 0.0  ;;  %v8190_v29 = vadd.f32 %v8093_v9, %v14665_v62  ;;  %v11822_v38 = vpop.f32.mrf.mxu1  ;;  %v9213_v5 = vpop.f32.mrf.mxu0 }
 0x30f   : > { %10996 = vst [vmem:[%s14207_s5 + $0xc8] sm:$0xff] %v10940_v34   ;;  %v9498_v13 = vmul.f32 %v14183_v4, %v9299_v53  ;;  %v8195_v60 = vadd.f32 %v11822_v38, %v14666_v57  ;;  %v9566_v51 = vadd.f32 %v14190_v50, %v9495_v30  ;;  %v9632_v25 = vmax.f32 %v9568_v12, 0.0 }
 0x310   : > { %v10935_v39 = vpack.c.bf16 %v9627_v56, %v9626_v18  ;;  %v9297_v49 = vadd.f32 %v9200_v6, %v8190_v29  ;;  %v8106_v27 = vpop.f32.mrf.mxu1  ;;  %v11889_v11 = vpop.f32.mrf.mxu0 }
 0x311   : > { %v9569_v55 = vadd.f32 %v14190_v50, %v9498_v13  ;;  %v9302_v52 = vadd.f32 %v11888_v28, %v8195_v60  ;;  %v8193_v7 = vadd.f32 %v8106_v27, %v14667_v1  ;;  %v9630_v44 = vmax.f32 %v9566_v51, 0.0  ;;  %v14672_v28 = vld [vmem:[#allocation37_spill] sm:$0xff] }
 0x312   : > { %10995 = vst [vmem:[%s14207_s5 + $0xc0] sm:$0xff] %v10935_v39   ;;  %v9496_v32 = vmul.f32 %v14183_v4, %v9297_v49  ;;  %v11823_v45 = vpop.f32.mrf.mxu1  ;;  %v9216_v22 = vpop.f32.mrf.mxu0 }
 0x313   : > { %v9633_v47 = vmax.f32 %v9569_v55, 0.0  ;;  %v9501_v17 = vmul.f32 %v14183_v4, %v9302_v52  ;;  %v9300_v8 = vadd.f32 %v9213_v5, %v8193_v7  ;;  %v8196_v26 = vadd.f32 %v11823_v45, %v14668_v23  ;;  %v14673_v5 = vld [vmem:[#allocation38_spill] sm:$0xff] }
 0x314   : > { %v9567_v3 = vadd.f32 %v14190_v50, %v9496_v32  ;;  %v8109_v48 = vpop.f32.mrf.mxu1  ;;  %v11892_v59 = vpop.f32.mrf.mxu0 }
 0x315   : > { %v10950_v14 = vpack.c.bf16 %v9633_v47, %v9632_v25  ;;  %v9303_v37 = vadd.f32 %v11889_v11, %v8196_v26  ;;  %v9572_v20 = vadd.f32 %v14190_v50, %v9501_v17  ;;  %v9499_v35 = vmul.f32 %v14183_v4, %v9300_v8 }
 0x316   : > { %v9631_v41 = vmax.f32 %v9567_v3, 0.0  ;;  %v8194_v43 = vadd.f32 %v8109_v48, %v14669_v15  ;;  %v11826_v54 = vpop.f32.mrf.mxu1  ;;  %v9229_v16 = vpop.f32.mrf.mxu0 }
 0x317   : > { %10998 = vst [vmem:[%s14207_s5 + $0xd8] sm:$0xff] %v10950_v14   ;;  %v9502_v42 = vmul.f32 %v14183_v4, %v9303_v37  ;;  %v8199_v0 = vadd.f32 %v11826_v54, %v14670_v21  ;;  %v9636_v33 = vmax.f32 %v9572_v20, 0.0  ;;  %v9570_v31 = vadd.f32 %v14190_v50, %v9499_v35 }
 0x318   : > { %v10945_v24 = vpack.c.bf16 %v9631_v41, %v9630_v44  ;;  %v9301_v2 = vadd.f32 %v9216_v22, %v8194_v43  ;;  %v8122_v10 = vpop.f32.mrf.mxu1  ;;  %v11893_v30 = vpop.f32.mrf.mxu0 }
 0x319   : > { %v9573_v58 = vadd.f32 %v14190_v50, %v9502_v42  ;;  %v9306_v63 = vadd.f32 %v11892_v59, %v8199_v0  ;;  %v8197_v6 = vadd.f32 %v8122_v10, %v14671_v61  ;;  %v9634_v62 = vmax.f32 %v9570_v31, 0.0 }
 0x31a   : > { %10997 = vst [vmem:[%s14207_s5 + $0xd0] sm:$0xff] %v10945_v24   ;;  %v9500_v40 = vmul.f32 %v14183_v4, %v9301_v2  ;;  %v11827_v19 = vpop.f32.mrf.mxu1  ;;  %v9232_v39 = vpop.f32.mrf.mxu0 }
 0x31b   : > { %v9637_v36 = vmax.f32 %v9573_v58, 0.0  ;;  %v9505_v46 = vmul.f32 %v14183_v4, %v9306_v63  ;;  %v9304_v9 = vadd.f32 %v9229_v16, %v8197_v6  ;;  %v8200_v34 = vadd.f32 %v11827_v19, %v14672_v28 }
 0x31c   : > { %v9571_v53 = vadd.f32 %v14190_v50, %v9500_v40  ;;  %v8125_v18 = vpop.f32.mrf.mxu1 }
 0x31d   : > { %v10960_v56 = vpack.c.bf16 %v9637_v36, %v9636_v33  ;;  %v9307_v12 = vadd.f32 %v11893_v30, %v8200_v34  ;;  %v9503_v38 = vmul.f32 %v14183_v4, %v9304_v9  ;;  %v8198_v13 = vadd.f32 %v8125_v18, %v14673_v5 }
 0x31e   : > { %v9635_v29 = vmax.f32 %v9571_v53, 0.0  ;;  %v9576_v57 = vadd.f32 %v14190_v50, %v9505_v46 }
 0x31f   : > { %11000 = vst [vmem:[%s14207_s5 + $0xe8] sm:$0xff] %v10960_v56   ;;  %v9506_v60 = vmul.f32 %v14183_v4, %v9307_v12  ;;  %v9305_v27 = vadd.f32 %v9232_v39, %v8198_v13  ;;  %v9574_v51 = vadd.f32 %v14190_v50, %v9503_v38 }
 0x320   : > { %v10955_v49 = vpack.c.bf16 %v9635_v29, %v9634_v62  ;;  %v9640_v52 = vmax.f32 %v9576_v57, 0.0 }
 0x321   : > { %v9577_v11 = vadd.f32 %v14190_v50, %v9506_v60  ;;  %v9504_v55 = vmul.f32 %v14183_v4, %v9305_v27  ;;  %v9638_v32 = vmax.f32 %v9574_v51, 0.0 }
 0x322   : > { %10999 = vst [vmem:[%s14207_s5 + $0xe0] sm:$0xff] %v10955_v49  }
 0x323   : > { %v9641_v1 = vmax.f32 %v9577_v11, 0.0  ;;  %v9575_v7 = vadd.f32 %v14190_v50, %v9504_v55 }
 0x325   : > { %v10970_v25 = vpack.c.bf16 %v9641_v1, %v9640_v52  ;;  %v9639_v45 = vmax.f32 %v9575_v7, 0.0 }
 0x327   : > { %11002 = vst [vmem:[%s14207_s5 + $0xf8] sm:$0xff] %v10970_v25   ;;  %v10965_v22 = vpack.c.bf16 %v9639_v45, %v9638_v32 }
 0x329   : > { %11001 = vst [vmem:[%s14207_s5 + $0xf0] sm:$0xff] %v10965_v22  }
 0x32a PF: > { %s14_s17 = sadd.s32 1, %s12251_s17   ;;  %s14674_s15 = smov %s12247_s16 }
 0x32b   : > { %p11_p6 = scmp.ge.s32.totalorder %s14_s17, 4   ;;  %s14675_s16 = smov %s14677_s18 }
 0x32d   :  { %13 = sbr.rel (!%p11_p6) target bundleno = 2 (0x2), region = 83 }

// kernel: basic_block_forward.3
= control target key start
LH: loop header
LB: loop body
LE: loop exit
PB: predicated region body
PF: predicated region fallthrough
CT: control target
= control target key end

     0   :  { %s12202_s18 = smov 0   ;;  %s12204_s19 = smov 0   ;;  %s14546_s0 = inlined_call_operand.vmem [shape: bf16[1104,8], index: 0, kind: input, shape index: {}]   ;;  %s14547_s1 = inlined_call_operand.vmem [shape: bf16[9,8,128], index: 1, kind: input, shape index: {}]   ;;  %s14548_s2 = inlined_call_operand.vmem [shape: f32[1,128], index: 2, kind: input, shape index: {}]   ;;  %s14549_s3 = inlined_call_operand.vmem [shape: f32[1,128], index: 3, kind: input, shape index: {}]   ;;  %s14550_s4 = inlined_call_operand.vmem [shape: bf16[1024,128], index: 4, kind: input, shape index: {}]   ;;  %s14551_s5 = inlined_call_operand.vmem [shape: f32[1024,128], index: 5, kind: output, shape index: {}]  }
   0x1   :  { %s12206_s20 = smov 0  }
   0x2 LB: > { %s27_s21 = sadd.s32 1, %s12166_s19  ;;  %p10158_p0 = scmp.ge.s32.totalorder %s12170_s20, 1  ;;  %s12170_s20 = sphi %s12206_s20, %s15_s20   ;;  %s12166_s19 = sphi %s12204_s19, %s14801_s19   ;;  %s12162_s18 = sphi %s12202_s18, %s14800_s18  }
   0x3   : > { %p29_p1 = scmp.ge.s32.totalorder %s27_s21, 2  ;;  %p243_p2 = scmp.lt.s32.totalorder %s12170_s20, 3 }
   0x5   : > { %s14803_s21 = smov (%p29_p1, %s27_s21), 0  ;;  %p244_p3 = pnand %p10158_p0, %p243_p2 }
   0x7   : > { %247 = sbr.rel (%p244_p3) target bundleno = 812 (0x32c), region = 40 }
   0xc   : > { %v392_v0 = vld [vmem:[%s14547_s1] sm:$0xf]  ;;  %vm914_vm0 = vcmask 1043456   ;;  %s292_s24 = smul.u32 69, %s12162_s18  ;;  %v10229_v2 = vld [vmem:[%s14547_s1 + $0x4] sm:$0xf] }
   0xd   : > { %11814 = vmatprep.subr.msk.bf16.mxu1 %vm914_vm0, %v392_v0  ;;  %11813 = vmatprep.subr.msk.bf16.mxu0 %vm914_vm0, %v392_v0  ;;  %v916_v1 = vsel %vm914_vm0, %v392_v0, 0  ;;  %v10295_v3 = vld [vmem:[%s14547_s1 + $0x8] sm:$0xf]  ;;  %vm556_vm1 = vsmask.f32 7424  ;;  %vm817_vm2 = vcmask 64512  }
   0xe   : > { %11812 = vmatpush3.bf16.msra.mxu1 %v916_v1  ;;  %11218 = vmatpush3.bf16.msra.mxu0 %v916_v1  ;;  %p293_p4 = scmp.lt.s32.totalorder %s292_s24, 137  ;;  %v1728_v12 = vsel %vm914_vm0, %v10229_v2, 0  ;;  %v2835_v13 = vsel %vm914_vm0, %v10295_v3, 0  ;;  %v12257_v33 = vld [vmem:[%s14547_s1 + $0x10] sm:$0xf]  ;;  %vm1565_vm4 = vcmask 1046528  }
   0xf   : > { %11815 = vmatprep.subr.msk.bf16.mxu1 %vm914_vm0, %v10229_v2  ;;  %11816 = vmatprep.subr.msk.bf16.mxu0 %vm914_vm0, %v10295_v3  ;;  %v12268_v44 = vld [vmem:[%s14547_s1 + $0xc] sm:$0xf]  ;;  %vm2441_vm3 = vsmask.f32 6400  ;;  %vm4654_vm5 = vcmask 1045504   ;;  %vm7743_vm8 = vcmask 1044480  }
  0x10   : > { %s14805_s24 = smov (!%p293_p4, %s292_s24), 137  ;;  %vm5530_vm6 = vsmask.f32 5376  ;;  %vm8619_vm7 = vsmask.f32 4352  ;;  %s10160_s28 = sshll.u32 %s12162_s18, 6 }
  0x11   : > { %s10159_s29 = sshll.u32 %s14805_s24, 2  ;;  %p309_p5 = scmp.lt.s32.totalorder %s10160_s28, 127 }
  0x12   : > { %s12240_s7 = scalar_lea.vmem %s14546_s0, %s10159_s29 }
  0x13   : > { %v11847_v4 = vld [vmem:[%s12240_s7] sm:$0xff]   ;;  %v11848_v5 = vld [vmem:[%s12240_s7 + $0x8] sm:$0xff]   ;;  %v11851_v16 = vld [vmem:[%s12240_s7 + $0x10] sm:$0xff]   ;;  %s14807_s28 = smov (!%p309_p5, %s10160_s28), 127 }
  0x14   : > { %v558_v6 = vshrl.u32 %v11847_v4, 16  ;;  %v560_v7 = vshll.u32 %v11847_v4, 16  ;;  %v565_v8 = vshll.u32 %v11848_v5, 16  ;;  %v569_v9 = vshrl.u32 %v11848_v5, 16  ;;  %v11849_v10 = vld [vmem:[%s12240_s7 + $0x80] sm:$0xff]   ;;  %v11850_v11 = vld [vmem:[%s12240_s7 + $0x88] sm:$0xff]  }
  0x15   : > { %v11852_v17 = vld [vmem:[%s12240_s7 + $0x90] sm:$0xff]   ;;  %v685_v18 = vshll.u32 %v11849_v10, 16  ;;  %v689_v19 = vshrl.u32 %v11849_v10, 16  ;;  %v693_v20 = vshll.u32 %v11850_v11, 16  ;;  %v697_v21 = vshrl.u32 %v11850_v11, 16  ;;  %v11853_v28 = vld [vmem:[%s12240_s7 + $0x18] sm:$0xff]  }
  0x16   : > { %v562_v14 = vrot.slane %v560_v7, 1  ;;  %v567_v15 = vrot.slane %v565_v8, 1  ;;  %v573_v24 = vshll.u32 %v11851_v16, 16  ;;  %v701_v25 = vshll.u32 %v11852_v17, 16  ;;  %v11854_v37 = vld [vmem:[%s12240_s7 + $0x98] sm:$0xff]   ;;  %v11855_v39 = vld [vmem:[%s12240_s7 + $0x20] sm:$0xff]  }
  0x17   : > { %v12250_v26 = vrot.slane %v685_v18, 1  ;;  %v695_v27 = vrot.slane %v693_v20, 1  ;;  %v577_v29 = vshrl.u32 %v11851_v16, 16  ;;  %v581_v36 = vshll.u32 %v11853_v28, 16  ;;  %v11856_v43 = vld [vmem:[%s12240_s7 + $0xa0] sm:$0xff]   ;;  %v11857_v49 = vld [vmem:[%s12240_s7 + $0x28] sm:$0xff]  }
  0x18   : > { %v563_v22 = vor.u32 %v562_v14, %v558_v6  ;;  %v571_v23 = vor.u32 %v569_v9, %v567_v15  ;;  %v575_v31 = vrot.slane %v573_v24, 1  ;;  %v703_v32 = vrot.slane %v701_v25, 1  ;;  %v11858_v61 = vld [vmem:[%s12240_s7 + $0xa8] sm:$0xff]   ;;  %v11859_v63 = vld [vmem:[%s12240_s7 + $0x30] sm:$0xff]   ;;  %v11861_v14 = vld [vmem:[%s12240_s7 + $0x38] sm:$0xff]   ;;  %s10161_s18 = sshll.u32 %s14807_s28, 2 }
  0x19   : > { %v691_v34 = vor.u32 %v689_v19, %v12250_v26  ;;  %v699_v35 = vor.u32 %v697_v21, %v695_v27  ;;  %v705_v38 = vshrl.u32 %v11852_v17, 16  ;;  %v585_v42 = vshrl.u32 %v11853_v28, 16  ;;  %v11860_v6 = vld [vmem:[%s12240_s7 + $0xb0] sm:$0xff]   ;;  %v11863_v24 = vld [vmem:[%s12240_s7 + $0x40] sm:$0xff]   ;;  %s14107_s6 = scalar_lea.vmem %s14550_s4, %s10161_s18  ;;  %s10163_s11 = sshll.u32 %s14807_s28, 3 }
  0x1a   : > { %v568_v30 = vsel %vm556_vm1, %v563_v22, %v567_v15  ;;  %v576_v40 = vsel %vm556_vm1, %v571_v23, %v575_v31  ;;  %v579_v41 = vor.u32 %v577_v29, %v575_v31  ;;  %v583_v47 = vrot.slane %v581_v36, 1  ;;  %v11862_v15 = vld [vmem:[%s12240_s7 + $0xb8] sm:$0xff]   ;;  %s14142_s14 = scalar_lea.vmem %s14551_s5, %s10163_s11 }
  0x1b   : > { %11219 = vmatprep.mubr.msk.bf16.mxu0 %vm817_vm2, %v568_v30  ;;  %v696_v45 = vsel %vm556_vm1, %v691_v34, %v695_v27  ;;  %v704_v46 = vsel %vm556_vm1, %v699_v35, %v703_v32  ;;  %v707_v48 = vor.u32 %v705_v38, %v703_v32  ;;  %v709_v50 = vshll.u32 %v11854_v37, 16  ;;  %v11864_v30 = vld [vmem:[%s12240_s7 + $0xc0] sm:$0xff]   ;;  %v11865_v35 = vld [vmem:[%s12240_s7 + $0x48] sm:$0xff]  }
  0x1c   : > { %11220 = vmatmul.mubr.msk.bf16.vlgmr.msra.gmra.mxu0 %vm817_vm2, %v576_v40  ;;  %11251 = vmatprep.mubr.msk.bf16.mxu1 %vm817_vm2, %v696_v45  ;;  %v589_v51 = vshll.u32 %v11855_v39, 16  ;;  %v713_v52 = vshrl.u32 %v11854_v37, 16  ;;  %v717_v53 = vshll.u32 %v11856_v43, 16  ;;  %v584_v54 = vsel %vm556_vm1, %v579_v41, %v583_v47  ;;  %v11866_v38 = vld [vmem:[%s12240_s7 + $0xc8] sm:$0xff]  }
  0x1d   : > { %11350 = vmatpush3.bf16.msra.mxu0 %v2835_v13  ;;  %11252 = vmatmul.mubr.msk.bf16.vlgmr.msra.gmra.mxu1 %vm817_vm2, %v704_v46  ;;  %v587_v55 = vor.u32 %v585_v42, %v583_v47  ;;  %v593_v56 = vshrl.u32 %v11855_v39, 16  ;;  %v597_v57 = vshll.u32 %v11857_v49, 16  ;;  %v711_v58 = vrot.slane %v709_v50, 1  ;;  %v11867_v47 = vld [vmem:[%s12240_s7 + $0x50] sm:$0xff]  }
  0x1e   : > { %11818 = vmatprep.subr.msk.bf16.mxu0 %vm914_vm0, %v12257_v33  ;;  %11284 = vmatpush3.bf16.msra.mxu1 %v1728_v12  ;;  %v591_v59 = vrot.slane %v589_v51, 1  ;;  %v719_v60 = vrot.slane %v717_v53, 1  ;;  %v721_v62 = vshrl.u32 %v11856_v43, 16  ;;  %v601_v1 = vshrl.u32 %v11857_v49, 16 }
  0x1f   : > { %11223 = vmatprep.mubr.msk.bf16.mxu0 %vm817_vm2, %v584_v54  ;;  %v599_v0 = vrot.slane %v597_v57, 1  ;;  %11817 = vmatprep.subr.msk.bf16.mxu1 %vm914_vm0, %v12268_v44  ;;  %v712_v2 = vsel %vm556_vm1, %v707_v48, %v711_v58  ;;  %v715_v4 = vor.u32 %v713_v52, %v711_v58  ;;  %v725_v8 = vshll.u32 %v11858_v61, 16  ;;  %v11868_v52 = vld [vmem:[%s12240_s7 + $0xd0] sm:$0xff]  }
  0x20   : > { %v592_v3 = vsel %vm556_vm1, %v587_v55, %v591_v59  ;;  %v595_v5 = vor.u32 %v593_v56, %v591_v59  ;;  %11255 = vmatprep.mubr.msk.bf16.mxu1 %vm817_vm2, %v712_v2  ;;  %v723_v7 = vor.u32 %v721_v62, %v719_v60  ;;  %v605_v9 = vshll.u32 %v11859_v63, 16  ;;  %v11869_v56 = vld [vmem:[%s12240_s7 + $0x58] sm:$0xff]  }
  0x21   : > { %v720_v10 = vsel %vm556_vm1, %v715_v4, %v719_v60  ;;  %v729_v12 = vshrl.u32 %v11858_v61, 16  ;;  %v733_v13 = vshll.u32 %v11860_v6, 16  ;;  %v727_v16 = vrot.slane %v725_v8, 1  ;;  %v11870_v61 = vld [vmem:[%s12240_s7 + $0xd8] sm:$0xff]  }
  0x22   : > { %v600_v11 = vsel %vm556_vm1, %v595_v5, %v599_v0  ;;  %v607_v17 = vrot.slane %v605_v9, 1  ;;  %v609_v18 = vshrl.u32 %v11859_v63, 16  ;;  %v737_v19 = vshrl.u32 %v11860_v6, 16 }
  0x23   : > { %v603_v20 = vor.u32 %v601_v1, %v599_v0  ;;  %v735_v21 = vrot.slane %v733_v13, 1  ;;  %v613_v22 = vshll.u32 %v11861_v14, 16  ;;  %v741_v23 = vshll.u32 %v11862_v15, 16 }
  0x24   : > { %11224 = vmatmul.mubr.msk.bf16.gmra.mxu0 %vm817_vm2, %v592_v3  ;;  %v728_v25 = vsel %vm556_vm1, %v723_v7, %v727_v16  ;;  %v611_v27 = vor.u32 %v609_v18, %v607_v17  ;;  %v731_v28 = vor.u32 %v729_v12, %v727_v16  ;;  %v621_v34 = vshll.u32 %v11863_v24, 16  ;;  %v11871_v7 = vld [vmem:[%s12240_s7 + $0x60] sm:$0xff]   ;;  %v11873_v16 = vld [vmem:[%s12240_s7 + $0x68] sm:$0xff]  }
  0x25   : > { %11227 = vmatprep.mubr.msk.bf16.mxu0 %vm817_vm2, %v600_v11  ;;  %11256 = vmatmul.mubr.msk.bf16.gmra.mxu1 %vm817_vm2, %v720_v10  ;;  %v615_v29 = vrot.slane %v613_v22, 1  ;;  %v739_v31 = vor.u32 %v737_v19, %v735_v21  ;;  %v743_v32 = vrot.slane %v741_v23, 1  ;;  %v608_v36 = vsel %vm556_vm1, %v603_v20, %v607_v17  ;;  %v11872_v12 = vld [vmem:[%s12240_s7 + $0xe0] sm:$0xff]  }
  0x26   : > { %11259 = vmatprep.mubr.msk.bf16.mxu1 %vm817_vm2, %v728_v25  ;;  %v617_v37 = vshrl.u32 %v11861_v14, 16  ;;  %v749_v40 = vshll.u32 %v11864_v30, 16  ;;  %v625_v41 = vshrl.u32 %v11863_v24, 16  ;;  %v629_v42 = vshll.u32 %v11865_v35, 16 }
  0x27   : > { %v616_v39 = vsel %vm556_vm1, %v611_v27, %v615_v29  ;;  %v736_v43 = vsel %vm556_vm1, %v731_v28, %v735_v21  ;;  %v623_v45 = vrot.slane %v621_v34, 1  ;;  %v745_v46 = vshrl.u32 %v11862_v15, 16  ;;  %v11874_v21 = vld [vmem:[%s12240_s7 + $0xe8] sm:$0xff]   ;;  %v11875_v34 = vld [vmem:[%s12240_s7 + $0x70] sm:$0xff]  }
  0x28   : > { %v744_v48 = vsel %vm556_vm1, %v739_v31, %v743_v32  ;;  %v753_v49 = vshrl.u32 %v11864_v30, 16  ;;  %v757_v50 = vshll.u32 %v11866_v38, 16  ;;  %v619_v51 = vor.u32 %v617_v37, %v615_v29  ;;  %v11876_v37 = vld [vmem:[%s12240_s7 + $0xf0] sm:$0xff]  }
  0x29   : > { %v751_v53 = vrot.slane %v749_v40, 1  ;;  %v627_v54 = vor.u32 %v625_v41, %v623_v45  ;;  %v631_v55 = vrot.slane %v629_v42, 1  ;;  %v747_v57 = vor.u32 %v745_v46, %v743_v32 }
  0x2a   : > { %v637_v58 = vshll.u32 %v11867_v47, 16  ;;  %v759_v60 = vrot.slane %v757_v50, 1  ;;  %v624_v62 = vsel %vm556_vm1, %v619_v51, %v623_v45  ;;  %v633_v63 = vshrl.u32 %v11865_v35, 16  ;;  %v11883_v51 = vld [vmem:[%s12240_s7 + $0x8] sm:$0xff]  }
  0x2b   : > { %v755_v59 = vor.u32 %v753_v49, %v751_v53  ;;  %v765_v0 = vshll.u32 %v11868_v52, 16  ;;  %v632_v1 = vsel %vm556_vm1, %v627_v54, %v631_v55  ;;  %v641_v2 = vshrl.u32 %v11867_v47, 16  ;;  %v11878_v47 = vld [vmem:[%s12240_s7 + $0xf8] sm:$0xff]  }
  0x2c   : > { %11228 = vmatmul.mubr.msk.bf16.gmra.mxu0 %vm817_vm2, %v608_v36  ;;  %v645_v3 = vshll.u32 %v11869_v56, 16  ;;  %v752_v4 = vsel %vm556_vm1, %v747_v57, %v751_v53  ;;  %v639_v5 = vrot.slane %v637_v58, 1  ;;  %v761_v6 = vshrl.u32 %v11866_v38, 16  ;;  %v11882_v53 = vld [vmem:[%s12240_s7] sm:$0xfe]  }
  0x2d   : > { %11231 = vmatprep.mubr.msk.bf16.mxu0 %vm817_vm2, %v616_v39  ;;  %11260 = vmatmul.mubr.msk.bf16.gmra.mxu1 %vm817_vm2, %v736_v43  ;;  %v760_v8 = vsel %vm556_vm1, %v755_v59, %v759_v60  ;;  %v769_v9 = vshrl.u32 %v11868_v52, 16  ;;  %v773_v10 = vshll.u32 %v11870_v61, 16  ;;  %v635_v11 = vor.u32 %v633_v63, %v631_v55  ;;  %v11877_v43 = vld [vmem:[%s12240_s7 + $0x78] sm:$0xff]  }
  0x2e   : > { %11263 = vmatprep.mubr.msk.bf16.mxu1 %vm817_vm2, %v744_v48  ;;  %v767_v13 = vrot.slane %v765_v0, 1  ;;  %v643_v14 = vor.u32 %v641_v2, %v639_v5  ;;  %v647_v15 = vrot.slane %v645_v3, 1  ;;  %v763_v17 = vor.u32 %v761_v6, %v759_v60 }
  0x2f   : > { %v653_v18 = vshll.u32 %v11871_v7, 16  ;;  %v775_v20 = vrot.slane %v773_v10, 1  ;;  %v640_v22 = vsel %vm556_vm1, %v635_v11, %v639_v5  ;;  %v649_v23 = vshrl.u32 %v11869_v56, 16 }
  0x30   : > { %v771_v19 = vor.u32 %v769_v9, %v767_v13  ;;  %v781_v24 = vshll.u32 %v11872_v12, 16  ;;  %v648_v25 = vsel %vm556_vm1, %v643_v14, %v647_v15  ;;  %v657_v27 = vshrl.u32 %v11871_v7, 16  ;;  %v11879_v9 = vld [vmem:[%s12240_s7 + $0x100] ss:$0 sps:$4 sm:$0x11]  }
  0x31   : > { %v661_v28 = vshll.u32 %v11873_v16, 16  ;;  %v768_v29 = vsel %vm556_vm1, %v763_v17, %v767_v13  ;;  %v655_v30 = vrot.slane %v653_v18, 1  ;;  %v777_v31 = vshrl.u32 %v11870_v61, 16  ;;  %v12350_v13 = vld [vmem:[%s12240_s7 + $0x8] sm:$0xff]   ;;  %v11885_v17 = vld [vmem:[%s12240_s7 + $0x10] sm:$0xff]  }
  0x32   : > { %v785_v32 = vshrl.u32 %v11872_v12, 16  ;;  %v776_v35 = vsel %vm556_vm1, %v771_v19, %v775_v20  ;;  %v789_v36 = vshll.u32 %v11874_v21, 16  ;;  %v651_v38 = vor.u32 %v649_v23, %v647_v15 }
  0x33   : > { %v783_v39 = vrot.slane %v781_v24, 1  ;;  %v659_v40 = vor.u32 %v657_v27, %v655_v30  ;;  %v663_v41 = vrot.slane %v661_v28, 1  ;;  %v665_v42 = vshrl.u32 %v11873_v16, 16 }
  0x34   : > { %11232 = vmatmul.mubr.msk.bf16.gmra.mxu0 %vm817_vm2, %v624_v62  ;;  %v779_v45 = vor.u32 %v777_v31, %v775_v20  ;;  %v669_v46 = vshll.u32 %v11875_v34, 16  ;;  %v791_v49 = vrot.slane %v789_v36, 1  ;;  %v797_v50 = vshll.u32 %v11876_v37, 16  ;;  %v11887_v20 = vld [vmem:[%s12240_s7 + $0x18] sm:$0xff]  }
  0x35   : > { %11235 = vmatprep.mubr.msk.bf16.mxu0 %vm817_vm2, %v632_v1  ;;  %11264 = vmatmul.mubr.msk.bf16.gmra.mxu1 %vm817_vm2, %v752_v4  ;;  %v787_v48 = vor.u32 %v785_v32, %v783_v39  ;;  %v656_v52 = vsel %vm556_vm1, %v651_v38, %v655_v30  ;;  %v664_v54 = vsel %vm556_vm1, %v659_v40, %v663_v41  ;;  %v793_v55 = vshrl.u32 %v11874_v21, 16 }
  0x36   : > { %11267 = vmatprep.mubr.msk.bf16.mxu1 %vm817_vm2, %v760_v8  ;;  %v673_v56 = vshrl.u32 %v11875_v34, 16  ;;  %v677_v57 = vshll.u32 %v11877_v43, 16  ;;  %v784_v58 = vsel %vm556_vm1, %v779_v45, %v783_v39  ;;  %v667_v59 = vor.u32 %v665_v42, %v663_v41  ;;  %v11889_v39 = vld [vmem:[%s12240_s7 + $0x20] sm:$0xff]  }
  0x37   : > { %v671_v60 = vrot.slane %v669_v46, 1  ;;  %v805_v61 = vshll.u32 %v11878_v47, 16  ;;  %v792_v62 = vsel %vm556_vm1, %v787_v48, %v791_v49  ;;  %v799_v63 = vrot.slane %v797_v50, 1  ;;  %v11886_v50 = vld [vmem:[%s12240_s7 + $0x18] sm:$0xff]  }
  0x38   : > { %v801_v0 = vshrl.u32 %v11876_v37, 16  ;;  %v2451_v1 = vshrl.u32 %v11883_v51, 16  ;;  %v2443_v2 = vshrl.u32 %v11882_v53, 16  ;;  %v2454_v3 = vshll.u32 %v11883_v51, 16 }
  0x39   : > { %v675_v4 = vor.u32 %v673_v56, %v671_v60  ;;  %v679_v5 = vrot.slane %v677_v57, 1  ;;  %v2446_v6 = vshll.u32 %v11882_v53, 16  ;;  %v795_v7 = vor.u32 %v793_v55, %v791_v49  ;;  %v11884_v49 = vld [vmem:[%s12240_s7 + $0x10] sm:$0xff]  }
  0x3a   : > { %v807_v8 = vrot.slane %v805_v61, 1  ;;  %v672_v10 = vsel %vm556_vm1, %v667_v59, %v671_v60  ;;  %v803_v11 = vor.u32 %v801_v0, %v799_v63  ;;  %v681_v12 = vshrl.u32 %v11877_v43, 16  ;;  %v11891_v43 = vld [vmem:[%s12240_s7 + $0x28] sm:$0xff]   ;;  %v11893_v0 = vld [vmem:[%s12240_s7 + $0x30] sm:$0xff]  }
  0x3b   : > { %v2445_v14 = vrot.slane %v2443_v2, 1  ;;  %v2453_v15 = vrot.slane %v2451_v1, 1  ;;  %v2456_v16 = vrot.slane %v2454_v3, 2  ;;  %v680_v18 = vsel %vm556_vm1, %v675_v4, %v679_v5  ;;  %v11895_v3 = vld [vmem:[%s12240_s7 + $0x38] sm:$0xff]  }
  0x3c   : > { %11236 = vmatmul.mubr.msk.bf16.gmra.mxu0 %vm817_vm2, %v640_v22  ;;  %v2448_v19 = vrot.slane %v2446_v6, 2  ;;  %v800_v21 = vsel %vm556_vm1, %v795_v7, %v799_v63  ;;  %v809_v22 = vshrl.u32 %v11878_v47, 16  ;;  %v813_v23 = vshll.u32 %v11879_v9, 16  ;;  %v11890_v7 = vld [vmem:[%s12240_s7 + $0x28] sm:$0xff]  }
  0x3d   : > { %11239 = vmatprep.mubr.msk.bf16.mxu0 %vm817_vm2, %v648_v25  ;;  %11268 = vmatmul.mubr.msk.bf16.gmra.mxu1 %vm817_vm2, %v768_v29  ;;  %v808_v24 = vsel %vm556_vm1, %v803_v11, %v807_v8  ;;  %v11880_v25 = vld [vmem:[%s12240_s7] sm:$0xfe]   ;;  %v683_v27 = vor.u32 %v681_v12, %v679_v5  ;;  %v2460_v28 = vshrl.u32 %v11885_v17, 16  ;;  %v2463_v29 = vshll.u32 %v11885_v17, 16 }
  0x3e   : > { %11271 = vmatprep.mubr.msk.bf16.mxu1 %vm817_vm2, %v776_v35  ;;  %v2449_v30 = vor.u32 %v2448_v19, %v2445_v14  ;;  %v2457_v31 = vor.u32 %v2456_v16, %v2453_v15  ;;  %v2469_v32 = vshrl.u32 %v11887_v20, 16  ;;  %v2472_v34 = vshll.u32 %v11887_v20, 16  ;;  %v11888_v5 = vld [vmem:[%s12240_s7 + $0x20] sm:$0xff]   ;;  %v11892_v20 = vld [vmem:[%s12240_s7 + $0x30] sm:$0xff]  }
  0x3f   : > { %v811_v35 = vor.u32 %v809_v22, %v807_v8  ;;  %v815_v36 = vrot.slane %v813_v23, 1  ;;  %v1567_v37 = vrot.slane %v12350_v13, 1  ;;  %v1566_v38 = vrot.slane %v11880_v25, 1  ;;  %v11897_v15 = vld [vmem:[%s12240_s7 + $0x40] sm:$0xff]   ;;  %v11899_v23 = vld [vmem:[%s12240_s7 + $0x48] sm:$0xff]   ;;  %v11894_v25 = vld [vmem:[%s12240_s7 + $0x38] sm:$0xff]  }
  0x40   : > { %v688_v40 = vsel %vm556_vm1, %v683_v27, %v12250_v26  ;;  %v2462_v41 = vrot.slane %v2460_v28, 1  ;;  %v2465_v42 = vrot.slane %v2463_v29, 2  ;;  %v2458_v45 = vsel %vm2441_vm3, %v2449_v30, %v2457_v31 }
  0x41   : > { %v2471_v46 = vrot.slane %v2469_v32, 1  ;;  %v2474_v47 = vrot.slane %v2472_v34, 2  ;;  %v816_v48 = vsel %vm556_vm1, %v811_v35, %v815_v36  ;;  %v1568_v51 = vsel %vm1565_vm4, %v1566_v38, %v1567_v37  ;;  %v11901_v38 = vld [vmem:[%s12240_s7 + $0x50] sm:$0xff]  }
  0x42   : > { %v2481_v53 = vshll.u32 %v11889_v39, 16  ;;  %v2466_v26 = vor.u32 %v2465_v42, %v2462_v41  ;;  %v2490_v56 = vshll.u32 %v11891_v43, 16  ;;  %v1569_v57 = vrot.slane %v11884_v49, 1  ;;  %v11903_v41 = vld [vmem:[%s12240_s7 + $0x58] sm:$0xff]   ;;  %v11898_v49 = vld [vmem:[%s12240_s7 + $0x48] sm:$0xff]  }
  0x43   : > { %v2475_v55 = vor.u32 %v2474_v47, %v2471_v46  ;;  %v1571_v59 = vrot.slane %v11886_v50, 1  ;;  %v3941_v6 = vsel %vm914_vm0, %v12268_v44, 0  ;;  %v2496_v9 = vshrl.u32 %v11893_v0, 16  ;;  %v11896_v47 = vld [vmem:[%s12240_s7 + $0x40] sm:$0xff]  }
  0x44   : > { %11240 = vmatmul.mubr.msk.bf16.gmra.mxu0 %vm817_vm2, %v656_v52  ;;  %v2478_v52 = vshrl.u32 %v11889_v39, 16  ;;  %v2483_v61 = vrot.slane %v2481_v53, 2  ;;  %v2492_v2 = vrot.slane %v2490_v56, 2  ;;  %v1570_v4 = vsel %vm1565_vm4, %v1567_v37, %v1569_v57 }
  0x45   : > { %11243 = vmatprep.mubr.msk.bf16.mxu0 %vm817_vm2, %v664_v54  ;;  %11272 = vmatmul.mubr.msk.bf16.gmra.mxu1 %vm817_vm2, %v784_v58  ;;  %v2487_v54 = vshrl.u32 %v11891_v43, 16  ;;  %v4817_v58 = vsel %vm914_vm0, %v12257_v33, 0  ;;  %v2476_v1 = vsel %vm2441_vm3, %v2466_v26, %v2475_v55  ;;  %v1572_v33 = vsel %vm1565_vm4, %v1569_v57, %v1571_v59 }
  0x46   : > { %11275 = vmatprep.mubr.msk.bf16.mxu1 %vm817_vm2, %v792_v62  ;;  %v2480_v60 = vrot.slane %v2478_v52, 1  ;;  %v2467_v62 = vsel %vm2441_vm3, %v2457_v31, %v2466_v26  ;;  %v2505_v12 = vshrl.u32 %v11895_v3, 16  ;;  %v2508_v13 = vshll.u32 %v11895_v3, 16 }
  0x47   : > { %v2489_v63 = vrot.slane %v2487_v54, 1  ;;  %v1573_v44 = vrot.slane %v11888_v5, 1  ;;  %v1575_v14 = vrot.slane %v11890_v7, 1  ;;  %v2498_v17 = vrot.slane %v2496_v9, 1 }
  0x48   : > { %v2484_v8 = vor.u32 %v2483_v61, %v2480_v60  ;;  %v2510_v22 = vrot.slane %v2508_v13, 2  ;;  %v2514_v28 = vshrl.u32 %v11897_v15, 16  ;;  %v2517_v30 = vshll.u32 %v11897_v15, 16  ;;  %v11905_v61 = vld [vmem:[%s12240_s7 + $0x60] sm:$0xff]   ;;  %v11911_v15 = vld [vmem:[%s12240_s7 + $0x78] sm:$0xff]  }
  0x49   : > { %v2493_v11 = vor.u32 %v2492_v2, %v2489_v63  ;;  %v1576_v27 = vsel %vm1565_vm4, %v1573_v44, %v1575_v14  ;;  %v2523_v32 = vshrl.u32 %v11899_v23, 16  ;;  %v2526_v34 = vshll.u32 %v11899_v23, 16  ;;  %v11900_v2 = vld [vmem:[%s12240_s7 + $0x50] sm:$0xff]  }
  0x4a   : > { %v2485_v16 = vsel %vm2441_vm3, %v2475_v55, %v2484_v8  ;;  %v1577_v35 = vrot.slane %v11892_v20, 1  ;;  %v1579_v36 = vrot.slane %v11894_v25, 1  ;;  %v2516_v37 = vrot.slane %v2514_v28, 1  ;;  %v11904_v20 = vld [vmem:[%s12240_s7 + $0x60] sm:$0xff]  }
  0x4b   : > { %v2494_v19 = vsel %vm2441_vm3, %v2484_v8, %v2493_v11  ;;  %v2525_v43 = vrot.slane %v2523_v32, 1  ;;  %v2532_v50 = vshrl.u32 %v11901_v38, 16  ;;  %v2535_v52 = vshll.u32 %v11901_v38, 16 }
  0x4c   : > { %11244 = vmatmul.mubr.msk.bf16.gmra.mxu0 %vm817_vm2, %v672_v10  ;;  %v2499_v10 = vshll.u32 %v11893_v0, 16  ;;  %v1578_v46 = vsel %vm1565_vm4, %v1575_v14, %v1577_v35  ;;  %v2541_v53 = vshrl.u32 %v11903_v41, 16  ;;  %v2544_v54 = vshll.u32 %v11903_v41, 16  ;;  %v11907_v0 = vld [vmem:[%s12240_s7 + $0x68] sm:$0xff]  }
  0x4d   : > { %11247 = vmatprep.mubr.msk.bf16.mxu0 %vm817_vm2, %v680_v18  ;;  %11276 = vmatmul.mubr.msk.bf16.gmra.mxu1 %vm817_vm2, %v800_v21  ;;  %v2507_v21 = vrot.slane %v2505_v12, 1  ;;  %v1581_v55 = vrot.slane %v11896_v47, 1  ;;  %v1583_v56 = vrot.slane %v11898_v49, 1  ;;  %v2559_v8 = vshrl.u32 %v11907_v0, 16  ;;  %v11909_v12 = vld [vmem:[%s12240_s7 + $0x70] sm:$0xff]  }
  0x4e   : > { %11279 = vmatprep.mubr.msk.bf16.mxu1 %vm817_vm2, %v808_v24  ;;  %v2501_v18 = vrot.slane %v2499_v10, 2  ;;  %v1574_v24 = vsel %vm1565_vm4, %v1571_v59, %v1573_v44  ;;  %v2537_v59 = vrot.slane %v2535_v52, 2  ;;  %v2543_v60 = vrot.slane %v2541_v53, 1 }
  0x4f   : > { %v2511_v31 = vor.u32 %v2510_v22, %v2507_v21  ;;  %v2546_v63 = vrot.slane %v2544_v54, 2  ;;  %v1584_v3 = vsel %vm1565_vm4, %v1581_v55, %v1583_v56  ;;  %v2562_v9 = vshll.u32 %v11907_v0, 16  ;;  %v11906_v22 = vld [vmem:[%s12240_s7 + $0x68] sm:$0xff]  }
  0x50   : > { %v2502_v29 = vor.u32 %v2501_v18, %v2498_v17  ;;  %v1585_v10 = vrot.slane %v11900_v2, 1  ;;  %v2561_v17 = vrot.slane %v2559_v8, 1  ;;  %v2568_v23 = vshrl.u32 %v11909_v12, 16  ;;  %v11914_v0 = vld [vmem:[%s12240_s7 + $0x88] sm:$0xff]   ;;  %v11921_v8 = vld [vmem:[%s12240_s7 + $0xa0] sm:$0xff]  }
  0x51   : > { %v2547_v7 = vor.u32 %v2546_v63, %v2543_v60  ;;  %v2564_v18 = vrot.slane %v2562_v9, 2  ;;  %v2571_v25 = vshll.u32 %v11909_v12, 16  ;;  %v11919_v60 = vld [vmem:[%s12240_s7 + $0x98] sm:$0xff]  }
  0x52   : > { %v2503_v39 = vsel %vm2441_vm3, %v2493_v11, %v2502_v29  ;;  %v2512_v42 = vsel %vm2441_vm3, %v2502_v29, %v2511_v31  ;;  %v2580_v29 = vshll.u32 %v11911_v15, 16  ;;  %v2570_v32 = vrot.slane %v2568_v23, 1 }
  0x53   : > { %v2565_v28 = vor.u32 %v2564_v18, %v2561_v17  ;;  %v11918_v17 = vld [vmem:[%s12240_s7 + $0x98] sm:$0xff]  }
  0x54   : > { %11248 = vmatmul.mubr.msk.bf16.gmra.mxu0 %vm817_vm2, %v688_v40  ;;  %v2519_v40 = vrot.slane %v2517_v30, 2  ;;  %v1589_v30 = vrot.slane %v11904_v20, 1  ;;  %v12476_v20 = vld [vmem:[%s14547_s1 + $0x14] sm:$0xf] }
  0x55   : > { %11351 = vmatprep.mubr.msk.bf16.mxu0 %vm817_vm2, %v2458_v45  ;;  %11280 = vmatmul.mubr.msk.bf16.gmra.mxu1 %vm817_vm2, %v816_v48  ;;  %v2528_v45 = vrot.slane %v2526_v34, 2  ;;  %v1580_v48 = vsel %vm1565_vm4, %v1577_v35, %v1579_v36  ;;  %v11913_v34 = vld [vmem:[%s12240_s7 + $0x80] sm:$0xff]  }
  0x56   : > { %11285 = vmatprep.mubr.msk.bf16.mxu1 %vm817_vm2, %v1568_v51  ;;  %v2520_v51 = vor.u32 %v2519_v40, %v2516_v37  ;;  %v11915_v40 = vld [vmem:[%s12240_s7 + $0x88] sm:$0xff]  }
  0x57   : > { %v2529_v26 = vor.u32 %v2528_v45, %v2525_v43  ;;  %v11910_v45 = vld [vmem:[%s12240_s7 + $0x78] sm:$0xff]  }
  0x58   : > { %v2521_v57 = vsel %vm2441_vm3, %v2511_v31, %v2520_v51  ;;  %v1591_v31 = vrot.slane %v11906_v22, 1  ;;  %v1595_v53 = vrot.slane %v11910_v45, 1  ;;  %v2625_v22 = vshll.u32 %v11921_v8, 16 }
  0x5a   : > { %v1592_v43 = vsel %vm1565_vm4, %v1589_v30, %v1591_v31 }
  0x5c   : > { %11352 = vmatmul.mubr.msk.bf16.vlgmr.msra.gmra.mxu0 %vm817_vm2, %v2467_v62  ;;  %v2530_v62 = vsel %vm2441_vm3, %v2520_v51, %v2529_v26  ;;  %v2598_v51 = vshll.u32 %v11915_v40, 16 }
  0x5d   : > { %11482 = vmatpush3.bf16.msra.mxu0 %v4817_v58  ;;  %11355 = vmatprep.mubr.msk.bf16.mxu0 %vm817_vm2, %v2476_v1  ;;  %v2534_v58 = vrot.slane %v2532_v50, 1  ;;  %v1582_v1 = vsel %vm1565_vm4, %v1579_v36, %v1581_v55  ;;  %v2573_v36 = vrot.slane %v2571_v25, 2  ;;  %v2595_v50 = vshrl.u32 %v11915_v40, 16 }
  0x5e   : > { %11286 = vmatmul.mubr.msk.bf16.vlgmr.msra.gmra.mxu1 %vm817_vm2, %v1570_v4  ;;  %v11902_v4 = vld [vmem:[%s12240_s7 + $0x58] sm:$0xff]  }
  0x5f   : > { %11416 = vmatpush3.bf16.msra.mxu1 %v3941_v6  ;;  %11289 = vmatprep.mubr.msk.bf16.mxu1 %vm817_vm2, %v1572_v33  ;;  %v2538_v5 = vor.u32 %v2537_v59, %v2534_v58  ;;  %v2550_v6 = vshrl.u32 %v11905_v61, 16  ;;  %v2553_v33 = vshll.u32 %v11905_v61, 16  ;;  %v1587_v11 = vrot.slane %v11902_v4, 1 }
  0x60   : > { %v2574_v47 = vor.u32 %v2573_v36, %v2570_v32  ;;  %v2597_v58 = vrot.slane %v2595_v50, 1  ;;  %v2600_v59 = vrot.slane %v2598_v51, 2  ;;  %11819 = vmatprep.subr.msk.bf16.mxu1 %vm914_vm0, %v12476_v20 }
  0x61   : > { %v2539_v13 = vsel %vm2441_vm3, %v2529_v26, %v2538_v5  ;;  %v2552_v44 = vrot.slane %v2550_v6, 1  ;;  %v2555_v14 = vrot.slane %v2553_v33, 2  ;;  %v1588_v21 = vsel %vm1565_vm4, %v1585_v10, %v1587_v11 }
  0x62   : > { %v1590_v41 = vsel %vm1565_vm4, %v1587_v11, %v1589_v30  ;;  %v2575_v54 = vsel %vm2441_vm3, %v2565_v28, %v2574_v47  ;;  %v2601_v4 = vor.u32 %v2600_v59, %v2597_v58  ;;  %v2616_v6 = vshll.u32 %v11919_v60, 16  ;;  %v11925_v30 = vld [vmem:[%s12240_s7 + $0xb0] sm:$0xff]   ;;  %v11931_v58 = vld [vmem:[%s12240_s7 + $0xc8] sm:$0xff]  }
  0x64   : > { %11356 = vmatmul.mubr.msk.bf16.gmra.mxu0 %vm817_vm2, %v2485_v16  ;;  %v2548_v16 = vsel %vm2441_vm3, %v2538_v5, %v2547_v7  ;;  %v2613_v5 = vshrl.u32 %v11919_v60, 16  ;;  %v11924_v60 = vld [vmem:[%s12240_s7 + $0xb0] sm:$0xff]  }
  0x65   : > { %11359 = vmatprep.mubr.msk.bf16.mxu0 %vm817_vm2, %v2494_v19  ;;  %v1586_v19 = vsel %vm1565_vm4, %v1583_v56, %v1585_v10  ;;  %v11917_v56 = vld [vmem:[%s12240_s7 + $0x90] sm:$0xff]  }
  0x66   : > { %11290 = vmatmul.mubr.msk.bf16.gmra.mxu1 %vm817_vm2, %v1574_v24  ;;  %v2556_v24 = vor.u32 %v2555_v14, %v2552_v44  ;;  %v2604_v2 = vshrl.u32 %v11917_v56, 16  ;;  %v2618_v44 = vrot.slane %v2616_v6, 2  ;;  %v11923_v14 = vld [vmem:[%s12240_s7 + $0xa8] sm:$0xff]  }
  0x67   : > { %11293 = vmatprep.mubr.msk.bf16.mxu1 %vm817_vm2, %v1576_v27  ;;  %v2577_v27 = vshrl.u32 %v11911_v15, 16  ;;  %v2634_v25 = vshll.u32 %v11923_v14, 16 }
  0x68   : > { %v2557_v35 = vsel %vm2441_vm3, %v2547_v7, %v2556_v24  ;;  %v2566_v38 = vsel %vm2441_vm3, %v2556_v24, %v2565_v28  ;;  %v1599_v7 = vrot.slane %v11914_v0, 1  ;;  %v2606_v10 = vrot.slane %v2604_v2, 1 }
  0x69   : > { %v2579_v37 = vrot.slane %v2577_v27, 1  ;;  %v2631_v24 = vshrl.u32 %v11923_v14, 16  ;;  %v1603_v28 = vrot.slane %v11918_v17, 1  ;;  %v11928_v14 = vld [vmem:[%s12240_s7 + $0xc0] sm:$0xff]  }
  0x6c   : > { %11360 = vmatmul.mubr.msk.bf16.gmra.mxu0 %vm817_vm2, %v2503_v39  ;;  %v2582_v39 = vrot.slane %v2580_v29, 2 }
  0x6d   : > { %11363 = vmatprep.mubr.msk.bf16.mxu0 %vm817_vm2, %v2512_v42  ;;  %v11908_v42 = vld [vmem:[%s12240_s7 + $0x70] sm:$0xff]  }
  0x6e   : > { %11294 = vmatmul.mubr.msk.bf16.gmra.mxu1 %vm817_vm2, %v1578_v46  ;;  %v2586_v46 = vshrl.u32 %v11913_v34, 16  ;;  %v2583_v49 = vor.u32 %v2582_v39, %v2579_v37  ;;  %v1593_v52 = vrot.slane %v11908_v42, 1  ;;  %v11920_v37 = vld [vmem:[%s12240_s7 + $0xa0] sm:$0xff]   ;;  %v2636_v39 = vrot.slane %v2634_v25, 2  ;;  %v11922_v42 = vld [vmem:[%s12240_s7 + $0xa8] sm:$0xff]  }
  0x6f   : > { %11297 = vmatprep.mubr.msk.bf16.mxu1 %vm817_vm2, %v1580_v48  ;;  %v2589_v48 = vshll.u32 %v11913_v34, 16  ;;  %v2627_v34 = vrot.slane %v2625_v22, 2  ;;  %v1605_v50 = vrot.slane %v11920_v37, 1  ;;  %v1607_v51 = vrot.slane %v11922_v42, 1  ;;  %v11937_v25 = vld [vmem:[%s12240_s7 + $0xe0] sm:$0xff]  }
  0x70   : > { %v2588_v26 = vrot.slane %v2586_v46, 1  ;;  %v1594_v61 = vsel %vm1565_vm4, %v1591_v31, %v1593_v52  ;;  %v1596_v63 = vsel %vm1565_vm4, %v1593_v52, %v1595_v53  ;;  %v12487_v31 = vld [vmem:[%s14547_s1 + $0x18] sm:$0xf]  ;;  %v2643_v46 = vshll.u32 %v11925_v30, 16  ;;  %v11929_v52 = vld [vmem:[%s12240_s7 + $0xc0] sm:$0xff]  }
  0x71   : > { %v2591_v55 = vrot.slane %v2589_v48, 2  ;;  %11820 = vmatprep.subr.msk.bf16.mxu0 %vm914_vm0, %v12487_v31  ;;  %v1606_v59 = vsel %vm1565_vm4, %v1603_v28, %v1605_v50  ;;  %v2697_v42 = vshll.u32 %v11937_v25, 16 }
  0x74   : > { %11364 = vmatmul.mubr.msk.bf16.gmra.mxu0 %vm817_vm2, %v2521_v57  ;;  %v2584_v57 = vsel %vm2441_vm3, %v2574_v47, %v2583_v49 }
  0x75   : > { %11367 = vmatprep.mubr.msk.bf16.mxu0 %vm817_vm2, %v2530_v62  ;;  %v11912_v62 = vld [vmem:[%s12240_s7 + $0x80] sm:$0xff]  }
  0x76   : > { %11298 = vmatmul.mubr.msk.bf16.gmra.mxu1 %vm817_vm2, %v1582_v1  ;;  %v2592_v1 = vor.u32 %v2591_v55, %v2588_v26  ;;  %v1597_v33 = vrot.slane %v11912_v62, 1  ;;  %v11926_v62 = vld [vmem:[%s12240_s7 + $0xb8] sm:$0xff]  }
  0x77   : > { %11301 = vmatprep.mubr.msk.bf16.mxu1 %vm817_vm2, %v1584_v3  ;;  %v2607_v3 = vshll.u32 %v11917_v56, 16  ;;  %v1611_v6 = vrot.slane %v11926_v62, 1 }
  0x78   : > { %v2593_v9 = vsel %vm2441_vm3, %v2583_v49, %v2592_v1  ;;  %v2602_v12 = vsel %vm2441_vm3, %v2592_v1, %v2601_v4  ;;  %v1598_v15 = vsel %vm1565_vm4, %v1595_v53, %v1597_v33  ;;  %v1600_v18 = vsel %vm1565_vm4, %v1597_v33, %v1599_v7 }
  0x79   : > { %v2609_v11 = vrot.slane %v2607_v3, 2  ;;  %v2661_v1 = vshll.u32 %v11929_v52, 16  ;;  %v2667_v3 = vshrl.u32 %v11931_v58, 16 }
  0x7c   : > { %11368 = vmatmul.mubr.msk.bf16.gmra.mxu0 %vm817_vm2, %v2539_v13  ;;  %v2615_v13 = vrot.slane %v2613_v5, 1  ;;  %v1609_v5 = vrot.slane %v11924_v60, 1 }
  0x7d   : > { %11371 = vmatprep.mubr.msk.bf16.mxu0 %vm817_vm2, %v2548_v16  ;;  %v11916_v16 = vld [vmem:[%s12240_s7 + $0x90] sm:$0xff]  }
  0x7e   : > { %11302 = vmatmul.mubr.msk.bf16.gmra.mxu1 %vm817_vm2, %v1586_v19  ;;  %v2622_v19 = vshrl.u32 %v11921_v8, 16  ;;  %v2619_v23 = vor.u32 %v2618_v44, %v2615_v13  ;;  %v1601_v27 = vrot.slane %v11916_v16, 1  ;;  %v2663_v8 = vrot.slane %v2661_v1, 2  ;;  %v11935_v13 = vld [vmem:[%s12240_s7 + $0xd8] sm:$0xff]   ;;  %v11930_v16 = vld [vmem:[%s12240_s7 + $0xc8] sm:$0xff]  }
  0x7f   : > { %11305 = vmatprep.mubr.msk.bf16.mxu1 %vm817_vm2, %v1588_v21  ;;  %v2610_v21 = vor.u32 %v2609_v11, %v2606_v10  ;;  %v2669_v11 = vrot.slane %v2667_v3, 1  ;;  %v1610_v44 = vsel %vm1565_vm4, %v1607_v51, %v1609_v5  ;;  %v2685_v22 = vshrl.u32 %v11935_v13, 16  ;;  %v11945_v1 = vld [vmem:[%s12240_s7 + $0x100] ss:$0 sps:$4 sm:$0x33]  }
  0x80   : > { %v2624_v29 = vrot.slane %v2622_v19, 1  ;;  %v1602_v40 = vsel %vm1565_vm4, %v1599_v7, %v1601_v27 }
  0x81   : > { %v2611_v32 = vsel %vm2441_vm3, %v2601_v4, %v2610_v21  ;;  %v2620_v36 = vsel %vm2441_vm3, %v2610_v21, %v2619_v23  ;;  %v2670_v4 = vshll.u32 %v11931_v58, 16  ;;  %v11936_v58 = vld [vmem:[%s12240_s7 + $0xe0] sm:$0xff]  }
  0x82   : > { %v2628_v45 = vor.u32 %v2627_v34, %v2624_v29 }
  0x84   : > { %11372 = vmatmul.mubr.msk.bf16.gmra.mxu0 %vm817_vm2, %v2557_v35  ;;  %v11927_v35 = vld [vmem:[%s12240_s7 + $0xb8] sm:$0xff]   ;;  %v2629_v53 = vsel %vm2441_vm3, %v2619_v23, %v2628_v45  ;;  %v2688_v23 = vshll.u32 %v11935_v13, 16  ;;  %v2730_v13 = vshrl.u32 %v11945_v1, 16 }
  0x85   : > { %11375 = vmatprep.mubr.msk.bf16.mxu0 %vm817_vm2, %v2566_v38  ;;  %v2633_v38 = vrot.slane %v2631_v24, 1  ;;  %v2649_v47 = vshrl.u32 %v11927_v35, 16  ;;  %v2652_v49 = vshll.u32 %v11927_v35, 16  ;;  %v1613_v24 = vrot.slane %v11928_v14, 1  ;;  %v11932_v35 = vld [vmem:[%s12240_s7 + $0xd0] sm:$0xff]  }
  0x86   : > { %11306 = vmatmul.mubr.msk.bf16.gmra.mxu1 %vm817_vm2, %v1590_v41  ;;  %v1604_v41 = vsel %vm1565_vm4, %v1601_v27, %v1603_v28  ;;  %v1615_v27 = vrot.slane %v11930_v16, 1  ;;  %v2690_v37 = vrot.slane %v2688_v23, 2  ;;  %v2732_v23 = vrot.slane %v2730_v13, 1 }
  0x87   : > { %11309 = vmatprep.mubr.msk.bf16.mxu1 %vm817_vm2, %v1592_v43  ;;  %v2640_v43 = vshrl.u32 %v11925_v30, 16  ;;  %v2637_v48 = vor.u32 %v2636_v39, %v2633_v38  ;;  %v2651_v55 = vrot.slane %v2649_v47, 1  ;;  %v1614_v38 = vsel %vm1565_vm4, %v1611_v6, %v1613_v24  ;;  %v11934_v39 = vld [vmem:[%s12240_s7 + $0xd8] sm:$0xff]  }
  0x88   : > { %v1617_v47 = vrot.slane %v11932_v35, 1  ;;  %v7030_v13 = vsel %vm914_vm0, %v12487_v31, 0 }
  0x89   : > { %v2642_v26 = vrot.slane %v2640_v43, 1  ;;  %v2638_v56 = vsel %vm2441_vm3, %v2628_v45, %v2637_v48 }
  0x8c   : > { %11376 = vmatmul.mubr.msk.bf16.gmra.mxu0 %vm817_vm2, %v2575_v54  ;;  %v2645_v54 = vrot.slane %v2643_v46, 2 }
  0x8d   : > { %11379 = vmatprep.mubr.msk.bf16.mxu0 %vm817_vm2, %v2584_v57  ;;  %v2654_v57 = vrot.slane %v2652_v49, 2  ;;  %v1619_v49 = vrot.slane %v11934_v39, 1 }
  0x8e   : > { %11310 = vmatmul.mubr.msk.bf16.gmra.mxu1 %vm817_vm2, %v1594_v61  ;;  %v1608_v61 = vsel %vm1565_vm4, %v1605_v50, %v1607_v51  ;;  %v2646_v0 = vor.u32 %v2645_v54, %v2642_v26  ;;  %v2699_v51 = vrot.slane %v2697_v42, 2 }
  0x8f   : > { %11313 = vmatprep.mubr.msk.bf16.mxu1 %vm817_vm2, %v1596_v63  ;;  %v2658_v63 = vshrl.u32 %v11929_v52, 16  ;;  %v2655_v2 = vor.u32 %v2654_v57, %v2651_v55  ;;  %v11941_v52 = vld [vmem:[%s12240_s7 + $0xf0] sm:$0xff]   ;;  %v1618_v57 = vsel %vm1565_vm4, %v1615_v27, %v1617_v47  ;;  %v1620_v60 = vsel %vm1565_vm4, %v1617_v47, %v1619_v49 }
  0x90   : > { %v2647_v7 = vsel %vm2441_vm3, %v2637_v48, %v2646_v0 }
  0x91   : > { %v2660_v33 = vrot.slane %v2658_v63, 1  ;;  %v2656_v10 = vsel %vm2441_vm3, %v2646_v0, %v2655_v2  ;;  %v2712_v63 = vshrl.u32 %v11941_v52, 16  ;;  %v2715_v0 = vshll.u32 %v11941_v52, 16 }
  0x93   : > { %v2664_v17 = vor.u32 %v2663_v8, %v2660_v33  ;;  %v12553_v33 = vld [vmem:[%s12240_s7 + $0xf8] sm:$0xff]  }
  0x94   : > { %11380 = vmatmul.mubr.msk.bf16.gmra.mxu0 %vm817_vm2, %v2593_v9  ;;  %v11933_v9 = vld [vmem:[%s12240_s7 + $0xd0] sm:$0xff]  }
  0x95   : > { %11383 = vmatprep.mubr.msk.bf16.mxu0 %vm817_vm2, %v2602_v12  ;;  %v2672_v12 = vrot.slane %v2670_v4, 2  ;;  %v2679_v19 = vshll.u32 %v11933_v9, 16  ;;  %v2665_v28 = vsel %vm2441_vm3, %v2655_v2, %v2664_v17  ;;  %v1621_v4 = vrot.slane %v11936_v58, 1 }
  0x96   : > { %11314 = vmatmul.mubr.msk.bf16.gmra.mxu1 %vm817_vm2, %v1598_v15  ;;  %v1612_v15 = vsel %vm1565_vm4, %v1609_v5, %v1611_v6  ;;  %v11940_v6 = vld [vmem:[%s12240_s7 + $0xf0] sm:$0xff]  }
  0x97   : > { %11317 = vmatprep.mubr.msk.bf16.mxu1 %vm817_vm2, %v1600_v18  ;;  %v2676_v18 = vshrl.u32 %v11933_v9, 16  ;;  %v2673_v21 = vor.u32 %v2672_v12, %v2669_v11  ;;  %v2681_v30 = vrot.slane %v2679_v19, 2  ;;  %v2714_v9 = vrot.slane %v2712_v63, 1  ;;  %v11956_v63 = vld [vmem:[%s12240_s7 + $0x30] sm:$0xff]  }
  0x98   : > { %v1622_v14 = vsel %vm1565_vm4, %v1619_v49, %v1621_v4  ;;  %v1625_v19 = vrot.slane %v11940_v6, 1 }
  0x99   : > { %v2678_v29 = vrot.slane %v2676_v18, 1  ;;  %v2674_v34 = vsel %vm2441_vm3, %v2664_v17, %v2673_v21  ;;  %v11947_v17 = vld [vmem:[%s12240_s7 + $0x10] sm:$0xff]  }
  0x9b   : > { %v2682_v43 = vor.u32 %v2681_v30, %v2678_v29  ;;  %v3560_v29 = vshll.u32 %v11947_v17, 16 }
  0x9c   : > { %11384 = vmatmul.mubr.msk.bf16.gmra.mxu0 %vm817_vm2, %v2611_v32  ;;  %v11939_v32 = vld [vmem:[%s12240_s7 + $0xe8] sm:$0xff]  }
  0x9d   : > { %11387 = vmatprep.mubr.msk.bf16.mxu0 %vm817_vm2, %v2620_v36  ;;  %v2687_v36 = vrot.slane %v2685_v22, 1  ;;  %v2703_v45 = vshrl.u32 %v11939_v32, 16  ;;  %v2706_v46 = vshll.u32 %v11939_v32, 16  ;;  %v11944_v32 = vld [vmem:[%s12240_s7 + $0x100] ss:$0 sps:$4 sm:$0x11]  }
  0x9e   : > { %11318 = vmatmul.mubr.msk.bf16.gmra.mxu1 %vm817_vm2, %v1602_v40  ;;  %v2694_v40 = vshrl.u32 %v11937_v25, 16 }
  0x9f   : > { %11321 = vmatprep.mubr.msk.bf16.mxu1 %vm817_vm2, %v1604_v41  ;;  %v1616_v41 = vsel %vm1565_vm4, %v1613_v24, %v1615_v27  ;;  %v2691_v48 = vor.u32 %v2690_v37, %v2687_v36  ;;  %v2705_v26 = vrot.slane %v2703_v45, 1  ;;  %v2708_v54 = vrot.slane %v2706_v46, 2  ;;  %v11949_v36 = vld [vmem:[%s12240_s7 + $0x10] sm:$0xff]   ;;  %v11950_v37 = vld [vmem:[%s12240_s7 + $0x18] sm:$0xff]   ;;  %v11952_v45 = vld [vmem:[%s12240_s7 + $0x20] sm:$0xff]  }
  0xa0   : > { %v2696_v50 = vrot.slane %v2694_v40, 1  ;;  %v3566_v49 = vshrl.u32 %v11950_v37, 16 }
  0xa1   : > { %v2692_v55 = vsel %vm2441_vm3, %v2682_v43, %v2691_v48  ;;  %v2709_v62 = vor.u32 %v2708_v54, %v2705_v26  ;;  %v3575_v26 = vshrl.u32 %v11952_v45, 16  ;;  %v3578_v54 = vshll.u32 %v11952_v45, 16  ;;  %v11962_v45 = vld [vmem:[%s12240_s7 + $0x48] sm:$0xff]  }
  0xa4   : > { %11388 = vmatmul.mubr.msk.bf16.gmra.mxu0 %vm817_vm2, %v2629_v53  ;;  %v2683_v53 = vsel %vm2441_vm3, %v2673_v21, %v2682_v43  ;;  %v1627_v21 = vrot.slane %v12553_v33, 1  ;;  %v3562_v43 = vrot.slane %v3560_v29, 2 }
  0xa5   : > { %11391 = vmatprep.mubr.msk.bf16.mxu0 %vm817_vm2, %v2638_v56  ;;  %v11943_v56 = vld [vmem:[%s12240_s7 + $0xf8] sm:$0xff]  }
  0xa6   : > { %11322 = vmatmul.mubr.msk.bf16.gmra.mxu1 %vm817_vm2, %v1606_v59  ;;  %v11938_v59 = vld [vmem:[%s12240_s7 + $0xe8] sm:$0xff]   ;;  %v2721_v2 = vshrl.u32 %v11943_v56, 16  ;;  %v2724_v3 = vshll.u32 %v11943_v56, 16  ;;  %v1628_v40 = vsel %vm1565_vm4, %v1625_v19, %v1627_v21  ;;  %v11951_v56 = vld [vmem:[%s12240_s7 + $0x18] sm:$0xff]  }
  0xa7   : > { %11325 = vmatprep.mubr.msk.bf16.mxu1 %vm817_vm2, %v1608_v61  ;;  %v2700_v61 = vor.u32 %v2699_v51, %v2696_v50  ;;  %v1623_v5 = vrot.slane %v11938_v59, 1  ;;  %v1629_v50 = vrot.slane %v11944_v32, 1  ;;  %v3569_v51 = vshll.u32 %v11950_v37, 16 }
  0xa8   : > { %v2723_v11 = vrot.slane %v2721_v2, 1  ;;  %v2726_v12 = vrot.slane %v2724_v3, 2  ;;  %v3568_v59 = vrot.slane %v3566_v49, 1  ;;  %v3580_v2 = vrot.slane %v3578_v54, 2  ;;  %v11964_v49 = vld [vmem:[%s12240_s7 + $0x50] sm:$0xff]  }
  0xa9   : > { %v2710_v8 = vsel %vm2441_vm3, %v2700_v61, %v2709_v62  ;;  %v1624_v16 = vsel %vm1565_vm4, %v1621_v4, %v1623_v5  ;;  %v4658_v3 = vrot.slane %v11951_v56, 2 }
  0xaa   : > { %v2727_v22 = vor.u32 %v2726_v12, %v2723_v11  ;;  %v5924_v11 = vsel %vm914_vm0, %v12476_v20, 0  ;;  %v11955_v12 = vld [vmem:[%s12240_s7 + $0x28] sm:$0xff]  }
  0xab   : > { %v4662_v31 = vrot.slane %v11955_v12, 2  ;;  %v11966_v12 = vld [vmem:[%s12240_s7 + $0x58] sm:$0xff]  }
  0xac   : > { %11392 = vmatmul.mubr.msk.bf16.gmra.mxu0 %vm817_vm2, %v2647_v7  ;;  %v2701_v7 = vsel %vm2441_vm3, %v2691_v48, %v2700_v61  ;;  %v4656_v48 = vrot.slane %v11949_v36, 2  ;;  %v1630_v61 = vsel %vm1565_vm4, %v1627_v21, %v1629_v50 }
  0xad   : > { %11395 = vmatprep.mubr.msk.bf16.mxu0 %vm817_vm2, %v2656_v10  ;;  %v2717_v10 = vrot.slane %v2715_v0, 2 }
  0xae   : > { %11326 = vmatmul.mubr.msk.bf16.gmra.mxu1 %vm817_vm2, %v1610_v44  ;;  %v2733_v44 = vshll.u32 %v11945_v1, 16  ;;  %v3577_v1 = vrot.slane %v3575_v26, 1 }
  0xaf   : > { %11329 = vmatprep.mubr.msk.bf16.mxu1 %vm817_vm2, %v1612_v15  ;;  %v11946_v15 = vld [vmem:[%s12240_s7 + $0x8] sm:$0xfe]   ;;  %v2718_v18 = vor.u32 %v2717_v10, %v2714_v9  ;;  %v3596_v9 = vshll.u32 %v11956_v63, 16  ;;  %v4659_v10 = vsel %vm4654_vm5, %v4656_v48, %v4658_v3 }
  0xb0   : > { %v2735_v24 = vrot.slane %v2733_v44, 2  ;;  %v3549_v25 = vshrl.u32 %v11946_v15, 16  ;;  %v3552_v27 = vshll.u32 %v11946_v15, 16 }
  0xb1   : > { %v2719_v30 = vsel %vm2441_vm3, %v2709_v62, %v2718_v18  ;;  %v2728_v35 = vsel %vm2441_vm3, %v2718_v18, %v2727_v22  ;;  %v3571_v62 = vrot.slane %v3569_v51, 2  ;;  %v3598_v20 = vrot.slane %v3596_v9, 2 }
  0xb2   : > { %v3551_v39 = vrot.slane %v3549_v25, 1  ;;  %v2736_v46 = vor.u32 %v2735_v24, %v2732_v23  ;;  %v11960_v23 = vld [vmem:[%s12240_s7 + $0x40] sm:$0xff]  }
  0xb3   : > { %v3572_v6 = vor.u32 %v3571_v62, %v3568_v59  ;;  %v3611_v36 = vshrl.u32 %v11960_v23, 16  ;;  %v3614_v37 = vshll.u32 %v11960_v23, 16 }
  0xb4   : > { %11396 = vmatmul.mubr.msk.bf16.gmra.mxu0 %vm817_vm2, %v2665_v28  ;;  %v3557_v28 = vshrl.u32 %v11947_v17, 16 }
  0xb5   : > { %11399 = vmatprep.mubr.msk.bf16.mxu0 %vm817_vm2, %v2674_v34  ;;  %v11948_v34 = vld [vmem:[%s12240_s7 + $0x8] sm:$0xfc]   ;;  %v3616_v26 = vrot.slane %v3614_v37, 2 }
  0xb6   : > { %11330 = vmatmul.mubr.msk.bf16.gmra.mxu1 %vm817_vm2, %v1614_v38  ;;  %v1626_v38 = vsel %vm1565_vm4, %v1623_v5, %v1625_v19  ;;  %v3559_v42 = vrot.slane %v3557_v28, 1  ;;  %v4655_v47 = vrot.slane %v11948_v34, 2  ;;  %v11958_v19 = vld [vmem:[%s12240_s7 + $0x38] sm:$0xff]  }
  0xb7   : > { %11333 = vmatprep.mubr.msk.bf16.mxu1 %vm817_vm2, %v1616_v41  ;;  %v3554_v41 = vrot.slane %v3552_v27, 2  ;;  %v3602_v29 = vshrl.u32 %v11958_v19, 16 }
  0xb8   : > { %v4657_v58 = vsel %vm4654_vm5, %v4655_v47, %v4656_v48 }
  0xb9   : > { %v3555_v52 = vor.u32 %v3554_v41, %v3551_v39  ;;  %v11959_v39 = vld [vmem:[%s12240_s7 + $0x38] sm:$0xff]   ;;  %v3604_v47 = vrot.slane %v3602_v29, 1 }
  0xba   : > { %v4666_v54 = vrot.slane %v11959_v39, 2 }
  0xbc   : > { %11400 = vmatmul.mubr.msk.bf16.gmra.mxu0 %vm817_vm2, %v2683_v53  ;;  %v3563_v53 = vor.u32 %v3562_v43, %v3559_v42  ;;  %v12625_v43 = vld [vmem:[%s12240_s7 + $0x40] sm:$0xff]  }
  0xbd   : > { %11403 = vmatprep.mubr.msk.bf16.mxu0 %vm817_vm2, %v2692_v55  ;;  %v2737_v55 = vsel %vm2441_vm3, %v2727_v22, %v2736_v46 }
  0xbe   : > { %11334 = vmatmul.mubr.msk.bf16.gmra.mxu1 %vm817_vm2, %v1618_v57  ;;  %v11953_v57 = vld [vmem:[%s12240_s7 + $0x20] sm:$0xff]   ;;  %v3564_v0 = vsel %vm2441_vm3, %v3555_v52, %v3563_v53  ;;  %v3573_v15 = vsel %vm2441_vm3, %v3563_v53, %v3572_v6  ;;  %v3613_v53 = vrot.slane %v3611_v36, 1 }
  0xbf   : > { %11337 = vmatprep.mubr.msk.bf16.mxu1 %vm817_vm2, %v1620_v60  ;;  %v11954_v60 = vld [vmem:[%s12240_s7 + $0x28] sm:$0xff]   ;;  %v4660_v4 = vrot.slane %v11953_v57, 2  ;;  %v4668_v57 = vrot.slane %v12625_v43, 2 }
  0xc0   : > { %v3584_v5 = vshrl.u32 %v11954_v60, 16  ;;  %v3587_v33 = vshll.u32 %v11954_v60, 16  ;;  %v3623_v60 = vshll.u32 %v11962_v45, 16 }
  0xc1   : > { %v4661_v44 = vsel %vm4654_vm5, %v4658_v3, %v4660_v4  ;;  %v11963_v3 = vld [vmem:[%s12240_s7 + $0x48] sm:$0xff]  }
  0xc2   : > { %v3589_v17 = vrot.slane %v3587_v33, 2  ;;  %v12656_v33 = vld [vmem:[%s12240_s7 + $0x50] sm:$0xff]  }
  0xc4   : > { %11404 = vmatmul.mubr.msk.bf16.gmra.mxu0 %vm817_vm2, %v2701_v7  ;;  %v3593_v7 = vshrl.u32 %v11956_v63, 16 }
  0xc5   : > { %11407 = vmatprep.mubr.msk.bf16.mxu0 %vm817_vm2, %v2710_v8  ;;  %v3581_v8 = vor.u32 %v3580_v2, %v3577_v1  ;;  %v3632_v1 = vshll.u32 %v11964_v49, 16 }
  0xc6   : > { %11338 = vmatmul.mubr.msk.bf16.gmra.mxu1 %vm817_vm2, %v1622_v14  ;;  %v11957_v14 = vld [vmem:[%s12240_s7 + $0x30] sm:$0xff]   ;;  %v3595_v18 = vrot.slane %v3593_v7, 1  ;;  %v10625_v7 = vld [vmem:[%s14547_s1 + $0x1c] sm:$0xf] }
  0xc7   : > { %11341 = vmatprep.mubr.msk.bf16.mxu1 %vm817_vm2, %v1624_v16  ;;  %v3586_v16 = vrot.slane %v3584_v5, 1  ;;  %v3582_v22 = vsel %vm2441_vm3, %v3572_v6, %v3581_v8  ;;  %v4664_v27 = vrot.slane %v11957_v14, 2  ;;  %v4669_v6 = vsel %vm4654_vm5, %v4666_v54, %v4668_v57 }
  0xc9   : > { %v3590_v28 = vor.u32 %v3589_v17, %v3586_v16  ;;  %v4665_v42 = vsel %vm4654_vm5, %v4662_v31, %v4664_v27  ;;  %v4667_v2 = vsel %vm4654_vm5, %v4664_v27, %v4666_v54  ;;  %v11968_v16 = vld [vmem:[%s12240_s7 + $0x60] sm:$0xff]   ;;  %v4670_v17 = vrot.slane %v11963_v3, 2 }
  0xca   : > { %v3641_v27 = vshll.u32 %v11966_v12, 16  ;;  %v3650_v36 = vshll.u32 %v11968_v16, 16 }
  0xcb   : > { %v3591_v46 = vsel %vm2441_vm3, %v3581_v8, %v3590_v28  ;;  %v4671_v37 = vsel %vm4654_vm5, %v4668_v57, %v4670_v17 }
  0xcc   : > { %11408 = vmatmul.mubr.msk.bf16.gmra.mxu0 %vm817_vm2, %v2719_v30  ;;  %v3605_v30 = vshll.u32 %v11958_v19, 16 }
  0xcd   : > { %11411 = vmatprep.mubr.msk.bf16.mxu0 %vm817_vm2, %v2728_v35  ;;  %v3599_v35 = vor.u32 %v3598_v20, %v3595_v18  ;;  %v10691_v18 = vld [vmem:[%s14547_s1 + $0x20] sm:$0xf]  ;;  %v4672_v20 = vrot.slane %v12656_v33, 2 }
  0xce   : > { %11342 = vmatmul.mubr.msk.bf16.gmra.mxu1 %vm817_vm2, %v1626_v38  ;;  %v4663_v38 = vsel %vm4654_vm5, %v4660_v4, %v4662_v31  ;;  %v3607_v48 = vrot.slane %v3605_v30, 2  ;;  %v3638_v31 = vshrl.u32 %v11966_v12, 16 }
  0xcf   : > { %11345 = vmatprep.mubr.msk.bf16.mxu1 %vm817_vm2, %v1628_v40  ;;  %v3600_v52 = vsel %vm2441_vm3, %v3590_v28, %v3599_v35  ;;  %v4673_v43 = vsel %vm4654_vm5, %v4670_v17, %v4672_v20  ;;  %v11974_v17 = vld [vmem:[%s12240_s7 + $0x78] sm:$0xff]  }
  0xd0   : > { %v3608_v59 = vor.u32 %v3607_v48, %v3604_v47  ;;  %v3640_v47 = vrot.slane %v3638_v31, 1  ;;  %v3643_v48 = vrot.slane %v3641_v27, 2  ;;  %v11976_v27 = vld [vmem:[%s12240_s7 + $0x80] sm:$0xff]  }
  0xd2   : > { %v3609_v8 = vsel %vm2441_vm3, %v3599_v35, %v3608_v59  ;;  %v3647_v35 = vshrl.u32 %v11968_v16, 16  ;;  %v11973_v16 = vld [vmem:[%s12240_s7 + $0x70] sm:$0xff]  }
  0xd4   : > { %11412 = vmatmul.mubr.msk.bf16.gmra.mxu0 %vm817_vm2, %v2737_v55  ;;  %v3649_v57 = vrot.slane %v3647_v35, 1 }
  0xd5   : > { %11483 = vmatprep.mubr.msk.bf16.mxu0 %vm817_vm2, %v4657_v58  ;;  %v3620_v58 = vshrl.u32 %v11962_v45, 16  ;;  %v11969_v45 = vld [vmem:[%s12240_s7 + $0x60] sm:$0xff]  }
  0xd6   : > { %11346 = vmatmul.mubr.msk.bf16.gmra.mxu1 %vm817_vm2, %v1630_v61  ;;  %v3629_v61 = vshrl.u32 %v11964_v49, 16  ;;  %v11970_v49 = vld [vmem:[%s12240_s7 + $0x68] sm:$0xff]  }
  0xd7   : > { %11417 = vmatprep.mubr.msk.bf16.mxu1 %vm817_vm2, %v3564_v0  ;;  %v3617_v0 = vor.u32 %v3616_v26, %v3613_v53  ;;  %v3622_v9 = vrot.slane %v3620_v58, 1  ;;  %v3652_v58 = vrot.slane %v3650_v36, 2  ;;  %v3659_v3 = vshll.u32 %v11970_v49, 16 }
  0xd9   : > { %v3618_v14 = vsel %vm2441_vm3, %v3608_v59, %v3617_v0  ;;  %v3661_v31 = vrot.slane %v3659_v3, 2 }
  0xdc   : > { %v12601_v21 = vpop.f32.mrf.mxu0  ;;  %11484 = vmatmul.mubr.msk.bf16.vlgmr.msra.gmra.mxu0 %vm817_vm2, %v4659_v10  ;;  %v3625_v10 = vrot.slane %v3623_v60, 2 }
  0xdd   : > { %11614 = vmatpush3.bf16.msra.mxu0 %v7030_v13  ;;  %11487 = vmatprep.mubr.msk.bf16.mxu0 %vm817_vm2, %v4661_v44  ;;  %v12607_v24 = vpop.f32.mrf.mxu1 }
  0xde   : > { %11418 = vmatmul.mubr.msk.bf16.vlgmr.msra.gmra.mxu1 %vm817_vm2, %v3573_v15  ;;  %v12610_v25 = vpop.f32.mrf.mxu0  ;;  %v3634_v15 = vrot.slane %v3632_v1, 2  ;;  %11822 = vmatprep.subr.msk.bf16.mxu0 %vm914_vm0, %v10691_v18  ;;  %v3626_v23 = vor.u32 %v3625_v10, %v3622_v9  ;;  %v3644_v1 = vor.u32 %v3643_v48, %v3640_v47  ;;  %v3674_v47 = vshrl.u32 %v11974_v17, 16 }
  0xdf   : > { %11548 = vmatpush3.bf16.msra.mxu1 %v5924_v11  ;;  %11421 = vmatprep.mubr.msk.bf16.mxu1 %vm817_vm2, %v3582_v22  ;;  %v12613_v32 = vpop.f32.mrf.mxu1  ;;  %v3631_v11 = vrot.slane %v3629_v61, 1 }
  0xe0   : > { %v12615_v34 = vpop.f32.mrf.mxu0  ;;  %11821 = vmatprep.subr.msk.bf16.mxu1 %vm914_vm0, %v10625_v7  ;;  %v3653_v7 = vor.u32 %v3652_v58, %v3649_v57 }
  0xe1   : > { %v12619_v40 = vpop.f32.mrf.mxu1  ;;  %v3635_v30 = vor.u32 %v3634_v15, %v3631_v11  ;;  %v11971_v11 = vld [vmem:[%s12240_s7 + $0x68] sm:$0xff]  }
  0xe2   : > { %v12621_v41 = vpop.f32.mrf.mxu0 }
  0xe3   : > { %v12630_v50 = vpop.f32.mrf.mxu1  ;;  %v3636_v54 = vsel %vm2441_vm3, %v3626_v23, %v3635_v30  ;;  %v3645_v18 = vsel %vm2441_vm3, %v3635_v30, %v3644_v1 }
  0xe4   : > { %14553 = vst [vmem:[#allocation3_spill] sm:$0xff] %v12630_v50  ;;  %v12632_v51 = vpop.f32.mrf.mxu0  ;;  %11488 = vmatmul.mubr.msk.bf16.gmra.mxu0 %vm817_vm2, %v4663_v38  ;;  %v11967_v38 = vld [vmem:[%s12240_s7 + $0x58] sm:$0xff]  }
  0xe5   : > { %11491 = vmatprep.mubr.msk.bf16.mxu0 %vm817_vm2, %v4665_v42  ;;  %v12637_v55 = vpop.f32.mrf.mxu1  ;;  %v4674_v59 = vrot.slane %v11967_v38, 2 }
  0xe6   : > { %14554 = vst [vmem:[#allocation4_spill] sm:$0xff] %v12637_v55  ;;  %11422 = vmatmul.mubr.msk.bf16.gmra.mxu1 %vm817_vm2, %v3591_v46  ;;  %v12640_v56 = vpop.f32.mrf.mxu0  ;;  %v3627_v46 = vsel %vm2441_vm3, %v3617_v0, %v3626_v23  ;;  %v4676_v0 = vrot.slane %v11969_v45, 2 }
  0xe7   : > { %11425 = vmatprep.mubr.msk.bf16.mxu1 %vm817_vm2, %v3600_v52  ;;  %v12644_v62 = vpop.f32.mrf.mxu1  ;;  %v11972_v52 = vld [vmem:[%s12240_s7 + $0x70] sm:$0xff]   ;;  %v4675_v10 = vsel %vm4654_vm5, %v4672_v20, %v4674_v59  ;;  %v3654_v20 = vsel %vm2441_vm3, %v3644_v1, %v3653_v7 }
  0xe8   : > { %14555 = vst [vmem:[#allocation5_spill] sm:$0xff] %v12644_v62  ;;  %v12646_v63 = vpop.f32.mrf.mxu0  ;;  %v3668_v9 = vshll.u32 %v11972_v52, 16  ;;  %v4677_v15 = vsel %vm4654_vm5, %v4674_v59, %v4676_v0  ;;  %v3686_v59 = vshll.u32 %v11976_v27, 16 }
  0xe9   : > { %v12650_v4 = vpop.f32.mrf.mxu1 }
  0xea   : > { %14556 = vst [vmem:[#allocation6_spill] sm:$0xff] %v12650_v4  ;;  %v12652_v5 = vpop.f32.mrf.mxu0  ;;  %v3670_v38 = vrot.slane %v3668_v9, 2  ;;  %v11994_v4 = vld [vmem:[%s12240_s7 + $0xc8] sm:$0xff]  }
  0xeb   : > { %v12664_v13 = vpop.f32.mrf.mxu1  ;;  %v3764_v50 = vshrl.u32 %v11994_v4, 16 }
  0xec   : > { %14557 = vst [vmem:[#allocation7_spill] sm:$0xff] %v12664_v13  ;;  %v12666_v44 = vpop.f32.mrf.mxu0  ;;  %11492 = vmatmul.mubr.msk.bf16.gmra.mxu0 %vm817_vm2, %v4667_v2  ;;  %v3656_v2 = vshrl.u32 %v11970_v49, 16  ;;  %v3677_v49 = vshll.u32 %v11974_v17, 16 }
  0xed   : > { %11495 = vmatprep.mubr.msk.bf16.mxu0 %vm817_vm2, %v4669_v6  ;;  %v12675_v19 = vpop.f32.mrf.mxu1 }
  0xee   : > { %14558 = vst [vmem:[#allocation8_spill] sm:$0xff] %v12675_v19  ;;  %11426 = vmatmul.mubr.msk.bf16.gmra.mxu1 %vm817_vm2, %v3609_v8  ;;  %v12678_v22 = vpop.f32.mrf.mxu0  ;;  %v3665_v8 = vshrl.u32 %v11972_v52, 16  ;;  %v3658_v23 = vrot.slane %v3656_v2, 1  ;;  %v3683_v52 = vshrl.u32 %v11976_v27, 16  ;;  %v11975_v2 = vld [vmem:[%s12240_s7 + $0x78] sm:$0xff]   ;;  %v3679_v17 = vrot.slane %v3677_v49, 2 }
  0xef   : > { %11429 = vmatprep.mubr.msk.bf16.mxu1 %vm817_vm2, %v3618_v14  ;;  %v12683_v28 = vpop.f32.mrf.mxu1  ;;  %v3688_v27 = vrot.slane %v3686_v59, 2 }
  0xf0   : > { %14559 = vst [vmem:[#allocation9_spill] sm:$0xff] %v12683_v28  ;;  %v12685_v29 = vpop.f32.mrf.mxu0  ;;  %v3662_v48 = vor.u32 %v3661_v31, %v3658_v23  ;;  %v11990_v28 = vld [vmem:[%s12240_s7 + $0xb8] sm:$0xff]  }
  0xf1   : > { %v12689_v39 = vpop.f32.mrf.mxu1 }
  0xf2   : > { %14560 = vst [vmem:[#allocation10_spill] sm:$0xff] %v12689_v39  ;;  %v12691_v42 = vpop.f32.mrf.mxu0  ;;  %v12833_v39 = vld [vmem:[%s12240_s7 + $0xb0] sm:$0xff]  }
  0xf3   : > { %v12698_v53 = vpop.f32.mrf.mxu1  ;;  %v4696_v19 = vrot.slane %v12833_v39, 2 }
  0xf4   : > { %14561 = vst [vmem:[#allocation11_spill] sm:$0xff] %v12698_v53  ;;  %v12700_v26 = vpop.f32.mrf.mxu0  ;;  %11496 = vmatmul.mubr.msk.bf16.gmra.mxu0 %vm817_vm2, %v4671_v37  ;;  %v3667_v37 = vrot.slane %v3665_v8, 1 }
  0xf5   : > { %11499 = vmatprep.mubr.msk.bf16.mxu0 %vm817_vm2, %v4673_v43  ;;  %v12705_v60 = vpop.f32.mrf.mxu1  ;;  %v4678_v43 = vrot.slane %v11971_v11, 2  ;;  %v11978_v11 = vld [vmem:[%s12240_s7 + $0x88] sm:$0xff]  }
  0xf6   : > { %14562 = vst [vmem:[#allocation12_spill] sm:$0xff] %v12705_v60  ;;  %11430 = vmatmul.mubr.msk.bf16.gmra.mxu1 %vm817_vm2, %v3627_v46  ;;  %v12708_v61 = vpop.f32.mrf.mxu0  ;;  %v4680_v46 = vrot.slane %v11973_v16, 2  ;;  %v3671_v58 = vor.u32 %v3670_v38, %v3667_v37  ;;  %v3676_v16 = vrot.slane %v3674_v47, 1  ;;  %v4682_v37 = vrot.slane %v11975_v2, 2  ;;  %v11988_v60 = vld [vmem:[%s12240_s7 + $0xb0] sm:$0xff]  }
  0xf7   : > { %11433 = vmatprep.mubr.msk.bf16.mxu1 %vm817_vm2, %v3636_v54  ;;  %v12711_v6 = vpop.f32.mrf.mxu1  ;;  %v4679_v1 = vsel %vm4654_vm5, %v4676_v0, %v4678_v43  ;;  %v3692_v47 = vshrl.u32 %v11978_v11, 16 }
  0xf8   : > { %14563 = vst [vmem:[#allocation13_spill] sm:$0xff] %v12711_v6  ;;  %v12713_v33 = vpop.f32.mrf.mxu0  ;;  %v4681_v9 = vsel %vm4654_vm5, %v4678_v43, %v4680_v46  ;;  %v3672_v0 = vsel %vm2441_vm3, %v3662_v48, %v3671_v58  ;;  %v3680_v49 = vor.u32 %v3679_v17, %v3676_v16  ;;  %v11981_v17 = vld [vmem:[%s12240_s7 + $0x90] sm:$0xff]  }
  0xf9   : > { %v12717_v12 = vpop.f32.mrf.mxu1  ;;  %v3694_v16 = vrot.slane %v3692_v47, 1 }
  0xfa   : > { %14564 = vst [vmem:[#allocation14_spill] sm:$0xff] %v12717_v12  ;;  %v12719_v14 = vpop.f32.mrf.mxu0 }
  0xfb   : > { %v12726_v35 = vpop.f32.mrf.mxu1 }
  0xfc   : > { %14565 = vst [vmem:[#allocation15_spill] sm:$0xff] %v12726_v35  ;;  %v12728_v36 = vpop.f32.mrf.mxu0  ;;  %11500 = vmatmul.mubr.msk.bf16.gmra.mxu0 %vm817_vm2, %v4675_v10  ;;  %v11977_v10 = vld [vmem:[%s12240_s7 + $0x80] sm:$0xff]  }
  0xfd   : > { %11503 = vmatprep.mubr.msk.bf16.mxu0 %vm817_vm2, %v4677_v15  ;;  %v12733_v45 = vpop.f32.mrf.mxu1  ;;  %v3663_v15 = vsel %vm2441_vm3, %v3653_v7, %v3662_v48  ;;  %v4684_v43 = vrot.slane %v11977_v10, 2  ;;  %v3695_v48 = vshll.u32 %v11978_v11, 16  ;;  %v3681_v11 = vsel %vm2441_vm3, %v3671_v58, %v3680_v49 }
  0xfe   : > { %14566 = vst [vmem:[#allocation16_spill] sm:$0xff] %v12733_v45  ;;  %11434 = vmatmul.mubr.msk.bf16.gmra.mxu1 %vm817_vm2, %v3645_v18  ;;  %v12736_v30 = vpop.f32.mrf.mxu0  ;;  %v3685_v18 = vrot.slane %v3683_v52, 1 }
  0xff   : > { %11437 = vmatprep.mubr.msk.bf16.mxu1 %vm817_vm2, %v3654_v20  ;;  %v12739_v54 = vpop.f32.mrf.mxu1  ;;  %v11980_v20 = vld [vmem:[%s12240_s7 + $0x90] sm:$0xff]  }
 0x100   : > { %14567 = vst [vmem:[#allocation17_spill] sm:$0xff] %v12739_v54  ;;  %v12741_v57 = vpop.f32.mrf.mxu0  ;;  %v3701_v2 = vshrl.u32 %v11980_v20, 16 }
 0x101   : > { %v12745_v3 = vpop.f32.mrf.mxu1 }
 0x102   : > { %14568 = vst [vmem:[#allocation18_spill] sm:$0xff] %v12745_v3  ;;  %v12747_v8 = vpop.f32.mrf.mxu0  ;;  %v11982_v3 = vld [vmem:[%s12240_s7 + $0x98] sm:$0xff]  }
 0x103   : > { %v12753_v23 = vpop.f32.mrf.mxu1 }
 0x104   : > { %14569 = vst [vmem:[#allocation19_spill] sm:$0xff] %v12753_v23  ;;  %v12755_v31 = vpop.f32.mrf.mxu0  ;;  %11504 = vmatmul.mubr.msk.bf16.gmra.mxu0 %vm817_vm2, %v4679_v1  ;;  %v3689_v1 = vor.u32 %v3688_v27, %v3685_v18  ;;  %v3703_v27 = vrot.slane %v3701_v2, 1  ;;  %v11983_v2 = vld [vmem:[%s12240_s7 + $0x98] sm:$0xff]  }
 0x105   : > { %11507 = vmatprep.mubr.msk.bf16.mxu0 %vm817_vm2, %v4681_v9  ;;  %v12761_v38 = vpop.f32.mrf.mxu1  ;;  %v3704_v9 = vshll.u32 %v11980_v20, 16 }
 0x106   : > { %14570 = vst [vmem:[#allocation20_spill] sm:$0xff] %v12761_v38  ;;  %11438 = vmatmul.mubr.msk.bf16.gmra.mxu1 %vm817_vm2, %v3663_v15  ;;  %v12764_v7 = vpop.f32.mrf.mxu0  ;;  %v4683_v38 = vsel %vm4654_vm5, %v4680_v46, %v4682_v37  ;;  %v11979_v15 = vld [vmem:[%s12240_s7 + $0x88] sm:$0xff]   ;;  %v3690_v46 = vsel %vm2441_vm3, %v3680_v49, %v3689_v1  ;;  %v3713_v49 = vshll.u32 %v11982_v3, 16 }
 0x107   : > { %11441 = vmatprep.mubr.msk.bf16.mxu1 %vm817_vm2, %v3672_v0  ;;  %v12767_v52 = vpop.f32.mrf.mxu1  ;;  %v4685_v0 = vsel %vm4654_vm5, %v4682_v37, %v4684_v43  ;;  %v3706_v20 = vrot.slane %v3704_v9, 2  ;;  %v4686_v37 = vrot.slane %v11979_v15, 2 }
 0x108   : > { %14571 = vst [vmem:[#allocation21_spill] sm:$0xff] %v12767_v52  ;;  %v12769_v59 = vpop.f32.mrf.mxu0  ;;  %v3697_v52 = vrot.slane %v3695_v48, 2  ;;  %v4688_v48 = vrot.slane %v11981_v17, 2 }
 0x109   : > { %v12773_v23 = vpop.f32.mrf.mxu1  ;;  %v3707_v15 = vor.u32 %v3706_v20, %v3703_v27 }
 0x10a   : > { %14572 = vst [vmem:[#allocation22_spill] sm:$0xff] %v12773_v23  ;;  %v12775_v10 = vpop.f32.mrf.mxu0  ;;  %v11984_v23 = vld [vmem:[%s12240_s7 + $0xa0] sm:$0xff]  }
 0x10b   : > { %v12781_v54 = vpop.f32.mrf.mxu1  ;;  %v3722_v35 = vshll.u32 %v11984_v23, 16 }
 0x10c   : > { %14573 = vst [vmem:[#allocation23_spill] sm:$0xff] %v12781_v54  ;;  %v12783_v18 = vpop.f32.mrf.mxu0  ;;  %11508 = vmatmul.mubr.msk.bf16.gmra.mxu0 %vm817_vm2, %v4683_v38  ;;  %v3698_v38 = vor.u32 %v3697_v52, %v3694_v16  ;;  %v3710_v54 = vshrl.u32 %v11982_v3, 16  ;;  %v4689_v52 = vsel %vm4654_vm5, %v4686_v37, %v4688_v48  ;;  %v12808_v16 = vld [vmem:[%s12240_s7 + $0xa0] sm:$0xff]  }
 0x10d   : > { %11511 = vmatprep.mubr.msk.bf16.mxu0 %vm817_vm2, %v4685_v0  ;;  %v12789_v47 = vpop.f32.mrf.mxu1  ;;  %v3719_v0 = vshrl.u32 %v11984_v23, 16 }
 0x10e   : > { %14574 = vst [vmem:[#allocation24_spill] sm:$0xff] %v12789_v47  ;;  %11442 = vmatmul.mubr.msk.bf16.gmra.mxu1 %vm817_vm2, %v3681_v11  ;;  %v12792_v58 = vpop.f32.mrf.mxu0  ;;  %v4687_v47 = vsel %vm4654_vm5, %v4684_v43, %v4686_v37  ;;  %v11986_v11 = vld [vmem:[%s12240_s7 + $0xa8] sm:$0xff]   ;;  %v3699_v3 = vsel %vm2441_vm3, %v3689_v1, %v3698_v38  ;;  %v3708_v23 = vsel %vm2441_vm3, %v3698_v38, %v3707_v15  ;;  %v4690_v43 = vrot.slane %v11983_v2, 2 }
 0x10f   : > { %11445 = vmatprep.mubr.msk.bf16.mxu1 %vm817_vm2, %v3690_v46  ;;  %v12796_v9 = vpop.f32.mrf.mxu1  ;;  %v3712_v46 = vrot.slane %v3710_v54, 1  ;;  %v3721_v20 = vrot.slane %v3719_v0, 1  ;;  %v3728_v37 = vshrl.u32 %v11986_v11, 16  ;;  %v3731_v53 = vshll.u32 %v11986_v11, 16  ;;  %v11987_v0 = vld [vmem:[%s12240_s7 + $0xa8] sm:$0xff]  }
 0x110   : > { %14575 = vst [vmem:[#allocation25_spill] sm:$0xff] %v12796_v9  ;;  %v12798_v45 = vpop.f32.mrf.mxu0  ;;  %v3715_v9 = vrot.slane %v3713_v49, 2  ;;  %v3737_v11 = vshrl.u32 %v11988_v60, 16 }
 0x111   : > { %v12802_v12 = vpop.f32.mrf.mxu1 }
 0x112   : > { %14576 = vst [vmem:[#allocation26_spill] sm:$0xff] %v12802_v12  ;;  %v12804_v17 = vpop.f32.mrf.mxu0  ;;  %v3724_v12 = vrot.slane %v3722_v35, 2  ;;  %v3716_v38 = vor.u32 %v3715_v9, %v3712_v46 }
 0x113   : > { %v12811_v6 = vpop.f32.mrf.mxu1 }
 0x114   : > { %14577 = vst [vmem:[#allocation27_spill] sm:$0xff] %v12811_v6  ;;  %v12813_v27 = vpop.f32.mrf.mxu0  ;;  %11512 = vmatmul.mubr.msk.bf16.gmra.mxu0 %vm817_vm2, %v4687_v47  ;;  %v4692_v47 = vrot.slane %v12808_v16, 2  ;;  %v3725_v2 = vor.u32 %v3724_v12, %v3721_v20  ;;  %v3730_v6 = vrot.slane %v3728_v37, 1  ;;  %v3717_v46 = vsel %vm2441_vm3, %v3707_v15, %v3716_v38 }
 0x115   : > { %11515 = vmatprep.mubr.msk.bf16.mxu0 %vm817_vm2, %v4689_v52  ;;  %v12819_v54 = vpop.f32.mrf.mxu1  ;;  %v3740_v52 = vshll.u32 %v11988_v60, 16 }
 0x116   : > { %14578 = vst [vmem:[#allocation28_spill] sm:$0xff] %v12819_v54  ;;  %11446 = vmatmul.mubr.msk.bf16.gmra.mxu1 %vm817_vm2, %v3699_v3  ;;  %v12822_v1 = vpop.f32.mrf.mxu0  ;;  %v4691_v54 = vsel %vm4654_vm5, %v4688_v48, %v4690_v43  ;;  %v3733_v3 = vrot.slane %v3731_v53, 2  ;;  %v4693_v9 = vsel %vm4654_vm5, %v4690_v43, %v4692_v47  ;;  %v3726_v53 = vsel %vm2441_vm3, %v3716_v38, %v3725_v2 }
 0x117   : > { %11449 = vmatprep.mubr.msk.bf16.mxu1 %vm817_vm2, %v3708_v23  ;;  %v12826_v35 = vpop.f32.mrf.mxu1  ;;  %v3739_v48 = vrot.slane %v3737_v11, 1  ;;  %v3742_v20 = vrot.slane %v3740_v52, 2  ;;  %v3746_v43 = vshrl.u32 %v11990_v28, 16 }
 0x118   : > { %14579 = vst [vmem:[#allocation29_spill] sm:$0xff] %v12826_v35  ;;  %v12828_v49 = vpop.f32.mrf.mxu0  ;;  %v11992_v35 = vld [vmem:[%s12240_s7 + $0xc0] sm:$0xff]   ;;  %v3734_v37 = vor.u32 %v3733_v3, %v3730_v6 }
 0x119   : > { %v12836_v16 = vpop.f32.mrf.mxu1  ;;  %v3755_v38 = vshrl.u32 %v11992_v35, 16  ;;  %v3758_v11 = vshll.u32 %v11992_v35, 16  ;;  %v12861_v35 = vld [vmem:[%s12240_s7 + $0xc0] sm:$0xff]  }
 0x11a   : > { %14580 = vst [vmem:[#allocation30_spill] sm:$0xff] %v12836_v16  ;;  %v12838_v23 = vpop.f32.mrf.mxu0  ;;  %v4694_v16 = vrot.slane %v11987_v0, 2  ;;  %v3743_v0 = vor.u32 %v3742_v20, %v3739_v48 }
 0x11b   : > { %v12843_v12 = vpop.f32.mrf.mxu1  ;;  %v3760_v20 = vrot.slane %v3758_v11, 2  ;;  %v4700_v11 = vrot.slane %v12861_v35, 2  ;;  %v12887_v35 = vld [vmem:[%s12240_s7 + $0xd0] sm:$0xff]  }
 0x11c   : > { %14581 = vst [vmem:[#allocation31_spill] sm:$0xff] %v12843_v12  ;;  %v11353_v60 = vpop.f32.mrf.mxu0  ;;  %11516 = vmatmul.mubr.msk.bf16.gmra.mxu0 %vm817_vm2, %v4691_v54  ;;  %v3749_v12 = vshll.u32 %v11990_v28, 16  ;;  %v11991_v28 = vld [vmem:[%s12240_s7 + $0xb8] sm:$0xff]  }
 0x11d   : > { %11519 = vmatprep.mubr.msk.bf16.mxu0 %vm817_vm2, %v4693_v9  ;;  %v3735_v9 = vsel %vm2441_vm3, %v3725_v2, %v3734_v37 }
 0x11e   : > { %v11287_v13 = vpop.f32.mrf.mxu1  ;;  %11450 = vmatmul.mubr.msk.bf16.gmra.mxu1 %vm817_vm2, %v3717_v46  ;;  %v2871_v15 = vpop.f32.mrf.mxu0  ;;  %v4695_v46 = vsel %vm4654_vm5, %v4692_v47, %v4694_v16  ;;  %v3751_v55 = vrot.slane %v3749_v12, 2 }
 0x11f   : > { %v2021_v54 = vadd.f32 %v11287_v13, %v12601_v21  ;;  %11453 = vmatprep.mubr.msk.bf16.mxu1 %vm817_vm2, %v3726_v53  ;;  %v4697_v13 = vsel %vm4654_vm5, %v4694_v16, %v4696_v19  ;;  %v3748_v53 = vrot.slane %v3746_v43, 1  ;;  %v11996_v16 = vld [vmem:[%s12240_s7 + $0xd0] sm:$0xff]  }
 0x120   : > { %v1764_v52 = vpop.f32.mrf.mxu1  ;;  %v11354_v6 = vpop.f32.mrf.mxu0 }
 0x121   : > { %v12853_v3 = vadd.f32 %v11353_v60, %v2021_v54  ;;  %v2019_v39 = vadd.f32 %v1764_v52, %v12610_v25  ;;  %v3757_v25 = vrot.slane %v3755_v38, 1  ;;  %v3744_v54 = vsel %vm2441_vm3, %v3734_v37, %v3743_v0 }
 0x122   : > { %v11288_v62 = vpop.f32.mrf.mxu1  ;;  %v2874_v21 = vpop.f32.mrf.mxu0  ;;  %v3767_v52 = vshll.u32 %v11994_v4, 16  ;;  %v3752_v38 = vor.u32 %v3751_v55, %v3748_v53 }
 0x123   : > { %v12863_v48 = vadd.f32 %v2871_v15, %v2019_v39  ;;  %v2022_v60 = vadd.f32 %v11288_v62, %v12615_v34  ;;  %v4698_v15 = vrot.slane %v11991_v28, 2  ;;  %v11998_v39 = vld [vmem:[%s12240_s7 + $0xd8] sm:$0xff]  }
 0x124   : > { %v1767_v2 = vpop.f32.mrf.mxu1  ;;  %v11357_v47 = vpop.f32.mrf.mxu0  ;;  %11520 = vmatmul.mubr.msk.bf16.gmra.mxu0 %vm817_vm2, %v4695_v46  ;;  %v11995_v46 = vld [vmem:[%s12240_s7 + $0xc8] sm:$0xff]  }
 0x125   : > { %v12869_v12 = vadd.f32 %v11354_v6, %v2022_v60  ;;  %v2020_v43 = vadd.f32 %v1767_v2, %v12621_v41  ;;  %11523 = vmatprep.mubr.msk.bf16.mxu0 %vm817_vm2, %v4697_v13  ;;  %v3761_v41 = vor.u32 %v3760_v20, %v3757_v25  ;;  %v3766_v6 = vrot.slane %v3764_v50, 1 }
 0x126   : > { %v11291_v34 = vpop.f32.mrf.mxu1  ;;  %11454 = vmatmul.mubr.msk.bf16.gmra.mxu1 %vm817_vm2, %v3735_v9  ;;  %v2887_v62 = vpop.f32.mrf.mxu0  ;;  %v3769_v60 = vrot.slane %v3767_v52, 2  ;;  %v3773_v9 = vshrl.u32 %v11996_v16, 16  ;;  %v3776_v2 = vshll.u32 %v11996_v16, 16  ;;  %v3753_v50 = vsel %vm2441_vm3, %v3743_v0, %v3752_v38 }
 0x127   : > { %14582 = vst [vmem:[#allocation32_spill] sm:$0xff] %v12869_v12  ;;  %v12876_v4 = vadd.f32 %v2874_v21, %v2020_v43  ;;  %v2025_v37 = vadd.f32 %v11291_v34, %v12632_v51  ;;  %11457 = vmatprep.mubr.msk.bf16.mxu1 %vm817_vm2, %v3744_v54  ;;  %v12000_v12 = vld [vmem:[%s12240_s7 + $0xe0] sm:$0xff]   ;;  %v4699_v21 = vsel %vm4654_vm5, %v4696_v19, %v4698_v15  ;;  %v3782_v20 = vshrl.u32 %v11998_v39, 16 }
 0x128   : > { %v1780_v28 = vpop.f32.mrf.mxu1  ;;  %v11358_v13 = vpop.f32.mrf.mxu0  ;;  %v4701_v25 = vsel %vm4654_vm5, %v4698_v15, %v4700_v11  ;;  %v3785_v54 = vshll.u32 %v11998_v39, 16  ;;  %v3762_v16 = vsel %vm2441_vm3, %v3752_v38, %v3761_v41  ;;  %v3778_v0 = vrot.slane %v3776_v2, 2  ;;  %v12002_v15 = vld [vmem:[%s12240_s7 + $0xe8] sm:$0xff]   ;;  %v12004_v2 = vld [vmem:[%s12240_s7 + $0xf0] sm:$0xff]  }
 0x129   : > { %14583 = vst [vmem:[#allocation33_spill] sm:$0xff] %v12876_v4  ;;  %v12882_v55 = vadd.f32 %v11357_v47, %v2025_v37  ;;  %v2023_v53 = vadd.f32 %v1780_v28, %v12640_v56  ;;  %v4702_v56 = vrot.slane %v11995_v46, 2  ;;  %v3770_v37 = vor.u32 %v3769_v60, %v3766_v6 }
 0x12a   : > { %v11292_v51 = vpop.f32.mrf.mxu1  ;;  %v2890_v43 = vpop.f32.mrf.mxu0  ;;  %v3775_v28 = vrot.slane %v3773_v9, 1  ;;  %v3794_v38 = vshll.u32 %v12000_v12, 16  ;;  %v3784_v46 = vrot.slane %v3782_v20, 1  ;;  %v3787_v60 = vrot.slane %v3785_v54, 2  ;;  %v11999_v9 = vld [vmem:[%s12240_s7 + $0xd8] sm:$0xff]  }
 0x12b   : > { %14584 = vst [vmem:[#allocation34_spill] sm:$0xff] %v12882_v55  ;;  %v12891_v52 = vadd.f32 %v2887_v62, %v2023_v53  ;;  %v2026_v47 = vadd.f32 %v11292_v51, %v12646_v63  ;;  %v3791_v55 = vshrl.u32 %v12000_v12, 16  ;;  %v4704_v63 = vrot.slane %v12887_v35, 2 }
 0x12c   : > { %v1783_v34 = vpop.f32.mrf.mxu1  ;;  %v11361_v19 = vpop.f32.mrf.mxu0  ;;  %11524 = vmatmul.mubr.msk.bf16.gmra.mxu0 %vm817_vm2, %v4699_v21  ;;  %v12006_v21 = vld [vmem:[%s12240_s7 + $0xf8] sm:$0xff]   ;;  %v3771_v51 = vsel %vm2441_vm3, %v3761_v41, %v3770_v37  ;;  %v3800_v20 = vshrl.u32 %v12002_v15, 16  ;;  %v3809_v41 = vshrl.u32 %v12004_v2, 16 }
 0x12d   : > { %v12897_v4 = vadd.f32 %v11358_v13, %v2026_v47  ;;  %v2024_v62 = vadd.f32 %v1783_v34, %v12652_v5  ;;  %11527 = vmatprep.mubr.msk.bf16.mxu0 %vm817_vm2, %v4701_v25  ;;  %v4703_v5 = vsel %vm4654_vm5, %v4700_v11, %v4702_v56  ;;  %v3793_v25 = vrot.slane %v3791_v55, 1  ;;  %v12913_v47 = vld [vmem:[%s12240_s7 + $0xe0] sm:$0xff]  }
 0x12e   : > { %v11295_v39 = vpop.f32.mrf.mxu1  ;;  %11458 = vmatmul.mubr.msk.bf16.gmra.mxu1 %vm817_vm2, %v3753_v50  ;;  %v2903_v6 = vpop.f32.mrf.mxu0  ;;  %v3779_v50 = vor.u32 %v3778_v0, %v3775_v28  ;;  %v3796_v34 = vrot.slane %v3794_v38, 2  ;;  %v4705_v11 = vsel %vm4654_vm5, %v4702_v56, %v4704_v63  ;;  %v3812_v0 = vshll.u32 %v12004_v2, 16 }
 0x12f   : > { %v12905_v53 = vadd.f32 %v2890_v43, %v2024_v62  ;;  %v2029_v13 = vadd.f32 %v11295_v39, %v12666_v44  ;;  %11461 = vmatprep.mubr.msk.bf16.mxu1 %vm817_vm2, %v3762_v16  ;;  %v3803_v44 = vshll.u32 %v12002_v15, 16  ;;  %v3788_v39 = vor.u32 %v3787_v60, %v3784_v46  ;;  %v12926_v46 = vld [vmem:[%s12240_s7 + $0xe8] sm:$0xff]   ;;  %v12008_v60 = vld [vmem:[%s12240_s7 + $0x100] sm:$0xff]  }
 0x130   : > { %v1796_v35 = vpop.f32.mrf.mxu1  ;;  %v11362_v12 = vpop.f32.mrf.mxu0  ;;  %v3780_v15 = vsel %vm2441_vm3, %v3770_v37, %v3779_v50  ;;  %v14552_v56 = vrot.slane %v12913_v47, 2  ;;  %v3797_v2 = vor.u32 %v3796_v34, %v3793_v25  ;;  %v3814_v34 = vrot.slane %v3812_v0, 2 }
 0x131   : > { %14585 = vst [vmem:[#allocation35_spill] sm:$0xff] %v12905_v53  ;;  %v12915_v54 = vadd.f32 %v11361_v19, %v2029_v13  ;;  %v2027_v43 = vadd.f32 %v1796_v35, %v12678_v22  ;;  %v4706_v53 = vrot.slane %v11999_v9, 2  ;;  %v3818_v19 = vshrl.u32 %v12006_v21, 16 }
 0x132   : > { %v11296_v62 = vpop.f32.mrf.mxu1  ;;  %v2906_v16 = vpop.f32.mrf.mxu0  ;;  %v3802_v13 = vrot.slane %v3800_v20, 1  ;;  %v3805_v35 = vrot.slane %v3803_v44, 2  ;;  %v4710_v0 = vrot.slane %v12926_v46, 2 }
 0x133   : > { %v12919_v28 = vadd.f32 %v2903_v6, %v2027_v43  ;;  %v2030_v55 = vadd.f32 %v11296_v62, %v12685_v29  ;;  %v3821_v6 = vshll.u32 %v12006_v21, 16  ;;  %v12934_v43 = vld [vmem:[%s12240_s7 + $0xf0] sm:$0xff]   ;;  %v3789_v21 = vsel %vm2441_vm3, %v3779_v50, %v3788_v39 }
 0x134   : > { %v1799_v22 = vpop.f32.mrf.mxu1  ;;  %v11365_v38 = vpop.f32.mrf.mxu0  ;;  %11528 = vmatmul.mubr.msk.bf16.gmra.mxu0 %vm817_vm2, %v4703_v5  ;;  %v12937_v5 = vld [vmem:[%s12240_s7 + $0xf8] sm:$0xff]   ;;  %v3811_v62 = vrot.slane %v3809_v41, 1  ;;  %v3820_v44 = vrot.slane %v3818_v19, 1  ;;  %v12951_v41 = vld [vmem:[%s12240_s7 + $0x100] sm:$0xff]   ;;  %v12013_v19 = vld [vmem:[%s12240_s7 + $0x10] sm:$0xff]  }
 0x135   : > { %14586 = vst [vmem:[#allocation36_spill] sm:$0xff] %v12919_v28  ;;  %v12929_v9 = vadd.f32 %v11362_v12, %v2030_v55  ;;  %v2028_v29 = vadd.f32 %v1799_v22, %v12691_v42  ;;  %11531 = vmatprep.mubr.msk.bf16.mxu0 %vm817_vm2, %v4705_v11  ;;  %v4707_v12 = vsel %vm4654_vm5, %v4704_v63, %v4706_v53  ;;  %v12010_v55 = vld [vmem:[%s12240_s7 + $0x108] ss:$0 sps:$4 sm:$0x33]   ;;  %v3823_v50 = vrot.slane %v3821_v6, 2 }
 0x136   : > { %v11299_v37 = vpop.f32.mrf.mxu1  ;;  %11462 = vmatmul.mubr.msk.bf16.gmra.mxu1 %vm817_vm2, %v3771_v51  ;;  %v2919_v20 = vpop.f32.mrf.mxu0  ;;  %v4709_v51 = vsel %vm4654_vm5, %v4706_v53, %v14552_v56  ;;  %v3830_v63 = vshll.u32 %v12008_v60, 16  ;;  %v4712_v28 = vrot.slane %v12934_v43, 2  ;;  %v3836_v53 = vshrl.u32 %v12010_v55, 16 }
 0x137   : > { %14587 = vst [vmem:[#allocation37_spill] sm:$0xff] %v12929_v9  ;;  %v12943_v42 = vadd.f32 %v2906_v16, %v2028_v29  ;;  %v2033_v25 = vadd.f32 %v11299_v37, %v12700_v26  ;;  %11465 = vmatprep.mubr.msk.bf16.mxu1 %vm817_vm2, %v3780_v15  ;;  %v3827_v9 = vshrl.u32 %v12008_v60, 16  ;;  %v3798_v26 = vsel %vm2441_vm3, %v3788_v39, %v3797_v2 }
 0x138   : > { %v1812_v11 = vpop.f32.mrf.mxu1  ;;  %v11366_v22 = vpop.f32.mrf.mxu0  ;;  %v3839_v6 = vshll.u32 %v12010_v55, 16  ;;  %v3824_v46 = vor.u32 %v3823_v50, %v3820_v44  ;;  %v3838_v44 = vrot.slane %v3836_v53, 1 }
 0x139   : > { %14588 = vst [vmem:[#allocation38_spill] sm:$0xff] %v12943_v42  ;;  %v12953_v16 = vadd.f32 %v11365_v38, %v2033_v25  ;;  %v2031_v29 = vadd.f32 %v1812_v11, %v12708_v61  ;;  %v3806_v42 = vor.u32 %v3805_v35, %v3802_v13  ;;  %v3815_v25 = vor.u32 %v3814_v34, %v3811_v62 }
 0x13a   : > { %v11300_v15 = vpop.f32.mrf.mxu1  ;;  %v2922_v37 = vpop.f32.mrf.mxu0  ;;  %v4714_v61 = vrot.slane %v12937_v5, 2  ;;  %v3829_v56 = vrot.slane %v3827_v9, 1  ;;  %v3832_v13 = vrot.slane %v3830_v63, 2  ;;  %v4716_v35 = vrot.slane %v12951_v41, 2  ;;  %v12015_v41 = vld [vmem:[%s12240_s7 + $0x18] sm:$0xff]  }
 0x13b   : > { %v12960_v60 = vadd.f32 %v2919_v20, %v2031_v29  ;;  %v2034_v38 = vadd.f32 %v11300_v15, %v12713_v33  ;;  %v12011_v33 = vld [vmem:[%s12240_s7 + $0x108] ss:$0 sps:$4 sm:$0x33]   ;;  %v5540_v62 = vshrl.u32 %v12013_v19, 16  ;;  %v14591_v9 = vrot.slane %v12913_v47, 2 }
 0x13c   : > { %v1815_v11 = vpop.f32.mrf.mxu1  ;;  %v11369_v39 = vpop.f32.mrf.mxu0  ;;  %11532 = vmatmul.mubr.msk.bf16.gmra.mxu0 %vm817_vm2, %v4707_v12  ;;  %v3807_v12 = vsel %vm2441_vm3, %v3797_v2, %v3806_v42  ;;  %v5543_v63 = vshll.u32 %v12013_v19, 16  ;;  %v3816_v47 = vsel %vm2441_vm3, %v3806_v42, %v3815_v25  ;;  %v12985_v15 = vsel %vm2441_vm3, %v3815_v25, %v3824_v46 }
 0x13d   : > { %14589 = vst [vmem:[#allocation39_spill] sm:$0xff] %v12960_v60  ;;  %v12966_v43 = vadd.f32 %v11366_v22, %v2034_v38  ;;  %v2032_v20 = vadd.f32 %v1815_v11, %v12719_v14  ;;  %11535 = vmatprep.mubr.msk.bf16.mxu0 %vm817_vm2, %v4709_v51  ;;  %v4711_v34 = vsel %vm4654_vm5, %v14591_v9, %v4710_v0  ;;  %v3841_v22 = vrot.slane %v3839_v6, 2  ;;  %v12012_v14 = vld [vmem:[%s12240_s7 + $0x8] sm:$0xfc]   ;;  %v12016_v6 = vld [vmem:[%s12240_s7 + $0x18] sm:$0xff]  }
 0x13e   : > { %v11303_v5 = vpop.f32.mrf.mxu1  ;;  %11466 = vmatmul.mubr.msk.bf16.gmra.mxu1 %vm817_vm2, %v3789_v21  ;;  %v2935_v55 = vpop.f32.mrf.mxu0  ;;  %v4713_v21 = vsel %vm4654_vm5, %v4710_v0, %v4712_v28  ;;  %v12988_v53 = vsel %vm4654_vm5, %v4712_v28, %v4714_v61  ;;  %v3833_v19 = vor.u32 %v3832_v13, %v3829_v56  ;;  %v4718_v38 = vrot.slane %v12011_v33, 2 }
 0x13f   : > { %14590 = vst [vmem:[#allocation40_spill] sm:$0xff] %v12966_v43  ;;  %v12977_v50 = vadd.f32 %v2922_v37, %v2032_v20  ;;  %v2037_v51 = vadd.f32 %v11303_v5, %v12728_v36  ;;  %11469 = vmatprep.mubr.msk.bf16.mxu1 %vm817_vm2, %v3798_v26  ;;  %v12991_v37 = vsel %vm4654_vm5, %v4714_v61, %v4716_v35  ;;  %v12014_v36 = vld [vmem:[%s12240_s7 + $0x10] sm:$0xfc]   ;;  %v5532_v5 = vshrl.u32 %v12012_v14, 16 }
 0x140   : > { %v1828_v2 = vpop.f32.mrf.mxu1  ;;  %v11370_v29 = vpop.f32.mrf.mxu0  ;;  %v3842_v42 = vor.u32 %v3841_v22, %v3838_v44  ;;  %v5535_v25 = vshll.u32 %v12012_v14, 16  ;;  %v5542_v9 = vrot.slane %v5540_v62, 2  ;;  %v5545_v61 = vrot.slane %v5543_v63, 3  ;;  %v12017_v22 = vld [vmem:[%s12240_s7 + $0x20] sm:$0xff]  }
 0x141   : > { %14592 = vst [vmem:[#allocation41_spill] sm:$0xff] %v12977_v50  ;;  %v12995_v26 = vadd.f32 %v11369_v39, %v2037_v51  ;;  %v2035_v0 = vadd.f32 %v1828_v2, %v12736_v30  ;;  %v6646_v43 = vshrl.u32 %v12015_v41, 16  ;;  %v6638_v30 = vshrl.u32 %v12014_v36, 16 }
 0x142   : > { %v11304_v11 = vpop.f32.mrf.mxu1  ;;  %v2938_v20 = vpop.f32.mrf.mxu0  ;;  %v6641_v56 = vshll.u32 %v12014_v36, 16  ;;  %v6649_v13 = vshll.u32 %v12015_v41, 16  ;;  %v5549_v33 = vshrl.u32 %v12016_v6, 16  ;;  %v13012_v51 = vsel %vm2441_vm3, %v3833_v19, %v3842_v42 }
 0x143   : > { %v12998_v50 = vadd.f32 %v2935_v55, %v2035_v0  ;;  %v2038_v28 = vadd.f32 %v11304_v11, %v12741_v57  ;;  %v13007_v57 = vsel %vm2441_vm3, %v3824_v46, %v3833_v19  ;;  %v5552_v55 = vshll.u32 %v12016_v6, 16 }
 0x144   : > { %v1831_v60 = vpop.f32.mrf.mxu1  ;;  %v11373_v39 = vpop.f32.mrf.mxu0  ;;  %11536 = vmatmul.mubr.msk.bf16.gmra.mxu0 %vm817_vm2, %v4711_v34  ;;  %v13015_v63 = vsel %vm4654_vm5, %v4716_v35, %v4718_v38  ;;  %v13022_v2 = vor.u32 %v5545_v61, %v5542_v9  ;;  %v6640_v0 = vrot.slane %v6638_v30, 2  ;;  %v6643_v19 = vrot.slane %v6641_v56, 3  ;;  %v12020_v61 = vld [vmem:[%s12240_s7 + $0x28] sm:$0xff]  }
 0x145   : > { %v13002_v44 = vadd.f32 %v11370_v29, %v2038_v28  ;;  %v2036_v62 = vadd.f32 %v1831_v60, %v12747_v8  ;;  %11539 = vmatprep.mubr.msk.bf16.mxu0 %vm817_vm2, %v4713_v21  ;;  %v5534_v8 = vrot.slane %v5532_v5, 2  ;;  %v5537_v60 = vrot.slane %v5535_v25, 3  ;;  %v12018_v21 = vld [vmem:[%s12240_s7 + $0x20] sm:$0xff]  }
 0x146   : > { %v11307_v14 = vpop.f32.mrf.mxu1  ;;  %11470 = vmatmul.mubr.msk.bf16.gmra.mxu1 %vm817_vm2, %v3807_v12  ;;  %v2951_v34 = vpop.f32.mrf.mxu0  ;;  %v6648_v29 = vrot.slane %v6646_v43, 2  ;;  %v12019_v12 = vld [vmem:[%s12240_s7 + $0x28] sm:$0xff]   ;;  %v6651_v35 = vrot.slane %v6649_v13, 3  ;;  %v5551_v38 = vrot.slane %v5549_v33, 2  ;;  %v5554_v42 = vrot.slane %v5552_v55, 3 }
 0x147   : > { %v13018_v41 = vadd.f32 %v2938_v20, %v2036_v62  ;;  %v2041_v46 = vadd.f32 %v11307_v14, %v12755_v31  ;;  %11473 = vmatprep.mubr.msk.bf16.mxu1 %vm817_vm2, %v3816_v47  ;;  %v6655_v5 = vshrl.u32 %v12017_v22, 16  ;;  %v5538_v47 = vor.u32 %v5537_v60, %v5534_v8  ;;  %v12021_v8 = vld [vmem:[%s12240_s7 + $0x30] sm:$0xff]  }
 0x148   : > { %v1844_v36 = vpop.f32.mrf.mxu1  ;;  %v11374_v6 = vpop.f32.mrf.mxu0  ;;  %v6658_v9 = vshll.u32 %v12017_v22, 16  ;;  %v5558_v28 = vshrl.u32 %v12018_v21, 16  ;;  %v5561_v43 = vshll.u32 %v12018_v21, 16  ;;  %v6664_v56 = vshrl.u32 %v12019_v12, 16  ;;  %v12144_v22 = vld [vmem:[%s14547_s1 + $0x1c] sm:$0xf] }
 0x149   : > { %v13025_v11 = vadd.f32 %v11373_v39, %v2041_v46  ;;  %v2039_v20 = vadd.f32 %v1844_v36, %v12764_v7  ;;  %v6667_v13 = vshll.u32 %v12019_v12, 16  ;;  %v6644_v7 = vor.u32 %v6643_v19, %v6640_v0 }
 0x14a   : > { %v11308_v31 = vpop.f32.mrf.mxu1  ;;  %v2954_v25 = vpop.f32.mrf.mxu0  ;;  %v13034_v55 = vor.u32 %v6651_v35, %v6648_v29  ;;  %v13040_v14 = vsel %vm914_vm0, %v12144_v22, 0  ;;  %v5555_v21 = vor.u32 %v5554_v42, %v5551_v38  ;;  %v6657_v46 = vrot.slane %v6655_v5, 2 }
 0x14b   : > { %v13029_v62 = vadd.f32 %v2951_v34, %v2039_v20  ;;  %v2042_v30 = vadd.f32 %v11308_v31, %v12769_v59  ;;  %v12145_v59 = vld [vmem:[%s14547_s1 + $0x20] sm:$0xf]  ;;  %v6660_v36 = vrot.slane %v6658_v9, 3  ;;  %v5560_v0 = vrot.slane %v5558_v28, 2  ;;  %v12023_v20 = vld [vmem:[%s12240_s7 + $0x38] sm:$0xff]  }
 0x14c   : > { %v1847_v39 = vpop.f32.mrf.mxu1  ;;  %v11377_v33 = vpop.f32.mrf.mxu0  ;;  %11540 = vmatmul.mubr.msk.bf16.gmra.mxu0 %vm817_vm2, %v12988_v53  ;;  %v13046_v34 = vsel %vm914_vm0, %v12145_v59, 0  ;;  %v5563_v19 = vrot.slane %v5561_v43, 3  ;;  %v5567_v35 = vshrl.u32 %v12020_v61, 16  ;;  %v6669_v38 = vrot.slane %v6667_v13, 3  ;;  %v12022_v43 = vld [vmem:[%s12240_s7 + $0x30] sm:$0xff]  }
 0x14d   : > { %v13049_v53 = vadd.f32 %v11374_v6, %v2042_v30  ;;  %v2040_v60 = vadd.f32 %v1847_v39, %v12775_v10  ;;  %11543 = vmatprep.mubr.msk.bf16.mxu0 %vm817_vm2, %v12991_v37  ;;  %v6666_v37 = vrot.slane %v6664_v56, 2  ;;  %v5570_v31 = vshll.u32 %v12020_v61, 16  ;;  %v12024_v56 = vld [vmem:[%s12240_s7 + $0x38] sm:$0xff]  }
 0x14e   : > { %v11311_v29 = vpop.f32.mrf.mxu1  ;;  %11474 = vmatmul.mubr.msk.bf16.gmra.mxu1 %vm817_vm2, %v12985_v15  ;;  %v2967_v12 = vpop.f32.mrf.mxu0  ;;  %v5547_v15 = vsel %vm5530_vm6, %v5538_v47, %v13022_v2  ;;  %v6673_v9 = vshrl.u32 %v12021_v8, 16  ;;  %v6676_v28 = vshll.u32 %v12021_v8, 16  ;;  %v6661_v47 = vor.u32 %v6660_v36, %v6657_v46 }
 0x14f   : > { %v13057_v6 = vadd.f32 %v2954_v25, %v2040_v60  ;;  %v2045_v10 = vadd.f32 %v11311_v29, %v12783_v18  ;;  %11477 = vmatprep.mubr.msk.bf16.mxu1 %vm817_vm2, %v13007_v57  ;;  %v6653_v18 = vsel %vm5530_vm6, %v6644_v7, %v13034_v55  ;;  %v13072_v57 = vsel %vm5530_vm6, %v13022_v2, %v5555_v21 }
 0x150   : > { %v1860_v42 = vpop.f32.mrf.mxu1  ;;  %v11378_v5 = vpop.f32.mrf.mxu0  ;;  %v13075_v61 = vor.u32 %v5563_v19, %v5560_v0  ;;  %v6682_v22 = vshrl.u32 %v12023_v20, 16  ;;  %v6685_v59 = vshll.u32 %v12023_v20, 16  ;;  %v13080_v8 = vor.u32 %v6669_v38, %v6666_v37  ;;  %v12025_v0 = vld [vmem:[%s12240_s7 + $0x40] sm:$0xff]  }
 0x151   : > { %v13065_v30 = vadd.f32 %v11377_v33, %v2045_v10  ;;  %v2043_v25 = vadd.f32 %v1860_v42, %v12792_v58  ;;  %v5569_v7 = vrot.slane %v5567_v35, 2  ;;  %v5572_v2 = vrot.slane %v5570_v31, 3  ;;  %v12026_v31 = vld [vmem:[%s12240_s7 + $0x40] sm:$0xff]  }
 0x152   : > { %v11312_v13 = vpop.f32.mrf.mxu1  ;;  %v2970_v39 = vpop.f32.mrf.mxu0  ;;  %v6675_v10 = vrot.slane %v6673_v9, 2  ;;  %v6678_v46 = vrot.slane %v6676_v28, 3  ;;  %v5576_v36 = vshrl.u32 %v12022_v43, 16  ;;  %v5585_v35 = vshrl.u32 %v12024_v56, 16 }
 0x153   : > { %v13077_v33 = vadd.f32 %v2967_v12, %v2043_v25  ;;  %v2046_v58 = vadd.f32 %v11312_v13, %v12798_v45  ;;  %v5579_v45 = vshll.u32 %v12022_v43, 16  ;;  %v6662_v37 = vsel %vm5530_vm6, %v13034_v55, %v6661_v47  ;;  %v12027_v43 = vld [vmem:[%s12240_s7 + $0x48] sm:$0xff]  }
 0x154   : > { %v1863_v60 = vpop.f32.mrf.mxu1  ;;  %v11381_v29 = vpop.f32.mrf.mxu0  ;;  %11544 = vmatmul.mubr.msk.bf16.gmra.mxu0 %vm817_vm2, %v13015_v63  ;;  %v6684_v38 = vrot.slane %v6682_v22, 2  ;;  %v6687_v42 = vrot.slane %v6685_v59, 3  ;;  %v5565_v28 = vsel %vm5530_vm6, %v5555_v21, %v13075_v61  ;;  %v6691_v13 = vshrl.u32 %v12025_v0, 16  ;;  %v12028_v22 = vld [vmem:[%s12240_s7 + $0x48] sm:$0xff]   ;;  %v12029_v21 = vld [vmem:[%s12240_s7 + $0x50] sm:$0xff]  }
 0x155   : > { %v13085_v19 = vadd.f32 %v11378_v5, %v2046_v58  ;;  %v2044_v12 = vadd.f32 %v1863_v60, %v12804_v17  ;;  %11615 = vmatprep.mubr.msk.bf16.mxu0 %vm817_vm2, %v6653_v18  ;;  %v5588_v5 = vshll.u32 %v12024_v56, 16  ;;  %v13103_v18 = vor.u32 %v5572_v2, %v5569_v7  ;;  %v13113_v2 = vld [vmem:[%s12240_s7 + $0x50] sm:$0xff]  }
 0x156   : > { %v11315_v20 = vpop.f32.mrf.mxu1  ;;  %11478 = vmatmul.mubr.msk.bf16.gmra.mxu1 %vm817_vm2, %v13012_v51  ;;  %v2983_v63 = vpop.f32.mrf.mxu0  ;;  %v6671_v51 = vsel %vm5530_vm6, %v6661_v47, %v13080_v8  ;;  %v5578_v56 = vrot.slane %v5576_v36, 2  ;;  %v6679_v59 = vor.u32 %v6678_v46, %v6675_v10  ;;  %v5581_v58 = vrot.slane %v5579_v45, 3 }
 0x157   : > { %v13094_v9 = vadd.f32 %v2970_v39, %v2044_v12  ;;  %v2049_v17 = vadd.f32 %v11315_v20, %v12813_v27  ;;  %11549 = vmatprep.mubr.msk.bf16.mxu1 %vm817_vm2, %v5547_v15  ;;  %v6694_v39 = vshll.u32 %v12025_v0, 16  ;;  %v13110_v47 = vor.u32 %v6687_v42, %v6684_v38 }
 0x158   : > { %v1876_v55 = vpop.f32.mrf.mxu1  ;;  %v11382_v25 = vpop.f32.mrf.mxu0  ;;  %v5587_v20 = vrot.slane %v5585_v35, 2  ;;  %v5594_v7 = vshrl.u32 %v12026_v31, 16  ;;  %v6693_v10 = vrot.slane %v6691_v13, 2  ;;  %v6703_v45 = vshll.u32 %v12027_v43, 16 }
 0x159   : > { %14593 = vst [vmem:[#allocation42_spill] sm:$0xff] %v13094_v9  ;;  %v13106_v27 = vadd.f32 %v11381_v29, %v2049_v17  ;;  %v2047_v15 = vadd.f32 %v1876_v55, %v12822_v1  ;;  %v5590_v9 = vrot.slane %v5588_v5, 3  ;;  %v5597_v29 = vshll.u32 %v12026_v31, 16 }
 0x15a   : > { %v11316_v60 = vpop.f32.mrf.mxu1  ;;  %v2986_v12 = vpop.f32.mrf.mxu0  ;;  %v6700_v17 = vshrl.u32 %v12027_v43, 16  ;;  %v6696_v46 = vrot.slane %v6694_v39, 3  ;;  %v5603_v38 = vshrl.u32 %v12028_v22, 16  ;;  %v5582_v43 = vor.u32 %v5581_v58, %v5578_v56 }
 0x15b   : > { %14594 = vst [vmem:[#allocation43_spill] sm:$0xff] %v13106_v27  ;;  %v13115_v36 = vadd.f32 %v2983_v63, %v2047_v15  ;;  %v2050_v0 = vadd.f32 %v11316_v60, %v12828_v49  ;;  %v5606_v63 = vshll.u32 %v12028_v22, 16  ;;  %v6709_v49 = vshrl.u32 %v12029_v21, 16  ;;  %v12031_v15 = vld [vmem:[%s12240_s7 + $0x58] sm:$0xff]  }
 0x15c   : > { %v1879_v27 = vpop.f32.mrf.mxu1  ;;  %v11385_v1 = vpop.f32.mrf.mxu0  ;;  %11616 = vmatmul.mubr.msk.bf16.vlgmr.msra.gmra.mxu0 %vm817_vm2, %v6662_v37  ;;  %v6680_v37 = vsel %vm5530_vm6, %v13080_v8, %v6679_v59  ;;  %v6712_v55 = vshll.u32 %v12029_v21, 16  ;;  %v6689_v8 = vsel %vm5530_vm6, %v6679_v59, %v13110_v47  ;;  %v5599_v56 = vrot.slane %v5597_v29, 3 }
 0x15d   : > { %v13119_v42 = vadd.f32 %v11382_v25, %v2050_v0  ;;  %v2048_v35 = vadd.f32 %v1879_v27, %v12838_v23  ;;  %11746 = vmatpush3.bf16.msra.mxu0 %v13046_v34  ;;  %11619 = vmatprep.mubr.msk.bf16.mxu0 %vm817_vm2, %v6671_v51  ;;  %v5612_v25 = vshrl.u32 %v13113_v2, 16  ;;  %v13134_v51 = vor.u32 %v5590_v9, %v5587_v20  ;;  %v12033_v0 = vld [vmem:[%s12240_s7 + $0x60] sm:$0xff]  }
 0x15e   : > { %v11319_v5 = vpop.f32.mrf.mxu1  ;;  %11550 = vmatmul.mubr.msk.bf16.vlgmr.msra.gmra.mxu1 %vm817_vm2, %v13072_v57  ;;  %v2999_v31 = vpop.f32.mrf.mxu0  ;;  %v5596_v57 = vrot.slane %v5594_v7, 2  ;;  %v6702_v22 = vrot.slane %v6700_v17, 2  ;;  %v6705_v27 = vrot.slane %v6703_v45, 3  ;;  %v13144_v9 = vrot.slane %v5606_v63, 3  ;;  %v13158_v45 = vld [vmem:[%s12240_s7 + $0x60] sm:$0xff]  }
 0x15f   : > { %v13129_v23 = vadd.f32 %v2986_v12, %v2048_v35  ;;  %v2053_v34 = vadd.f32 %v11319_v5, %v12607_v24  ;;  %11680 = vmatpush3.bf16.msra.mxu1 %v13040_v14  ;;  %11553 = vmatprep.mubr.msk.bf16.mxu1 %vm817_vm2, %v5565_v28  ;;  %v13142_v14 = vrot.slane %v5603_v38, 2  ;;  %v12032_v28 = vld [vmem:[%s12240_s7 + $0x58] sm:$0xff]   ;;  %v6697_v12 = vor.u32 %v6696_v46, %v6693_v10 }
 0x160   : > { %v1892_v13 = vpop.f32.mrf.mxu1  ;;  %v11386_v39 = vpop.f32.mrf.mxu0  ;;  %v6711_v20 = vrot.slane %v6709_v49, 2  ;;  %v6714_v59 = vrot.slane %v6712_v55, 3  ;;  %v13147_v7 = vrot.slane %v5612_v25, 2  ;;  %v5583_v10 = vsel %vm5530_vm6, %v13103_v18, %v5582_v43 }
 0x161   : > { %v13139_v58 = vadd.f32 %v11385_v1, %v2053_v34  ;;  %v2051_v24 = vadd.f32 %v1892_v13, %v12613_v32  ;;  %v5574_v32 = vsel %vm5530_vm6, %v13075_v61, %v13103_v18  ;;  %v5615_v1 = vshll.u32 %v13113_v2, 16  ;;  %v14596_v61 = vld [vmem:[#allocation3_spill] sm:$0xff]  ;;  %v12035_v13 = vld [vmem:[%s12240_s7 + $0x68] sm:$0xff]  }
 0x162   : > { %v11320_v21 = vpop.f32.mrf.mxu1  ;;  %v3002_v60 = vpop.f32.mrf.mxu0  ;;  %v5592_v46 = vsel %vm5530_vm6, %v5582_v43, %v13134_v51  ;;  %v6721_v63 = vshll.u32 %v12031_v15, 16  ;;  %v5621_v2 = vshrl.u32 %v12032_v28, 16  ;;  %v6698_v18 = vsel %vm5530_vm6, %v13110_v47, %v6697_v12 }
 0x163   : > { %v13150_v29 = vadd.f32 %v2999_v31, %v2051_v24  ;;  %v2054_v17 = vadd.f32 %v11320_v21, %v12619_v40  ;;  %v6718_v40 = vshrl.u32 %v12031_v15, 16  ;;  %v5624_v31 = vshll.u32 %v12032_v28, 16  ;;  %v14598_v15 = vld [vmem:[#allocation4_spill] sm:$0xff] }
 0x164   : > { %v1895_v38 = vpop.f32.mrf.mxu1  ;;  %v11389_v35 = vpop.f32.mrf.mxu0  ;;  %11620 = vmatmul.mubr.msk.bf16.gmra.mxu0 %vm817_vm2, %v6680_v37  ;;  %v13172_v25 = vor.u32 %v5599_v56, %v5596_v57  ;;  %v6706_v43 = vor.u32 %v6705_v27, %v6702_v22  ;;  %v6727_v34 = vshrl.u32 %v12033_v0, 16  ;;  %v5630_v28 = vshrl.u32 %v13158_v45, 16  ;;  %v12036_v56 = vld [vmem:[%s12240_s7 + $0x68] sm:$0xff]   ;;  %v14600_v27 = vld [vmem:[#allocation5_spill] sm:$0xff] }
 0x165   : > { %v13165_v49 = vadd.f32 %v11386_v39, %v2054_v17  ;;  %v2052_v5 = vadd.f32 %v1895_v38, %v14596_v61  ;;  %11623 = vmatprep.mubr.msk.bf16.mxu0 %vm817_vm2, %v6689_v8  ;;  %v6730_v8 = vshll.u32 %v12033_v0, 16  ;;  %v5617_v47 = vrot.slane %v5615_v1, 3 }
 0x166   : > { %v11323_v55 = vpop.f32.mrf.mxu1  ;;  %11554 = vmatmul.mubr.msk.bf16.gmra.mxu1 %vm817_vm2, %v5574_v32  ;;  %v3015_v37 = vpop.f32.mrf.mxu0  ;;  %v6715_v32 = vor.u32 %v6714_v59, %v6711_v20  ;;  %v6720_v38 = vrot.slane %v6718_v40, 2  ;;  %v6723_v57 = vrot.slane %v6721_v63, 3  ;;  %v13184_v61 = vrot.slane %v5621_v2, 2  ;;  %v12037_v59 = vld [vmem:[%s12240_s7 + $0x70] sm:$0xff]  }
 0x167   : > { %14595 = vst [vmem:[#allocation44_spill] sm:$0xff] %v13165_v49  ;;  %v13175_v39 = vadd.f32 %v3002_v60, %v2052_v5  ;;  %v2057_v24 = vadd.f32 %v11323_v55, %v14598_v15  ;;  %11557 = vmatprep.mubr.msk.bf16.mxu1 %vm817_vm2, %v5583_v10  ;;  %v13186_v5 = vrot.slane %v5624_v31, 3  ;;  %v6707_v55 = vsel %vm5530_vm6, %v6697_v12, %v6706_v43 }
 0x168   : > { %v1908_v21 = vpop.f32.mrf.mxu1  ;;  %v11390_v17 = vpop.f32.mrf.mxu0  ;;  %v6729_v15 = vrot.slane %v6727_v34, 2  ;;  %v6736_v20 = vshrl.u32 %v12035_v13, 16  ;;  %v6732_v63 = vrot.slane %v6730_v8, 3  ;;  %v5601_v12 = vsel %vm5530_vm6, %v13134_v51, %v13172_v25  ;;  %v12038_v8 = vld [vmem:[%s12240_s7 + $0x70] sm:$0xff]  }
 0x169   : > { %14597 = vst [vmem:[#allocation3_spill] sm:$0xff] %v13175_v39  ;;  %v13181_v22 = vadd.f32 %v11389_v35, %v2057_v24  ;;  %v2055_v60 = vadd.f32 %v1908_v21, %v14600_v27  ;;  %v5633_v39 = vshll.u32 %v13158_v45, 16  ;;  %v14602_v35 = vld [vmem:[#allocation6_spill] sm:$0xff]  ;;  %v5632_v24 = vrot.slane %v5630_v28, 2  ;;  %v14604_v27 = vld [vmem:[#allocation7_spill] sm:$0xff] }
 0x16a   : > { %v11324_v10 = vpop.f32.mrf.mxu1  ;;  %v3018_v0 = vpop.f32.mrf.mxu0  ;;  %v6739_v31 = vshll.u32 %v12035_v13, 16  ;;  %v5639_v34 = vshrl.u32 %v12036_v56, 16  ;;  %v6724_v51 = vor.u32 %v6723_v57, %v6720_v38  ;;  %v12040_v38 = vld [vmem:[%s12240_s7 + $0x78] sm:$0xff]  }
 0x16b   : > { %14599 = vst [vmem:[#allocation4_spill] sm:$0xff] %v13181_v22  ;;  %v13191_v1 = vadd.f32 %v3015_v37, %v2055_v60  ;;  %v2058_v40 = vadd.f32 %v11324_v10, %v14602_v35  ;;  %v5642_v37 = vshll.u32 %v12036_v56, 16  ;;  %v5635_v13 = vrot.slane %v5633_v39, 3  ;;  %v14606_v35 = vld [vmem:[#allocation8_spill] sm:$0xff] }
 0x16c   : > { %v1911_v2 = vpop.f32.mrf.mxu1  ;;  %v11393_v21 = vpop.f32.mrf.mxu0  ;;  %11624 = vmatmul.mubr.msk.bf16.gmra.mxu0 %vm817_vm2, %v6698_v18  ;;  %v5609_v18 = vor.u32 %v13144_v9, %v13142_v14  ;;  %v6745_v10 = vshrl.u32 %v12037_v59, 16  ;;  %v6716_v56 = vsel %vm5530_vm6, %v6706_v43, %v6715_v32  ;;  %v6741_v14 = vrot.slane %v6739_v31, 3  ;;  %v12041_v31 = vld [vmem:[%s12240_s7 + $0x80] sm:$0xff]  }
 0x16d   : > { %14601 = vst [vmem:[#allocation5_spill] sm:$0xff] %v13191_v1  ;;  %v13198_v45 = vadd.f32 %v11390_v17, %v2058_v40  ;;  %v2056_v22 = vadd.f32 %v1911_v2, %v14604_v27  ;;  %11627 = vmatprep.mubr.msk.bf16.mxu0 %vm817_vm2, %v6707_v55  ;;  %v6738_v55 = vrot.slane %v6736_v20, 2  ;;  %v12039_v2 = vld [vmem:[%s12240_s7 + $0x78] sm:$0xff]   ;;  %v13213_v9 = vrot.slane %v5639_v34, 2 }
 0x16e   : > { %v11327_v28 = vpop.f32.mrf.mxu1  ;;  %11558 = vmatmul.mubr.msk.bf16.gmra.mxu1 %vm817_vm2, %v5592_v46  ;;  %v3031_v60 = vpop.f32.mrf.mxu0  ;;  %v6748_v39 = vshll.u32 %v12037_v59, 16  ;;  %v14609_v59 = vld [vmem:[#allocation10_spill] sm:$0xff]  ;;  %v6757_v1 = vshll.u32 %v12039_v2, 16 }
 0x16f   : > { %14603 = vst [vmem:[#allocation6_spill] sm:$0xff] %v13198_v45  ;;  %v13206_v17 = vadd.f32 %v3018_v0, %v2056_v22  ;;  %v2061_v40 = vadd.f32 %v11327_v28, %v14606_v35  ;;  %11561 = vmatprep.mubr.msk.bf16.mxu1 %vm817_vm2, %v5601_v12  ;;  %v5618_v45 = vor.u32 %v5617_v47, %v13147_v7  ;;  %v14608_v22 = vld [vmem:[#allocation9_spill] sm:$0xff]  ;;  %v13219_v28 = vrot.slane %v5642_v37, 3 }
 0x170   : > { %v1924_v27 = vpop.f32.mrf.mxu1  ;;  %v11394_v46 = vpop.f32.mrf.mxu0  ;;  %v5648_v12 = vshrl.u32 %v12038_v8, 16  ;;  %v5610_v35 = vsel %vm5530_vm6, %v13172_v25, %v5609_v18  ;;  %v6733_v7 = vor.u32 %v6732_v63, %v6729_v15  ;;  %v6747_v47 = vrot.slane %v6745_v10, 2 }
 0x171   : > { %14605 = vst [vmem:[#allocation7_spill] sm:$0xff] %v13206_v17  ;;  %v13216_v57 = vadd.f32 %v11393_v21, %v2061_v40  ;;  %v2059_v0 = vadd.f32 %v1924_v27, %v14608_v22  ;;  %v6725_v17 = vsel %vm5530_vm6, %v6715_v32, %v6724_v51  ;;  %v5651_v40 = vshll.u32 %v12038_v8, 16  ;;  %v14610_v32 = vld [vmem:[#allocation11_spill] sm:$0xff] }
 0x172   : > { %v11328_v43 = vpop.f32.mrf.mxu1  ;;  %v3034_v20 = vpop.f32.mrf.mxu0  ;;  %v5619_v22 = vsel %vm5530_vm6, %v5609_v18, %v5618_v45  ;;  %v5657_v25 = vshrl.u32 %v12040_v38, 16  ;;  %v6750_v63 = vrot.slane %v6748_v39, 3  ;;  %v6742_v18 = vor.u32 %v6741_v14, %v6738_v55  ;;  %v14614_v55 = vld [vmem:[#allocation13_spill] sm:$0xff] }
 0x173   : > { %14607 = vst [vmem:[#allocation8_spill] sm:$0xff] %v13216_v57  ;;  %v13225_v34 = vadd.f32 %v3031_v60, %v2059_v0  ;;  %v2062_v21 = vadd.f32 %v11328_v43, %v14609_v59  ;;  %v6754_v57 = vshrl.u32 %v12039_v2, 16  ;;  %v5660_v60 = vshll.u32 %v12040_v38, 16  ;;  %v14612_v59 = vld [vmem:[#allocation12_spill] sm:$0xff] }
 0x174   : > { %v1927_v27 = vpop.f32.mrf.mxu1  ;;  %v11397_v37 = vpop.f32.mrf.mxu0  ;;  %11628 = vmatmul.mubr.msk.bf16.gmra.mxu0 %vm817_vm2, %v6716_v56  ;;  %v5627_v56 = vor.u32 %v13186_v5, %v13184_v61  ;;  %v13237_v0 = vor.u32 %v5635_v13, %v5632_v24  ;;  %v5650_v2 = vrot.slane %v5648_v12, 2  ;;  %v5653_v39 = vrot.slane %v5651_v40, 3  ;;  %v12043_v38 = vld [vmem:[%s12240_s7 + $0x88] sm:$0xff]  }
 0x175   : > { %v13230_v49 = vadd.f32 %v11394_v46, %v2062_v21  ;;  %v2060_v15 = vadd.f32 %v1927_v27, %v14610_v32  ;;  %11631 = vmatprep.mubr.msk.bf16.mxu0 %vm817_vm2, %v6725_v17  ;;  %v12042_v46 = vld [vmem:[%s12240_s7 + $0x80] sm:$0xff]   ;;  %v6734_v17 = vsel %vm5530_vm6, %v6724_v51, %v6733_v7  ;;  %v6756_v32 = vrot.slane %v6754_v57, 2 }
 0x176   : > { %v11331_v8 = vpop.f32.mrf.mxu1  ;;  %11562 = vmatmul.mubr.msk.bf16.gmra.mxu1 %vm817_vm2, %v5610_v35  ;;  %v3047_v10 = vpop.f32.mrf.mxu0  ;;  %v6759_v61 = vrot.slane %v6757_v1, 3  ;;  %v13246_v5 = vrot.slane %v5657_v25, 2  ;;  %v6763_v24 = vshrl.u32 %v12041_v31, 16  ;;  %v13251_v12 = vrot.slane %v5660_v60, 3  ;;  %v12044_v1 = vld [vmem:[%s12240_s7 + $0x88] sm:$0xff]  }
 0x177   : > { %v13240_v43 = vadd.f32 %v3034_v20, %v2060_v15  ;;  %v2065_v21 = vadd.f32 %v11331_v8, %v14612_v59  ;;  %11565 = vmatprep.mubr.msk.bf16.mxu1 %vm817_vm2, %v5619_v22  ;;  %v6766_v20 = vshll.u32 %v12041_v31, 16  ;;  %v5628_v40 = vsel %vm5530_vm6, %v5618_v45, %v5627_v56  ;;  %v14615_v59 = vld [vmem:[#allocation14_spill] sm:$0xff]  ;;  %v12045_v45 = vld [vmem:[%s12240_s7 + $0x90] sm:$0xff]  }
 0x178   : > { %v1940_v35 = vpop.f32.mrf.mxu1  ;;  %v11398_v27 = vpop.f32.mrf.mxu0  ;;  %v6743_v15 = vsel %vm5530_vm6, %v6733_v7, %v6742_v18  ;;  %v6751_v8 = vor.u32 %v6750_v63, %v6747_v47  ;;  %v5666_v57 = vshrl.u32 %v12042_v46, 16  ;;  %v5637_v31 = vsel %vm5530_vm6, %v5627_v56, %v13237_v0  ;;  %v14617_v7 = vld [vmem:[#allocation15_spill] sm:$0xff] }
 0x179   : > { %14611 = vst [vmem:[#allocation9_spill] sm:$0xff] %v13240_v43  ;;  %v13248_v13 = vadd.f32 %v11397_v37, %v2065_v21  ;;  %v2063_v14 = vadd.f32 %v1940_v35, %v14614_v55  ;;  %v5669_v21 = vshll.u32 %v12042_v46, 16  ;;  %v6765_v55 = vrot.slane %v6763_v24, 2 }
 0x17a   : > { %v11332_v22 = vpop.f32.mrf.mxu1  ;;  %v3050_v51 = vpop.f32.mrf.mxu0  ;;  %v6768_v63 = vrot.slane %v6766_v20, 3  ;;  %v6760_v56 = vor.u32 %v6759_v61, %v6756_v32  ;;  %v5668_v24 = vrot.slane %v5666_v57, 2  ;;  %v6752_v20 = vsel %vm5530_vm6, %v6742_v18, %v6751_v8  ;;  %v12047_v32 = vld [vmem:[%s12240_s7 + $0x98] sm:$0xff]  }
 0x17b   : > { %14613 = vst [vmem:[#allocation10_spill] sm:$0xff] %v13248_v13  ;;  %v13256_v25 = vadd.f32 %v3047_v10, %v2063_v14  ;;  %v2066_v37 = vadd.f32 %v11332_v22, %v14615_v59  ;;  %v6772_v13 = vshrl.u32 %v12043_v38, 16  ;;  %v6775_v10 = vshll.u32 %v12043_v38, 16  ;;  %v14619_v59 = vld [vmem:[#allocation16_spill] sm:$0xff] }
 0x17c   : > { %v1943_v35 = vpop.f32.mrf.mxu1  ;;  %v11401_v60 = vpop.f32.mrf.mxu0  ;;  %11632 = vmatmul.mubr.msk.bf16.gmra.mxu0 %vm817_vm2, %v6734_v17  ;;  %v5645_v17 = vor.u32 %v13219_v28, %v13213_v9  ;;  %v5675_v22 = vshrl.u32 %v12044_v1, 16  ;;  %v5671_v38 = vrot.slane %v5669_v21, 3  ;;  %v5678_v9 = vshll.u32 %v12044_v1, 16 }
 0x17d   : > { %v13263_v43 = vadd.f32 %v11398_v27, %v2066_v37  ;;  %v2064_v47 = vadd.f32 %v1943_v35, %v14617_v7  ;;  %11635 = vmatprep.mubr.msk.bf16.mxu0 %vm817_vm2, %v6743_v15  ;;  %v12046_v15 = vld [vmem:[%s12240_s7 + $0x90] sm:$0xff]   ;;  %v5654_v7 = vor.u32 %v5653_v39, %v5650_v2  ;;  %v6781_v28 = vshrl.u32 %v12045_v45, 16  ;;  %v13286_v2 = vld [vmem:[%s12240_s7 + $0x98] sm:$0xff]  }
 0x17e   : > { %v11335_v46 = vpop.f32.mrf.mxu1  ;;  %11566 = vmatmul.mubr.msk.bf16.gmra.mxu1 %vm817_vm2, %v5628_v40  ;;  %v3063_v14 = vpop.f32.mrf.mxu0  ;;  %v5646_v18 = vsel %vm5530_vm6, %v13237_v0, %v5645_v17  ;;  %v6761_v21 = vsel %vm5530_vm6, %v6751_v8, %v6760_v56  ;;  %v5663_v8 = vor.u32 %v13251_v12, %v13246_v5 }
 0x17f   : > { %14616 = vst [vmem:[#allocation11_spill] sm:$0xff] %v13263_v43  ;;  %v13270_v27 = vadd.f32 %v3050_v51, %v2064_v47  ;;  %v2069_v37 = vadd.f32 %v11335_v46, %v14619_v59  ;;  %11569 = vmatprep.mubr.msk.bf16.mxu1 %vm817_vm2, %v5637_v31  ;;  %v6774_v43 = vrot.slane %v6772_v13, 2  ;;  %v14621_v51 = vld [vmem:[#allocation17_spill] sm:$0xff]  ;;  %v6777_v47 = vrot.slane %v6775_v10, 3  ;;  %v14623_v13 = vld [vmem:[#allocation18_spill] sm:$0xff] }
 0x180   : > { %v1956_v35 = vpop.f32.mrf.mxu1  ;;  %v11402_v40 = vpop.f32.mrf.mxu0  ;;  %v6784_v46 = vshll.u32 %v12045_v45, 16  ;;  %v5655_v0 = vsel %vm5530_vm6, %v5645_v17, %v5654_v7 }
 0x181   : > { %14618 = vst [vmem:[#allocation12_spill] sm:$0xff] %v13270_v27  ;;  %v13277_v61 = vadd.f32 %v11401_v60, %v2069_v37  ;;  %v2067_v57 = vadd.f32 %v1956_v35, %v14621_v51  ;;  %v13283_v27 = vrot.slane %v5675_v22, 2  ;;  %v6769_v60 = vor.u32 %v6768_v63, %v6765_v55  ;;  %v13292_v35 = vld [vmem:[%s12240_s7 + $0xa0] sm:$0xff]  }
 0x182   : > { %v11336_v31 = vpop.f32.mrf.mxu1  ;;  %v3066_v59 = vpop.f32.mrf.mxu0  ;;  %v5684_v37 = vshrl.u32 %v12046_v15, 16  ;;  %v5687_v22 = vshll.u32 %v12046_v15, 16  ;;  %v6790_v51 = vshrl.u32 %v12047_v32, 16  ;;  %v5680_v55 = vrot.slane %v5678_v9, 3  ;;  %v14627_v15 = vld [vmem:[#allocation20_spill] sm:$0xff] }
 0x183   : > { %14620 = vst [vmem:[#allocation13_spill] sm:$0xff] %v13277_v61  ;;  %v13288_v39 = vadd.f32 %v3063_v14, %v2067_v57  ;;  %v2070_v1 = vadd.f32 %v11336_v31, %v14623_v13  ;;  %v14625_v14 = vld [vmem:[#allocation19_spill] sm:$0xff]  ;;  %v6793_v63 = vshll.u32 %v12047_v32, 16  ;;  %v13303_v13 = vor.u32 %v5671_v38, %v5668_v24 }
 0x184   : > { %v1959_v45 = vpop.f32.mrf.mxu1  ;;  %v11405_v10 = vpop.f32.mrf.mxu0  ;;  %11636 = vmatmul.mubr.msk.bf16.gmra.mxu0 %vm817_vm2, %v6752_v20  ;;  %v6778_v17 = vor.u32 %v6777_v47, %v6774_v43  ;;  %v6786_v5 = vrot.slane %v6784_v46, 3  ;;  %v5693_v9 = vshrl.u32 %v13286_v2, 16  ;;  %v12050_v32 = vld [vmem:[%s12240_s7 + $0xa0] sm:$0xff]   ;;  %v5686_v24 = vrot.slane %v5684_v37, 2  ;;  %v14629_v46 = vld [vmem:[#allocation21_spill] sm:$0xff] }
 0x185   : > { %14622 = vst [vmem:[#allocation14_spill] sm:$0xff] %v13288_v39  ;;  %v13298_v61 = vadd.f32 %v11402_v40, %v2070_v1  ;;  %v2068_v57 = vadd.f32 %v1959_v45, %v14625_v14  ;;  %11639 = vmatprep.mubr.msk.bf16.mxu0 %vm817_vm2, %v6761_v21  ;;  %v6783_v39 = vrot.slane %v6781_v28, 2  ;;  %v6770_v21 = vsel %vm5530_vm6, %v6760_v56, %v6769_v60  ;;  %v12051_v14 = vld [vmem:[%s12240_s7 + $0xa8] sm:$0xff]  }
 0x186   : > { %v11339_v31 = vpop.f32.mrf.mxu1  ;;  %11570 = vmatmul.mubr.msk.bf16.gmra.mxu1 %vm817_vm2, %v5646_v18  ;;  %v3079_v20 = vpop.f32.mrf.mxu0  ;;  %v5689_v38 = vrot.slane %v5687_v22, 3  ;;  %v6792_v43 = vrot.slane %v6790_v51, 2  ;;  %v6799_v28 = vshrl.u32 %v13292_v35, 16  ;;  %v6795_v45 = vrot.slane %v6793_v63, 3  ;;  %v13322_v22 = vld [vmem:[%s12240_s7 + $0xa8] sm:$0xff]  }
 0x187   : > { %14624 = vst [vmem:[#allocation15_spill] sm:$0xff] %v13298_v61  ;;  %v13305_v12 = vadd.f32 %v3066_v59, %v2068_v57  ;;  %v2073_v40 = vadd.f32 %v11339_v31, %v14627_v15  ;;  %11573 = vmatprep.mubr.msk.bf16.mxu1 %vm817_vm2, %v5655_v0  ;;  %v5696_v0 = vshll.u32 %v13286_v2, 16  ;;  %v5664_v31 = vsel %vm5530_vm6, %v5654_v7, %v5663_v8 }
 0x188   : > { %v1972_v1 = vpop.f32.mrf.mxu1  ;;  %v11406_v18 = vpop.f32.mrf.mxu0  ;;  %v6779_v15 = vsel %vm5530_vm6, %v6769_v60, %v6778_v17  ;;  %v6802_v37 = vshll.u32 %v13292_v35, 16  ;;  %v5702_v63 = vshrl.u32 %v12050_v32, 16  ;;  %v5673_v7 = vsel %vm5530_vm6, %v5663_v8, %v13303_v13  ;;  %v14633_v35 = vld [vmem:[#allocation23_spill] sm:$0xff] }
 0x189   : > { %14626 = vst [vmem:[#allocation16_spill] sm:$0xff] %v13305_v12  ;;  %v13313_v47 = vadd.f32 %v11405_v10, %v2073_v40  ;;  %v2071_v59 = vadd.f32 %v1972_v1, %v14629_v46  ;;  %v6787_v12 = vor.u32 %v6786_v5, %v6783_v39  ;;  %v14631_v10 = vld [vmem:[#allocation22_spill] sm:$0xff]  ;;  %v5695_v1 = vrot.slane %v5693_v9, 2 }
 0x18a   : > { %v11340_v56 = vpop.f32.mrf.mxu1  ;;  %v3082_v57 = vpop.f32.mrf.mxu0  ;;  %v5705_v60 = vshll.u32 %v12050_v32, 16  ;;  %v6804_v8 = vrot.slane %v6802_v37, 3  ;;  %v5711_v32 = vshrl.u32 %v13322_v22, 16  ;;  %v14637_v37 = vld [vmem:[#allocation25_spill] sm:$0xff] }
 0x18b   : > { %14628 = vst [vmem:[#allocation17_spill] sm:$0xff] %v13313_v47  ;;  %v13324_v51 = vadd.f32 %v3079_v20, %v2071_v59  ;;  %v2074_v40 = vadd.f32 %v11340_v56, %v14631_v10  ;;  %v6801_v47 = vrot.slane %v6799_v28, 2  ;;  %v6808_v20 = vshrl.u32 %v12051_v14, 16  ;;  %v14635_v28 = vld [vmem:[#allocation24_spill] sm:$0xff] }
 0x18c   : > { %v1975_v46 = vpop.f32.mrf.mxu1  ;;  %v11409_v2 = vpop.f32.mrf.mxu0  ;;  %11640 = vmatmul.mubr.msk.bf16.gmra.mxu0 %vm817_vm2, %v6770_v21  ;;  %v6811_v59 = vshll.u32 %v12051_v14, 16  ;;  %v5681_v21 = vor.u32 %v5680_v55, %v13283_v27  ;;  %v6796_v10 = vor.u32 %v6795_v45, %v6792_v43  ;;  %v6788_v14 = vsel %vm5530_vm6, %v6778_v17, %v6787_v12  ;;  %v12054_v45 = vld [vmem:[%s12240_s7 + $0xb0] sm:$0xff]  }
 0x18d   : > { %14630 = vst [vmem:[#allocation18_spill] sm:$0xff] %v13324_v51  ;;  %v13330_v39 = vadd.f32 %v11406_v18, %v2074_v40  ;;  %v2072_v5 = vadd.f32 %v1975_v46, %v14633_v35  ;;  %11643 = vmatprep.mubr.msk.bf16.mxu0 %vm817_vm2, %v6779_v15  ;;  %v5698_v15 = vrot.slane %v5696_v0, 3  ;;  %v12053_v46 = vld [vmem:[%s12240_s7 + $0xb0] sm:$0xff]   ;;  %v5704_v27 = vrot.slane %v5702_v63, 2 }
 0x18e   : > { %v11343_v9 = vpop.f32.mrf.mxu1  ;;  %11574 = vmatmul.mubr.msk.bf16.gmra.mxu1 %vm817_vm2, %v5664_v31  ;;  %v3095_v56 = vpop.f32.mrf.mxu0  ;;  %v5707_v55 = vrot.slane %v5705_v60, 3  ;;  %v5714_v43 = vshll.u32 %v13322_v22, 16  ;;  %v5682_v0 = vsel %vm5530_vm6, %v13303_v13, %v5681_v21  ;;  %v5713_v63 = vrot.slane %v5711_v32, 2  ;;  %v12056_v60 = vld [vmem:[%s12240_s7 + $0xb8] sm:$0xff]  }
 0x18f   : > { %14632 = vst [vmem:[#allocation19_spill] sm:$0xff] %v13330_v39  ;;  %v13337_v18 = vadd.f32 %v3082_v57, %v2072_v5  ;;  %v2077_v40 = vadd.f32 %v11343_v9, %v14635_v28  ;;  %11577 = vmatprep.mubr.msk.bf16.mxu1 %vm817_vm2, %v5673_v7  ;;  %v5690_v39 = vor.u32 %v5689_v38, %v5686_v24  ;;  %v6810_v9 = vrot.slane %v6808_v20, 2  ;;  %v12055_v7 = vld [vmem:[%s12240_s7 + $0xb8] sm:$0xff]  }
 0x190   : > { %v1988_v31 = vpop.f32.mrf.mxu1  ;;  %v11410_v35 = vpop.f32.mrf.mxu0  ;;  %v6813_v28 = vrot.slane %v6811_v59, 3  ;;  %v6797_v24 = vsel %vm5530_vm6, %v6787_v12, %v6796_v10  ;;  %v6805_v38 = vor.u32 %v6804_v8, %v6801_v47  ;;  %v14638_v22 = vld [vmem:[#allocation26_spill] sm:$0xff]  ;;  %v5720_v13 = vshrl.u32 %v12054_v45, 16  ;;  %v14640_v47 = vld [vmem:[#allocation27_spill] sm:$0xff] }
 0x191   : > { %14634 = vst [vmem:[#allocation20_spill] sm:$0xff] %v13337_v18  ;;  %v13345_v57 = vadd.f32 %v11409_v2, %v2077_v40  ;;  %v2075_v5 = vadd.f32 %v1988_v31, %v14637_v37  ;;  %v6817_v40 = vshrl.u32 %v12053_v46, 16  ;;  %v5691_v59 = vsel %vm5530_vm6, %v5681_v21, %v5690_v39 }
 0x192   : > { %v11344_v18 = vpop.f32.mrf.mxu1  ;;  %v3098_v17 = vpop.f32.mrf.mxu0  ;;  %v5699_v37 = vor.u32 %v5698_v15, %v5695_v1  ;;  %v5723_v61 = vshll.u32 %v12054_v45, 16  ;;  %v6829_v32 = vshll.u32 %v12055_v7, 16  ;;  %v6814_v21 = vor.u32 %v6813_v28, %v6810_v9  ;;  %v12057_v1 = vld [vmem:[%s12240_s7 + $0xc0] sm:$0xff]  }
 0x193   : > { %14636 = vst [vmem:[#allocation21_spill] sm:$0xff] %v13345_v57  ;;  %v13353_v51 = vadd.f32 %v3095_v56, %v2075_v5  ;;  %v2078_v2 = vadd.f32 %v11344_v18, %v14638_v22  ;;  %v6820_v57 = vshll.u32 %v12053_v46, 16  ;;  %v6826_v56 = vshrl.u32 %v12055_v7, 16 }
 0x194   : > { %v1991_v31 = vpop.f32.mrf.mxu1  ;;  %v11413_v20 = vpop.f32.mrf.mxu0  ;;  %11644 = vmatmul.mubr.msk.bf16.gmra.mxu0 %vm817_vm2, %v6788_v14  ;;  %v6806_v14 = vsel %vm5530_vm6, %v6796_v10, %v6805_v38  ;;  %v5708_v5 = vor.u32 %v5707_v55, %v5704_v27  ;;  %v5716_v22 = vrot.slane %v5714_v43, 3  ;;  %v5732_v10 = vshll.u32 %v12056_v60, 16  ;;  %v14644_v55 = vld [vmem:[#allocation29_spill] sm:$0xff] }
 0x195   : > { %v13358_v12 = vadd.f32 %v11410_v35, %v2078_v2  ;;  %v2076_v8 = vadd.f32 %v1991_v31, %v14640_v47  ;;  %11647 = vmatprep.mubr.msk.bf16.mxu0 %vm817_vm2, %v6797_v24  ;;  %v14642_v35 = vld [vmem:[#allocation28_spill] sm:$0xff]  ;;  %v6819_v2 = vrot.slane %v6817_v40, 2  ;;  %v6822_v24 = vrot.slane %v6820_v57, 3 }
 0x196   : > { %v11347_v18 = vpop.f32.mrf.mxu1  ;;  %11578 = vmatmul.mubr.msk.bf16.gmra.mxu1 %vm817_vm2, %v5682_v0  ;;  %v3111_v46 = vpop.f32.mrf.mxu0  ;;  %v5722_v0 = vrot.slane %v5720_v13, 2  ;;  %v5725_v47 = vrot.slane %v5723_v61, 3  ;;  %v6828_v9 = vrot.slane %v6826_v56, 2  ;;  %v6831_v28 = vrot.slane %v6829_v32, 3  ;;  %v14645_v61 = vld [vmem:[#allocation30_spill] sm:$0xff] }
 0x197   : > { %14639 = vst [vmem:[#allocation22_spill] sm:$0xff] %v13358_v12  ;;  %v13365_v15 = vadd.f32 %v3098_v17, %v2076_v8  ;;  %v2081_v45 = vadd.f32 %v11347_v18, %v14642_v35  ;;  %11581 = vmatprep.mubr.msk.bf16.mxu1 %vm817_vm2, %v5691_v59  ;;  %v5729_v12 = vshrl.u32 %v12056_v60, 16  ;;  %v5700_v59 = vsel %vm5530_vm6, %v5690_v39, %v5699_v37  ;;  %v12058_v18 = vld [vmem:[%s12240_s7 + $0xc0] sm:$0xff]   ;;  %v12059_v35 = vld [vmem:[%s12240_s7 + $0xc8] sm:$0xff]  }
 0x198   : > { %v2004_v7 = vpop.f32.mrf.mxu1  ;;  %v11414_v31 = vpop.f32.mrf.mxu0  ;;  %v5709_v57 = vsel %vm5530_vm6, %v5699_v37, %v5708_v5  ;;  %v6815_v40 = vsel %vm5530_vm6, %v6805_v38, %v6814_v21  ;;  %v5717_v56 = vor.u32 %v5716_v22, %v5713_v63  ;;  %v6823_v32 = vor.u32 %v6822_v24, %v6819_v2  ;;  %v14647_v38 = vld [vmem:[#allocation31_spill] sm:$0xff] }
 0x199   : > { %14641 = vst [vmem:[#allocation23_spill] sm:$0xff] %v13365_v15  ;;  %v13369_v27 = vadd.f32 %v11413_v20, %v2081_v45  ;;  %v2079_v43 = vadd.f32 %v2004_v7, %v14644_v55  ;;  %v6835_v20 = vshrl.u32 %v12057_v1, 16  ;;  %v6838_v45 = vshll.u32 %v12057_v1, 16 }
 0x19a   : > { %v11348_v17 = vpop.f32.mrf.mxu1  ;;  %v3114_v8 = vpop.f32.mrf.mxu0  ;;  %v13381_v55 = vor.u32 %v5725_v47, %v5722_v0  ;;  %v5731_v39 = vrot.slane %v5729_v12, 2  ;;  %v5741_v63 = vshll.u32 %v12058_v18, 16  ;;  %v6844_v22 = vshrl.u32 %v12059_v35, 16 }
 0x19b   : > { %14643 = vst [vmem:[#allocation24_spill] sm:$0xff] %v13369_v27  ;;  %v13377_v13 = vadd.f32 %v3111_v46, %v2079_v43  ;;  %v2082_v60 = vadd.f32 %v11348_v17, %v14645_v61  ;;  %v6832_v46 = vor.u32 %v6831_v28, %v6828_v9  ;;  %v5734_v43 = vrot.slane %v5732_v10, 3  ;;  %v12060_v28 = vld [vmem:[%s12240_s7 + $0xc8] sm:$0xff]  }
 0x19c   : > { %v2007_v27 = vpop.f32.mrf.mxu1  ;;  %v11485_v7 = vpop.f32.mrf.mxu0  ;;  %11648 = vmatmul.mubr.msk.bf16.gmra.mxu0 %vm817_vm2, %v6806_v14  ;;  %v5738_v14 = vshrl.u32 %v12058_v18, 16  ;;  %v6847_v2 = vshll.u32 %v12059_v35, 16  ;;  %v6840_v0 = vrot.slane %v6838_v45, 3  ;;  %v6824_v9 = vsel %vm5530_vm6, %v6814_v21, %v6823_v32  ;;  %v12063_v45 = vld [vmem:[%s12240_s7 + $0xd8] sm:$0xff]  }
 0x19d   : > { %v13383_v37 = vadd.f32 %v11414_v31, %v2082_v60  ;;  %v2080_v15 = vadd.f32 %v2007_v27, %v14647_v38  ;;  %11651 = vmatprep.mubr.msk.bf16.mxu0 %vm817_vm2, %v6815_v40  ;;  %v6837_v31 = vrot.slane %v6835_v20, 2  ;;  %v5718_v27 = vsel %vm5530_vm6, %v5708_v5, %v5717_v56  ;;  %v14650_v38 = vld [vmem:[#allocation32_spill] sm:$0xff] }
 0x19e   : > { %v11419_v17 = vpop.f32.mrf.mxu1  ;;  %11582 = vmatmul.mubr.msk.bf16.gmra.mxu1 %vm817_vm2, %v5700_v59  ;;  %v4853_v1 = vpop.f32.mrf.mxu0  ;;  %v12061_v59 = vld [vmem:[%s12240_s7 + $0xd0] sm:$0xff]   ;;  %v5740_v61 = vrot.slane %v5738_v14, 2  ;;  %v5743_v60 = vrot.slane %v5741_v63, 3  ;;  %v6846_v20 = vrot.slane %v6844_v22, 2  ;;  %v6849_v5 = vrot.slane %v6847_v2, 3 }
 0x19f   : > { %14646 = vst [vmem:[#allocation25_spill] sm:$0xff] %v13383_v37  ;;  %v13388_v12 = vadd.f32 %v3114_v8, %v2080_v15  ;;  %v4234_v24 = vadd.f32 %v11419_v17, %v12853_v3  ;;  %11585 = vmatprep.mubr.msk.bf16.mxu1 %vm817_vm2, %v5709_v57  ;;  %v5727_v3 = vsel %vm5530_vm6, %v5717_v56, %v13381_v55  ;;  %v12062_v57 = vld [vmem:[%s12240_s7 + $0xd0] sm:$0xff]   ;;  %v5747_v56 = vshrl.u32 %v12060_v28, 16 }
 0x1a0   : > { %v3977_v47 = vpop.f32.mrf.mxu1  ;;  %v11486_v10 = vpop.f32.mrf.mxu0  ;;  %v6833_v8 = vsel %vm5530_vm6, %v6823_v32, %v6832_v46  ;;  %v5735_v17 = vor.u32 %v5734_v43, %v5731_v39  ;;  %v5750_v32 = vshll.u32 %v12060_v28, 16  ;;  %v14651_v14 = vld [vmem:[#allocation33_spill] sm:$0xff]  ;;  %v5759_v22 = vshll.u32 %v12062_v57, 16 }
 0x1a1   : > { %14648 = vst [vmem:[#allocation26_spill] sm:$0xff] %v13388_v12  ;;  %v13396_v40 = vadd.f32 %v11485_v7, %v4234_v24  ;;  %v4232_v15 = vadd.f32 %v3977_v47, %v12863_v48  ;;  %v6841_v24 = vor.u32 %v6840_v0, %v6837_v31  ;;  %v6856_v12 = vshll.u32 %v12061_v59, 16 }
 0x1a2   : > { %v11420_v18 = vpop.f32.mrf.mxu1  ;;  %v4856_v35 = vpop.f32.mrf.mxu0  ;;  %v5744_v43 = vor.u32 %v5743_v60, %v5740_v61  ;;  %v6850_v31 = vor.u32 %v6849_v5, %v6846_v20  ;;  %v6862_v0 = vshrl.u32 %v12063_v45, 16  ;;  %v5749_v61 = vrot.slane %v5747_v56, 2 }
 0x1a3   : > { %14649 = vst [vmem:[#allocation27_spill] sm:$0xff] %v13396_v40  ;;  %v13404_v21 = vadd.f32 %v4853_v1, %v4232_v15  ;;  %v4235_v7 = vadd.f32 %v11420_v18, %v14650_v38  ;;  %v6853_v40 = vshrl.u32 %v12061_v59, 16  ;;  %v5756_v1 = vshrl.u32 %v12062_v57, 16  ;;  %v12065_v57 = vld [vmem:[%s12240_s7 + $0xe0] sm:$0xff]  }
 0x1a4   : > { %v3980_v48 = vpop.f32.mrf.mxu1  ;;  %v11489_v47 = vpop.f32.mrf.mxu0  ;;  %11652 = vmatmul.mubr.msk.bf16.gmra.mxu0 %vm817_vm2, %v6824_v9  ;;  %v6865_v9 = vshll.u32 %v12063_v45, 16  ;;  %v5736_v15 = vsel %vm5530_vm6, %v13381_v55, %v5735_v17  ;;  %v5752_v60 = vrot.slane %v5750_v32, 3  ;;  %v6858_v5 = vrot.slane %v6856_v12, 3 }
 0x1a5   : > { %v13408_v37 = vadd.f32 %v11486_v10, %v4235_v7  ;;  %v4233_v63 = vadd.f32 %v3980_v48, %v14651_v14  ;;  %11655 = vmatprep.mubr.msk.bf16.mxu0 %vm817_vm2, %v6833_v8  ;;  %v14652_v10 = vld [vmem:[#allocation34_spill] sm:$0xff]  ;;  %v6842_v8 = vsel %vm5530_vm6, %v6832_v46, %v6841_v24  ;;  %v6855_v20 = vrot.slane %v6853_v40, 2 }
 0x1a6   : > { %v11423_v2 = vpop.f32.mrf.mxu1  ;;  %11586 = vmatmul.mubr.msk.bf16.gmra.mxu1 %vm817_vm2, %v5718_v27  ;;  %v4869_v39 = vpop.f32.mrf.mxu0  ;;  %v5758_v7 = vrot.slane %v5756_v1, 2  ;;  %v12064_v48 = vld [vmem:[%s12240_s7 + $0xd8] sm:$0xff]   ;;  %v5745_v46 = vsel %vm5530_vm6, %v5735_v17, %v5744_v43  ;;  %v6867_v56 = vrot.slane %v6865_v9, 3  ;;  %v6871_v40 = vshrl.u32 %v12065_v57, 16 }
 0x1a7   : > { %v13413_v28 = vadd.f32 %v4856_v35, %v4233_v63  ;;  %v4238_v59 = vadd.f32 %v11423_v2, %v14652_v10  ;;  %11589 = vmatprep.mubr.msk.bf16.mxu1 %vm817_vm2, %v5727_v3  ;;  %v12067_v35 = vld [vmem:[%s12240_s7 + $0xe8] sm:$0xff]   ;;  %v5761_v3 = vrot.slane %v5759_v22, 3  ;;  %v6851_v63 = vsel %vm5530_vm6, %v6841_v24, %v6850_v31  ;;  %v12066_v10 = vld [vmem:[%s12240_s7 + $0xe0] sm:$0xff]  }
 0x1a8   : > { %v3993_v27 = vpop.f32.mrf.mxu1  ;;  %v11490_v18 = vpop.f32.mrf.mxu0  ;;  %v6864_v2 = vrot.slane %v6862_v0, 2  ;;  %v5753_v1 = vor.u32 %v5752_v60, %v5749_v61  ;;  %v6859_v22 = vor.u32 %v6858_v5, %v6855_v20  ;;  %v14654_v24 = vld [vmem:[#allocation35_spill] sm:$0xff]  ;;  %v5774_v61 = vshrl.u32 %v12066_v10, 16 }
 0x1a9   : > { %v13422_v45 = vadd.f32 %v11489_v47, %v4238_v59  ;;  %v4236_v38 = vadd.f32 %v3993_v27, %v12891_v52  ;;  %v6874_v47 = vshll.u32 %v12065_v57, 16  ;;  %v6880_v27 = vshrl.u32 %v12067_v35, 16 }
 0x1aa   : > { %v11424_v14 = vpop.f32.mrf.mxu1  ;;  %v4872_v55 = vpop.f32.mrf.mxu0  ;;  %v5777_v60 = vshll.u32 %v12066_v10, 16  ;;  %v6873_v5 = vrot.slane %v6871_v40, 2  ;;  %v14657_v10 = vld [vmem:[#allocation36_spill] sm:$0xff]  ;;  %v12070_v40 = vld [vmem:[%s12240_s7 + $0xf0] sm:$0xff]  }
 0x1ab   : > { %14653 = vst [vmem:[#allocation28_spill] sm:$0xff] %v13422_v45  ;;  %v13429_v32 = vadd.f32 %v4869_v39, %v4236_v38  ;;  %v4239_v12 = vadd.f32 %v11424_v14, %v12897_v4  ;;  %v6883_v45 = vshll.u32 %v12067_v35, 16  ;;  %v13437_v39 = vor.u32 %v5761_v3, %v5758_v7  ;;  %v12068_v7 = vld [vmem:[%s12240_s7 + $0xe8] sm:$0xff]  }
 0x1ac   : > { %v3996_v59 = vpop.f32.mrf.mxu1  ;;  %v11493_v52 = vpop.f32.mrf.mxu0  ;;  %11656 = vmatmul.mubr.msk.bf16.gmra.mxu0 %vm817_vm2, %v6842_v8  ;;  %v5765_v4 = vshrl.u32 %v12064_v48, 16  ;;  %v6868_v38 = vor.u32 %v6867_v56, %v6864_v2  ;;  %v5768_v8 = vshll.u32 %v12064_v48, 16  ;;  %v6876_v35 = vrot.slane %v6874_v47, 3  ;;  %v12069_v56 = vld [vmem:[%s12240_s7 + $0xf0] sm:$0xff]  }
 0x1ad   : > { %v13433_v17 = vadd.f32 %v11490_v18, %v4239_v12  ;;  %v4237_v0 = vadd.f32 %v3996_v59, %v14654_v24  ;;  %11659 = vmatprep.mubr.msk.bf16.mxu0 %vm817_vm2, %v6851_v63  ;;  %v6860_v63 = vsel %vm5530_vm6, %v6850_v31, %v6859_v22  ;;  %v6882_v48 = vrot.slane %v6880_v27, 2  ;;  %v12071_v31 = vld [vmem:[%s12240_s7 + $0xf8] sm:$0xff]  }
 0x1ae   : > { %v11427_v9 = vpop.f32.mrf.mxu1  ;;  %11590 = vmatmul.mubr.msk.bf16.gmra.mxu1 %vm817_vm2, %v5736_v15  ;;  %v4885_v57 = vpop.f32.mrf.mxu0  ;;  %v5754_v15 = vsel %vm5530_vm6, %v5744_v43, %v5753_v1  ;;  %v6885_v2 = vrot.slane %v6883_v45, 3  ;;  %v5767_v12 = vrot.slane %v5765_v4, 2  ;;  %v6869_v24 = vsel %vm5530_vm6, %v6859_v22, %v6868_v38  ;;  %v14659_v45 = vld [vmem:[#allocation37_spill] sm:$0xff] }
 0x1af   : > { %v13440_v20 = vadd.f32 %v4872_v55, %v4237_v0  ;;  %v4242_v18 = vadd.f32 %v11427_v9, %v12915_v54  ;;  %11593 = vmatprep.mubr.msk.bf16.mxu1 %vm817_vm2, %v5745_v46  ;;  %v5763_v46 = vsel %vm5530_vm6, %v5753_v1, %v13437_v39  ;;  %v5770_v43 = vrot.slane %v5768_v8, 3 }
 0x1b0   : > { %v4009_v3 = vpop.f32.mrf.mxu1  ;;  %v11494_v14 = vpop.f32.mrf.mxu0  ;;  %v5776_v0 = vrot.slane %v5774_v61, 2  ;;  %v5779_v9 = vrot.slane %v5777_v60, 3  ;;  %v13460_v1 = vor.u32 %v6885_v2, %v6882_v48  ;;  %v5786_v4 = vshll.u32 %v12068_v7, 16  ;;  %v14661_v61 = vld [vmem:[#allocation38_spill] sm:$0xff] }
 0x1b1   : > { %14655 = vst [vmem:[#allocation29_spill] sm:$0xff] %v13440_v20  ;;  %v13448_v55 = vadd.f32 %v11493_v52, %v4242_v18  ;;  %v4240_v54 = vadd.f32 %v4009_v3, %v14657_v10  ;;  %v6877_v18 = vor.u32 %v6876_v35, %v6873_v5  ;;  %v6889_v20 = vshrl.u32 %v12069_v56, 16  ;;  %v12072_v2 = vld [vmem:[%s12240_s7 + $0xf8] sm:$0xff]  }
 0x1b2   : > { %v11428_v47 = vpop.f32.mrf.mxu1  ;;  %v4888_v59 = vpop.f32.mrf.mxu0  ;;  %v6892_v22 = vshll.u32 %v12069_v56, 16  ;;  %v6901_v48 = vshll.u32 %v12071_v31, 16 }
 0x1b3   : > { %14656 = vst [vmem:[#allocation30_spill] sm:$0xff] %v13448_v55  ;;  %v13456_v27 = vadd.f32 %v4885_v57, %v4240_v54  ;;  %v4243_v52 = vadd.f32 %v11428_v47, %v14659_v45  ;;  %v5783_v55 = vshrl.u32 %v12068_v7, 16  ;;  %v5792_v57 = vshrl.u32 %v12070_v40, 16 }
 0x1b4   : > { %v4012_v3 = vpop.f32.mrf.mxu1  ;;  %v11497_v10 = vpop.f32.mrf.mxu0  ;;  %11660 = vmatmul.mubr.msk.bf16.gmra.mxu0 %vm817_vm2, %v6860_v63  ;;  %v5795_v54 = vshll.u32 %v12070_v40, 16  ;;  %v5771_v47 = vor.u32 %v5770_v43, %v5767_v12  ;;  %v13467_v63 = vor.u32 %v5779_v9, %v5776_v0  ;;  %v6898_v7 = vshrl.u32 %v12071_v31, 16  ;;  %v12075_v31 = vld [vmem:[%s12240_s7 + $0x108] sm:$0xff]  }
 0x1b5   : > { %14658 = vst [vmem:[#allocation31_spill] sm:$0xff] %v13456_v27  ;;  %v13462_v8 = vadd.f32 %v11494_v14, %v4243_v52  ;;  %v4241_v60 = vadd.f32 %v4012_v3, %v14661_v61  ;;  %11663 = vmatprep.mubr.msk.bf16.mxu0 %vm817_vm2, %v6869_v24  ;;  %v6878_v40 = vsel %vm5530_vm6, %v6868_v38, %v6877_v18  ;;  %v5785_v24 = vrot.slane %v5783_v55, 2  ;;  %v12073_v52 = vld [vmem:[%s12240_s7 + $0x100] sm:$0xff]  }
 0x1b6   : > { %v11431_v5 = vpop.f32.mrf.mxu1  ;;  %11594 = vmatmul.mubr.msk.bf16.gmra.mxu1 %vm817_vm2, %v5754_v15  ;;  %v4901_v35 = vpop.f32.mrf.mxu0  ;;  %v6887_v12 = vsel %vm5530_vm6, %v6877_v18, %v13460_v1  ;;  %v5788_v43 = vrot.slane %v5786_v4, 3  ;;  %v6891_v0 = vrot.slane %v6889_v20, 2  ;;  %v6894_v9 = vrot.slane %v6892_v22, 3  ;;  %v14664_v3 = vld [vmem:[#allocation39_spill] sm:$0xff]  ;;  %v14666_v18 = vld [vmem:[#allocation40_spill] sm:$0xff] }
 0x1b7   : > { %14660 = vst [vmem:[#allocation32_spill] sm:$0xff] %v13462_v8  ;;  %v13470_v14 = vadd.f32 %v4888_v59, %v4241_v60  ;;  %v4246_v56 = vadd.f32 %v11431_v5, %v12953_v16  ;;  %11597 = vmatprep.mubr.msk.bf16.mxu1 %vm817_vm2, %v5763_v46  ;;  %v5794_v61 = vrot.slane %v5792_v57, 2  ;;  %v5797_v46 = vrot.slane %v5795_v54, 3  ;;  %v12074_v22 = vld [vmem:[%s12240_s7 + $0x100] sm:$0xff]  }
 0x1b8   : > { %v4025_v45 = vpop.f32.mrf.mxu1  ;;  %v11498_v15 = vpop.f32.mrf.mxu0  ;;  %v6900_v55 = vrot.slane %v6898_v7, 2  ;;  %v6903_v5 = vrot.slane %v6901_v48, 3  ;;  %v5804_v8 = vshll.u32 %v12072_v2, 16  ;;  %v5772_v4 = vsel %vm5530_vm6, %v13437_v39, %v5771_v47 }
 0x1b9   : > { %14662 = vst [vmem:[#allocation33_spill] sm:$0xff] %v13470_v14  ;;  %v13479_v59 = vadd.f32 %v11497_v10, %v4246_v56  ;;  %v4244_v16 = vadd.f32 %v4025_v45, %v14664_v3  ;;  %v5801_v14 = vshrl.u32 %v12072_v2, 16  ;;  %v5781_v10 = vsel %vm5530_vm6, %v5771_v47, %v13467_v63 }
 0x1ba   : > { %v11432_v60 = vpop.f32.mrf.mxu1  ;;  %v4904_v38 = vpop.f32.mrf.mxu0  ;;  %v6907_v54 = vshrl.u32 %v12073_v52, 16  ;;  %v6910_v7 = vshll.u32 %v12073_v52, 16  ;;  %v6916_v48 = vshrl.u32 %v12075_v31, 16  ;;  %v6919_v45 = vshll.u32 %v12075_v31, 16 }
 0x1bb   : > { %14663 = vst [vmem:[#allocation34_spill] sm:$0xff] %v13479_v59  ;;  %v13482_v27 = vadd.f32 %v4901_v35, %v4244_v16  ;;  %v4247_v20 = vadd.f32 %v11432_v60, %v14666_v18  ;;  %v14667_v35 = vld [vmem:[#allocation41_spill] sm:$0xff]  ;;  %v5789_v16 = vor.u32 %v5788_v43, %v5785_v24  ;;  %v6895_v39 = vor.u32 %v6894_v9, %v6891_v0 }
 0x1bc   : > { %v4028_v56 = vpop.f32.mrf.mxu1  ;;  %v11501_v57 = vpop.f32.mrf.mxu0  ;;  %11664 = vmatmul.mubr.msk.bf16.gmra.mxu0 %vm817_vm2, %v6878_v40  ;;  %v5798_v18 = vor.u32 %v5797_v46, %v5794_v61  ;;  %v5803_v59 = vrot.slane %v5801_v14, 2  ;;  %v5806_v40 = vrot.slane %v5804_v8, 3  ;;  %v5810_v31 = vshrl.u32 %v12074_v22, 16  ;;  %v12077_v46 = vld [vmem:[%s12240_s7 + $0x110] ss:$0 sps:$4 sm:$0x77]  }
 0x1bd   : > { %14665 = vst [vmem:[#allocation35_spill] sm:$0xff] %v13482_v27  ;;  %v13491_v2 = vadd.f32 %v11498_v15, %v4247_v20  ;;  %v4245_v3 = vadd.f32 %v4028_v56, %v14667_v35  ;;  %11667 = vmatprep.mubr.msk.bf16.mxu0 %vm817_vm2, %v6887_v12  ;;  %v6904_v27 = vor.u32 %v6903_v5, %v6900_v55  ;;  %v5813_v12 = vshll.u32 %v12074_v22, 16  ;;  %v12081_v22 = vld [vmem:[%s12240_s7 + $0x18] sm:$0xff]  }
 0x1be   : > { %v11435_v60 = vpop.f32.mrf.mxu1  ;;  %11598 = vmatmul.mubr.msk.bf16.gmra.mxu1 %vm817_vm2, %v5772_v4  ;;  %v4917_v47 = vpop.f32.mrf.mxu0  ;;  %v6909_v0 = vrot.slane %v6907_v54, 2  ;;  %v6912_v9 = vrot.slane %v6910_v7, 3  ;;  %v6918_v20 = vrot.slane %v6916_v48, 2  ;;  %v6921_v61 = vrot.slane %v6919_v45, 3 }
 0x1bf   : > { %v13496_v52 = vadd.f32 %v4904_v38, %v4245_v3  ;;  %v4250_v15 = vadd.f32 %v11435_v60, %v12995_v26  ;;  %11601 = vmatprep.mubr.msk.bf16.mxu1 %vm817_vm2, %v5781_v10  ;;  %v6896_v26 = vsel %vm5530_vm6, %v13460_v1, %v6895_v39  ;;  %v5790_v5 = vsel %vm5530_vm6, %v13467_v63, %v5789_v16  ;;  %v12080_v10 = vld [vmem:[%s12240_s7 + $0x10] sm:$0xf8]   ;;  %v12076_v7 = vld [vmem:[%s12240_s7 + $0x108] ss:$0 sps:$4 sm:$0x77]  }
 0x1c0   : > { %v4041_v24 = vpop.f32.mrf.mxu1  ;;  %v11502_v43 = vpop.f32.mrf.mxu0  ;;  %v6905_v4 = vsel %vm5530_vm6, %v6895_v39, %v6904_v27  ;;  %v5799_v54 = vsel %vm5530_vm6, %v5789_v16, %v5798_v18  ;;  %v6913_v45 = vor.u32 %v6912_v9, %v6909_v0  ;;  %v5812_v35 = vrot.slane %v5810_v31, 2 }
 0x1c1   : > { %v13500_v14 = vadd.f32 %v11501_v57, %v4250_v15  ;;  %v4248_v8 = vadd.f32 %v4041_v24, %v12998_v50  ;;  %v5807_v50 = vor.u32 %v5806_v40, %v5803_v59  ;;  %v5815_v3 = vrot.slane %v5813_v12, 3 }
 0x1c2   : > { %v11436_v38 = vpop.f32.mrf.mxu1  ;;  %v4920_v55 = vpop.f32.mrf.mxu0  ;;  %v13517_v63 = vor.u32 %v6921_v61, %v6918_v20  ;;  %v8621_v40 = vshrl.u32 %v12080_v10, 16  ;;  %v8624_v15 = vshll.u32 %v12080_v10, 16  ;;  %v8629_v24 = vshrl.u32 %v12081_v22, 16 }
 0x1c3   : > { %v13511_v56 = vadd.f32 %v4917_v47, %v4248_v8  ;;  %v4251_v57 = vadd.f32 %v11436_v38, %v13002_v44  ;;  %v6925_v44 = vshrl.u32 %v12077_v46, 16  ;;  %v6928_v47 = vshll.u32 %v12077_v46, 16  ;;  %v12083_v38 = vld [vmem:[%s12240_s7 + $0x20] sm:$0xff]  }
 0x1c4   : > { %v4044_v48 = vpop.f32.mrf.mxu1  ;;  %v11505_v1 = vpop.f32.mrf.mxu0  ;;  %11668 = vmatmul.mubr.msk.bf16.gmra.mxu0 %vm817_vm2, %v6896_v26  ;;  %v8632_v31 = vshll.u32 %v12081_v22, 16  ;;  %v5822_v0 = vshll.u32 %v12076_v7, 16  ;;  %v5808_v61 = vsel %vm5530_vm6, %v5798_v18, %v5807_v50  ;;  %v6914_v8 = vsel %vm5530_vm6, %v6904_v27, %v6913_v45  ;;  %v12085_v27 = vld [vmem:[%s12240_s7 + $0x28] sm:$0xff]  }
 0x1c5   : > { %v13519_v39 = vadd.f32 %v11502_v43, %v4251_v57  ;;  %v4249_v60 = vadd.f32 %v4044_v48, %v13018_v41  ;;  %11671 = vmatprep.mubr.msk.bf16.mxu0 %vm817_vm2, %v6905_v4  ;;  %v5819_v41 = vshrl.u32 %v12076_v7, 16  ;;  %v5816_v26 = vor.u32 %v5815_v3, %v5812_v35 }
 0x1c6   : > { %v11439_v16 = vpop.f32.mrf.mxu1  ;;  %11602 = vmatmul.mubr.msk.bf16.gmra.mxu1 %vm817_vm2, %v5790_v5  ;;  %v4933_v59 = vpop.f32.mrf.mxu0  ;;  %v6923_v46 = vsel %vm5530_vm6, %v6913_v45, %v13517_v63  ;;  %v6927_v5 = vrot.slane %v6925_v44, 2  ;;  %v6930_v4 = vrot.slane %v6928_v47, 3  ;;  %v8623_v57 = vrot.slane %v8621_v40, 3  ;;  %v12078_v44 = vld [vmem:[%s12240_s7 + $0x10] sm:$0xf8]   ;;  %v13544_v47 = vld [vmem:[%s12240_s7 + $0x18] sm:$0xff]  }
 0x1c7   : > { %v13524_v12 = vadd.f32 %v4920_v55, %v4249_v60  ;;  %v4254_v43 = vadd.f32 %v11439_v16, %v13025_v11  ;;  %11605 = vmatprep.mubr.msk.bf16.mxu1 %vm817_vm2, %v5799_v54  ;;  %v8626_v54 = vrot.slane %v8624_v15, 4  ;;  %v8631_v18 = vrot.slane %v8629_v24, 3 }
 0x1c8   : > { %v4057_v9 = vpop.f32.mrf.mxu1  ;;  %v11506_v20 = vpop.f32.mrf.mxu0  ;;  %v8634_v7 = vrot.slane %v8632_v31, 4  ;;  %v5821_v35 = vrot.slane %v5819_v41, 2  ;;  %v8638_v16 = vshrl.u32 %v12083_v38, 16  ;;  %v8641_v40 = vshll.u32 %v12083_v38, 16 }
 0x1c9   : > { %v13533_v55 = vadd.f32 %v11505_v1, %v4254_v43  ;;  %v4252_v11 = vadd.f32 %v4057_v9, %v13029_v62  ;;  %v5824_v1 = vrot.slane %v5822_v0, 3  ;;  %v5817_v62 = vsel %vm5530_vm6, %v5807_v50, %v5816_v26 }
 0x1ca   : > { %v11440_v10 = vpop.f32.mrf.mxu1  ;;  %v4936_v22 = vpop.f32.mrf.mxu0  ;;  %v8627_v43 = vor.u32 %v8626_v54, %v8623_v57  ;;  %v8635_v41 = vor.u32 %v8634_v7, %v8631_v18  ;;  %v8647_v0 = vshrl.u32 %v12085_v27, 16  ;;  %v8650_v50 = vshll.u32 %v12085_v27, 16 }
 0x1cb   : > { %v13537_v48 = vadd.f32 %v4933_v59, %v4252_v11  ;;  %v4255_v45 = vadd.f32 %v11440_v10, %v13049_v53  ;;  %v6931_v53 = vor.u32 %v6930_v4, %v6927_v5  ;;  %v7744_v38 = vrot.slane %v12078_v44, 3 }
 0x1cc   : > { %v4060_v3 = vpop.f32.mrf.mxu1  ;;  %v11509_v60 = vpop.f32.mrf.mxu0  ;;  %11672 = vmatmul.mubr.msk.bf16.gmra.mxu0 %vm817_vm2, %v6914_v8  ;;  %v8640_v11 = vrot.slane %v8638_v16, 3  ;;  %v8643_v5 = vrot.slane %v8641_v40, 4  ;;  %v8636_v18 = vsel %vm8619_vm7, %v8627_v43, %v8635_v41  ;;  %v8649_v7 = vrot.slane %v8647_v0, 3  ;;  %v14668_v40 = vld [vmem:[#allocation42_spill] sm:$0xff] }
 0x1cd   : > { %v13546_v15 = vadd.f32 %v11506_v20, %v4255_v45  ;;  %v4253_v59 = vadd.f32 %v4060_v3, %v13057_v6  ;;  %11675 = vmatprep.mubr.msk.bf16.mxu0 %vm817_vm2, %v6923_v46  ;;  %v5825_v20 = vor.u32 %v5824_v1, %v5821_v35  ;;  %v8652_v27 = vrot.slane %v8650_v50, 4  ;;  %v12089_v45 = vld [vmem:[%s12240_s7 + $0x38] sm:$0xff]  }
 0x1ce   : > { %v11443_v24 = vpop.f32.mrf.mxu1  ;;  %11606 = vmatmul.mubr.msk.bf16.gmra.mxu1 %vm817_vm2, %v5808_v61  ;;  %v4949_v31 = vpop.f32.mrf.mxu0  ;;  %v7745_v61 = vrot.slane %v13544_v47, 3  ;;  %v8644_v44 = vor.u32 %v8643_v5, %v8640_v11  ;;  %v13572_v47 = vld [vmem:[%s12240_s7 + $0x28] sm:$0xff]   ;;  %v8665_v43 = vshrl.u32 %v12089_v45, 16  ;;  %v8668_v0 = vshll.u32 %v12089_v45, 16 }
 0x1cf   : > { %v13551_v9 = vadd.f32 %v4936_v22, %v4253_v59  ;;  %v4258_v8 = vadd.f32 %v11443_v24, %v13065_v30  ;;  %11609 = vmatprep.mubr.msk.bf16.mxu1 %vm817_vm2, %v5817_v62  ;;  %v6932_v30 = vsel %vm5530_vm6, %v13517_v63, %v6931_v53  ;;  %v12087_v22 = vld [vmem:[%s12240_s7 + $0x30] sm:$0xff]   ;;  %v5826_v3 = vsel %vm5530_vm6, %v5816_v26, %v5825_v20 }
 0x1d0   : > { %v4073_v6 = vpop.f32.mrf.mxu1  ;;  %v11510_v46 = vpop.f32.mrf.mxu0  ;;  %v7746_v63 = vsel %vm7743_vm8, %v7744_v38, %v7745_v61  ;;  %v8656_v53 = vshrl.u32 %v12087_v22, 16  ;;  %v8645_v11 = vsel %vm8619_vm7, %v8635_v41, %v8644_v44  ;;  %v7749_v5 = vrot.slane %v13572_v47, 3 }
 0x1d1   : > { %v13556_v4 = vadd.f32 %v11509_v60, %v4258_v8  ;;  %v4256_v10 = vadd.f32 %v4073_v6, %v13077_v33  ;;  %v12082_v33 = vld [vmem:[%s12240_s7 + $0x20] sm:$0xff]   ;;  %v8667_v45 = vrot.slane %v8665_v43, 3 }
 0x1d2   : > { %v11444_v57 = vpop.f32.mrf.mxu1  ;;  %v4952_v54 = vpop.f32.mrf.mxu0  ;;  %v14669_v8 = vld [vmem:[#allocation43_spill] sm:$0xff]  ;;  %v7747_v6 = vrot.slane %v12082_v33, 3 }
 0x1d3   : > { %v13564_v35 = vadd.f32 %v4949_v31, %v4256_v10  ;;  %v4259_v1 = vadd.f32 %v11444_v57, %v13085_v19  ;;  %v8659_v19 = vshll.u32 %v12087_v22, 16  ;;  %v8653_v31 = vor.u32 %v8652_v27, %v8649_v7  ;;  %v12091_v10 = vld [vmem:[%s12240_s7 + $0x40] sm:$0xff]  }
 0x1d4   : > { %v4076_v60 = vpop.f32.mrf.mxu1  ;;  %v11513_v62 = vpop.f32.mrf.mxu0  ;;  %11676 = vmatmul.mubr.msk.bf16.gmra.mxu0 %vm817_vm2, %v6932_v30  ;;  %v8658_v57 = vrot.slane %v8656_v53, 3 }
 0x1d5   : > { %v13574_v16 = vadd.f32 %v11510_v46, %v4259_v1  ;;  %v4257_v59 = vadd.f32 %v4076_v60, %v14668_v40  ;;  %11747 = vmatprep.mubr.msk.bf16.mxu0 %vm817_vm2, %v8636_v18  ;;  %v8654_v27 = vsel %vm8619_vm7, %v8644_v44, %v8653_v31  ;;  %v8670_v1 = vrot.slane %v8668_v0, 4  ;;  %v13599_v40 = vld [vmem:[%s12240_s7 + $0x38] sm:$0xff]  }
 0x1d6   : > { %v11447_v26 = vpop.f32.mrf.mxu1  ;;  %11610 = vmatmul.mubr.msk.bf16.gmra.mxu1 %vm817_vm2, %v5826_v3  ;;  %v4965_v24 = vpop.f32.mrf.mxu0  ;;  %v12093_v3 = vld [vmem:[%s12240_s7 + $0x48] sm:$0xff]   ;;  %v7748_v60 = vsel %vm7743_vm8, %v7745_v61, %v7747_v6  ;;  %v8677_v44 = vshll.u32 %v12091_v10, 16 }
 0x1d7   : > { %v13579_v50 = vadd.f32 %v4952_v54, %v4257_v59  ;;  %v4262_v20 = vadd.f32 %v11447_v26, %v14669_v8  ;;  %11681 = vmatprep.mubr.msk.bf16.mxu1 %vm817_vm2, %v7746_v63  ;;  %v8661_v54 = vrot.slane %v8659_v19, 4  ;;  %v8674_v59 = vshrl.u32 %v12091_v10, 16 }
 0x1d8   : > { %v4089_v46 = vpop.f32.mrf.mxu1  ;;  %v11514_v38 = vpop.f32.mrf.mxu0  ;;  %v8683_v43 = vshrl.u32 %v12093_v3, 16  ;;  %v8686_v0 = vshll.u32 %v12093_v3, 16  ;;  %v8679_v10 = vrot.slane %v8677_v44, 4  ;;  %v12097_v3 = vld [vmem:[%s12240_s7 + $0x58] sm:$0xff]  }
 0x1d9   : > { %v13586_v30 = vadd.f32 %v11513_v62, %v4262_v20  ;;  %v4260_v22 = vadd.f32 %v4089_v46, %v13115_v36  ;;  %v12086_v62 = vld [vmem:[%s12240_s7 + $0x30] sm:$0xff]   ;;  %v7750_v36 = vsel %vm7743_vm8, %v7747_v6, %v7749_v5 }
 0x1da   : > { %v11448_v18 = vpop.f32.mrf.mxu1  ;;  %v4968_v7 = vpop.f32.mrf.mxu0  ;;  %v7751_v6 = vrot.slane %v12086_v62, 3 }
 0x1db   : > { %v13591_v33 = vadd.f32 %v4965_v24, %v4260_v22  ;;  %v4263_v41 = vadd.f32 %v11448_v18, %v13119_v42  ;;  %v8662_v42 = vor.u32 %v8661_v54, %v8658_v57  ;;  %v8671_v24 = vor.u32 %v8670_v1, %v8667_v45  ;;  %v12095_v18 = vld [vmem:[%s12240_s7 + $0x50] sm:$0xff]  }
 0x1dc   : > { %v4092_v63 = vpop.f32.mrf.mxu1  ;;  %v11517_v47 = vpop.f32.mrf.mxu0  ;;  %11748 = vmatmul.mubr.msk.bf16.vlgmr.msra.gmra.mxu0 %vm817_vm2, %v8645_v11  ;;  %v8676_v11 = vrot.slane %v8674_v59, 3  ;;  %v8685_v45 = vrot.slane %v8683_v43, 3  ;;  %v8688_v1 = vrot.slane %v8686_v0, 4  ;;  %v13626_v59 = vld [vmem:[%s12240_s7 + $0x48] sm:$0xff]  }
 0x1dd   : > { %v13601_v53 = vadd.f32 %v11514_v38, %v4263_v41  ;;  %v4261_v19 = vadd.f32 %v4092_v63, %v13129_v23  ;;  %11751 = vmatprep.mubr.msk.bf16.mxu0 %vm817_vm2, %v8654_v27  ;;  %v7753_v38 = vrot.slane %v13599_v40, 3  ;;  %v8663_v54 = vsel %vm8619_vm7, %v8653_v31, %v8662_v42 }
 0x1de   : > { %v11451_v26 = vpop.f32.mrf.mxu1  ;;  %11682 = vmatmul.mubr.msk.bf16.vlgmr.msra.gmra.mxu1 %vm817_vm2, %v7748_v60  ;;  %v4981_v61 = vpop.f32.mrf.mxu0  ;;  %v8672_v27 = vsel %vm8619_vm7, %v8662_v42, %v8671_v24  ;;  %v14670_v60 = vld [vmem:[#allocation44_spill] sm:$0xff]  ;;  %v7752_v63 = vsel %vm7743_vm8, %v7749_v5, %v7751_v6  ;;  %v8680_v40 = vor.u32 %v8679_v10, %v8676_v11  ;;  %v8689_v0 = vor.u32 %v8688_v1, %v8685_v45  ;;  %v14674_v45 = vld [vmem:[#allocation5_spill] sm:$0xff] }
 0x1df   : > { %v13606_v8 = vadd.f32 %v4968_v7, %v4261_v19  ;;  %v4266_v20 = vadd.f32 %v11451_v26, %v13139_v58  ;;  %11685 = vmatprep.mubr.msk.bf16.mxu1 %vm817_vm2, %v7750_v36  ;;  %v7754_v31 = vsel %vm7743_vm8, %v7751_v6, %v7753_v38  ;;  %v14671_v19 = vld [vmem:[#allocation3_spill] sm:$0xff]  ;;  %v8692_v26 = vshrl.u32 %v12095_v18, 16  ;;  %v14672_v11 = vld [vmem:[#allocation4_spill] sm:$0xff] }
 0x1e0   : > { %v4105_v23 = vpop.f32.mrf.mxu1  ;;  %v11518_v46 = vpop.f32.mrf.mxu0 }
 0x1e1   : > { %v13611_v22 = vadd.f32 %v11517_v47, %v4266_v20  ;;  %v4264_v57 = vadd.f32 %v4105_v23, %v13150_v29  ;;  %v12090_v47 = vld [vmem:[%s12240_s7 + $0x40] sm:$0xff]   ;;  %v8701_v20 = vshrl.u32 %v12097_v3, 16  ;;  %v8704_v23 = vshll.u32 %v12097_v3, 16 }
 0x1e2   : > { %v11452_v58 = vpop.f32.mrf.mxu1  ;;  %v4984_v7 = vpop.f32.mrf.mxu0 }
 0x1e3   : > { %v13618_v41 = vadd.f32 %v4981_v61, %v4264_v57  ;;  %v4267_v62 = vadd.f32 %v11452_v58, %v14670_v60  ;;  %v8695_v61 = vshll.u32 %v12095_v18, 16  ;;  %v8681_v58 = vsel %vm8619_vm7, %v8671_v24, %v8680_v40  ;;  %v14676_v24 = vld [vmem:[#allocation6_spill] sm:$0xff] }
 0x1e4   : > { %v4108_v36 = vpop.f32.mrf.mxu1  ;;  %v11521_v29 = vpop.f32.mrf.mxu0  ;;  %11752 = vmatmul.mubr.msk.bf16.gmra.mxu0 %vm817_vm2, %v8663_v54  ;;  %v7757_v18 = vrot.slane %v13626_v59, 3 }
 0x1e5   : > { %v13628_v44 = vadd.f32 %v11518_v46, %v4267_v62  ;;  %v4265_v42 = vadd.f32 %v4108_v36, %v14671_v19  ;;  %11755 = vmatprep.mubr.msk.bf16.mxu0 %vm817_vm2, %v8672_v27  ;;  %v7755_v46 = vrot.slane %v12090_v47, 3  ;;  %v12099_v27 = vld [vmem:[%s12240_s7 + $0x60] sm:$0xff]   ;;  %v8697_v3 = vrot.slane %v8695_v61, 4  ;;  %v12101_v19 = vld [vmem:[%s12240_s7 + $0x68] sm:$0xff]   ;;  %v13653_v61 = vld [vmem:[%s12240_s7 + $0x58] sm:$0xff]  }
 0x1e6   : > { %v11455_v5 = vpop.f32.mrf.mxu1  ;;  %11686 = vmatmul.mubr.msk.bf16.gmra.mxu1 %vm817_vm2, %v7752_v63  ;;  %v4997_v43 = vpop.f32.mrf.mxu0  ;;  %v8690_v36 = vsel %vm8619_vm7, %v8680_v40, %v8689_v0  ;;  %v8703_v47 = vrot.slane %v8701_v20, 3  ;;  %v8713_v40 = vshll.u32 %v12099_v27, 16 }
 0x1e7   : > { %v13633_v6 = vadd.f32 %v4984_v7, %v4265_v42  ;;  %v4270_v10 = vadd.f32 %v11455_v5, %v14672_v11  ;;  %11689 = vmatprep.mubr.msk.bf16.mxu1 %vm817_vm2, %v7754_v31  ;;  %v8694_v7 = vrot.slane %v8692_v26, 3  ;;  %v8706_v31 = vrot.slane %v8704_v23, 4  ;;  %v14677_v23 = vld [vmem:[#allocation7_spill] sm:$0xff] }
 0x1e8   : > { %v4121_v57 = vpop.f32.mrf.mxu1  ;;  %v11522_v54 = vpop.f32.mrf.mxu0  ;;  %v7756_v59 = vsel %vm7743_vm8, %v7753_v38, %v7755_v46  ;;  %v7758_v26 = vsel %vm7743_vm8, %v7755_v46, %v7757_v18 }
 0x1e9   : > { %v13640_v60 = vadd.f32 %v11521_v29, %v4270_v10  ;;  %v4268_v1 = vadd.f32 %v4121_v57, %v14674_v45  ;;  %v12094_v29 = vld [vmem:[%s12240_s7 + $0x50] sm:$0xff]   ;;  %v8710_v57 = vshrl.u32 %v12099_v27, 16  ;;  %v8698_v45 = vor.u32 %v8697_v3, %v8694_v7 }
 0x1ea   : > { %v11456_v62 = vpop.f32.mrf.mxu1  ;;  %v5000_v63 = vpop.f32.mrf.mxu0  ;;  %v7761_v7 = vrot.slane %v13653_v61, 3 }
 0x1eb   : > { %14673 = vst [vmem:[#allocation36_spill] sm:$0xff] %v13640_v60  ;;  %v13645_v42 = vadd.f32 %v4997_v43, %v4268_v1  ;;  %v4271_v5 = vadd.f32 %v11456_v62, %v14676_v24  ;;  %v8707_v62 = vor.u32 %v8706_v31, %v8703_v47  ;;  %v8722_v24 = vshll.u32 %v12101_v19, 16  ;;  %v12103_v31 = vld [vmem:[%s12240_s7 + $0x70] sm:$0xff]  }
 0x1ec   : > { %v4124_v11 = vpop.f32.mrf.mxu1  ;;  %v11525_v10 = vpop.f32.mrf.mxu0  ;;  %11756 = vmatmul.mubr.msk.bf16.gmra.mxu0 %vm817_vm2, %v8681_v58  ;;  %v8719_v58 = vshrl.u32 %v12101_v19, 16  ;;  %v8712_v3 = vrot.slane %v8710_v57, 3 }
 0x1ed   : > { %14675 = vst [vmem:[#allocation37_spill] sm:$0xff] %v13645_v42  ;;  %v13655_v20 = vadd.f32 %v11522_v54, %v4271_v5  ;;  %v4269_v43 = vadd.f32 %v4124_v11, %v14677_v23  ;;  %11759 = vmatprep.mubr.msk.bf16.mxu0 %vm817_vm2, %v8690_v36  ;;  %v14678_v42 = vld [vmem:[#allocation8_spill] sm:$0xff]  ;;  %v7759_v54 = vrot.slane %v12094_v29, 3  ;;  %v8715_v36 = vrot.slane %v8713_v40, 4  ;;  %v12105_v23 = vld [vmem:[%s12240_s7 + $0x78] sm:$0xff]  }
 0x1ee   : > { %v11459_v1 = vpop.f32.mrf.mxu1  ;;  %11690 = vmatmul.mubr.msk.bf16.gmra.mxu1 %vm817_vm2, %v7756_v59  ;;  %v5013_v38 = vpop.f32.mrf.mxu0  ;;  %v8708_v11 = vsel %vm8619_vm7, %v8698_v45, %v8707_v62  ;;  %v8721_v29 = vrot.slane %v8719_v58, 3  ;;  %v14681_v58 = vld [vmem:[#allocation9_spill] sm:$0xff] }
 0x1ef   : > { %v13660_v46 = vadd.f32 %v5000_v63, %v4269_v43  ;;  %v4274_v60 = vadd.f32 %v11459_v1, %v14678_v42  ;;  %11693 = vmatprep.mubr.msk.bf16.mxu1 %vm817_vm2, %v7758_v26  ;;  %v8699_v63 = vsel %vm8619_vm7, %v8689_v0, %v8698_v45  ;;  %v8724_v26 = vrot.slane %v8722_v24, 4  ;;  %v13680_v1 = vld [vmem:[%s12240_s7 + $0x68] sm:$0xff]  }
 0x1f0   : > { %v4137_v27 = vpop.f32.mrf.mxu1  ;;  %v11526_v5 = vpop.f32.mrf.mxu0  ;;  %v7762_v0 = vsel %vm7743_vm8, %v7759_v54, %v7761_v7  ;;  %v8716_v40 = vor.u32 %v8715_v36, %v8712_v3  ;;  %v14683_v3 = vld [vmem:[#allocation10_spill] sm:$0xff] }
 0x1f1   : > { %v13665_v59 = vadd.f32 %v11525_v10, %v4274_v60  ;;  %v4272_v47 = vadd.f32 %v4137_v27, %v13225_v34  ;;  %v7760_v60 = vsel %vm7743_vm8, %v7757_v18, %v7759_v54  ;;  %v12098_v10 = vld [vmem:[%s12240_s7 + $0x60] sm:$0xff]  }
 0x1f2   : > { %v11460_v19 = vpop.f32.mrf.mxu1  ;;  %v5016_v42 = vpop.f32.mrf.mxu0 }
 0x1f3   : > { %v13672_v43 = vadd.f32 %v5013_v38, %v4272_v47  ;;  %v4275_v61 = vadd.f32 %v11460_v19, %v13230_v49  ;;  %v8728_v38 = vshrl.u32 %v12103_v31, 16  ;;  %v8731_v49 = vshll.u32 %v12103_v31, 16 }
 0x1f4   : > { %v4140_v57 = vpop.f32.mrf.mxu1  ;;  %v11529_v34 = vpop.f32.mrf.mxu0  ;;  %11760 = vmatmul.mubr.msk.bf16.gmra.mxu0 %vm817_vm2, %v8699_v63  ;;  %v8725_v47 = vor.u32 %v8724_v26, %v8721_v29  ;;  %v8737_v63 = vshrl.u32 %v12105_v23, 16  ;;  %v8740_v19 = vshll.u32 %v12105_v23, 16  ;;  %v7765_v31 = vrot.slane %v13680_v1, 3 }
 0x1f5   : > { %14679 = vst [vmem:[#allocation38_spill] sm:$0xff] %v13672_v43  ;;  %v13682_v45 = vadd.f32 %v11526_v5, %v4275_v61  ;;  %v4273_v24 = vadd.f32 %v4140_v57, %v14681_v58  ;;  %11763 = vmatprep.mubr.msk.bf16.mxu0 %vm817_vm2, %v8708_v11  ;;  %v7763_v5 = vrot.slane %v12098_v10, 3  ;;  %v8717_v57 = vsel %vm8619_vm7, %v8707_v62, %v8716_v40  ;;  %v14686_v62 = vld [vmem:[#allocation11_spill] sm:$0xff] }
 0x1f6   : > { %v11463_v18 = vpop.f32.mrf.mxu1  ;;  %11694 = vmatmul.mubr.msk.bf16.gmra.mxu1 %vm817_vm2, %v7760_v60  ;;  %v5029_v27 = vpop.f32.mrf.mxu0  ;;  %v12107_v60 = vld [vmem:[%s12240_s7 + $0x80] sm:$0xff]   ;;  %v8733_v26 = vrot.slane %v8731_v49, 4  ;;  %v8739_v10 = vrot.slane %v8737_v63, 3 }
 0x1f7   : > { %14680 = vst [vmem:[#allocation39_spill] sm:$0xff] %v13682_v45  ;;  %v13687_v54 = vadd.f32 %v5016_v42, %v4273_v24  ;;  %v4278_v36 = vadd.f32 %v11463_v18, %v14683_v3  ;;  %11697 = vmatprep.mubr.msk.bf16.mxu1 %vm817_vm2, %v7762_v0  ;;  %v8730_v42 = vrot.slane %v8728_v38, 3  ;;  %v8726_v0 = vsel %vm8619_vm7, %v8716_v40, %v8725_v47  ;;  %v12109_v3 = vld [vmem:[%s12240_s7 + $0x88] sm:$0xff]   ;;  %v13707_v38 = vld [vmem:[%s12240_s7 + $0x78] sm:$0xff]  }
 0x1f8   : > { %v4153_v61 = vpop.f32.mrf.mxu1  ;;  %v11530_v11 = vpop.f32.mrf.mxu0  ;;  %v8742_v18 = vrot.slane %v8740_v19, 4  ;;  %v7764_v1 = vsel %vm7743_vm8, %v7761_v7, %v7763_v5  ;;  %v8746_v49 = vshrl.u32 %v12107_v60, 16  ;;  %v8749_v40 = vshll.u32 %v12107_v60, 16  ;;  %v14688_v19 = vld [vmem:[#allocation12_spill] sm:$0xff] }
 0x1f9   : > { %14682 = vst [vmem:[#allocation40_spill] sm:$0xff] %v13687_v54  ;;  %v13694_v58 = vadd.f32 %v11529_v34, %v4278_v36  ;;  %v4276_v29 = vadd.f32 %v4153_v61, %v13256_v25  ;;  %v12102_v34 = vld [vmem:[%s12240_s7 + $0x70] sm:$0xff]   ;;  %v7766_v25 = vsel %vm7743_vm8, %v7763_v5, %v7765_v31  ;;  %v8734_v61 = vor.u32 %v8733_v26, %v8730_v42 }
 0x1fa   : > { %v11464_v23 = vpop.f32.mrf.mxu1  ;;  %v5032_v24 = vpop.f32.mrf.mxu0  ;;  %v7769_v42 = vrot.slane %v13707_v38, 3  ;;  %v8748_v26 = vrot.slane %v8746_v49, 3  ;;  %v14694_v38 = vld [vmem:[#allocation15_spill] sm:$0xff] }
 0x1fb   : > { %14684 = vst [vmem:[#allocation41_spill] sm:$0xff] %v13694_v58  ;;  %v13699_v54 = vadd.f32 %v5029_v27, %v4276_v29  ;;  %v4279_v45 = vadd.f32 %v11464_v23, %v14686_v62  ;;  %v8743_v23 = vor.u32 %v8742_v18, %v8739_v10  ;;  %v8758_v62 = vshll.u32 %v12109_v3, 16  ;;  %v14692_v10 = vld [vmem:[#allocation14_spill] sm:$0xff] }
 0x1fc   : > { %v4156_v36 = vpop.f32.mrf.mxu1  ;;  %v11533_v58 = vpop.f32.mrf.mxu0  ;;  %11764 = vmatmul.mubr.msk.bf16.gmra.mxu0 %vm817_vm2, %v8717_v57  ;;  %v8755_v57 = vshrl.u32 %v12109_v3, 16  ;;  %v12111_v3 = vld [vmem:[%s12240_s7 + $0x90] sm:$0xff]  }
 0x1fd   : > { %14685 = vst [vmem:[#allocation42_spill] sm:$0xff] %v13699_v54  ;;  %v13709_v63 = vadd.f32 %v11530_v11, %v4279_v45  ;;  %v4277_v27 = vadd.f32 %v4156_v36, %v14688_v19  ;;  %11767 = vmatprep.mubr.msk.bf16.mxu0 %vm817_vm2, %v8726_v0  ;;  %v14690_v54 = vld [vmem:[#allocation13_spill] sm:$0xff]  ;;  %v7767_v45 = vrot.slane %v12102_v34, 3  ;;  %v8751_v0 = vrot.slane %v8749_v40, 4 }
 0x1fe   : > { %v11467_v29 = vpop.f32.mrf.mxu1  ;;  %11698 = vmatmul.mubr.msk.bf16.gmra.mxu1 %vm817_vm2, %v7764_v1  ;;  %v5045_v7 = vpop.f32.mrf.mxu0  ;;  %v8757_v34 = vrot.slane %v8755_v57, 3  ;;  %v8760_v19 = vrot.slane %v8758_v62, 4  ;;  %v14696_v57 = vld [vmem:[#allocation16_spill] sm:$0xff] }
 0x1ff   : > { %14687 = vst [vmem:[#allocation43_spill] sm:$0xff] %v13709_v63  ;;  %v13714_v5 = vadd.f32 %v5032_v24, %v4277_v27  ;;  %v4282_v43 = vadd.f32 %v11467_v29, %v14690_v54  ;;  %11701 = vmatprep.mubr.msk.bf16.mxu1 %vm817_vm2, %v7766_v25  ;;  %v8735_v24 = vsel %vm8619_vm7, %v8725_v47, %v8734_v61  ;;  %v12113_v27 = vld [vmem:[%s12240_s7 + $0x98] sm:$0xff]  }
 0x200   : > { %v4169_v11 = vpop.f32.mrf.mxu1  ;;  %v11534_v60 = vpop.f32.mrf.mxu0  ;;  %v8744_v25 = vsel %vm8619_vm7, %v8734_v61, %v8743_v23  ;;  %v7770_v47 = vsel %vm7743_vm8, %v7767_v45, %v7769_v42 }
 0x201   : > { %14689 = vst [vmem:[#allocation44_spill] sm:$0xff] %v13714_v5  ;;  %v13719_v1 = vadd.f32 %v11533_v58, %v4282_v43  ;;  %v4280_v18 = vadd.f32 %v4169_v11, %v14692_v10  ;;  %v7768_v43 = vsel %vm7743_vm8, %v7765_v31, %v7767_v45  ;;  %v12106_v58 = vld [vmem:[%s12240_s7 + $0x80] sm:$0xff]   ;;  %v8752_v10 = vor.u32 %v8751_v0, %v8748_v26  ;;  %v14698_v26 = vld [vmem:[#allocation17_spill] sm:$0xff] }
 0x202   : > { %v11468_v54 = vpop.f32.mrf.mxu1  ;;  %v5048_v36 = vpop.f32.mrf.mxu0 }
 0x203   : > { %14691 = vst [vmem:[#allocation3_spill] sm:$0xff] %v13719_v1  ;;  %v13726_v29 = vadd.f32 %v5045_v7, %v4280_v18  ;;  %v4283_v49 = vadd.f32 %v11468_v54, %v14694_v38  ;;  %v13734_v1 = vld [vmem:[%s12240_s7 + $0x88] sm:$0xff]   ;;  %v8764_v7 = vshrl.u32 %v12111_v3, 16  ;;  %v8767_v18 = vshll.u32 %v12111_v3, 16 }
 0x204   : > { %v4172_v40 = vpop.f32.mrf.mxu1  ;;  %v11537_v11 = vpop.f32.mrf.mxu0  ;;  %11768 = vmatmul.mubr.msk.bf16.gmra.mxu0 %vm817_vm2, %v8735_v24  ;;  %v8761_v38 = vor.u32 %v8760_v19, %v8757_v34  ;;  %v8773_v24 = vshrl.u32 %v12113_v27, 16  ;;  %v7773_v3 = vrot.slane %v13734_v1, 3  ;;  %v14700_v34 = vld [vmem:[#allocation18_spill] sm:$0xff] }
 0x205   : > { %14693 = vst [vmem:[#allocation4_spill] sm:$0xff] %v13726_v29  ;;  %v13736_v61 = vadd.f32 %v11534_v60, %v4283_v49  ;;  %v4281_v62 = vadd.f32 %v4172_v40, %v14696_v57  ;;  %11771 = vmatprep.mubr.msk.bf16.mxu0 %vm817_vm2, %v8744_v25  ;;  %v8776_v29 = vshll.u32 %v12113_v27, 16  ;;  %v7771_v60 = vrot.slane %v12106_v58, 3 }
 0x206   : > { %v11471_v31 = vpop.f32.mrf.mxu1  ;;  %11702 = vmatmul.mubr.msk.bf16.gmra.mxu1 %vm817_vm2, %v7768_v43  ;;  %v5061_v54 = vpop.f32.mrf.mxu0  ;;  %v8753_v40 = vsel %vm8619_vm7, %v8743_v23, %v8752_v10  ;;  %v12115_v43 = vld [vmem:[%s12240_s7 + $0xa0] sm:$0xff]   ;;  %v8769_v27 = vrot.slane %v8767_v18, 4  ;;  %v8775_v58 = vrot.slane %v8773_v24, 3  ;;  %v13761_v18 = vld [vmem:[%s12240_s7 + $0x98] sm:$0xff]  }
 0x207   : > { %14695 = vst [vmem:[#allocation5_spill] sm:$0xff] %v13736_v61  ;;  %v13741_v45 = vadd.f32 %v5048_v36, %v4281_v62  ;;  %v4286_v0 = vadd.f32 %v11471_v31, %v14698_v26  ;;  %11705 = vmatprep.mubr.msk.bf16.mxu1 %vm817_vm2, %v7770_v47  ;;  %v8766_v36 = vrot.slane %v8764_v7, 3  ;;  %v8762_v47 = vsel %vm8619_vm7, %v8752_v10, %v8761_v38  ;;  %v14702_v23 = vld [vmem:[#allocation19_spill] sm:$0xff] }
 0x208   : > { %v4185_v49 = vpop.f32.mrf.mxu1  ;;  %v11538_v25 = vpop.f32.mrf.mxu0  ;;  %v8778_v26 = vrot.slane %v8776_v29, 4  ;;  %v7772_v1 = vsel %vm7743_vm8, %v7769_v42, %v7771_v60  ;;  %v7774_v7 = vsel %vm7743_vm8, %v7771_v60, %v7773_v3  ;;  %v8785_v10 = vshll.u32 %v12115_v43, 16  ;;  %v14703_v29 = vld [vmem:[#allocation20_spill] sm:$0xff] }
 0x209   : > { %14697 = vst [vmem:[#allocation6_spill] sm:$0xff] %v13741_v45  ;;  %v13748_v57 = vadd.f32 %v11537_v11, %v4286_v0  ;;  %v4284_v19 = vadd.f32 %v4185_v49, %v14700_v34  ;;  %v12117_v45 = vld [vmem:[%s12240_s7 + $0xa8] sm:$0xff]   ;;  %v12110_v11 = vld [vmem:[%s12240_s7 + $0x90] sm:$0xff]   ;;  %v8782_v49 = vshrl.u32 %v12115_v43, 16  ;;  %v8770_v34 = vor.u32 %v8769_v27, %v8766_v36 }
 0x20a   : > { %v11472_v62 = vpop.f32.mrf.mxu1  ;;  %v5064_v31 = vpop.f32.mrf.mxu0  ;;  %v7777_v36 = vrot.slane %v13761_v18, 3  ;;  %v14707_v18 = vld [vmem:[#allocation22_spill] sm:$0xff] }
 0x20b   : > { %14699 = vst [vmem:[#allocation7_spill] sm:$0xff] %v13748_v57  ;;  %v13753_v61 = vadd.f32 %v5061_v54, %v4284_v19  ;;  %v4287_v5 = vadd.f32 %v11472_v62, %v14702_v23  ;;  %v8779_v62 = vor.u32 %v8778_v26, %v8775_v58  ;;  %v8794_v23 = vshll.u32 %v12117_v45, 16 }
 0x20c   : > { %v4188_v0 = vpop.f32.mrf.mxu1  ;;  %v11541_v57 = vpop.f32.mrf.mxu0  ;;  %11772 = vmatmul.mubr.msk.bf16.gmra.mxu0 %vm817_vm2, %v8753_v40  ;;  %v8791_v40 = vshrl.u32 %v12117_v45, 16  ;;  %v8784_v27 = vrot.slane %v8782_v49, 3  ;;  %v8771_v45 = vsel %vm8619_vm7, %v8761_v38, %v8770_v34 }
 0x20d   : > { %14701 = vst [vmem:[#allocation8_spill] sm:$0xff] %v13753_v61  ;;  %v13763_v24 = vadd.f32 %v11538_v25, %v4287_v5  ;;  %v4285_v54 = vadd.f32 %v4188_v0, %v14703_v29  ;;  %11775 = vmatprep.mubr.msk.bf16.mxu0 %vm817_vm2, %v8762_v47  ;;  %v14704_v61 = vld [vmem:[#allocation21_spill] sm:$0xff]  ;;  %v7775_v5 = vrot.slane %v12110_v11, 3  ;;  %v8787_v47 = vrot.slane %v8785_v10, 4  ;;  %v12121_v29 = vld [vmem:[%s12240_s7 + $0xb8] sm:$0xff]  }
 0x20e   : > { %v11475_v19 = vpop.f32.mrf.mxu1  ;;  %11706 = vmatmul.mubr.msk.bf16.gmra.mxu1 %vm817_vm2, %v7772_v1  ;;  %v5077_v42 = vpop.f32.mrf.mxu0  ;;  %v8780_v0 = vsel %vm8619_vm7, %v8770_v34, %v8779_v62  ;;  %v8793_v11 = vrot.slane %v8791_v40, 3  ;;  %v14709_v40 = vld [vmem:[#allocation23_spill] sm:$0xff] }
 0x20f   : > { %v13768_v60 = vadd.f32 %v5064_v31, %v4285_v54  ;;  %v4290_v63 = vadd.f32 %v11475_v19, %v14704_v61  ;;  %11709 = vmatprep.mubr.msk.bf16.mxu1 %vm817_vm2, %v7774_v7  ;;  %v12119_v31 = vld [vmem:[%s12240_s7 + $0xb0] sm:$0xff]   ;;  %v8796_v7 = vrot.slane %v8794_v23, 4  ;;  %v7778_v38 = vsel %vm7743_vm8, %v7775_v5, %v7777_v36 }
 0x210   : > { %v4201_v25 = vpop.f32.mrf.mxu1  ;;  %v11542_v43 = vpop.f32.mrf.mxu0  ;;  %v8788_v19 = vor.u32 %v8787_v47, %v8784_v27  ;;  %v14711_v27 = vld [vmem:[#allocation24_spill] sm:$0xff] }
 0x211   : > { %v13773_v1 = vadd.f32 %v11541_v57, %v4290_v63  ;;  %v4288_v58 = vadd.f32 %v4201_v25, %v13353_v51  ;;  %v7776_v63 = vsel %vm7743_vm8, %v7773_v3, %v7775_v5  ;;  %v12114_v57 = vld [vmem:[%s12240_s7 + $0xa0] sm:$0xff]   ;;  %v13788_v25 = vld [vmem:[%s12240_s7 + $0xa8] sm:$0xff]  }
 0x212   : > { %v11476_v61 = vpop.f32.mrf.mxu1  ;;  %v5080_v26 = vpop.f32.mrf.mxu0 }
 0x213   : > { %14705 = vst [vmem:[#allocation9_spill] sm:$0xff] %v13773_v1  ;;  %v13780_v54 = vadd.f32 %v5077_v42, %v4288_v58  ;;  %v4291_v49 = vadd.f32 %v11476_v61, %v14707_v18  ;;  %v8800_v42 = vshrl.u32 %v12119_v31, 16  ;;  %v8803_v58 = vshll.u32 %v12119_v31, 16 }
 0x214   : > { %v4204_v10 = vpop.f32.mrf.mxu1  ;;  %v11545_v51 = vpop.f32.mrf.mxu0  ;;  %11776 = vmatmul.mubr.msk.bf16.gmra.mxu0 %vm817_vm2, %v8771_v45  ;;  %v8797_v18 = vor.u32 %v8796_v7, %v8793_v11  ;;  %v8809_v45 = vshrl.u32 %v12121_v29, 16  ;;  %v7781_v31 = vrot.slane %v13788_v25, 3 }
 0x215   : > { %14706 = vst [vmem:[#allocation10_spill] sm:$0xff] %v13780_v54  ;;  %v13790_v34 = vadd.f32 %v11542_v43, %v4291_v49  ;;  %v4289_v23 = vadd.f32 %v4204_v10, %v14709_v40  ;;  %11779 = vmatprep.mubr.msk.bf16.mxu0 %vm817_vm2, %v8780_v0  ;;  %v8812_v54 = vshll.u32 %v12121_v29, 16  ;;  %v7779_v43 = vrot.slane %v12114_v57, 3 }
 0x216   : > { %v11479_v3 = vpop.f32.mrf.mxu1  ;;  %11710 = vmatmul.mubr.msk.bf16.gmra.mxu1 %vm817_vm2, %v7776_v63  ;;  %v5093_v61 = vpop.f32.mrf.mxu0  ;;  %v8789_v10 = vsel %vm8619_vm7, %v8779_v62, %v8788_v19  ;;  %v12123_v63 = vld [vmem:[%s12240_s7 + $0xc0] sm:$0xff]   ;;  %v8805_v7 = vrot.slane %v8803_v58, 4  ;;  %v8811_v57 = vrot.slane %v8809_v45, 3  ;;  %v14714_v62 = vld [vmem:[#allocation25_spill] sm:$0xff] }
 0x217   : > { %14708 = vst [vmem:[#allocation11_spill] sm:$0xff] %v13790_v34  ;;  %v13795_v5 = vadd.f32 %v5080_v26, %v4289_v23  ;;  %v4294_v47 = vadd.f32 %v11479_v3, %v14711_v27  ;;  %11713 = vmatprep.mubr.msk.bf16.mxu1 %vm817_vm2, %v7778_v38  ;;  %v8802_v26 = vrot.slane %v8800_v42, 3  ;;  %v8798_v38 = vsel %vm8619_vm7, %v8788_v19, %v8797_v18  ;;  %v12125_v27 = vld [vmem:[%s12240_s7 + $0xc8] sm:$0xff]   ;;  %v13815_v42 = vld [vmem:[%s12240_s7 + $0xb8] sm:$0xff]  }
 0x218   : > { %v4217_v49 = vpop.f32.mrf.mxu1  ;;  %v11546_v0 = vpop.f32.mrf.mxu0  ;;  %v8814_v3 = vrot.slane %v8812_v54, 4  ;;  %v7780_v25 = vsel %vm7743_vm8, %v7777_v36, %v7779_v43  ;;  %v8818_v58 = vshrl.u32 %v12123_v63, 16  ;;  %v8821_v19 = vshll.u32 %v12123_v63, 16  ;;  %v14715_v54 = vld [vmem:[#allocation26_spill] sm:$0xff] }
 0x219   : > { %14710 = vst [vmem:[#allocation12_spill] sm:$0xff] %v13795_v5  ;;  %v13802_v40 = vadd.f32 %v11545_v51, %v4294_v47  ;;  %v4292_v11 = vadd.f32 %v4217_v49, %v13377_v13  ;;  %v12118_v51 = vld [vmem:[%s12240_s7 + $0xb0] sm:$0xff]   ;;  %v7782_v13 = vsel %vm7743_vm8, %v7779_v43, %v7781_v31  ;;  %v8806_v49 = vor.u32 %v8805_v7, %v8802_v26 }
 0x21a   : > { %v11480_v29 = vpop.f32.mrf.mxu1  ;;  %v5096_v23 = vpop.f32.mrf.mxu0  ;;  %v7785_v26 = vrot.slane %v13815_v42, 3  ;;  %v8820_v7 = vrot.slane %v8818_v58, 3 }
 0x21b   : > { %14712 = vst [vmem:[#allocation13_spill] sm:$0xff] %v13802_v40  ;;  %v13807_v5 = vadd.f32 %v5093_v61, %v4292_v11  ;;  %v4295_v34 = vadd.f32 %v11480_v29, %v14714_v62  ;;  %v8815_v29 = vor.u32 %v8814_v3, %v8811_v57  ;;  %v8830_v62 = vshll.u32 %v12125_v27, 16  ;;  %v12127_v3 = vld [vmem:[%s12240_s7 + $0xd0] sm:$0xff]  }
 0x21c   : > { %v4220_v47 = vpop.f32.mrf.mxu1  ;;  %v11617_v40 = vpop.f32.mrf.mxu0  ;;  %11780 = vmatmul.mubr.msk.bf16.gmra.mxu0 %vm817_vm2, %v8789_v10  ;;  %v8827_v10 = vshrl.u32 %v12125_v27, 16 }
 0x21d   : > { %14713 = vst [vmem:[#allocation14_spill] sm:$0xff] %v13807_v5  ;;  %v13817_v45 = vadd.f32 %v11546_v0, %v4295_v34  ;;  %v4293_v61 = vadd.f32 %v4220_v47, %v14715_v54  ;;  %11783 = vmatprep.mubr.msk.bf16.mxu0 %vm817_vm2, %v8798_v38  ;;  %v14716_v5 = vld [vmem:[#allocation27_spill] sm:$0xff]  ;;  %v7783_v34 = vrot.slane %v12118_v51, 3  ;;  %v8823_v38 = vrot.slane %v8821_v19, 4  ;;  %v12129_v54 = vld [vmem:[%s12240_s7 + $0xd8] sm:$0xff]  }
 0x21e   : > { %v11551_v11 = vpop.f32.mrf.mxu1  ;;  %11714 = vmatmul.mubr.msk.bf16.gmra.mxu1 %vm817_vm2, %v7780_v25  ;;  %v7066_v36 = vpop.f32.mrf.mxu0  ;;  %v8816_v47 = vsel %vm8619_vm7, %v8806_v49, %v8815_v29  ;;  %v8829_v51 = vrot.slane %v8827_v10, 3 }
 0x21f   : > { %v13822_v43 = vadd.f32 %v5096_v23, %v4293_v61  ;;  %v6217_v1 = vadd.f32 %v11551_v11, %v14716_v5  ;;  %11717 = vmatprep.mubr.msk.bf16.mxu1 %vm817_vm2, %v7782_v13  ;;  %v8807_v23 = vsel %vm8619_vm7, %v8797_v18, %v8806_v49  ;;  %v8832_v13 = vrot.slane %v8830_v62, 4  ;;  %v13842_v11 = vld [vmem:[%s12240_s7 + $0xc8] sm:$0xff]  }
 0x220   : > { %v5960_v0 = vpop.f32.mrf.mxu1  ;;  %v11618_v63 = vpop.f32.mrf.mxu0  ;;  %v7786_v18 = vsel %vm7743_vm8, %v7783_v34, %v7785_v26  ;;  %v8824_v19 = vor.u32 %v8823_v38, %v8820_v7  ;;  %v14718_v7 = vld [vmem:[#allocation28_spill] sm:$0xff] }
 0x221   : > { %v13827_v25 = vadd.f32 %v11617_v40, %v6217_v1  ;;  %v6215_v57 = vadd.f32 %v5960_v0, %v13404_v21  ;;  %v7784_v1 = vsel %vm7743_vm8, %v7781_v31, %v7783_v34  ;;  %v12122_v40 = vld [vmem:[%s12240_s7 + $0xc0] sm:$0xff]   ;;  %v8833_v0 = vor.u32 %v8832_v13, %v8829_v51 }
 0x222   : > { %v11552_v5 = vpop.f32.mrf.mxu1  ;;  %v7069_v27 = vpop.f32.mrf.mxu0 }
 0x223   : > { %v13834_v61 = vadd.f32 %v7066_v36, %v6215_v57  ;;  %v6218_v42 = vadd.f32 %v11552_v5, %v13408_v37  ;;  %v8836_v36 = vshrl.u32 %v12127_v3, 16  ;;  %v8839_v37 = vshll.u32 %v12127_v3, 16 }
 0x224   : > { %v5963_v58 = vpop.f32.mrf.mxu1  ;;  %v11621_v21 = vpop.f32.mrf.mxu0  ;;  %11784 = vmatmul.mubr.msk.bf16.gmra.mxu0 %vm817_vm2, %v8807_v23  ;;  %v8845_v57 = vshrl.u32 %v12129_v54, 16  ;;  %v8848_v23 = vshll.u32 %v12129_v54, 16  ;;  %v7789_v3 = vrot.slane %v13842_v11, 3 }
 0x225   : > { %v13844_v49 = vadd.f32 %v11618_v63, %v6218_v42  ;;  %v6216_v10 = vadd.f32 %v5963_v58, %v13413_v28  ;;  %11787 = vmatprep.mubr.msk.bf16.mxu0 %vm817_vm2, %v8816_v47  ;;  %v7787_v28 = vrot.slane %v12122_v40, 3  ;;  %v8825_v47 = vsel %vm8619_vm7, %v8815_v29, %v8824_v19  ;;  %v12131_v42 = vld [vmem:[%s12240_s7 + $0xe0] sm:$0xff]  }
 0x226   : > { %v11555_v31 = vpop.f32.mrf.mxu1  ;;  %11718 = vmatmul.mubr.msk.bf16.gmra.mxu1 %vm817_vm2, %v7784_v1  ;;  %v7082_v62 = vpop.f32.mrf.mxu0  ;;  %v8841_v13 = vrot.slane %v8839_v37, 4  ;;  %v8847_v40 = vrot.slane %v8845_v57, 3  ;;  %v8854_v37 = vshrl.u32 %v12131_v42, 16 }
 0x227   : > { %v13849_v34 = vadd.f32 %v7069_v27, %v6216_v10  ;;  %v6221_v38 = vadd.f32 %v11555_v31, %v14718_v7  ;;  %11721 = vmatprep.mubr.msk.bf16.mxu1 %vm817_vm2, %v7786_v18  ;;  %v8838_v27 = vrot.slane %v8836_v36, 3  ;;  %v8834_v18 = vsel %vm8619_vm7, %v8824_v19, %v8833_v0  ;;  %v12133_v31 = vld [vmem:[%s12240_s7 + $0xe8] sm:$0xff]   ;;  %v13869_v36 = vld [vmem:[%s12240_s7 + $0xd8] sm:$0xff]  }
 0x228   : > { %v5976_v63 = vpop.f32.mrf.mxu1  ;;  %v11622_v5 = vpop.f32.mrf.mxu0  ;;  %v8850_v10 = vrot.slane %v8848_v23, 4  ;;  %v7788_v11 = vsel %vm7743_vm8, %v7785_v26, %v7787_v28  ;;  %v8857_v19 = vshll.u32 %v12131_v42, 16  ;;  %v14721_v23 = vld [vmem:[#allocation29_spill] sm:$0xff] }
 0x229   : > { %14717 = vst [vmem:[#allocation15_spill] sm:$0xff] %v13849_v34  ;;  %v13856_v1 = vadd.f32 %v11621_v21, %v6221_v38  ;;  %v6219_v51 = vadd.f32 %v5976_v63, %v13429_v32  ;;  %v12126_v21 = vld [vmem:[%s12240_s7 + $0xd0] sm:$0xff]   ;;  %v7790_v32 = vsel %vm7743_vm8, %v7787_v28, %v7789_v3 }
 0x22a   : > { %v11556_v54 = vpop.f32.mrf.mxu1  ;;  %v7085_v58 = vpop.f32.mrf.mxu0 }
 0x22b   : > { %14719 = vst [vmem:[#allocation16_spill] sm:$0xff] %v13856_v1  ;;  %v13861_v7 = vadd.f32 %v7082_v62, %v6219_v51  ;;  %v6222_v29 = vadd.f32 %v11556_v54, %v13433_v17  ;;  %v8842_v17 = vor.u32 %v8841_v13, %v8838_v27  ;;  %v8851_v51 = vor.u32 %v8850_v10, %v8847_v40  ;;  %v14724_v40 = vld [vmem:[#allocation31_spill] sm:$0xff] }
 0x22c   : > { %v5979_v38 = vpop.f32.mrf.mxu1  ;;  %v11625_v1 = vpop.f32.mrf.mxu0  ;;  %11788 = vmatmul.mubr.msk.bf16.gmra.mxu0 %vm817_vm2, %v8825_v47  ;;  %v8863_v47 = vshrl.u32 %v12133_v31, 16  ;;  %v8866_v54 = vshll.u32 %v12133_v31, 16  ;;  %v7793_v27 = vrot.slane %v13869_v36, 3  ;;  %v8856_v13 = vrot.slane %v8854_v37, 3  ;;  %v12135_v31 = vld [vmem:[%s12240_s7 + $0xf0] sm:$0xff]   ;;  %v14726_v36 = vld [vmem:[#allocation32_spill] sm:$0xff] }
 0x22d   : > { %14720 = vst [vmem:[#allocation17_spill] sm:$0xff] %v13861_v7  ;;  %v13871_v57 = vadd.f32 %v11622_v5, %v6222_v29  ;;  %v6220_v62 = vadd.f32 %v5979_v38, %v14721_v23  ;;  %11791 = vmatprep.mubr.msk.bf16.mxu0 %vm817_vm2, %v8834_v18  ;;  %v14722_v7 = vld [vmem:[#allocation30_spill] sm:$0xff]  ;;  %v7791_v5 = vrot.slane %v12126_v21, 3  ;;  %v8859_v18 = vrot.slane %v8857_v19, 4 }
 0x22e   : > { %v11559_v63 = vpop.f32.mrf.mxu1  ;;  %11722 = vmatmul.mubr.msk.bf16.gmra.mxu1 %vm817_vm2, %v7788_v11  ;;  %v7098_v26 = vpop.f32.mrf.mxu0  ;;  %v8865_v21 = vrot.slane %v8863_v47, 3  ;;  %v8868_v23 = vrot.slane %v8866_v54, 4  ;;  %v14728_v47 = vld [vmem:[#allocation33_spill] sm:$0xff] }
 0x22f   : > { %v13876_v28 = vadd.f32 %v7085_v58, %v6220_v62  ;;  %v6225_v34 = vadd.f32 %v11559_v63, %v14722_v7  ;;  %11725 = vmatprep.mubr.msk.bf16.mxu1 %vm817_vm2, %v7790_v32  ;;  %v8843_v58 = vsel %vm8619_vm7, %v8833_v0, %v8842_v17  ;;  %v8852_v32 = vsel %vm8619_vm7, %v8842_v17, %v8851_v51  ;;  %v12137_v62 = vld [vmem:[%s12240_s7 + $0xf8] sm:$0xff]  }
 0x230   : > { %v5992_v42 = vpop.f32.mrf.mxu1  ;;  %v11626_v29 = vpop.f32.mrf.mxu0  ;;  %v7794_v0 = vsel %vm7743_vm8, %v7791_v5, %v7793_v27 }
 0x231   : > { %v13881_v11 = vadd.f32 %v11625_v1, %v6225_v34  ;;  %v6223_v10 = vadd.f32 %v5992_v42, %v14724_v40  ;;  %v7792_v34 = vsel %vm7743_vm8, %v7789_v3, %v7791_v5  ;;  %v12130_v1 = vld [vmem:[%s12240_s7 + $0xe0] sm:$0xff]   ;;  %v8860_v40 = vor.u32 %v8859_v18, %v8856_v13  ;;  %v14730_v13 = vld [vmem:[#allocation34_spill] sm:$0xff] }
 0x232   : > { %v11560_v7 = vpop.f32.mrf.mxu1  ;;  %v7101_v38 = vpop.f32.mrf.mxu0 }
 0x233   : > { %14723 = vst [vmem:[#allocation18_spill] sm:$0xff] %v13881_v11  ;;  %v13888_v63 = vadd.f32 %v7098_v26, %v6223_v10  ;;  %v6226_v37 = vadd.f32 %v11560_v7, %v14726_v36  ;;  %v13896_v11 = vld [vmem:[%s12240_s7 + $0xe8] sm:$0xff]   ;;  %v8872_v26 = vshrl.u32 %v12135_v31, 16  ;;  %v8875_v10 = vshll.u32 %v12135_v31, 16 }
 0x234   : > { %v5995_v19 = vpop.f32.mrf.mxu1  ;;  %v11629_v42 = vpop.f32.mrf.mxu0  ;;  %11792 = vmatmul.mubr.msk.bf16.gmra.mxu0 %vm817_vm2, %v8843_v58  ;;  %v8869_v36 = vor.u32 %v8868_v23, %v8865_v21  ;;  %v8881_v58 = vshrl.u32 %v12137_v62, 16  ;;  %v7797_v31 = vrot.slane %v13896_v11, 3  ;;  %v14732_v21 = vld [vmem:[#allocation35_spill] sm:$0xff] }
 0x235   : > { %14725 = vst [vmem:[#allocation19_spill] sm:$0xff] %v13888_v63  ;;  %v13898_v17 = vadd.f32 %v11626_v29, %v6226_v37  ;;  %v6224_v54 = vadd.f32 %v5995_v19, %v14728_v47  ;;  %11795 = vmatprep.mubr.msk.bf16.mxu0 %vm817_vm2, %v8852_v32  ;;  %v8884_v63 = vshll.u32 %v12137_v62, 16  ;;  %v7795_v29 = vrot.slane %v12130_v1, 3 }
 0x236   : > { %v11563_v3 = vpop.f32.mrf.mxu1  ;;  %11726 = vmatmul.mubr.msk.bf16.gmra.mxu1 %vm817_vm2, %v7792_v34  ;;  %v7114_v7 = vpop.f32.mrf.mxu0  ;;  %v8861_v19 = vsel %vm8619_vm7, %v8851_v51, %v8860_v40  ;;  %v12139_v34 = vld [vmem:[%s12240_s7 + $0x100] sm:$0xff]   ;;  %v8877_v62 = vrot.slane %v8875_v10, 4  ;;  %v8883_v1 = vrot.slane %v8881_v58, 3  ;;  %v13923_v10 = vld [vmem:[%s12240_s7 + $0xf8] sm:$0xff]  }
 0x237   : > { %14727 = vst [vmem:[#allocation20_spill] sm:$0xff] %v13898_v17  ;;  %v13903_v5 = vadd.f32 %v7101_v38, %v6224_v54  ;;  %v6229_v18 = vadd.f32 %v11563_v3, %v14730_v13  ;;  %11729 = vmatprep.mubr.msk.bf16.mxu1 %vm817_vm2, %v7794_v0  ;;  %v8874_v38 = vrot.slane %v8872_v26, 3  ;;  %v8870_v0 = vsel %vm8619_vm7, %v8860_v40, %v8869_v36 }
 0x238   : > { %v6008_v37 = vpop.f32.mrf.mxu1  ;;  %v11630_v32 = vpop.f32.mrf.mxu0  ;;  %v8886_v13 = vrot.slane %v8884_v63, 4  ;;  %v7796_v11 = vsel %vm7743_vm8, %v7793_v27, %v7795_v29  ;;  %v7798_v26 = vsel %vm7743_vm8, %v7795_v29, %v7797_v31  ;;  %v8893_v40 = vshll.u32 %v12139_v34, 16 }
 0x239   : > { %14729 = vst [vmem:[#allocation21_spill] sm:$0xff] %v13903_v5  ;;  %v13910_v47 = vadd.f32 %v11629_v42, %v6229_v18  ;;  %v6227_v23 = vadd.f32 %v6008_v37, %v14732_v21  ;;  %v12141_v5 = vld [vmem:[%s12240_s7 + $0x108] sm:$0xff]   ;;  %v12134_v42 = vld [vmem:[%s12240_s7 + $0xf0] sm:$0xff]   ;;  %v8890_v37 = vshrl.u32 %v12139_v34, 16 }
 0x23a   : > { %v11564_v54 = vpop.f32.mrf.mxu1  ;;  %v7117_v3 = vpop.f32.mrf.mxu0  ;;  %v8887_v21 = vor.u32 %v8886_v13, %v8883_v1 }
 0x23b   : > { %14731 = vst [vmem:[#allocation22_spill] sm:$0xff] %v13910_v47  ;;  %v13915_v17 = vadd.f32 %v7114_v7, %v6227_v23  ;;  %v6230_v51 = vadd.f32 %v11564_v54, %v13491_v2  ;;  %v8878_v2 = vor.u32 %v8877_v62, %v8874_v38  ;;  %v8902_v23 = vshll.u32 %v12141_v5, 16 }
 0x23c   : > { %v6011_v18 = vpop.f32.mrf.mxu1  ;;  %v11633_v47 = vpop.f32.mrf.mxu0  ;;  %11796 = vmatmul.mubr.msk.bf16.gmra.mxu0 %vm817_vm2, %v8861_v19  ;;  %v8899_v19 = vshrl.u32 %v12141_v5, 16  ;;  %v7801_v38 = vrot.slane %v13923_v10, 3  ;;  %v8892_v62 = vrot.slane %v8890_v37, 3 }
 0x23d   : > { %v13925_v58 = vadd.f32 %v11630_v32, %v6230_v51  ;;  %v6228_v63 = vadd.f32 %v6011_v18, %v13496_v52  ;;  %11799 = vmatprep.mubr.msk.bf16.mxu0 %vm817_vm2, %v8870_v0  ;;  %v7799_v32 = vrot.slane %v12134_v42, 3  ;;  %v8895_v0 = vrot.slane %v8893_v40, 4 }
 0x23e   : > { %v11567_v7 = vpop.f32.mrf.mxu1  ;;  %11730 = vmatmul.mubr.msk.bf16.gmra.mxu1 %vm817_vm2, %v7796_v11  ;;  %v7130_v27 = vpop.f32.mrf.mxu0  ;;  %v8879_v5 = vsel %vm8619_vm7, %v8869_v36, %v8878_v2  ;;  %v8888_v11 = vsel %vm8619_vm7, %v8878_v2, %v8887_v21  ;;  %v8901_v42 = vrot.slane %v8899_v19, 3  ;;  %v8904_v18 = vrot.slane %v8902_v23, 4 }
 0x23f   : > { %v13930_v29 = vadd.f32 %v7117_v3, %v6228_v63  ;;  %v6233_v54 = vadd.f32 %v11567_v7, %v13500_v14  ;;  %11733 = vmatprep.mubr.msk.bf16.mxu1 %vm817_vm2, %v7798_v26  ;;  %v12143_v3 = vld [vmem:[%s12240_s7 + $0x110] ss:$0 sps:$4 sm:$0xff]   ;;  %v7800_v37 = vsel %vm7743_vm8, %v7797_v31, %v7799_v32  ;;  %v8896_v36 = vor.u32 %v8895_v0, %v8892_v62  ;;  %v12140_v7 = vld [vmem:[%s12240_s7 + $0x108] sm:$0xff]  }
 0x240   : > { %v6024_v34 = vpop.f32.mrf.mxu1  ;;  %v11634_v52 = vpop.f32.mrf.mxu0  ;;  %v8911_v19 = vshll.u32 %v12143_v3, 16  ;;  %v8905_v23 = vor.u32 %v8904_v18, %v8901_v42  ;;  %v7805_v0 = vrot.slane %v12140_v7, 3 }
 0x241   : > { %v13935_v51 = vadd.f32 %v11633_v47, %v6233_v54  ;;  %v6231_v1 = vadd.f32 %v6024_v34, %v13511_v56  ;;  %v12138_v47 = vld [vmem:[%s12240_s7 + $0x100] sm:$0xff]   ;;  %v7802_v56 = vsel %vm7743_vm8, %v7799_v32, %v7801_v38 }
 0x242   : > { %v11568_v13 = vpop.f32.mrf.mxu1  ;;  %v7133_v14 = vpop.f32.mrf.mxu0  ;;  %v7803_v32 = vrot.slane %v12138_v47, 3  ;;  %v8906_v18 = vsel %vm8619_vm7, %v8896_v36, %v8905_v23  ;;  %v12142_v47 = vld [vmem:[%s12240_s7 + $0x110] ss:$0 sps:$4 sm:$0x77]  }
 0x243   : > { %v13941_v26 = vadd.f32 %v7130_v27, %v6231_v1  ;;  %v6234_v10 = vadd.f32 %v11568_v13, %v13519_v39  ;;  %v8908_v27 = vshrl.u32 %v12143_v3, 16 }
 0x244   : > { %v6027_v40 = vpop.f32.mrf.mxu1  ;;  %v11637_v63 = vpop.f32.mrf.mxu0  ;;  %11800 = vmatmul.mubr.msk.bf16.gmra.mxu0 %vm817_vm2, %v8879_v5 }
 0x245   : > { %v13949_v54 = vadd.f32 %v11634_v52, %v6234_v10  ;;  %v6232_v2 = vadd.f32 %v6027_v40, %v13524_v12  ;;  %11803 = vmatprep.mubr.msk.bf16.mxu0 %vm817_vm2, %v8888_v11  ;;  %v8897_v12 = vsel %vm8619_vm7, %v8887_v21, %v8896_v36  ;;  %v8910_v13 = vrot.slane %v8908_v27, 3 }
 0x246   : > { %v11571_v39 = vpop.f32.mrf.mxu1  ;;  %11734 = vmatmul.mubr.msk.bf16.gmra.mxu1 %vm817_vm2, %v7800_v37  ;;  %v7146_v31 = vpop.f32.mrf.mxu0  ;;  %v8913_v11 = vrot.slane %v8911_v19, 4  ;;  %v7804_v37 = vsel %vm7743_vm8, %v7801_v38, %v7803_v32  ;;  %v7807_v27 = vrot.slane %v12142_v47, 3 }
 0x247   : > { %v13954_v34 = vadd.f32 %v7133_v14, %v6232_v2  ;;  %v6237_v1 = vadd.f32 %v11571_v39, %v13533_v55  ;;  %11737 = vmatprep.mubr.msk.bf16.mxu1 %vm817_vm2, %v7802_v56 }
 0x248   : > { %v6040_v52 = vpop.f32.mrf.mxu1  ;;  %v11638_v62 = vpop.f32.mrf.mxu0  ;;  %v8914_v36 = vor.u32 %v8913_v11, %v8910_v13 }
 0x249   : > { %v13959_v5 = vadd.f32 %v11637_v63, %v6237_v1  ;;  %v6235_v3 = vadd.f32 %v6040_v52, %v13537_v48  ;;  %v7806_v63 = vsel %vm7743_vm8, %v7803_v32, %v7805_v0 }
 0x24a   : > { %v11572_v42 = vpop.f32.mrf.mxu1  ;;  %v7149_v14 = vpop.f32.mrf.mxu0  ;;  %v8915_v1 = vsel %vm8619_vm7, %v8905_v23, %v8914_v36 }
 0x24b   : > { %v13963_v55 = vadd.f32 %v7146_v31, %v6235_v3  ;;  %v6238_v10 = vadd.f32 %v11572_v42, %v13546_v15  ;;  %v7808_v3 = vsel %vm7743_vm8, %v7805_v0, %v7807_v27 }
 0x24c   : > { %v6043_v40 = vpop.f32.mrf.mxu1  ;;  %v11641_v21 = vpop.f32.mrf.mxu0  ;;  %11804 = vmatmul.mubr.msk.bf16.gmra.mxu0 %vm817_vm2, %v8897_v12 }
 0x24d   : > { %v13970_v48 = vadd.f32 %v11638_v62, %v6238_v10  ;;  %v6236_v56 = vadd.f32 %v6043_v40, %v13551_v9  ;;  %11807 = vmatprep.mubr.msk.bf16.mxu0 %vm817_vm2, %v8906_v18 }
 0x24e   : > { %v11575_v7 = vpop.f32.mrf.mxu1  ;;  %11738 = vmatmul.mubr.msk.bf16.gmra.mxu1 %vm817_vm2, %v7804_v37  ;;  %v7162_v15 = vpop.f32.mrf.mxu0 }
 0x24f   : > { %v13975_v2 = vadd.f32 %v7149_v14, %v6236_v56  ;;  %v6241_v38 = vadd.f32 %v11575_v7, %v13556_v4  ;;  %11741 = vmatprep.mubr.msk.bf16.mxu1 %vm817_vm2, %v7806_v63 }
 0x250   : > { %v6056_v19 = vpop.f32.mrf.mxu1  ;;  %v11642_v39 = vpop.f32.mrf.mxu0 }
 0x251   : > { %v13979_v31 = vadd.f32 %v11641_v21, %v6241_v38  ;;  %v6239_v9 = vadd.f32 %v6056_v19, %v13564_v35 }
 0x252   : > { %v11576_v32 = vpop.f32.mrf.mxu1  ;;  %v7165_v52 = vpop.f32.mrf.mxu0 }
 0x253   : > { %v13983_v62 = vadd.f32 %v7162_v15, %v6239_v9  ;;  %v6242_v12 = vadd.f32 %v11576_v32, %v13574_v16 }
 0x254   : > { %v6059_v4 = vpop.f32.mrf.mxu1  ;;  %v11645_v13 = vpop.f32.mrf.mxu0  ;;  %11808 = vmatmul.mubr.msk.bf16.gmra.mxu0 %vm817_vm2, %v8915_v1 }
 0x255   : > { %v13988_v11 = vadd.f32 %v11642_v39, %v6242_v12  ;;  %v6240_v42 = vadd.f32 %v6059_v4, %v13579_v50 }
 0x256   : > { %v11579_v14 = vpop.f32.mrf.mxu1  ;;  %11742 = vmatmul.mubr.msk.bf16.gmra.mxu1 %vm817_vm2, %v7808_v3  ;;  %v7178_v35 = vpop.f32.mrf.mxu0 }
 0x257   : > { %v13992_v23 = vadd.f32 %v7165_v52, %v6240_v42  ;;  %v6245_v18 = vadd.f32 %v11579_v14, %v13586_v30  ;;  %v14733_v14 = vld [vmem:[#allocation36_spill] sm:$0xff] }
 0x258   : > { %v6072_v10 = vpop.f32.mrf.mxu1  ;;  %v11646_v16 = vpop.f32.mrf.mxu0 }
 0x259   : > { %v13995_v37 = vadd.f32 %v11645_v13, %v6245_v18  ;;  %v6243_v0 = vadd.f32 %v6072_v10, %v13591_v33 }
 0x25a   : > { %v11580_v47 = vpop.f32.mrf.mxu1  ;;  %v7181_v40 = vpop.f32.mrf.mxu0 }
 0x25b   : > { %v13998_v21 = vadd.f32 %v7178_v35, %v6243_v0  ;;  %v6246_v50 = vadd.f32 %v11580_v47, %v13601_v53 }
 0x25c   : > { %v6075_v63 = vpop.f32.mrf.mxu1  ;;  %v11649_v56 = vpop.f32.mrf.mxu0 }
 0x25d   : > { %v14001_v36 = vadd.f32 %v11646_v16, %v6246_v50  ;;  %v6244_v7 = vadd.f32 %v6075_v63, %v13606_v8  ;;  %v14734_v16 = vld [vmem:[#allocation37_spill] sm:$0xff] }
 0x25e   : > { %v11583_v15 = vpop.f32.mrf.mxu1  ;;  %v7194_v30 = vpop.f32.mrf.mxu0 }
 0x25f   : > { %v14004_v38 = vadd.f32 %v7181_v40, %v6244_v7  ;;  %v6249_v27 = vadd.f32 %v11583_v15, %v13611_v22 }
 0x260   : > { %v6088_v19 = vpop.f32.mrf.mxu1  ;;  %v11650_v33 = vpop.f32.mrf.mxu0 }
 0x261   : > { %v14007_v39 = vadd.f32 %v11649_v56, %v6249_v27  ;;  %v6247_v9 = vadd.f32 %v6088_v19, %v13618_v41 }
 0x262   : > { %v11584_v1 = vpop.f32.mrf.mxu1  ;;  %v7197_v53 = vpop.f32.mrf.mxu0 }
 0x263   : > { %v14010_v32 = vadd.f32 %v7194_v30, %v6247_v9  ;;  %v6250_v52 = vadd.f32 %v11584_v1, %v13628_v44 }
 0x264   : > { %v6091_v12 = vpop.f32.mrf.mxu1  ;;  %v11653_v8 = vpop.f32.mrf.mxu0 }
 0x265   : > { %v14013_v3 = vadd.f32 %v11650_v33, %v6250_v52  ;;  %v6248_v4 = vadd.f32 %v6091_v12, %v13633_v6 }
 0x266   : > { %v11587_v13 = vpop.f32.mrf.mxu1  ;;  %v7210_v22 = vpop.f32.mrf.mxu0 }
 0x267   : > { %v14016_v42 = vadd.f32 %v7197_v53, %v6248_v4  ;;  %v6253_v35 = vadd.f32 %v11587_v13, %v14733_v14  ;;  %v14735_v53 = vld [vmem:[#allocation38_spill] sm:$0xff]  ;;  %v14736_v4 = vld [vmem:[#allocation39_spill] sm:$0xff] }
 0x268   : > { %v6104_v18 = vpop.f32.mrf.mxu1  ;;  %v11654_v41 = vpop.f32.mrf.mxu0 }
 0x269   : > { %v14019_v10 = vadd.f32 %v11653_v8, %v6253_v35  ;;  %v6251_v0 = vadd.f32 %v6104_v18, %v14734_v16  ;;  %v14737_v35 = vld [vmem:[#allocation40_spill] sm:$0xff] }
 0x26a   : > { %v11588_v47 = vpop.f32.mrf.mxu1  ;;  %v7213_v44 = vpop.f32.mrf.mxu0 }
 0x26b   : > { %v14022_v40 = vadd.f32 %v7210_v22, %v6251_v0  ;;  %v6254_v50 = vadd.f32 %v11588_v47, %v13655_v20  ;;  %v14738_v0 = vld [vmem:[#allocation41_spill] sm:$0xff] }
 0x26c   : > { %v6107_v63 = vpop.f32.mrf.mxu1  ;;  %v11657_v6 = vpop.f32.mrf.mxu0 }
 0x26d   : > { %v14025_v56 = vadd.f32 %v11654_v41, %v6254_v50  ;;  %v6252_v7 = vadd.f32 %v6107_v63, %v13660_v46 }
 0x26e   : > { %v11591_v15 = vpop.f32.mrf.mxu1  ;;  %v7226_v30 = vpop.f32.mrf.mxu0 }
 0x26f   : > { %v14028_v27 = vadd.f32 %v7213_v44, %v6252_v7  ;;  %v6257_v19 = vadd.f32 %v11591_v15, %v13665_v59 }
 0x270   : > { %v6120_v33 = vpop.f32.mrf.mxu1  ;;  %v11658_v9 = vpop.f32.mrf.mxu0 }
 0x271   : > { %v14031_v1 = vadd.f32 %v11657_v6, %v6257_v19  ;;  %v6255_v52 = vadd.f32 %v6120_v33, %v14735_v53  ;;  %v14739_v6 = vld [vmem:[#allocation42_spill] sm:$0xff]  ;;  %v14741_v33 = vld [vmem:[#allocation43_spill] sm:$0xff] }
 0x272   : > { %v11592_v12 = vpop.f32.mrf.mxu1  ;;  %v7229_v20 = vpop.f32.mrf.mxu0 }
 0x273   : > { %v14034_v8 = vadd.f32 %v7226_v30, %v6255_v52  ;;  %v6258_v13 = vadd.f32 %v11592_v12, %v14736_v4 }
 0x274   : > { %v6123_v22 = vpop.f32.mrf.mxu1  ;;  %v11661_v46 = vpop.f32.mrf.mxu0 }
 0x275   : > { %v14037_v14 = vadd.f32 %v11658_v9, %v6258_v13  ;;  %v6256_v18 = vadd.f32 %v6123_v22, %v14737_v35 }
 0x276   : > { %v11595_v41 = vpop.f32.mrf.mxu1  ;;  %v7242_v59 = vpop.f32.mrf.mxu0 }
 0x277   : > { %v14040_v16 = vadd.f32 %v7229_v20, %v6256_v18  ;;  %v6261_v47 = vadd.f32 %v11595_v41, %v14738_v0  ;;  %v14743_v20 = vld [vmem:[#allocation44_spill] sm:$0xff] }
 0x278   : > { %v6136_v44 = vpop.f32.mrf.mxu1  ;;  %v11662_v50 = vpop.f32.mrf.mxu0 }
 0x279   : > { %v14043_v63 = vadd.f32 %v11661_v46, %v6261_v47  ;;  %v6259_v7 = vadd.f32 %v6136_v44, %v14739_v6  ;;  %v14745_v46 = vld [vmem:[#allocation3_spill] sm:$0xff] }
 0x27a   : > { %v11596_v15 = vpop.f32.mrf.mxu1  ;;  %v7245_v30 = vpop.f32.mrf.mxu0 }
 0x27b   : > { %v14046_v19 = vadd.f32 %v7242_v59, %v6259_v7  ;;  %v6262_v9 = vadd.f32 %v11596_v15, %v14741_v33  ;;  %v14747_v59 = vld [vmem:[#allocation4_spill] sm:$0xff] }
 0x27c   : > { %v6139_v53 = vpop.f32.mrf.mxu1  ;;  %v11665_v52 = vpop.f32.mrf.mxu0 }
 0x27d   : > { %14740 = vst [vmem:[#allocation23_spill] sm:$0xff] %v14046_v19  ;;  %v14049_v12 = vadd.f32 %v11662_v50, %v6262_v9  ;;  %v6260_v4 = vadd.f32 %v6139_v53, %v14743_v20  ;;  %v14749_v50 = vld [vmem:[#allocation5_spill] sm:$0xff] }
 0x27e   : > { %v11599_v13 = vpop.f32.mrf.mxu1  ;;  %v7258_v22 = vpop.f32.mrf.mxu0 }
 0x27f   : > { %14742 = vst [vmem:[#allocation24_spill] sm:$0xff] %v14049_v12  ;;  %v14052_v35 = vadd.f32 %v7245_v30, %v6260_v4  ;;  %v6265_v18 = vadd.f32 %v11599_v13, %v14745_v46  ;;  %v14751_v30 = vld [vmem:[#allocation6_spill] sm:$0xff] }
 0x280   : > { %v6152_v41 = vpop.f32.mrf.mxu1  ;;  %v11666_v0 = vpop.f32.mrf.mxu0 }
 0x281   : > { %14744 = vst [vmem:[#allocation25_spill] sm:$0xff] %v14052_v35  ;;  %v14055_v47 = vadd.f32 %v11665_v52, %v6265_v18  ;;  %v6263_v44 = vadd.f32 %v6152_v41, %v14747_v59  ;;  %v14753_v52 = vld [vmem:[#allocation7_spill] sm:$0xff] }
 0x282   : > { %v11600_v6 = vpop.f32.mrf.mxu1  ;;  %v7261_v7 = vpop.f32.mrf.mxu0 }
 0x283   : > { %14746 = vst [vmem:[#allocation26_spill] sm:$0xff] %v14055_v47  ;;  %v14058_v15 = vadd.f32 %v7258_v22, %v6263_v44  ;;  %v6266_v33 = vadd.f32 %v11600_v6, %v14749_v50  ;;  %v14755_v22 = vld [vmem:[#allocation8_spill] sm:$0xff] }
 0x284   : > { %v6155_v9 = vpop.f32.mrf.mxu1  ;;  %v11669_v53 = vpop.f32.mrf.mxu0 }
 0x285   : > { %14748 = vst [vmem:[#allocation27_spill] sm:$0xff] %v14058_v15  ;;  %v14061_v20 = vadd.f32 %v11666_v0, %v6266_v33  ;;  %v6264_v4 = vadd.f32 %v6155_v9, %v14751_v30 }
 0x286   : > { %v11603_v35 = vpop.f32.mrf.mxu1  ;;  %v7274_v13 = vpop.f32.mrf.mxu0 }
 0x287   : > { %14750 = vst [vmem:[#allocation28_spill] sm:$0xff] %v14061_v20  ;;  %v14064_v46 = vadd.f32 %v7261_v7, %v6264_v4  ;;  %v6269_v18 = vadd.f32 %v11603_v35, %v14753_v52 }
 0x288   : > { %v6168_v47 = vpop.f32.mrf.mxu1  ;;  %v11670_v41 = vpop.f32.mrf.mxu0 }
 0x289   : > { %14752 = vst [vmem:[#allocation29_spill] sm:$0xff] %v14064_v46  ;;  %v14067_v59 = vadd.f32 %v11669_v53, %v6269_v18  ;;  %v6267_v44 = vadd.f32 %v6168_v47, %v14755_v22  ;;  %v14759_v53 = vld [vmem:[#allocation9_spill] sm:$0xff] }
 0x28a   : > { %v11604_v6 = vpop.f32.mrf.mxu1  ;;  %v7277_v50 = vpop.f32.mrf.mxu0 }
 0x28b   : > { %14754 = vst [vmem:[#allocation30_spill] sm:$0xff] %v14067_v59  ;;  %v14070_v15 = vadd.f32 %v7274_v13, %v6267_v44  ;;  %v6270_v0 = vadd.f32 %v11604_v6, %v13763_v24  ;;  %v14761_v13 = vld [vmem:[#allocation10_spill] sm:$0xff] }
 0x28c   : > { %v6171_v33 = vpop.f32.mrf.mxu1  ;;  %v11673_v9 = vpop.f32.mrf.mxu0 }
 0x28d   : > { %14756 = vst [vmem:[#allocation31_spill] sm:$0xff] %v14070_v15  ;;  %v14073_v30 = vadd.f32 %v11670_v41, %v6270_v0  ;;  %v6268_v7 = vadd.f32 %v6171_v33, %v13768_v60  ;;  %v14763_v41 = vld [vmem:[#allocation11_spill] sm:$0xff] }
 0x28e   : > { %v11607_v35 = vpop.f32.mrf.mxu1  ;;  %v7290_v4 = vpop.f32.mrf.mxu0 }
 0x28f   : > { %14757 = vst [vmem:[#allocation32_spill] sm:$0xff] %v14073_v30  ;;  %v14076_v52 = vadd.f32 %v7277_v50, %v6268_v7  ;;  %v6273_v18 = vadd.f32 %v11607_v35, %v14759_v53  ;;  %v14765_v7 = vld [vmem:[#allocation12_spill] sm:$0xff] }
 0x290   : > { %v6184_v59 = vpop.f32.mrf.mxu1  ;;  %v11674_v47 = vpop.f32.mrf.mxu0 }
 0x291   : > { %14758 = vst [vmem:[#allocation33_spill] sm:$0xff] %v14076_v52  ;;  %v14080_v22 = vadd.f32 %v11673_v9, %v6273_v18  ;;  %v6271_v44 = vadd.f32 %v6184_v59, %v14761_v13  ;;  %v14767_v9 = vld [vmem:[#allocation13_spill] sm:$0xff] }
 0x292   : > { %v11608_v24 = vpop.f32.mrf.mxu1  ;;  %v7293_v6 = vpop.f32.mrf.mxu0 }
 0x293   : > { %14760 = vst [vmem:[#allocation34_spill] sm:$0xff] %v14080_v22  ;;  %v14083_v15 = vadd.f32 %v7290_v4, %v6271_v44  ;;  %v6274_v0 = vadd.f32 %v11608_v24, %v14763_v41  ;;  %v14769_v44 = vld [vmem:[#allocation14_spill] sm:$0xff]  ;;  %v14774_v22 = vld [vmem:[#allocation16_spill] sm:$0xff] }
 0x294   : > { %v6187_v60 = vpop.f32.mrf.mxu1  ;;  %v11677_v33 = vpop.f32.mrf.mxu0 }
 0x295   : > { %14762 = vst [vmem:[#allocation35_spill] sm:$0xff] %v14083_v15  ;;  %v14086_v50 = vadd.f32 %v11674_v47, %v6274_v0  ;;  %v6272_v35 = vadd.f32 %v6187_v60, %v14765_v7 }
 0x296   : > { %v11611_v53 = vpop.f32.mrf.mxu1  ;;  %v7306_v52 = vpop.f32.mrf.mxu0 }
 0x297   : > { %14764 = vst [vmem:[#allocation36_spill] sm:$0xff] %v14086_v50  ;;  %v14089_v30 = vadd.f32 %v7293_v6, %v6272_v35  ;;  %v6277_v18 = vadd.f32 %v11611_v53, %v14767_v9 }
 0x298   : > { %v6200_v59 = vpop.f32.mrf.mxu1  ;;  %v11678_v4 = vpop.f32.mrf.mxu0 }
 0x299   : > { %14766 = vst [vmem:[#allocation37_spill] sm:$0xff] %v14089_v30  ;;  %v14094_v13 = vadd.f32 %v11677_v33, %v6277_v18  ;;  %v6275_v24 = vadd.f32 %v6200_v59, %v14769_v44  ;;  %v14115_v18 = vld [vmem:[%s14548_s2] ss:$0 sm:$0xff]  ;;  %v10889_v44 = vld [vmem:[%s14107_s6 + $0x8] sm:$0xff]  }
 0x29a   : > { %v11612_v41 = vpop.f32.mrf.mxu1  ;;  %v7309_v47 = vpop.f32.mrf.mxu0 }
 0x29b   : > { %14768 = vst [vmem:[#allocation38_spill] sm:$0xff] %v14094_v13  ;;  %v14097_v0 = vadd.f32 %v7306_v52, %v6275_v24  ;;  %v6278_v60 = vadd.f32 %v11612_v41, %v13817_v45  ;;  %v14122_v41 = vld [vmem:[%s14549_s3] ss:$0 sm:$0xff] }
 0x29c   : > { %v6203_v6 = vpop.f32.mrf.mxu1  ;;  %v11749_v7 = vpop.f32.mrf.mxu0 }
 0x29d   : > { %14770 = vst [vmem:[#allocation39_spill] sm:$0xff] %v14097_v0  ;;  %v14101_v35 = vadd.f32 %v11678_v4, %v6278_v60  ;;  %v6276_v53 = vadd.f32 %v6203_v6, %v13822_v43  ;;  %v14773_v0 = vld [vmem:[#allocation15_spill] sm:$0xff] }
 0x29e   : > { %v11683_v9 = vpop.f32.mrf.mxu1  ;;  %v9049_v33 = vpop.f32.mrf.mxu0 }
 0x29f   : > { %14771 = vst [vmem:[#allocation40_spill] sm:$0xff] %v14101_v35  ;;  %v14109_v52 = vadd.f32 %v7309_v47, %v6276_v53  ;;  %v8199_v45 = vadd.f32 %v11683_v9, %v13827_v25  ;;  %v10762_v53 = vld [vmem:[%s14107_s6] sm:$0xff]  }
 0x2a0   : > { %v7942_v59 = vpop.f32.mrf.mxu1  ;;  %v11750_v43 = vpop.f32.mrf.mxu0  ;;  %v10763_v30 = vunpack.c.l.bf16 %v10762_v53 }
 0x2a1   : > { %14772 = vst [vmem:[#allocation41_spill] sm:$0xff] %v14109_v52  ;;  %v9306_v4 = vadd.f32 %v11749_v7, %v8199_v45  ;;  %v8197_v24 = vadd.f32 %v7942_v59, %v13834_v61  ;;  %v10767_v52 = vunpack.c.l.bf16 %v10889_v44 }
 0x2a2   : > { %v11684_v47 = vpop.f32.mrf.mxu1  ;;  %v9052_v60 = vpop.f32.mrf.mxu0 }
 0x2a3   : > { %v9505_v25 = vmul.f32 %v14115_v18, %v9306_v4  ;;  %v9304_v6 = vadd.f32 %v9049_v33, %v8197_v24  ;;  %v8200_v9 = vadd.f32 %v11684_v47, %v13844_v49  ;;  %v10768_v47 = vunpack.c.h.bf16 %v10889_v44 }
 0x2a4   : > { %v7945_v35 = vpop.f32.mrf.mxu1  ;;  %v11753_v7 = vpop.f32.mrf.mxu0 }
 0x2a5   : > { %v9576_v45 = vadd.f32 %v14122_v41, %v9505_v25  ;;  %v9503_v61 = vmul.f32 %v14115_v18, %v9304_v6  ;;  %v9307_v59 = vadd.f32 %v11750_v43, %v8200_v9  ;;  %v8198_v13 = vadd.f32 %v7945_v35, %v14773_v0  ;;  %v14137_v9 = vld [vmem:[%s14107_s6 + $0x18] sm:$0xff]  }
 0x2a6   : > { %v11687_v50 = vpop.f32.mrf.mxu1  ;;  %v9065_v15 = vpop.f32.mrf.mxu0 }
 0x2a7   : > { %v9640_v4 = vmax.f32 %v9576_v45, 0.0  ;;  %v9574_v33 = vadd.f32 %v14122_v41, %v9503_v61  ;;  %v9506_v49 = vmul.f32 %v14115_v18, %v9307_v59  ;;  %v9305_v24 = vadd.f32 %v9052_v60, %v8198_v13 }
 0x2a8   : > { %v8203_v46 = vadd.f32 %v11687_v50, %v14774_v22  ;;  %v7958_v25 = vpop.f32.mrf.mxu1  ;;  %v11754_v20 = vpop.f32.mrf.mxu0  ;;  %v10764_v13 = vunpack.c.h.bf16 %v10762_v53  ;;  %v14775_v22 = vld [vmem:[#allocation17_spill] sm:$0xff] }
 0x2a9   : > { %v9832_v43 = vadd.f32 %v10767_v52, %v9640_v4  ;;  %v9638_v6 = vmax.f32 %v9574_v33, 0.0  ;;  %v9577_v0 = vadd.f32 %v14122_v41, %v9506_v49  ;;  %v9504_v35 = vmul.f32 %v14115_v18, %v9305_v24  ;;  %v14147_v33 = vld [vmem:[%s14107_s6 + $0x10] sm:$0xff]  }
 0x2aa   : > { %v9310_v44 = vadd.f32 %v11753_v7, %v8203_v46  ;;  %v8201_v50 = vadd.f32 %v7958_v25, %v14775_v22  ;;  %v11688_v60 = vpop.f32.mrf.mxu1  ;;  %v9068_v45 = vpop.f32.mrf.mxu0  ;;  %v10775_v24 = vunpack.c.l.bf16 %v14137_v9 }
 0x2ab   : > { %v9896_v52 = vmax.f32 %v9832_v43, 0.0  ;;  %v9830_v61 = vadd.f32 %v10763_v30, %v9638_v6  ;;  %v9641_v59 = vmax.f32 %v9577_v0, 0.0  ;;  %v9575_v4 = vadd.f32 %v14122_v41, %v9504_v35 }
 0x2ac   : > { %v9509_v49 = vmul.f32 %v14115_v18, %v9310_v44  ;;  %v9308_v12 = vadd.f32 %v9065_v15, %v8201_v50  ;;  %v8204_v53 = vadd.f32 %v11688_v60, %v13871_v57  ;;  %v7961_v46 = vpop.f32.mrf.mxu1  ;;  %v11757_v7 = vpop.f32.mrf.mxu0  ;;  %v10771_v35 = vunpack.c.l.bf16 %v14147_v33 }
 0x2ad   : > { %9960 = vst [vmem:[%s14142_s14 + $0x10] sm:$0xff] %v9896_v52  ;;  %v9894_v25 = vmax.f32 %v9830_v61, 0.0  ;;  %v9833_v22 = vadd.f32 %v10768_v47, %v9641_v59  ;;  %v9639_v43 = vmax.f32 %v9575_v4, 0.0  ;;  %v8202_v30 = vadd.f32 %v7961_v46, %v13876_v28  ;;  %v14776_v52 = vld [vmem:[#allocation18_spill] sm:$0xff] }
 0x2ae   : > { %v9580_v6 = vadd.f32 %v14122_v41, %v9509_v49  ;;  %v9507_v0 = vmul.f32 %v14115_v18, %v9308_v12  ;;  %v9311_v44 = vadd.f32 %v11754_v20, %v8204_v53  ;;  %v11691_v19 = vpop.f32.mrf.mxu1  ;;  %v9081_v15 = vpop.f32.mrf.mxu0  ;;  %v10776_v12 = vunpack.c.h.bf16 %v14137_v9 }
 0x2af   : > { %9958 = vst [vmem:[%s14142_s14] sm:$0xff] %v9894_v25  ;;  %v9897_v57 = vmax.f32 %v9833_v22, 0.0  ;;  %v9831_v50 = vadd.f32 %v10764_v13, %v9639_v43  ;;  %v9309_v60 = vadd.f32 %v9068_v45, %v8202_v30  ;;  %v8207_v47 = vadd.f32 %v11691_v19, %v14776_v52  ;;  %v14165_v13 = vld [vmem:[%s14107_s6 + $0x28] sm:$0xff]   ;;  %v14777_v45 = vld [vmem:[#allocation19_spill] sm:$0xff] }
 0x2b0   : > { %v9644_v61 = vmax.f32 %v9580_v6, 0.0  ;;  %v9578_v28 = vadd.f32 %v14122_v41, %v9507_v0  ;;  %v9510_v59 = vmul.f32 %v14115_v18, %v9311_v44  ;;  %v7974_v4 = vpop.f32.mrf.mxu1  ;;  %v11758_v49 = vpop.f32.mrf.mxu0  ;;  %v10772_v30 = vunpack.c.h.bf16 %v14147_v33 }
 0x2b1   : > { %9961 = vst [vmem:[%s14142_s14 + $0x18] sm:$0xff] %v9897_v57  ;;  %v9895_v20 = vmax.f32 %v9831_v50, 0.0  ;;  %v9508_v53 = vmul.f32 %v14115_v18, %v9309_v60  ;;  %v9314_v46 = vadd.f32 %v11757_v7, %v8207_v47  ;;  %v8205_v19 = vadd.f32 %v7974_v4, %v14777_v45  ;;  %v14174_v7 = vld [vmem:[%s14107_s6 + $0x20] sm:$0xff]   ;;  %v14778_v50 = vld [vmem:[#allocation20_spill] sm:$0xff] }
 0x2b2   : > { %v9836_v25 = vadd.f32 %v10775_v24, %v9644_v61  ;;  %v9642_v22 = vmax.f32 %v9578_v28, 0.0  ;;  %v9581_v43 = vadd.f32 %v14122_v41, %v9510_v59  ;;  %v11692_v6 = vpop.f32.mrf.mxu1  ;;  %v9084_v9 = vpop.f32.mrf.mxu0  ;;  %v10783_v61 = vunpack.c.l.bf16 %v14165_v13 }
 0x2b3   : > { %9959 = vst [vmem:[%s14142_s14 + $0x8] sm:$0xff] %v9895_v20  ;;  %v9579_v0 = vadd.f32 %v14122_v41, %v9508_v53  ;;  %v9513_v44 = vmul.f32 %v14115_v18, %v9314_v46  ;;  %v9312_v57 = vadd.f32 %v9081_v15, %v8205_v19  ;;  %v8208_v60 = vadd.f32 %v11692_v6, %v14778_v50  ;;  %v14779_v19 = vld [vmem:[#allocation21_spill] sm:$0xff] }
 0x2b4   : > { %v9900_v52 = vmax.f32 %v9836_v25, 0.0  ;;  %v9834_v24 = vadd.f32 %v10771_v35, %v9642_v22  ;;  %v9645_v47 = vmax.f32 %v9581_v43, 0.0  ;;  %v7977_v28 = vpop.f32.mrf.mxu1  ;;  %v11761_v33 = vpop.f32.mrf.mxu0  ;;  %v10779_v45 = vunpack.c.l.bf16 %v14174_v7 }
 0x2b5   : > { %v9643_v59 = vmax.f32 %v9579_v0, 0.0  ;;  %v9584_v4 = vadd.f32 %v14122_v41, %v9513_v44  ;;  %v9511_v20 = vmul.f32 %v14115_v18, %v9312_v57  ;;  %v9315_v53 = vadd.f32 %v11758_v49, %v8208_v60 }
 0x2b6   : > { %9964 = vst [vmem:[%s14142_s14 + $0x30] sm:$0xff] %v9900_v52  ;;  %v9898_v15 = vmax.f32 %v9834_v24, 0.0  ;;  %v9837_v46 = vadd.f32 %v10776_v12, %v9645_v47  ;;  %v8206_v25 = vadd.f32 %v7977_v28, %v14779_v19  ;;  %v11695_v35 = vpop.f32.mrf.mxu1  ;;  %v9097_v22 = vpop.f32.mrf.mxu0  ;;  %v10784_v49 = vunpack.c.h.bf16 %v14165_v13  ;;  %v14780_v12 = vld [vmem:[#allocation22_spill] sm:$0xff] }
 0x2b7   : > { %v9835_v43 = vadd.f32 %v10772_v30, %v9643_v59  ;;  %v9648_v6 = vmax.f32 %v9584_v4, 0.0  ;;  %v9582_v0 = vadd.f32 %v14122_v41, %v9511_v20  ;;  %v9514_v44 = vmul.f32 %v14115_v18, %v9315_v53  ;;  %v14190_v4 = vld [vmem:[%s14107_s6 + $0x38] sm:$0xff]  }
 0x2b8   : > { %9962 = vst [vmem:[%s14142_s14 + $0x20] sm:$0xff] %v9898_v15  ;;  %v9901_v57 = vmax.f32 %v9837_v46, 0.0  ;;  %v9313_v50 = vadd.f32 %v9084_v9, %v8206_v25  ;;  %v8211_v60 = vadd.f32 %v11695_v35, %v14780_v12  ;;  %v7990_v52 = vpop.f32.mrf.mxu1  ;;  %v11762_v24 = vpop.f32.mrf.mxu0  ;;  %v10780_v53 = vunpack.c.h.bf16 %v14174_v7  ;;  %v14198_v35 = vld [vmem:[%s14107_s6 + $0x30] sm:$0xff]  }
 0x2b9   : > { %v9899_v47 = vmax.f32 %v9835_v43, 0.0  ;;  %v9840_v28 = vadd.f32 %v10783_v61, %v9648_v6  ;;  %v9646_v30 = vmax.f32 %v9582_v0, 0.0  ;;  %v9585_v59 = vadd.f32 %v14122_v41, %v9514_v44 }
 0x2ba   : > { %9965 = vst [vmem:[%s14142_s14 + $0x38] sm:$0xff] %v9901_v57  ;;  %v9512_v20 = vmul.f32 %v14115_v18, %v9313_v50  ;;  %v9318_v13 = vadd.f32 %v11761_v33, %v8211_v60  ;;  %v8209_v9 = vadd.f32 %v7990_v52, %v13915_v17  ;;  %v11696_v15 = vpop.f32.mrf.mxu1  ;;  %v9100_v46 = vpop.f32.mrf.mxu0  ;;  %v10791_v7 = vunpack.c.l.bf16 %v14190_v4 }
 0x2bb   : > { %9963 = vst [vmem:[%s14142_s14 + $0x28] sm:$0xff] %v9899_v47  ;;  %v9904_v19 = vmax.f32 %v9840_v28, 0.0  ;;  %v9838_v25 = vadd.f32 %v10779_v45, %v9646_v30  ;;  %v9649_v61 = vmax.f32 %v9585_v59, 0.0  ;;  %v8212_v43 = vadd.f32 %v11696_v15, %v13925_v58 }
 0x2bc   : > { %v9583_v6 = vadd.f32 %v14122_v41, %v9512_v20  ;;  %v9517_v0 = vmul.f32 %v14115_v18, %v9318_v13  ;;  %v9316_v33 = vadd.f32 %v9097_v22, %v8209_v9  ;;  %v7993_v44 = vpop.f32.mrf.mxu1  ;;  %v11765_v17 = vpop.f32.mrf.mxu0  ;;  %v10787_v47 = vunpack.c.l.bf16 %v14198_v35 }
 0x2bd   : > { %9968 = vst [vmem:[%s14142_s14 + $0x50] sm:$0xff] %v9904_v19  ;;  %v9902_v57 = vmax.f32 %v9838_v25, 0.0  ;;  %v9841_v50 = vadd.f32 %v10784_v49, %v9649_v61  ;;  %v9319_v12 = vadd.f32 %v11762_v24, %v8212_v43  ;;  %v8210_v45 = vadd.f32 %v7993_v44, %v13930_v29 }
 0x2be   : > { %v9647_v60 = vmax.f32 %v9583_v6, 0.0  ;;  %v9588_v52 = vadd.f32 %v14122_v41, %v9517_v0  ;;  %v9515_v58 = vmul.f32 %v14115_v18, %v9316_v33  ;;  %v11699_v28 = vpop.f32.mrf.mxu1  ;;  %v9113_v30 = vpop.f32.mrf.mxu0  ;;  %v10792_v9 = vunpack.c.h.bf16 %v14190_v4  ;;  %v14218_v6 = vld [vmem:[%s14107_s6 + $0x48] sm:$0xff]  }
 0x2bf   : > { %9966 = vst [vmem:[%s14142_s14 + $0x40] sm:$0xff] %v9902_v57  ;;  %v9905_v22 = vmax.f32 %v9841_v50, 0.0  ;;  %v9518_v59 = vmul.f32 %v14115_v18, %v9319_v12  ;;  %v9317_v20 = vadd.f32 %v9100_v46, %v8210_v45  ;;  %v8215_v49 = vadd.f32 %v11699_v28, %v13935_v51 }
 0x2c0   : > { %v9839_v24 = vadd.f32 %v10780_v53, %v9647_v60  ;;  %v9652_v29 = vmax.f32 %v9588_v52, 0.0  ;;  %v9586_v13 = vadd.f32 %v14122_v41, %v9515_v58  ;;  %v8006_v15 = vpop.f32.mrf.mxu1  ;;  %v11766_v19 = vpop.f32.mrf.mxu0  ;;  %v10788_v33 = vunpack.c.h.bf16 %v14198_v35  ;;  %v14225_v60 = vld [vmem:[%s14107_s6 + $0x40] sm:$0xff]  }
 0x2c1   : > { %9969 = vst [vmem:[%s14142_s14 + $0x58] sm:$0xff] %v9905_v22  ;;  %v9589_v25 = vadd.f32 %v14122_v41, %v9518_v59  ;;  %v9516_v61 = vmul.f32 %v14115_v18, %v9317_v20  ;;  %v9322_v43 = vadd.f32 %v11765_v17, %v8215_v49  ;;  %v8213_v51 = vadd.f32 %v8006_v15, %v13941_v26 }
 0x2c2   : > { %v9903_v53 = vmax.f32 %v9839_v24, 0.0  ;;  %v9844_v46 = vadd.f32 %v10791_v7, %v9652_v29  ;;  %v9650_v0 = vmax.f32 %v9586_v13, 0.0  ;;  %v11700_v4 = vpop.f32.mrf.mxu1  ;;  %v9116_v44 = vpop.f32.mrf.mxu0  ;;  %v10799_v26 = vunpack.c.l.bf16 %v14218_v6 }
 0x2c3   : > { %v9653_v57 = vmax.f32 %v9589_v25, 0.0  ;;  %v9587_v50 = vadd.f32 %v14122_v41, %v9516_v61  ;;  %v9521_v12 = vmul.f32 %v14115_v18, %v9322_v43  ;;  %v9320_v45 = vadd.f32 %v9113_v30, %v8213_v51 }
 0x2c4   : > { %9967 = vst [vmem:[%s14142_s14 + $0x48] sm:$0xff] %v9903_v53  ;;  %v9908_v17 = vmax.f32 %v9844_v46, 0.0  ;;  %v9842_v52 = vadd.f32 %v10787_v47, %v9650_v0  ;;  %v8216_v7 = vadd.f32 %v11700_v4, %v13949_v54  ;;  %v8009_v58 = vpop.f32.mrf.mxu1  ;;  %v11769_v35 = vpop.f32.mrf.mxu0  ;;  %v10795_v49 = vunpack.c.l.bf16 %v14225_v60 }
 0x2c5   : > { %v9845_v28 = vadd.f32 %v10792_v9, %v9653_v57  ;;  %v9651_v22 = vmax.f32 %v9587_v50, 0.0  ;;  %v9592_v59 = vadd.f32 %v14122_v41, %v9521_v12  ;;  %v9519_v20 = vmul.f32 %v14115_v18, %v9320_v45 }
 0x2c6   : > { %9972 = vst [vmem:[%s14142_s14 + $0x70] sm:$0xff] %v9908_v17  ;;  %v9906_v30 = vmax.f32 %v9842_v52, 0.0  ;;  %v9323_v24 = vadd.f32 %v11766_v19, %v8216_v7  ;;  %v8214_v47 = vadd.f32 %v8009_v58, %v13954_v34  ;;  %v11703_v29 = vpop.f32.mrf.mxu1  ;;  %v9129_v13 = vpop.f32.mrf.mxu0  ;;  %v10800_v43 = vunpack.c.h.bf16 %v14218_v6 }
 0x2c7   : > { %v9909_v54 = vmax.f32 %v9845_v28, 0.0  ;;  %v9843_v15 = vadd.f32 %v10788_v33, %v9651_v22  ;;  %v9656_v25 = vmax.f32 %v9592_v59, 0.0  ;;  %v9590_v9 = vadd.f32 %v14122_v41, %v9519_v20  ;;  %v14242_v33 = vld [vmem:[%s14107_s6 + $0x58] sm:$0xff]  }
 0x2c8   : > { %9970 = vst [vmem:[%s14142_s14 + $0x60] sm:$0xff] %v9906_v30  ;;  %v9522_v61 = vmul.f32 %v14115_v18, %v9323_v24  ;;  %v9321_v51 = vadd.f32 %v9116_v44, %v8214_v47  ;;  %v8219_v53 = vadd.f32 %v11703_v29, %v13959_v5  ;;  %v8022_v19 = vpop.f32.mrf.mxu1  ;;  %v11770_v46 = vpop.f32.mrf.mxu0  ;;  %v10796_v6 = vunpack.c.h.bf16 %v14225_v60 }
 0x2c9   : > { %9973 = vst [vmem:[%s14142_s14 + $0x78] sm:$0xff] %v9909_v54  ;;  %v9907_v34 = vmax.f32 %v9843_v15, 0.0  ;;  %v9848_v0 = vadd.f32 %v10799_v26, %v9656_v25  ;;  %v9654_v4 = vmax.f32 %v9590_v9, 0.0  ;;  %v8217_v57 = vadd.f32 %v8022_v19, %v13963_v55  ;;  %v14250_v26 = vld [vmem:[%s14107_s6 + $0x50] sm:$0xff]  }
 0x2ca   : > { %v9593_v50 = vadd.f32 %v14122_v41, %v9522_v61  ;;  %v9520_v12 = vmul.f32 %v14115_v18, %v9321_v51  ;;  %v9326_v44 = vadd.f32 %v11769_v35, %v8219_v53  ;;  %v11704_v5 = vpop.f32.mrf.mxu1  ;;  %v9132_v45 = vpop.f32.mrf.mxu0  ;;  %v10807_v60 = vunpack.c.l.bf16 %v14242_v33 }
 0x2cb   : > { %9971 = vst [vmem:[%s14142_s14 + $0x68] sm:$0xff] %v9907_v34  ;;  %v9912_v17 = vmax.f32 %v9848_v0, 0.0  ;;  %v9846_v52 = vadd.f32 %v10795_v49, %v9654_v4  ;;  %v9324_v7 = vadd.f32 %v9129_v13, %v8217_v57  ;;  %v8220_v58 = vadd.f32 %v11704_v5, %v13970_v48 }
 0x2cc   : > { %v9657_v28 = vmax.f32 %v9593_v50, 0.0  ;;  %v9591_v55 = vadd.f32 %v14122_v41, %v9520_v12  ;;  %v9525_v22 = vmul.f32 %v14115_v18, %v9326_v44  ;;  %v8025_v59 = vpop.f32.mrf.mxu1  ;;  %v11773_v35 = vpop.f32.mrf.mxu0  ;;  %v10803_v13 = vunpack.c.l.bf16 %v14250_v26  ;;  %v14269_v12 = vld [vmem:[%s14107_s6 + $0x68] sm:$0xff]  }
 0x2cd   : > { %9976 = vst [vmem:[%s14142_s14 + $0x90] sm:$0xff] %v9912_v17  ;;  %v9910_v20 = vmax.f32 %v9846_v52, 0.0  ;;  %v9523_v30 = vmul.f32 %v14115_v18, %v9324_v7  ;;  %v9327_v49 = vadd.f32 %v11770_v46, %v8220_v58  ;;  %v8218_v24 = vadd.f32 %v8025_v59, %v13975_v2 }
 0x2ce   : > { %v9849_v47 = vadd.f32 %v10800_v43, %v9657_v28  ;;  %v9655_v29 = vmax.f32 %v9591_v55, 0.0  ;;  %v9596_v48 = vadd.f32 %v14122_v41, %v9525_v22  ;;  %v11707_v54 = vpop.f32.mrf.mxu1  ;;  %v9145_v15 = vpop.f32.mrf.mxu0  ;;  %v10808_v19 = vunpack.c.h.bf16 %v14242_v33  ;;  %v14277_v28 = vld [vmem:[%s14107_s6 + $0x60] sm:$0xff]  }
 0x2cf   : > { %9974 = vst [vmem:[%s14142_s14 + $0x80] sm:$0xff] %v9910_v20  ;;  %v9594_v25 = vadd.f32 %v14122_v41, %v9523_v30  ;;  %v9526_v9 = vmul.f32 %v14115_v18, %v9327_v49  ;;  %v9325_v61 = vadd.f32 %v9132_v45, %v8218_v24  ;;  %v8223_v51 = vadd.f32 %v11707_v54, %v13979_v31 }
 0x2d0   : > { %v9913_v53 = vmax.f32 %v9849_v47, 0.0  ;;  %v9847_v2 = vadd.f32 %v10796_v6, %v9655_v29  ;;  %v9660_v43 = vmax.f32 %v9596_v48, 0.0  ;;  %v8038_v46 = vpop.f32.mrf.mxu1  ;;  %v11774_v34 = vpop.f32.mrf.mxu0  ;;  %v10804_v6 = vunpack.c.h.bf16 %v14250_v26 }
 0x2d1   : > { %v9658_v0 = vmax.f32 %v9594_v25, 0.0  ;;  %v9597_v4 = vadd.f32 %v14122_v41, %v9526_v9  ;;  %v9524_v57 = vmul.f32 %v14115_v18, %v9325_v61  ;;  %v9330_v50 = vadd.f32 %v11773_v35, %v8223_v51 }
 0x2d2   : > { %9977 = vst [vmem:[%s14142_s14 + $0x98] sm:$0xff] %v9913_v53  ;;  %v9911_v44 = vmax.f32 %v9847_v2, 0.0  ;;  %v9852_v31 = vadd.f32 %v10807_v60, %v9660_v43  ;;  %v8221_v5 = vadd.f32 %v8038_v46, %v13983_v62  ;;  %v11708_v33 = vpop.f32.mrf.mxu1  ;;  %v9148_v45 = vpop.f32.mrf.mxu0  ;;  %v10815_v22 = vunpack.c.l.bf16 %v14269_v12 }
 0x2d3   : > { %v9850_v17 = vadd.f32 %v10803_v13, %v9658_v0  ;;  %v9661_v52 = vmax.f32 %v9597_v4, 0.0  ;;  %v9595_v7 = vadd.f32 %v14122_v41, %v9524_v57  ;;  %v9529_v58 = vmul.f32 %v14115_v18, %v9330_v50  ;;  %v14294_v0 = vld [vmem:[%s14107_s6 + $0x78] sm:$0xff]  }
 0x2d4   : > { %9975 = vst [vmem:[%s14142_s14 + $0x88] sm:$0xff] %v9911_v44  ;;  %v9916_v55 = vmax.f32 %v9852_v31, 0.0  ;;  %v9328_v60 = vadd.f32 %v9145_v15, %v8221_v5  ;;  %v8224_v26 = vadd.f32 %v11708_v33, %v13988_v11  ;;  %v8041_v62 = vpop.f32.mrf.mxu1  ;;  %v11777_v59 = vpop.f32.mrf.mxu0  ;;  %v10811_v47 = vunpack.c.l.bf16 %v14277_v28 }
 0x2d5   : > { %v9914_v35 = vmax.f32 %v9850_v17, 0.0  ;;  %v9853_v20 = vadd.f32 %v10808_v19, %v9661_v52  ;;  %v9659_v30 = vmax.f32 %v9595_v7, 0.0  ;;  %v9600_v49 = vadd.f32 %v14122_v41, %v9529_v58 }
 0x2d6   : > { %9980 = vst [vmem:[%s14142_s14 + $0xb0] sm:$0xff] %v9916_v55  ;;  %v9527_v24 = vmul.f32 %v14115_v18, %v9328_v60  ;;  %v9331_v29 = vadd.f32 %v11774_v34, %v8224_v26  ;;  %v8222_v48 = vadd.f32 %v8041_v62, %v13992_v23  ;;  %v11711_v13 = vpop.f32.mrf.mxu1  ;;  %v9161_v54 = vpop.f32.mrf.mxu0  ;;  %v10816_v53 = vunpack.c.h.bf16 %v14269_v12 }
 0x2d7   : > { %9978 = vst [vmem:[%s14142_s14 + $0xa0] sm:$0xff] %v9914_v35  ;;  %v9917_v11 = vmax.f32 %v9853_v20, 0.0  ;;  %v9851_v15 = vadd.f32 %v10804_v6, %v9659_v30  ;;  %v9664_v25 = vmax.f32 %v9600_v49, 0.0  ;;  %v8227_v9 = vadd.f32 %v11711_v13, %v13995_v37 }
 0x2d8   : > { %v9598_v61 = vadd.f32 %v14122_v41, %v9527_v24  ;;  %v9530_v51 = vmul.f32 %v14115_v18, %v9331_v29  ;;  %v9329_v2 = vadd.f32 %v9148_v45, %v8222_v48  ;;  %v8054_v43 = vpop.f32.mrf.mxu1  ;;  %v11778_v19 = vpop.f32.mrf.mxu0  ;;  %v10812_v12 = vunpack.c.h.bf16 %v14277_v28  ;;  %v14303_v45 = vld [vmem:[%s14107_s6 + $0x70] sm:$0xff]  }
 0x2d9   : > { %9981 = vst [vmem:[%s14142_s14 + $0xb8] sm:$0xff] %v9917_v11  ;;  %v9915_v23 = vmax.f32 %v9851_v15, 0.0  ;;  %v9856_v46 = vadd.f32 %v10815_v22, %v9664_v25  ;;  %v9334_v34 = vadd.f32 %v11777_v59, %v8227_v9  ;;  %v8225_v4 = vadd.f32 %v8054_v43, %v13998_v21 }
 0x2da   : > { %v9662_v37 = vmax.f32 %v9598_v61, 0.0  ;;  %v9601_v57 = vadd.f32 %v14122_v41, %v9530_v51  ;;  %v9528_v50 = vmul.f32 %v14115_v18, %v9329_v2  ;;  %v11712_v44 = vpop.f32.mrf.mxu1  ;;  %v9164_v31 = vpop.f32.mrf.mxu0  ;;  %v10823_v58 = vunpack.c.l.bf16 %v14294_v0  ;;  %v14321_v2 = vld [vmem:[%s14107_s6 + $0x88] sm:$0xff]  }
 0x2db   : > { %9979 = vst [vmem:[%s14142_s14 + $0xa8] sm:$0xff] %v9915_v23  ;;  %v9920_v6 = vmax.f32 %v9856_v46, 0.0  ;;  %v9533_v5 = vmul.f32 %v14115_v18, %v9334_v34  ;;  %v9332_v33 = vadd.f32 %v9161_v54, %v8225_v4  ;;  %v8228_v17 = vadd.f32 %v11712_v44, %v14001_v36 }
 0x2dc   : > { %v9854_v21 = vadd.f32 %v10811_v47, %v9662_v37  ;;  %v9665_v52 = vmax.f32 %v9601_v57, 0.0  ;;  %v9599_v7 = vadd.f32 %v14122_v41, %v9528_v50  ;;  %v8057_v55 = vpop.f32.mrf.mxu1  ;;  %v11781_v22 = vpop.f32.mrf.mxu0  ;;  %v10819_v20 = vunpack.c.l.bf16 %v14303_v45  ;;  %v14328_v50 = vld [vmem:[%s14107_s6 + $0x80] sm:$0xff]  }
 0x2dd   : > { %9984 = vst [vmem:[%s14142_s14 + $0xd0] sm:$0xff] %v9920_v6  ;;  %v9604_v28 = vadd.f32 %v14122_v41, %v9533_v5  ;;  %v9531_v60 = vmul.f32 %v14115_v18, %v9332_v33  ;;  %v9335_v26 = vadd.f32 %v11778_v19, %v8228_v17  ;;  %v8226_v62 = vadd.f32 %v8057_v55, %v14004_v38 }
 0x2de   : > { %v9918_v59 = vmax.f32 %v9854_v21, 0.0  ;;  %v9857_v35 = vadd.f32 %v10816_v53, %v9665_v52  ;;  %v9663_v36 = vmax.f32 %v9599_v7, 0.0  ;;  %v11715_v30 = vpop.f32.mrf.mxu1  ;;  %v9177_v49 = vpop.f32.mrf.mxu0  ;;  %v10824_v38 = vunpack.c.h.bf16 %v14294_v0 }
 0x2df   : > { %v9668_v24 = vmax.f32 %v9604_v28, 0.0  ;;  %v9602_v47 = vadd.f32 %v14122_v41, %v9531_v60  ;;  %v9534_v29 = vmul.f32 %v14115_v18, %v9335_v26  ;;  %v9333_v48 = vadd.f32 %v9164_v31, %v8226_v62 }
 0x2e0   : > { %9982 = vst [vmem:[%s14142_s14 + $0xc0] sm:$0xff] %v9918_v59  ;;  %v9921_v13 = vmax.f32 %v9857_v35, 0.0  ;;  %v9855_v54 = vadd.f32 %v10812_v12, %v9663_v36  ;;  %v8231_v11 = vadd.f32 %v11715_v30, %v14007_v39  ;;  %v8070_v15 = vpop.f32.mrf.mxu1  ;;  %v11782_v25 = vpop.f32.mrf.mxu0  ;;  %v10820_v19 = vunpack.c.h.bf16 %v14303_v45 }
 0x2e1   : > { %v9860_v9 = vadd.f32 %v10823_v58, %v9668_v24  ;;  %v9666_v61 = vmax.f32 %v9602_v47, 0.0  ;;  %v9605_v51 = vadd.f32 %v14122_v41, %v9534_v29  ;;  %v9532_v53 = vmul.f32 %v14115_v18, %v9333_v48  ;;  %v14347_v29 = vld [vmem:[%s14107_s6 + $0x98] sm:$0xff]  }
 0x2e2   : > { %9985 = vst [vmem:[%s14142_s14 + $0xd8] sm:$0xff] %v9921_v13  ;;  %v9919_v43 = vmax.f32 %v9855_v54, 0.0  ;;  %v9338_v23 = vadd.f32 %v11781_v22, %v8231_v11  ;;  %v8229_v39 = vadd.f32 %v8070_v15, %v14010_v32  ;;  %v11716_v46 = vpop.f32.mrf.mxu1  ;;  %v9180_v34 = vpop.f32.mrf.mxu0  ;;  %v10831_v44 = vunpack.c.l.bf16 %v14321_v2 }
 0x2e3   : > { %v9924_v0 = vmax.f32 %v9860_v9, 0.0  ;;  %v9858_v4 = vadd.f32 %v10819_v20, %v9666_v61  ;;  %v9669_v37 = vmax.f32 %v9605_v51, 0.0  ;;  %v9603_v57 = vadd.f32 %v14122_v41, %v9532_v53  ;;  %v14356_v51 = vld [vmem:[%s14107_s6 + $0x90] sm:$0xff]  }
 0x2e4   : > { %9983 = vst [vmem:[%s14142_s14 + $0xc8] sm:$0xff] %v9919_v43  ;;  %v9537_v12 = vmul.f32 %v14115_v18, %v9338_v23  ;;  %v9336_v31 = vadd.f32 %v9177_v49, %v8229_v39  ;;  %v8232_v6 = vadd.f32 %v11716_v46, %v14013_v3  ;;  %v8073_v5 = vpop.f32.mrf.mxu1  ;;  %v11785_v32 = vpop.f32.mrf.mxu0  ;;  %v10827_v58 = vunpack.c.l.bf16 %v14328_v50 }
 0x2e5   : > { %9988 = vst [vmem:[%s14142_s14 + $0xf0] sm:$0xff] %v9924_v0  ;;  %v9922_v33 = vmax.f32 %v9858_v4, 0.0  ;;  %v9861_v45 = vadd.f32 %v10824_v38, %v9669_v37  ;;  %v9667_v17 = vmax.f32 %v9603_v57, 0.0  ;;  %v8230_v21 = vadd.f32 %v8073_v5, %v14016_v42 }
 0x2e6   : > { %v9608_v52 = vadd.f32 %v14122_v41, %v9537_v12  ;;  %v9535_v7 = vmul.f32 %v14115_v18, %v9336_v31  ;;  %v9339_v55 = vadd.f32 %v11782_v25, %v8232_v6  ;;  %v11719_v22 = vpop.f32.mrf.mxu1  ;;  %v9193_v28 = vpop.f32.mrf.mxu0  ;;  %v10832_v36 = vunpack.c.h.bf16 %v14321_v2 }
 0x2e7   : > { %9986 = vst [vmem:[%s14142_s14 + $0xe0] sm:$0xff] %v9922_v33  ;;  %v9925_v3 = vmax.f32 %v9861_v45, 0.0  ;;  %v9859_v60 = vadd.f32 %v10820_v19, %v9667_v17  ;;  %v9337_v26 = vadd.f32 %v9180_v34, %v8230_v21  ;;  %v8235_v62 = vadd.f32 %v11719_v22, %v14019_v10 }
 0x2e8   : > { %v9672_v59 = vmax.f32 %v9608_v52, 0.0  ;;  %v9606_v42 = vadd.f32 %v14122_v41, %v9535_v7  ;;  %v9538_v35 = vmul.f32 %v14115_v18, %v9339_v55  ;;  %v8086_v20 = vpop.f32.mrf.mxu1  ;;  %v11786_v30 = vpop.f32.mrf.mxu0  ;;  %v10828_v38 = vunpack.c.h.bf16 %v14328_v50 }
 0x2e9   : > { %9989 = vst [vmem:[%s14142_s14 + $0xf8] sm:$0xff] %v9925_v3  ;;  %v9923_v49 = vmax.f32 %v9859_v60, 0.0  ;;  %v9536_v24 = vmul.f32 %v14115_v18, %v9337_v26  ;;  %v9342_v47 = vadd.f32 %v11785_v32, %v8235_v62  ;;  %v8233_v10 = vadd.f32 %v8086_v20, %v14022_v40  ;;  %v14380_v20 = vld [vmem:[%s14107_s6 + $0xa0] sm:$0xff]  }
 0x2ea   : > { %v9864_v48 = vadd.f32 %v10831_v44, %v9672_v59  ;;  %v9670_v13 = vmax.f32 %v9606_v42, 0.0  ;;  %v9609_v54 = vadd.f32 %v14122_v41, %v9538_v35  ;;  %v11720_v11 = vpop.f32.mrf.mxu1  ;;  %v9196_v15 = vpop.f32.mrf.mxu0  ;;  %v10839_v19 = vunpack.c.l.bf16 %v14347_v29 }
 0x2eb   : > { %9987 = vst [vmem:[%s14142_s14 + $0xe8] sm:$0xff] %v9923_v49  ;;  %v9607_v25 = vadd.f32 %v14122_v41, %v9536_v24  ;;  %v9541_v9 = vmul.f32 %v14115_v18, %v9342_v47  ;;  %v9340_v61 = vadd.f32 %v9193_v28, %v8233_v10  ;;  %v8236_v53 = vadd.f32 %v11720_v11, %v14025_v56  ;;  %v14372_v28 = vld [vmem:[%s14107_s6 + $0xa8] sm:$0xff]  }
 0x2ec   : > { %v9928_v40 = vmax.f32 %v9864_v48, 0.0  ;;  %v9862_v2 = vadd.f32 %v10827_v58, %v9670_v13  ;;  %v9673_v43 = vmax.f32 %v9609_v54, 0.0  ;;  %v8089_v23 = vpop.f32.mrf.mxu1  ;;  %v11789_v39 = vpop.f32.mrf.mxu0  ;;  %v10835_v50 = vunpack.c.l.bf16 %v14356_v51 }
 0x2ed   : > { %v9671_v46 = vmax.f32 %v9607_v25, 0.0  ;;  %v9612_v34 = vadd.f32 %v14122_v41, %v9541_v9  ;;  %v9539_v0 = vmul.f32 %v14115_v18, %v9340_v61  ;;  %v9343_v4 = vadd.f32 %v11786_v30, %v8236_v53 }
 0x2ee   : > { %9992 = vst [vmem:[%s14142_s14 + $0x110] sm:$0xff] %v9928_v40  ;;  %v9926_v37 = vmax.f32 %v9862_v2, 0.0  ;;  %v9865_v57 = vadd.f32 %v10832_v36, %v9673_v43  ;;  %v8234_v56 = vadd.f32 %v8089_v23, %v14028_v27  ;;  %v11723_v12 = vpop.f32.mrf.mxu1  ;;  %v9209_v44 = vpop.f32.mrf.mxu0  ;;  %v10840_v45 = vunpack.c.h.bf16 %v14347_v29 }
 0x2ef   : > { %v9863_v31 = vadd.f32 %v10828_v38, %v9671_v46  ;;  %v9676_v6 = vmax.f32 %v9612_v34, 0.0  ;;  %v9610_v5 = vadd.f32 %v14122_v41, %v9539_v0  ;;  %v9542_v32 = vmul.f32 %v14115_v18, %v9343_v4 }
 0x2f0   : > { %9990 = vst [vmem:[%s14142_s14 + $0x100] sm:$0xff] %v9926_v37  ;;  %v9929_v33 = vmax.f32 %v9865_v57, 0.0  ;;  %v9341_v17 = vadd.f32 %v9196_v15, %v8234_v56  ;;  %v8239_v21 = vadd.f32 %v11723_v12, %v14031_v1  ;;  %v8102_v52 = vpop.f32.mrf.mxu1  ;;  %v11790_v27 = vpop.f32.mrf.mxu0  ;;  %v10836_v60 = vunpack.c.h.bf16 %v14356_v51  ;;  %v14400_v37 = vld [vmem:[%s14107_s6 + $0xb8] sm:$0xff]   ;;  %v14781_v57 = vld [vmem:[#allocation23_spill] sm:$0xff] }
 0x2f1   : > { %v9927_v7 = vmax.f32 %v9863_v31, 0.0  ;;  %v9868_v58 = vadd.f32 %v10839_v19, %v9676_v6  ;;  %v9674_v55 = vmax.f32 %v9610_v5, 0.0  ;;  %v9613_v22 = vadd.f32 %v14122_v41, %v9542_v32 }
 0x2f2   : > { %9993 = vst [vmem:[%s14142_s14 + $0x118] sm:$0xff] %v9929_v33  ;;  %v9540_v3 = vmul.f32 %v14115_v18, %v9341_v17  ;;  %v9346_v26 = vadd.f32 %v11789_v39, %v8239_v21  ;;  %v8237_v62 = vadd.f32 %v8102_v52, %v14034_v8  ;;  %v11724_v1 = vpop.f32.mrf.mxu1  ;;  %v9212_v59 = vpop.f32.mrf.mxu0  ;;  %v10847_v47 = vunpack.c.l.bf16 %v14372_v28  ;;  %v14407_v17 = vld [vmem:[%s14107_s6 + $0xb0] sm:$0xff]  }
 0x2f3   : > { %9991 = vst [vmem:[%s14142_s14 + $0x108] sm:$0xff] %v9927_v7  ;;  %v9932_v42 = vmax.f32 %v9868_v58, 0.0  ;;  %v9866_v35 = vadd.f32 %v10835_v50, %v9674_v55  ;;  %v9677_v36 = vmax.f32 %v9613_v22, 0.0  ;;  %v8240_v30 = vadd.f32 %v11724_v1, %v14037_v14  ;;  %v14782_v7 = vld [vmem:[#allocation24_spill] sm:$0xff] }
 0x2f4   : > { %v9611_v49 = vadd.f32 %v14122_v41, %v9540_v3  ;;  %v9545_v24 = vmul.f32 %v14115_v18, %v9346_v26  ;;  %v9344_v29 = vadd.f32 %v9209_v44, %v8237_v62  ;;  %v8105_v10 = vpop.f32.mrf.mxu1  ;;  %v11793_v8 = vpop.f32.mrf.mxu0  ;;  %v10843_v25 = vunpack.c.l.bf16 %v14380_v20 }
 0x2f5   : > { %9996 = vst [vmem:[%s14142_s14 + $0x130] sm:$0xff] %v9932_v42  ;;  %v9930_v48 = vmax.f32 %v9866_v35, 0.0  ;;  %v9869_v13 = vadd.f32 %v10840_v45, %v9677_v36  ;;  %v9347_v54 = vadd.f32 %v11790_v27, %v8240_v30  ;;  %v8238_v38 = vadd.f32 %v8105_v10, %v14040_v16  ;;  %v14783_v42 = vld [vmem:[#allocation25_spill] sm:$0xff] }
 0x2f6   : > { %v9675_v11 = vmax.f32 %v9611_v49, 0.0  ;;  %v9616_v15 = vadd.f32 %v14122_v41, %v9545_v24  ;;  %v9543_v14 = vmul.f32 %v14115_v18, %v9344_v29  ;;  %v11727_v9 = vpop.f32.mrf.mxu1  ;;  %v9225_v61 = vpop.f32.mrf.mxu0  ;;  %v10848_v23 = vunpack.c.h.bf16 %v14372_v28  ;;  %v14425_v24 = vld [vmem:[%s14549_s3] ss:$0 sm:$0xff] }
 0x2f7   : > { %9994 = vst [vmem:[%s14142_s14 + $0x120] sm:$0xff] %v9930_v48  ;;  %v9933_v51 = vmax.f32 %v9869_v13, 0.0  ;;  %v9546_v53 = vmul.f32 %v14115_v18, %v9347_v54  ;;  %v9345_v40 = vadd.f32 %v9212_v59, %v8238_v38  ;;  %v8243_v2 = vadd.f32 %v11727_v9, %v14043_v63  ;;  %v14784_v48 = vld [vmem:[#allocation26_spill] sm:$0xff]  ;;  %v14785_v9 = vld [vmem:[#allocation27_spill] sm:$0xff] }
 0x2f8   : > { %v9867_v43 = vadd.f32 %v10836_v60, %v9675_v11  ;;  %v9680_v16 = vmax.f32 %v9616_v15, 0.0  ;;  %v9614_v19 = vadd.f32 %v14122_v41, %v9543_v14  ;;  %v8118_v39 = vpop.f32.mrf.mxu1  ;;  %v11794_v46 = vpop.f32.mrf.mxu0  ;;  %v10844_v44 = vunpack.c.h.bf16 %v14380_v20 }
 0x2f9   : > { %9997 = vst [vmem:[%s14142_s14 + $0x138] sm:$0xff] %v9933_v51  ;;  %v9617_v34 = vadd.f32 %v14122_v41, %v9546_v53  ;;  %v9544_v0 = vmul.f32 %v14115_v18, %v9345_v40  ;;  %v9350_v4 = vadd.f32 %v11793_v8, %v8243_v2  ;;  %v8241_v63 = vadd.f32 %v8118_v39, %v14781_v57 }
 0x2fa   : > { %v9931_v50 = vmax.f32 %v9867_v43, 0.0  ;;  %v9872_v56 = vadd.f32 %v10847_v47, %v9680_v16  ;;  %v9678_v12 = vmax.f32 %v9614_v19, 0.0  ;;  %v11728_v31 = vpop.f32.mrf.mxu1  ;;  %v9228_v6 = vpop.f32.mrf.mxu0  ;;  %v10855_v27 = vunpack.c.l.bf16 %v14400_v37 }
 0x2fb   : > { %v9681_v5 = vmax.f32 %v9617_v34, 0.0  ;;  %v9615_v32 = vadd.f32 %v14122_v41, %v9544_v0  ;;  %v9549_v33 = vmul.f32 %v14115_v18, %v9350_v4  ;;  %v9348_v45 = vadd.f32 %v9225_v61, %v8241_v63  ;;  %v14416_v18 = vld [vmem:[%s14548_s2] ss:$0 sm:$0xff]  ;;  %v14786_v34 = vld [vmem:[#allocation28_spill] sm:$0xff] }
 0x2fc   : > { %9995 = vst [vmem:[%s14142_s14 + $0x128] sm:$0xff] %v9931_v50  ;;  %v9936_v21 = vmax.f32 %v9872_v56, 0.0  ;;  %v9870_v52 = vadd.f32 %v10843_v25, %v9678_v12  ;;  %v8244_v58 = vadd.f32 %v11728_v31, %v14782_v7  ;;  %v8121_v55 = vpop.f32.mrf.mxu1  ;;  %v11797_v22 = vpop.f32.mrf.mxu0  ;;  %v10851_v1 = vunpack.c.l.bf16 %v14407_v17  ;;  %v14434_v25 = vld [vmem:[%s14107_s6 + $0xc8] sm:$0xff]  }
 0x2fd   : > { %v9873_v28 = vadd.f32 %v10848_v23, %v9681_v5  ;;  %v9679_v3 = vmax.f32 %v9615_v32, 0.0  ;;  %v9620_v60 = vadd.f32 %v14122_v41, %v9549_v33  ;;  %v9547_v26 = vmul.f32 %v14416_v18, %v9348_v45 }
 0x2fe   : > { %10000 = vst [vmem:[%s14142_s14 + $0x150] sm:$0xff] %v9936_v21  ;;  %v9934_v62 = vmax.f32 %v9870_v52, 0.0  ;;  %v9351_v59 = vadd.f32 %v11794_v46, %v8244_v58  ;;  %v8242_v35 = vadd.f32 %v8121_v55, %v14783_v42  ;;  %v11731_v36 = vpop.f32.mrf.mxu1  ;;  %v9241_v20 = vpop.f32.mrf.mxu0  ;;  %v10856_v10 = vunpack.c.h.bf16 %v14400_v37  ;;  %v14442_v46 = vld [vmem:[%s14107_s6 + $0xc0] sm:$0xff]   ;;  %v14788_v55 = vld [vmem:[#allocation30_spill] sm:$0xff] }
 0x2ff   : > { %v9937_v30 = vmax.f32 %v9873_v28, 0.0  ;;  %v9871_v41 = vadd.f32 %v10844_v44, %v9679_v3  ;;  %v9684_v49 = vmax.f32 %v9620_v60, 0.0  ;;  %v9618_v47 = vadd.f32 %v14425_v24, %v9547_v26 }
 0x300   : > { %9998 = vst [vmem:[%s14142_s14 + $0x140] sm:$0xff] %v9934_v62  ;;  %v9550_v29 = vmul.f32 %v14416_v18, %v9351_v59  ;;  %v9349_v8 = vadd.f32 %v9228_v6, %v8242_v35  ;;  %v8247_v13 = vadd.f32 %v11731_v36, %v14784_v48  ;;  %v8134_v54 = vpop.f32.mrf.mxu1  ;;  %v11798_v38 = vpop.f32.mrf.mxu0  ;;  %v10852_v40 = vunpack.c.h.bf16 %v14407_v17  ;;  %v14787_v6 = vld [vmem:[#allocation29_spill] sm:$0xff] }
 0x301   : > { %10001 = vst [vmem:[%s14142_s14 + $0x158] sm:$0xff] %v9937_v30  ;;  %v9935_v11 = vmax.f32 %v9871_v41, 0.0  ;;  %v9876_v15 = vadd.f32 %v10855_v27, %v9684_v49  ;;  %v9682_v14 = vmax.f32 %v9618_v47, 0.0  ;;  %v8245_v61 = vadd.f32 %v8134_v54, %v14785_v9  ;;  %v14789_v47 = vld [vmem:[#allocation31_spill] sm:$0xff]  ;;  %v14790_v9 = vld [vmem:[#allocation32_spill] sm:$0xff] }
 0x302   : > { %v9621_v51 = vadd.f32 %v14425_v24, %v9550_v29  ;;  %v9548_v53 = vmul.f32 %v14416_v18, %v9349_v8  ;;  %v9354_v2 = vadd.f32 %v11797_v22, %v8247_v13  ;;  %v11732_v43 = vpop.f32.mrf.mxu1  ;;  %v9244_v16 = vpop.f32.mrf.mxu0  ;;  %v10863_v63 = vunpack.c.l.bf16 %v14434_v25 }
 0x303   : > { %9999 = vst [vmem:[%s14142_s14 + $0x148] sm:$0xff] %v9935_v11  ;;  %v9940_v19 = vmax.f32 %v9876_v15, 0.0  ;;  %v9874_v23 = vadd.f32 %v10851_v1, %v9682_v14  ;;  %v9352_v39 = vadd.f32 %v9241_v20, %v8245_v61  ;;  %v8248_v0 = vadd.f32 %v11732_v43, %v14786_v34  ;;  %v14461_v20 = vld [vmem:[%s14107_s6 + $0xd8] sm:$0xff]   ;;  %v14469_v11 = vld [vmem:[%s14107_s6 + $0xd0] sm:$0xff]  }
 0x304   : > { %v9685_v4 = vmax.f32 %v9621_v51, 0.0  ;;  %v9619_v37 = vadd.f32 %v14425_v24, %v9548_v53  ;;  %v9553_v57 = vmul.f32 %v14416_v18, %v9354_v2  ;;  %v8137_v50 = vpop.f32.mrf.mxu1  ;;  %v11801_v56 = vpop.f32.mrf.mxu0  ;;  %v10859_v17 = vunpack.c.l.bf16 %v14442_v46 }
 0x305   : > { %10004 = vst [vmem:[%s14142_s14 + $0x170] sm:$0xff] %v9940_v19  ;;  %v9938_v12 = vmax.f32 %v9874_v23, 0.0  ;;  %v9551_v44 = vmul.f32 %v14416_v18, %v9352_v39  ;;  %v9355_v31 = vadd.f32 %v11798_v38, %v8248_v0  ;;  %v8246_v5 = vadd.f32 %v8137_v50, %v14787_v6  ;;  %v14792_v50 = vld [vmem:[#allocation34_spill] sm:$0xff] }
 0x306   : > { %v9877_v32 = vadd.f32 %v10856_v10, %v9685_v4  ;;  %v9683_v33 = vmax.f32 %v9619_v37, 0.0  ;;  %v9624_v45 = vadd.f32 %v14425_v24, %v9553_v57  ;;  %v11735_v21 = vpop.f32.mrf.mxu1  ;;  %v9257_v52 = vpop.f32.mrf.mxu0  ;;  %v10864_v26 = vunpack.c.h.bf16 %v14434_v25 }
 0x307   : > { %10002 = vst [vmem:[%s14142_s14 + $0x160] sm:$0xff] %v9938_v12  ;;  %v9622_v27 = vadd.f32 %v14425_v24, %v9551_v44  ;;  %v9554_v7 = vmul.f32 %v14416_v18, %v9355_v31  ;;  %v9353_v58 = vadd.f32 %v9244_v16, %v8246_v5  ;;  %v8251_v22 = vadd.f32 %v11735_v21, %v14788_v55  ;;  %v14486_v21 = vld [vmem:[%s14107_s6 + $0xe8] sm:$0xff]  }
 0x308   : > { %v9941_v28 = vmax.f32 %v9877_v32, 0.0  ;;  %v9875_v3 = vadd.f32 %v10852_v40, %v9683_v33  ;;  %v9688_v60 = vmax.f32 %v9624_v45, 0.0  ;;  %v8150_v62 = vpop.f32.mrf.mxu1  ;;  %v11802_v1 = vpop.f32.mrf.mxu0  ;;  %v10860_v49 = vunpack.c.h.bf16 %v14442_v46  ;;  %v14791_v46 = vld [vmem:[#allocation33_spill] sm:$0xff] }
 0x309   : > { %v9686_v59 = vmax.f32 %v9622_v27, 0.0  ;;  %v9625_v42 = vadd.f32 %v14425_v24, %v9554_v7  ;;  %v9552_v35 = vmul.f32 %v14416_v18, %v9353_v58  ;;  %v9358_v36 = vadd.f32 %v11801_v56, %v8251_v22 }
 0x30a   : > { %10005 = vst [vmem:[%s14142_s14 + $0x178] sm:$0xff] %v9941_v28  ;;  %v9939_v30 = vmax.f32 %v9875_v3, 0.0  ;;  %v9880_v41 = vadd.f32 %v10863_v63, %v9688_v60  ;;  %v8249_v29 = vadd.f32 %v8150_v62, %v14789_v47  ;;  %v11736_v10 = vpop.f32.mrf.mxu1  ;;  %v9260_v8 = vpop.f32.mrf.mxu0  ;;  %v10871_v14 = vunpack.c.l.bf16 %v14461_v20 }
 0x30b   : > { %v9878_v48 = vadd.f32 %v10859_v17, %v9686_v59  ;;  %v9689_v13 = vmax.f32 %v9625_v42, 0.0  ;;  %v9623_v54 = vadd.f32 %v14425_v24, %v9552_v35  ;;  %v9557_v38 = vmul.f32 %v14416_v18, %v9358_v36  ;;  %v14794_v59 = vld [vmem:[#allocation36_spill] sm:$0xff] }
 0x30c   : > { %10003 = vst [vmem:[%s14142_s14 + $0x168] sm:$0xff] %v9939_v30  ;;  %v9944_v15 = vmax.f32 %v9880_v41, 0.0  ;;  %v9356_v25 = vadd.f32 %v9257_v52, %v8249_v29  ;;  %v8252_v61 = vadd.f32 %v11736_v10, %v14790_v9  ;;  %v8153_v51 = vpop.f32.mrf.mxu1  ;;  %v11805_v53 = vpop.f32.mrf.mxu0  ;;  %v10867_v23 = vunpack.c.l.bf16 %v14469_v11  ;;  %v14793_v52 = vld [vmem:[#allocation35_spill] sm:$0xff] }
 0x30d   : > { %v9942_v40 = vmax.f32 %v9878_v48, 0.0  ;;  %v9881_v2 = vadd.f32 %v10864_v26, %v9689_v13  ;;  %v9687_v43 = vmax.f32 %v9623_v54, 0.0  ;;  %v9628_v16 = vadd.f32 %v14425_v24, %v9557_v38 }
 0x30e   : > { %10008 = vst [vmem:[%s14142_s14 + $0x190] sm:$0xff] %v9944_v15  ;;  %v9555_v19 = vmul.f32 %v14416_v18, %v9356_v25  ;;  %v9359_v39 = vadd.f32 %v11802_v1, %v8252_v61  ;;  %v8250_v34 = vadd.f32 %v8153_v51, %v14791_v46  ;;  %v11739_v0 = vpop.f32.mrf.mxu1  ;;  %v9273_v4 = vpop.f32.mrf.mxu0  ;;  %v10872_v31 = vunpack.c.h.bf16 %v14461_v20  ;;  %v14495_v1 = vld [vmem:[%s14107_s6 + $0xe0] sm:$0xff]  }
 0x30f   : > { %10006 = vst [vmem:[%s14142_s14 + $0x180] sm:$0xff] %v9942_v40  ;;  %v9945_v37 = vmax.f32 %v9881_v2, 0.0  ;;  %v9879_v57 = vadd.f32 %v10860_v49, %v9687_v43  ;;  %v9692_v63 = vmax.f32 %v9628_v16, 0.0  ;;  %v8255_v56 = vadd.f32 %v11739_v0, %v14792_v50  ;;  %v14796_v43 = vld [vmem:[#allocation38_spill] sm:$0xff] }
 0x310   : > { %v9626_v12 = vadd.f32 %v14425_v24, %v9555_v19  ;;  %v9558_v44 = vmul.f32 %v14416_v18, %v9359_v39  ;;  %v9357_v6 = vadd.f32 %v9260_v8, %v8250_v34  ;;  %v8166_v5 = vpop.f32.mrf.mxu1  ;;  %v11806_v32 = vpop.f32.mrf.mxu0  ;;  %v10868_v22 = vunpack.c.h.bf16 %v14469_v11  ;;  %v14795_v8 = vld [vmem:[#allocation37_spill] sm:$0xff] }
 0x311   : > { %10009 = vst [vmem:[%s14142_s14 + $0x198] sm:$0xff] %v9945_v37  ;;  %v9943_v33 = vmax.f32 %v9879_v57, 0.0  ;;  %v9884_v45 = vadd.f32 %v10871_v14, %v9692_v63  ;;  %v9362_v17 = vadd.f32 %v11805_v53, %v8255_v56  ;;  %v8253_v27 = vadd.f32 %v8166_v5, %v14793_v52  ;;  %v14797_v57 = vld [vmem:[#allocation39_spill] sm:$0xff]  ;;  %v10919_v5 = vld [vmem:[%s14107_s6 + $0xf8] sm:$0xff]  }
 0x312   : > { %v9690_v7 = vmax.f32 %v9626_v12, 0.0  ;;  %v9629_v58 = vadd.f32 %v14425_v24, %v9558_v44  ;;  %v9556_v55 = vmul.f32 %v14416_v18, %v9357_v6  ;;  %v11740_v28 = vpop.f32.mrf.mxu1  ;;  %v9276_v3 = vpop.f32.mrf.mxu0  ;;  %v10879_v30 = vunpack.c.l.bf16 %v14486_v21 }
 0x313   : > { %10007 = vst [vmem:[%s14142_s14 + $0x188] sm:$0xff] %v9943_v33  ;;  %v9948_v60 = vmax.f32 %v9884_v45, 0.0  ;;  %v9561_v26 = vmul.f32 %v14416_v18, %v9362_v17  ;;  %v9360_v62 = vadd.f32 %v9273_v4, %v8253_v27  ;;  %v8256_v42 = vadd.f32 %v11740_v28, %v14794_v59  ;;  %v14798_v45 = vld [vmem:[#allocation40_spill] sm:$0xff] }
 0x314   : > { %v9882_v35 = vadd.f32 %v10867_v23, %v9690_v7  ;;  %v9693_v36 = vmax.f32 %v9629_v58, 0.0  ;;  %v9627_v20 = vadd.f32 %v14425_v24, %v9556_v55  ;;  %v8169_v41 = vpop.f32.mrf.mxu1  ;;  %v11809_v49 = vpop.f32.mrf.mxu0  ;;  %v10875_v11 = vunpack.c.l.bf16 %v14495_v1  ;;  %v10918_v58 = vld [vmem:[%s14107_s6 + $0xf0] sm:$0xff]  }
 0x315   : > { %10012 = vst [vmem:[%s14142_s14 + $0x1b0] sm:$0xff] %v9948_v60  ;;  %v9632_v47 = vadd.f32 %v14425_v24, %v9561_v26  ;;  %v9559_v29 = vmul.f32 %v14416_v18, %v9360_v62  ;;  %v9363_v10 = vadd.f32 %v11806_v32, %v8256_v42  ;;  %v8254_v48 = vadd.f32 %v8169_v41, %v14795_v8  ;;  %v14799_v55 = vld [vmem:[#allocation41_spill] sm:$0xff] }
 0x316   : > { %v9946_v13 = vmax.f32 %v9882_v35, 0.0  ;;  %v9885_v54 = vadd.f32 %v10872_v31, %v9693_v36  ;;  %v9691_v38 = vmax.f32 %v9627_v20, 0.0  ;;  %v11743_v15 = vpop.f32.mrf.mxu1  ;;  %v9289_v14 = vpop.f32.mrf.mxu0  ;;  %v10880_v2 = vunpack.c.h.bf16 %v14486_v21 }
 0x317   : > { %v9696_v25 = vmax.f32 %v9632_v47, 0.0  ;;  %v9630_v9 = vadd.f32 %v14425_v24, %v9559_v29  ;;  %v9562_v61 = vmul.f32 %v14416_v18, %v9363_v10  ;;  %v9361_v51 = vadd.f32 %v9276_v3, %v8254_v48 }
 0x318   : > { %10010 = vst [vmem:[%s14142_s14 + $0x1a0] sm:$0xff] %v9946_v13  ;;  %v9949_v53 = vmax.f32 %v9885_v54, 0.0  ;;  %v9883_v40 = vadd.f32 %v10868_v22, %v9691_v38  ;;  %v8259_v16 = vadd.f32 %v11743_v15, %v14796_v43  ;;  %v8182_v19 = vpop.f32.mrf.mxu1  ;;  %v10876_v4 = vunpack.c.h.bf16 %v14495_v1  ;;  %v11810_v56 = vpop.f32.mrf.mxu0 }
 0x319   : > { %v9888_v23 = vadd.f32 %v10879_v30, %v9696_v25  ;;  %v9694_v39 = vmax.f32 %v9630_v9, 0.0  ;;  %v9633_v46 = vadd.f32 %v14425_v24, %v9562_v61  ;;  %v9560_v34 = vmul.f32 %v14416_v18, %v9361_v51 }
 0x31a   : > { %10013 = vst [vmem:[%s14142_s14 + $0x1b8] sm:$0xff] %v9949_v53  ;;  %v9947_v0 = vmax.f32 %v9883_v40, 0.0  ;;  %v9366_v37 = vadd.f32 %v11809_v49, %v8259_v16  ;;  %v8257_v63 = vadd.f32 %v8182_v19, %v14797_v57  ;;  %v11744_v50 = vpop.f32.mrf.mxu1  ;;  %v10887_v3 = vunpack.c.l.bf16 %v10919_v5  ;;  %v9292_v62 = vpop.f32.mrf.mxu0 }
 0x31b   : > { %v9952_v12 = vmax.f32 %v9888_v23, 0.0  ;;  %v9886_v44 = vadd.f32 %v10875_v11, %v9694_v39  ;;  %v9697_v31 = vmax.f32 %v9633_v46, 0.0  ;;  %v9631_v6 = vadd.f32 %v14425_v24, %v9560_v34 }
 0x31c   : > { %10011 = vst [vmem:[%s14142_s14 + $0x1a8] sm:$0xff] %v9947_v0  ;;  %v9565_v32 = vmul.f32 %v14416_v18, %v9366_v37  ;;  %v9364_v33 = vadd.f32 %v9289_v14, %v8257_v63  ;;  %v8260_v17 = vadd.f32 %v11744_v50, %v14798_v45  ;;  %v8185_v21 = vpop.f32.mrf.mxu1  ;;  %v10883_v20 = vunpack.c.l.bf16 %v10918_v58 }
 0x31d   : > { %10016 = vst [vmem:[%s14142_s14 + $0x1d0] sm:$0xff] %v9952_v12  ;;  %v9950_v52 = vmax.f32 %v9886_v44, 0.0  ;;  %v9889_v27 = vadd.f32 %v10880_v2, %v9697_v31  ;;  %v9695_v7 = vmax.f32 %v9631_v6, 0.0  ;;  %v8258_v22 = vadd.f32 %v8185_v21, %v14799_v55 }
 0x31e   : > { %v9636_v28 = vadd.f32 %v14425_v24, %v9565_v32  ;;  %v9563_v60 = vmul.f32 %v14416_v18, %v9364_v33  ;;  %v9367_v26 = vadd.f32 %v11810_v56, %v8260_v17  ;;  %v10888_v8 = vunpack.c.h.bf16 %v10919_v5 }
 0x31f   : > { %10014 = vst [vmem:[%s14142_s14 + $0x1c0] sm:$0xff] %v9950_v52  ;;  %v9953_v1 = vmax.f32 %v9889_v27, 0.0  ;;  %v9887_v59 = vadd.f32 %v10876_v4, %v9695_v7  ;;  %v9365_v42 = vadd.f32 %v9292_v62, %v8258_v22  ;;  %v10884_v13 = vunpack.c.h.bf16 %v10918_v58 }
 0x320   : > { %v9700_v35 = vmax.f32 %v9636_v28, 0.0  ;;  %v9634_v36 = vadd.f32 %v14425_v24, %v9563_v60  ;;  %v9566_v30 = vmul.f32 %v14416_v18, %v9367_v26 }
 0x321   : > { %10017 = vst [vmem:[%s14142_s14 + $0x1d8] sm:$0xff] %v9953_v1  ;;  %v9951_v41 = vmax.f32 %v9887_v59, 0.0  ;;  %v9564_v49 = vmul.f32 %v14416_v18, %v9365_v42 }
 0x322   : > { %v9892_v47 = vadd.f32 %v10887_v3, %v9700_v35  ;;  %v9698_v29 = vmax.f32 %v9634_v36, 0.0  ;;  %v9637_v10 = vadd.f32 %v14425_v24, %v9566_v30 }
 0x323   : > { %10015 = vst [vmem:[%s14142_s14 + $0x1c8] sm:$0xff] %v9951_v41  ;;  %v9635_v48 = vadd.f32 %v14425_v24, %v9564_v49 }
 0x324   : > { %v9956_v54 = vmax.f32 %v9892_v47, 0.0  ;;  %v9890_v38 = vadd.f32 %v10883_v20, %v9698_v29  ;;  %v9701_v11 = vmax.f32 %v9637_v10, 0.0 }
 0x325   : > { %v9699_v15 = vmax.f32 %v9635_v48, 0.0 }
 0x326   : > { %10020 = vst [vmem:[%s14142_s14 + $0x1f0] sm:$0xff] %v9956_v54  ;;  %v9954_v14 = vmax.f32 %v9890_v38, 0.0  ;;  %v9893_v25 = vadd.f32 %v10888_v8, %v9701_v11 }
 0x327   : > { %v9891_v18 = vadd.f32 %v10884_v13, %v9699_v15 }
 0x328   : > { %10018 = vst [vmem:[%s14142_s14 + $0x1e0] sm:$0xff] %v9954_v14  ;;  %v9957_v9 = vmax.f32 %v9893_v25, 0.0 }
 0x329   : > { %v9955_v61 = vmax.f32 %v9891_v18, 0.0 }
 0x32a   : > { %10021 = vst [vmem:[%s14142_s14 + $0x1f8] sm:$0xff] %v9957_v9 }
 0x32b   : > { %10019 = vst [vmem:[%s14142_s14 + $0x1e8] sm:$0xff] %v9955_v61 }
 0x32c PF: > { %s15_s20 = sadd.s32 1, %s12170_s20   ;;  %s14800_s18 = smov %s12166_s19 }
 0x32d   : > { %p12_p6 = scmp.ge.s32.totalorder %s15_s20, 4   ;;  %s14801_s19 = smov %s14803_s21 }
 0x32f   :  { %14 = sbr.rel (!%p12_p6) target bundleno = 2 (0x2), region = 90 }

</bundles_post_ra>
